<compile_context>
chip_gen: v5e
topology: v5e:2x2
jax: 0.10.0
libtpu: 0.0.40
codegen_flags: <defaults>
</compile_context>

<pallas_src>
from functools import partial

import jax
import jax.numpy as jnp
from jax.experimental import pallas as pl
from jax.experimental.pallas import tpu as pltpu

EPS = 1e-5
LANE = 128


# ----------------------------- small helpers -------------------------------

def _round_up(x, m):
    return (x + m - 1) // m * m


def _images_per_block(n_images, rows_per_image, target_rows):
    """Largest divisor of n_images whose total row count stays <= target (min 1)."""
    nb = 1
    for d in range(1, n_images + 1):
        if n_images % d == 0 and d * rows_per_image <= target_rows:
            nb = d
    return nb


def _vmem_limit_bytes():
    """Per-generation VMEM budget: ~16 MiB headroom under the physical capacity."""
    cap = None
    try:
        cap = getattr(pltpu.get_tpu_info(), "vmem_capacity_bytes", None)
    except Exception:
        cap = None
    if not cap:
        return 48 * 1024 * 1024            # safe everywhere (v7x has 64 MiB physical)
    return int(min(max(int(cap) - 16 * 1024 * 1024, 32 * 1024 * 1024),
                   100 * 1024 * 1024))


def _pad2d(a, rows, cols):
    r, c = a.shape
    return jnp.pad(a, ((0, rows - r), (0, cols - c)))


def _bn_scale_bias(s, sq, gamma_p, beta_p, count):
    """Fold batch stats + affine params into per-channel scale/bias (tiny, plain JAX)."""
    mean = s / count
    var = jnp.maximum(sq / count - mean * mean, 0.0)
    scale = gamma_p * jax.lax.rsqrt(var + EPS)
    bias = beta_p - mean * scale
    return scale, bias


def _reduce_stats(stats):
    """stats: (G*8, C); row 0 of every 8-row block = per-tile sum, row 1 = sumsq."""
    st = stats.reshape(-1, 8, stats.shape[-1])
    return (jnp.sum(st[:, 0, :], axis=0, keepdims=True),
            jnp.sum(st[:, 1, :], axis=0, keepdims=True))


def _pack_stats(acc):
    """Pack per-tile (sum, sumsq) of an f32 accumulator into an (8, C) block."""
    s = jnp.sum(acc, axis=0, keepdims=True)
    q = jnp.sum(acc * acc, axis=0, keepdims=True)
    z = jnp.zeros((6, s.shape[-1]), jnp.float32)
    return jnp.concatenate([s, q, z], axis=0)


# ----------------------------- Pallas kernels ------------------------------

def conv1x1_stats_kernel(x_ref, w_ref, y_ref, stats_ref):
    """y = x @ w (bf16 MXU, f32 acc); per-tile sum/sumsq written as an (8, C) block."""
    nb, hw, cin = x_ref.shape
    acc = jnp.dot(x_ref[...].reshape(nb * hw, cin), w_ref[...],
                  preferred_element_type=jnp.float32)
    y_ref[...] = acc.astype(jnp.bfloat16).reshape(nb, hw, -1)
    stats_ref[...] = _pack_stats(acc)


def bn_relu_conv1x1_stats_kernel(y_in_ref, scale_ref, bias_ref, w_ref,
                                 y_out_ref, stats_ref):
    """Apply previous layer's BN+ReLU, then 1x1 conv; per-tile stats output."""
    nb, hw, c = y_in_ref.shape
    a = jnp.maximum(
        y_in_ref[...].reshape(nb * hw, c).astype(jnp.float32) * scale_ref[...]
        + bias_ref[...], 0.0)
    acc = jnp.dot(a.astype(jnp.bfloat16), w_ref[...],
                  preferred_element_type=jnp.float32)
    y_out_ref[...] = acc.astype(jnp.bfloat16).reshape(nb, hw, -1)
    stats_ref[...] = _pack_stats(acc)


def make_bn_relu_conv3x3_stats_kernel(H, W, Cp, Pp, nb):
    """BN1+ReLU fused into a 3x3 (pad=1) conv over `nb` images per grid step.

    The BN-applied activations are cast once to bf16 and written into a bf16
    zero-bordered halo scratch; the conv is 9 per-tap K=Cp MXU matmuls accumulated
    in an f32 value (no im2col concat buffer).  The halo border is zeroed every
    step, so the grid axis is safe to shard across TensorCores ("parallel").
    """
    rows = nb * H * W

    def kernel(y1_ref, scale_ref, bias_ref, w2_ref, y2_ref, stats_ref, pad_ref):
        # Zero only the thin halo border (parallel-grid safe; interior is rewritten).
        zrow = jnp.zeros((nb, 1, W + 2, Cp), jnp.bfloat16)
        zcol = jnp.zeros((nb, H + 2, 1, Cp), jnp.bfloat16)
        pad_ref[:, pl.ds(0, 1), :, :] = zrow
        pad_ref[:, pl.ds(H + 1, 1), :, :] = zrow
        pad_ref[:, :, pl.ds(0, 1), :] = zcol
        pad_ref[:, :, pl.ds(W + 1, 1), :] = zcol

        # BN1 apply + ReLU, single f32->bf16 cast, interior write into the halo plane.
        a = jnp.maximum(
            y1_ref[...].reshape(rows, Cp).astype(jnp.float32) * scale_ref[...]
            + bias_ref[...], 0.0).astype(jnp.bfloat16)
        pad_ref[:, pl.ds(1, H), pl.ds(1, W), :] = a.reshape(nb, H, W, Cp)

        # 9 per-tap MXU matmuls (K = Cp) accumulated in f32.
        acc = jnp.zeros((rows, Pp), jnp.float32)
        for dy in range(3):
            for dx in range(3):
                tap = pad_ref[:, pl.ds(dy, H), pl.ds(dx, W), :].reshape(rows, Cp)
                acc = acc + jnp.dot(tap, w2_ref[dy * 3 + dx],
                                    preferred_element_type=jnp.float32)

        y2_ref[...] = acc.astype(jnp.bfloat16).reshape(nb, H, W, Pp)
        stats_ref[...] = _pack_stats(acc)

    return kernel


def bn_add_relu_kernel(y_ref, scale_ref, bias_ref, res_ref, out_ref):
    """BN3 apply + identity residual add + final ReLU."""
    nb, hw, c = y_ref.shape
    y = (y_ref[...].reshape(nb * hw, c).astype(jnp.float32) * scale_ref[...]
         + bias_ref[...])
    # NOTE: residual is the bf16-cast input (documented rounding difference vs f32 ref).
    y = y + res_ref[...].reshape(nb * hw, c).astype(jnp.float32)
    out_ref[...] = jnp.maximum(y, 0.0).reshape(nb, hw, c).astype(out_ref.dtype)


# ----------------------------- parameters ----------------------------------

def init_bottleneck_params(key, inplanes, planes, expansion=4):
    cout = planes * expansion
    ks = jax.random.split(key, 9)

    def rnd(k, shape, s=0.1):
        v = s * jax.random.normal(k, shape, jnp.float32)
        return v.astype(jnp.bfloat16).astype(jnp.float32)  # bf16-representable

    p = {}
    # conv weights stored channels-last: w1 (Cin,P), w2 (3,3,P,P) HWIO, w3 (P,Cout)
    p["w1"] = rnd(ks[0], (inplanes, planes))
    p["g1"] = 1.0 + rnd(ks[1], (1, planes))
    p["b1"] = rnd(ks[2], (1, planes))
    p["w2"] = rnd(ks[3], (3, 3, planes, planes))
    p["g2"] = 1.0 + rnd(ks[4], (1, planes))
    p["b2"] = rnd(ks[5], (1, planes))
    p["w3"] = rnd(ks[6], (planes, cout))
    p["g3"] = 1.0 + rnd(ks[7], (1, cout))
    p["b3"] = rnd(ks[8], (1, cout))
    return p


# ----------------------------- forward (wrapper) ----------------------------

@partial(jax.jit, static_argnames=("planes", "expansion", "rows_linear",
                                   "rows_conv", "out_dtype"))
def bottleneck_forward(x_nchw, params, *, planes, expansion=4,
                       rows_linear=2048, rows_conv=1024, out_dtype=jnp.float32):
    N, Cin, H, W = x_nchw.shape
    cout = planes * expansion
    assert Cin == cout, "identity residual requires inplanes == planes*expansion"
    HW = H * W
    M = N * HW

    f32, bf16 = jnp.float32, jnp.bfloat16
    Cin_p = _round_up(Cin, LANE)
    Pp = _round_up(planes, LANE)
    Cout_p = _round_up(cout, LANE)

    nb_lin = _images_per_block(N, HW, rows_linear)   # images/step, stages 1/3/4
    nb_cnv = _images_per_block(N, HW, rows_conv)     # images/step, stage 2
    g_lin = N // nb_lin
    g_cnv = N // nb_cnv

    par = pltpu.CompilerParams(dimension_semantics=("parallel",),
                               vmem_limit_bytes=_vmem_limit_bytes())

    # layout: NCHW -> NHWC -> (N, HW, C); channels padded to 128 lanes; bf16 operands.
    # TODO(synk): accept/emit NHWC end-to-end to drop these two transposes.
    x3d = jnp.transpose(x_nchw, (0, 2, 3, 1)).reshape(N, HW, Cin).astype(f32)
    x3d = jnp.pad(x3d, ((0, 0), (0, 0), (0, Cin_p - Cin))).astype(bf16)

    w1 = _pad2d(params["w1"].astype(f32), Cin_p, Pp).astype(bf16)
    w2 = jnp.pad(params["w2"].astype(f32),
                 ((0, 0), (0, 0), (0, Pp - planes), (0, Pp - planes)))
    w2 = w2.reshape(9, Pp, Pp).astype(bf16)           # per-tap (ky*3+kx, Cin, Cout)
    w3 = _pad2d(params["w3"].astype(f32), Pp, Cout_p).astype(bf16)
    g1 = _pad2d(params["g1"].astype(f32), 1, Pp)
    b1 = _pad2d(params["b1"].astype(f32), 1, Pp)
    g2 = _pad2d(params["g2"].astype(f32), 1, Pp)
    b2 = _pad2d(params["b2"].astype(f32), 1, Pp)
    g3 = _pad2d(params["g3"].astype(f32), 1, Cout_p)
    b3 = _pad2d(params["b3"].astype(f32), 1, Cout_p)

    # ---- stage 1: conv1 (1x1) + per-tile batch stats ------------------------
    y1, st1 = pl.pallas_call(
        conv1x1_stats_kernel,
        grid=(g_lin,),
        in_specs=[pl.BlockSpec((nb_lin, HW, Cin_p), lambda i: (i, 0, 0)),
                  pl.BlockSpec((Cin_p, Pp), lambda i: (0, 0))],
        out_specs=[pl.BlockSpec((nb_lin, HW, Pp), lambda i: (i, 0, 0)),
                   pl.BlockSpec((8, Pp), lambda i: (i, 0))],
        out_shape=[jax.ShapeDtypeStruct((N, HW, Pp), bf16),
                   jax.ShapeDtypeStruct((g_lin * 8, Pp), f32)],
        compiler_params=par,
        cost_estimate=pl.CostEstimate(
            flops=2 * M * Cin_p * Pp, transcendentals=0,
            bytes_accessed=2 * M * (Cin_p + Pp) + 2 * Cin_p * Pp),
    )(x3d, w1)
    s1, q1 = _reduce_stats(st1)
    scale1, bias1 = _bn_scale_bias(s1, q1, g1, b1, M)

    # ---- stage 2: BN1+ReLU fused into conv2 (3x3, pad=1) + per-tile stats ----
    y1_4d = y1.reshape(N, H, W, Pp)
    y2, st2 = pl.pallas_call(
        make_bn_relu_conv3x3_stats_kernel(H, W, Pp, Pp, nb_cnv),
        grid=(g_cnv,),
        in_specs=[pl.BlockSpec((nb_cnv, H, W, Pp), lambda n: (n, 0, 0, 0)),
                  pl.BlockSpec((1, Pp), lambda n: (0, 0)),
                  pl.BlockSpec((1, Pp), lambda n: (0, 0)),
                  pl.BlockSpec((9, Pp, Pp), lambda n: (0, 0, 0))],
        out_specs=[pl.BlockSpec((nb_cnv, H, W, Pp), lambda n: (n, 0, 0, 0)),
                   pl.BlockSpec((8, Pp), lambda n: (n, 0))],
        out_shape=[jax.ShapeDtypeStruct((N, H, W, Pp), bf16),
                   jax.ShapeDtypeStruct((g_cnv * 8, Pp), f32)],
        scratch_shapes=[pltpu.VMEM((nb_cnv, H + 2, W + 2, Pp), bf16)],
        compiler_params=par,
        cost_estimate=pl.CostEstimate(
            flops=2 * M * 9 * Pp * Pp, transcendentals=0,
            bytes_accessed=4 * M * Pp + 2 * 9 * Pp * Pp),
    )(y1_4d, scale1, bias1, w2)
    s2, q2 = _reduce_stats(st2)
    scale2, bias2 = _bn_scale_bias(s2, q2, g2, b2, M)

    # ---- stage 3: BN2+ReLU fused into conv3 (1x1) + per-tile stats ----------
    y2_3d = y2.reshape(N, HW, Pp)
    y3, st3 = pl.pallas_call(
        bn_relu_conv1x1_stats_kernel,
        grid=(g_lin,),
        in_specs=[pl.BlockSpec((nb_lin, HW, Pp), lambda i: (i, 0, 0)),
                  pl.BlockSpec((1, Pp), lambda i: (0, 0)),
                  pl.BlockSpec((1, Pp), lambda i: (0, 0)),
                  pl.BlockSpec((Pp, Cout_p), lambda i: (0, 0))],
        out_specs=[pl.BlockSpec((nb_lin, HW, Cout_p), lambda i: (i, 0, 0)),
                   pl.BlockSpec((8, Cout_p), lambda i: (i, 0))],
        out_shape=[jax.ShapeDtypeStruct((N, HW, Cout_p), bf16),
                   jax.ShapeDtypeStruct((g_lin * 8, Cout_p), f32)],
        compiler_params=par,
        cost_estimate=pl.CostEstimate(
            flops=2 * M * Pp * Cout_p, transcendentals=0,
            bytes_accessed=2 * M * (Pp + Cout_p) + 2 * Pp * Cout_p),
    )(y2_3d, scale2, bias2, w3)
    s3, q3 = _reduce_stats(st3)
    scale3, bias3 = _bn_scale_bias(s3, q3, g3, b3, M)

    # ---- stage 4: BN3 apply + identity residual + ReLU ----------------------
    out_bytes = jnp.dtype(out_dtype).itemsize
    out = pl.pallas_call(
        bn_add_relu_kernel,
        grid=(g_lin,),
        in_specs=[pl.BlockSpec((nb_lin, HW, Cout_p), lambda i: (i, 0, 0)),
                  pl.BlockSpec((1, Cout_p), lambda i: (0, 0)),
                  pl.BlockSpec((1, Cout_p), lambda i: (0, 0)),
                  pl.BlockSpec((nb_lin, HW, Cin_p), lambda i: (i, 0, 0))],
        out_specs=pl.BlockSpec((nb_lin, HW, Cout_p), lambda i: (i, 0, 0)),
        out_shape=jax.ShapeDtypeStruct((N, HW, Cout_p), out_dtype),
        compiler_params=par,
        cost_estimate=pl.CostEstimate(
            flops=4 * M * Cout_p, transcendentals=0,
            bytes_accessed=M * Cout_p * (2 + 2 + out_bytes)),
    )(y3, scale3, bias3, x3d)

    out = out[:, :, :cout].reshape(N, H, W, cout)
    return jnp.transpose(out, (0, 3, 1, 2))  # back to NCHW


# ----------------------------- pure-JAX reference ---------------------------

def _ref_bn(y, gamma, beta):
    mean = jnp.mean(y, axis=(0, 1, 2), keepdims=True)
    var = jnp.mean((y - mean) ** 2, axis=(0, 1, 2), keepdims=True)
    return ((y - mean) / jnp.sqrt(var + EPS) * gamma.reshape(1, 1, 1, -1)
            + beta.reshape(1, 1, 1, -1))


def bottleneck_reference(x_nchw, params):
    x = jnp.transpose(x_nchw, (0, 2, 3, 1)).astype(jnp.float32)
    y = jnp.einsum("nhwc,cd->nhwd", x, params["w1"])
    y = jnp.maximum(_ref_bn(y, params["g1"], params["b1"]), 0.0)
    y = jax.lax.conv_general_dilated(
        y, params["w2"], window_strides=(1, 1), padding=((1, 1), (1, 1)),
        dimension_numbers=("NHWC", "HWIO", "NHWC"))
    y = jnp.maximum(_ref_bn(y, params["g2"], params["b2"]), 0.0)
    y = jnp.einsum("nhwc,cd->nhwd", y, params["w3"])
    y = _ref_bn(y, params["g3"], params["b3"])
    y = jnp.maximum(y + x, 0.0)
    return jnp.transpose(y, (0, 3, 1, 2))


# ----------------------------- main -----------------------------------------

if __name__ == "__main__":
    key = jax.random.PRNGKey(0)
    kx, kp = jax.random.split(key)

    N, planes, expansion, H, W = 2, 4, 4, 16, 16
    inplanes = planes * expansion  # identity residual path

    x = jax.random.normal(kx, (N, inplanes, H, W), jnp.float32)
    x = x.astype(jnp.bfloat16).astype(jnp.float32)  # bf16-representable test input
    params = init_bottleneck_params(kp, inplanes, planes, expansion)

    # Small row targets so every stage runs a multi-step grid (nb=1, 2 steps) and the
    # cross-tile partial-stats reduction path is exercised; real shapes use defaults.
    out = bottleneck_forward(x, params, planes=planes, expansion=expansion,
                             rows_linear=256, rows_conv=256)
    out = jax.block_until_ready(out)

    assert out.shape == (N, inplanes, H, W)
    ref = bottleneck_reference(x, params)
    max_err = float(jnp.max(jnp.abs(out - ref)))
    rel_l2 = float(jnp.linalg.norm(out - ref) / (jnp.linalg.norm(ref) + 1e-12))
    assert rel_l2 < 3e-2 and max_err < 1.5e-1, f"rel_l2={rel_l2} max_err={max_err}"

    print("KERNEL_OK")
</pallas_src>

<mosaic_0001>
module attributes {stable_mosaic.version = 11 : i64} {
  func.func @conv1x1_stats_kernel(%arg0: i32, %arg1: memref<1x256x128xbf16, #tpu.memory_space<vmem>>, %arg2: memref<128x128xbf16, #tpu.memory_space<vmem>>, %arg3: memref<1x256x128xbf16, #tpu.memory_space<vmem>>, %arg4: memref<8x128xf32, #tpu.memory_space<vmem>>) attributes {dimension_semantics = [#tpu.dimension_semantics<parallel>], iteration_bounds = array<i64: 2>, scalar_prefetch = 0 : i64, scratch_operands = 0 : i64, tpu.core_type = #tpu.core_type<tc>, window_params = [{transform_indices = @transform_0, window_bounds = array<i64: 1, 256, 128>}, {pipeline_mode = #tpu.pipeline_mode<synchronous>, transform_indices = @transform_1, window_bounds = array<i64: 128, 128>}, {transform_indices = @transform_2, window_bounds = array<i64: 1, 256, 128>}, {transform_indices = @transform_3, window_bounds = array<i64: 8, 128>}]} {
    %c0 = arith.constant 0 : index
    %c0_0 = arith.constant 0 : index
    %c0_1 = arith.constant 0 : index
    %0 = vector.load %arg1[%c0, %c0_0, %c0_1] : memref<1x256x128xbf16, #tpu.memory_space<vmem>>, vector<1x256x128xbf16>
    %1 = vector.shape_cast %0 : vector<1x256x128xbf16> to vector<256x128xbf16>
    %c0_2 = arith.constant 0 : index
    %c0_3 = arith.constant 0 : index
    %2 = vector.load %arg2[%c0_2, %c0_3] : memref<128x128xbf16, #tpu.memory_space<vmem>>, vector<128x128xbf16>
    %cst = arith.constant dense<0.000000e+00> : vector<256x128xf32>
    %3 = tpu.matmul %1, %2, %cst {dimension_numbers = #tpu.dot_dimension_numbers<[1], [0], [0], [1], [0, 0, 1, 1], [], []>} : vector<256x128xbf16>, vector<128x128xbf16>, vector<256x128xf32> -> vector<256x128xf32>
    %4 = arith.truncf %3 : vector<256x128xf32> to vector<256x128xbf16>
    %5 = vector.shape_cast %4 : vector<256x128xbf16> to vector<1x256x128xbf16>
    %c0_4 = arith.constant 0 : index
    %c0_5 = arith.constant 0 : index
    %c0_6 = arith.constant 0 : index
    %6 = vector.load %arg3[%c0_4, %c0_5, %c0_6] : memref<1x256x128xbf16, #tpu.memory_space<vmem>>, vector<1x256x128xbf16>
    tpu.vector_store %arg3[%c0_4, %c0_5, %c0_6], %5 {strides = array<i32>} : memref<1x256x128xbf16, #tpu.memory_space<vmem>>, vector<1x256x128xbf16>,
    %cst_7 = arith.constant dense<0.000000e+00> : vector<128xf32>
    %7 = vector.multi_reduction <add>, %3, %cst_7 [0] : vector<256x128xf32> to vector<128xf32>
    %8 = vector.shape_cast %7 : vector<128xf32> to vector<1x128xf32>
    %9 = arith.mulf %3, %3 : vector<256x128xf32>
    %cst_8 = arith.constant dense<0.000000e+00> : vector<128xf32>
    %10 = vector.multi_reduction <add>, %9, %cst_8 [0] : vector<256x128xf32> to vector<128xf32>
    %11 = vector.shape_cast %10 : vector<128xf32> to vector<1x128xf32>
    %cst_9 = arith.constant 0.000000e+00 : f32
    %12 = vector.broadcast %cst_9 : f32 to vector<6x128xf32>
    %13 = tpu.concatenate %8, %11, %12 in 0 : vector<1x128xf32>, vector<1x128xf32>, vector<6x128xf32> -> vector<8x128xf32>
    %c0_10 = arith.constant 0 : index
    %c0_11 = arith.constant 0 : index
    %14 = vector.load %arg4[%c0_10, %c0_11] : memref<8x128xf32, #tpu.memory_space<vmem>>, vector<8x128xf32>
    tpu.vector_store %arg4[%c0_10, %c0_11], %13 {strides = array<i32>} : memref<8x128xf32, #tpu.memory_space<vmem>>, vector<8x128xf32>,
    return
  }
  func.func @transform_0(%arg0: i32) -> (i32, i32, i32) {
    %c0_i32 = arith.constant 0 : i32
    %c0_i32_0 = arith.constant 0 : i32
    %c0_i32_1 = arith.constant 0 : i32
    return %arg0, %c0_i32, %c0_i32_0 : i32, i32, i32
  }
  func.func @transform_1(%arg0: i32) -> (i32, i32) {
    %c0_i32 = arith.constant 0 : i32
    %c0_i32_0 = arith.constant 0 : i32
    %c0_i32_1 = arith.constant 0 : i32
    return %c0_i32, %c0_i32_0 : i32, i32
  }
  func.func @transform_2(%arg0: i32) -> (i32, i32, i32) {
    %c0_i32 = arith.constant 0 : i32
    %c0_i32_0 = arith.constant 0 : i32
    %c0_i32_1 = arith.constant 0 : i32
    return %arg0, %c0_i32, %c0_i32_0 : i32, i32, i32
  }
  func.func @transform_3(%arg0: i32) -> (i32, i32) {
    %c0_i32 = arith.constant 0 : i32
    %c0_i32_0 = arith.constant 0 : i32
    return %arg0, %c0_i32 : i32, i32
  }
}

module attributes {stable_mosaic.version = 11 : i64} {
  func.func @kernel(%arg0: i32, %arg1: memref<1x16x16x128xbf16, #tpu.memory_space<vmem>>, %arg2: memref<1x128xf32, #tpu.memory_space<vmem>>, %arg3: memref<1x128xf32, #tpu.memory_space<vmem>>, %arg4: memref<9x128x128xbf16, #tpu.memory_space<vmem>>, %arg5: memref<1x16x16x128xbf16, #tpu.memory_space<vmem>>, %arg6: memref<8x128xf32, #tpu.memory_space<vmem>>, %arg7: memref<1x18x18x128xbf16, #tpu.memory_space<vmem>>) attributes {dimension_semantics = [#tpu.dimension_semantics<parallel>], iteration_bounds = array<i64: 2>, scalar_prefetch = 0 : i64, scratch_operands = 1 : i64, tpu.core_type = #tpu.core_type<tc>, window_params = [{transform_indices = @transform_0, window_bounds = array<i64: 1, 16, 16, 128>}, {pipeline_mode = #tpu.pipeline_mode<synchronous>, transform_indices = @transform_1, window_bounds = array<i64: 1, 128>}, {pipeline_mode = #tpu.pipeline_mode<synchronous>, transform_indices = @transform_2, window_bounds = array<i64: 1, 128>}, {pipeline_mode = #tpu.pipeline_mode<synchronous>, transform_indices = @transform_3, window_bounds = array<i64: 9, 128, 128>}, {transform_indices = @transform_4, window_bounds = array<i64: 1, 16, 16, 128>}, {transform_indices = @transform_5, window_bounds = array<i64: 8, 128>}]} {
    %cst = arith.constant 0.000000e+00 : bf16
    %0 = vector.broadcast %cst : bf16 to vector<1x1x18x128xbf16>
    %cst_0 = arith.constant 0.000000e+00 : bf16
    %1 = vector.broadcast %cst_0 : bf16 to vector<1x18x1x128xbf16>
    %c0 = arith.constant 0 : index
    %c0_1 = arith.constant 0 : index
    %c0_2 = arith.constant 0 : index
    %c0_3 = arith.constant 0 : index
    %2 = vector.load %arg7[%c0, %c0_1, %c0_2, %c0_3] : memref<1x18x18x128xbf16, #tpu.memory_space<vmem>>, vector<1x1x18x128xbf16>
    tpu.vector_store %arg7[%c0, %c0_1, %c0_2, %c0_3], %0 {strides = array<i32>} : memref<1x18x18x128xbf16, #tpu.memory_space<vmem>>, vector<1x1x18x128xbf16>,
    %c0_4 = arith.constant 0 : index
    %c17 = arith.constant 17 : index
    %c0_5 = arith.constant 0 : index
    %c0_6 = arith.constant 0 : index
    %3 = vector.load %arg7[%c0_4, %c17, %c0_5, %c0_6] : memref<1x18x18x128xbf16, #tpu.memory_space<vmem>>, vector<1x1x18x128xbf16>
    tpu.vector_store %arg7[%c0_4, %c17, %c0_5, %c0_6], %0 {strides = array<i32>} : memref<1x18x18x128xbf16, #tpu.memory_space<vmem>>, vector<1x1x18x128xbf16>,
    %c0_7 = arith.constant 0 : index
    %c0_8 = arith.constant 0 : index
    %c0_9 = arith.constant 0 : index
    %c0_10 = arith.constant 0 : index
    %4 = vector.load %arg7[%c0_7, %c0_8, %c0_9, %c0_10] : memref<1x18x18x128xbf16, #tpu.memory_space<vmem>>, vector<1x18x1x128xbf16>
    tpu.vector_store %arg7[%c0_7, %c0_8, %c0_9, %c0_10], %1 {strides = array<i32>} : memref<1x18x18x128xbf16, #tpu.memory_space<vmem>>, vector<1x18x1x128xbf16>,
    %c0_11 = arith.constant 0 : index
    %c0_12 = arith.constant 0 : index
    %c17_13 = arith.constant 17 : index
    %c0_14 = arith.constant 0 : index
    %5 = vector.load %arg7[%c0_11, %c0_12, %c17_13, %c0_14] : memref<1x18x18x128xbf16, #tpu.memory_space<vmem>>, vector<1x18x1x128xbf16>
    tpu.vector_store %arg7[%c0_11, %c0_12, %c17_13, %c0_14], %1 {strides = array<i32>} : memref<1x18x18x128xbf16, #tpu.memory_space<vmem>>, vector<1x18x1x128xbf16>,
    %c0_15 = arith.constant 0 : index
    %c0_16 = arith.constant 0 : index
    %c0_17 = arith.constant 0 : index
    %c0_18 = arith.constant 0 : index
    %6 = vector.load %arg1[%c0_15, %c0_16, %c0_17, %c0_18] : memref<1x16x16x128xbf16, #tpu.memory_space<vmem>>, vector<1x16x16x128xbf16>
    %7 = vector.shape_cast %6 : vector<1x16x16x128xbf16> to vector<256x128xbf16>
    %8 = arith.extf %7 : vector<256x128xbf16> to vector<256x128xf32>
    %c0_19 = arith.constant 0 : index
    %c0_20 = arith.constant 0 : index
    %9 = vector.load %arg2[%c0_19, %c0_20] : memref<1x128xf32, #tpu.memory_space<vmem>>, vector<1x128xf32>
    %10 = vector.broadcast %9 : vector<1x128xf32> to vector<256x128xf32>
    %11 = arith.mulf %8, %10 : vector<256x128xf32>
    %c0_21 = arith.constant 0 : index
    %c0_22 = arith.constant 0 : index
    %12 = vector.load %arg3[%c0_21, %c0_22] : memref<1x128xf32, #tpu.memory_space<vmem>>, vector<1x128xf32>
    %13 = vector.broadcast %12 : vector<1x128xf32> to vector<256x128xf32>
    %14 = arith.addf %11, %13 : vector<256x128xf32>
    %cst_23 = arith.constant 0.000000e+00 : f32
    %15 = vector.broadcast %cst_23 : f32 to vector<256x128xf32>
    %16 = arith.maximumf %14, %15 : vector<256x128xf32>
    %17 = arith.truncf %16 : vector<256x128xf32> to vector<256x128xbf16>
    %18 = vector.shape_cast %17 : vector<256x128xbf16> to vector<1x16x16x128xbf16>
    %c0_24 = arith.constant 0 : index
    %c1 = arith.constant 1 : index
    %c1_25 = arith.constant 1 : index
    %c0_26 = arith.constant 0 : index
    %19 = vector.load %arg7[%c0_24, %c1, %c1_25, %c0_26] : memref<1x18x18x128xbf16, #tpu.memory_space<vmem>>, vector<1x16x16x128xbf16>
    tpu.vector_store %arg7[%c0_24, %c1, %c1_25, %c0_26], %18 {strides = array<i32>} : memref<1x18x18x128xbf16, #tpu.memory_space<vmem>>, vector<1x16x16x128xbf16>,
    %cst_27 = arith.constant 0.000000e+00 : f32
    %20 = vector.broadcast %cst_27 : f32 to vector<256x128xf32>
    %c0_28 = arith.constant 0 : index
    %c0_29 = arith.constant 0 : index
    %c0_30 = arith.constant 0 : index
    %c0_31 = arith.constant 0 : index
    %21 = vector.load %arg7[%c0_28, %c0_29, %c0_30, %c0_31] : memref<1x18x18x128xbf16, #tpu.memory_space<vmem>>, vector<1x16x16x128xbf16>
    %22 = vector.shape_cast %21 : vector<1x16x16x128xbf16> to vector<256x128xbf16>
    %c0_32 = arith.constant 0 : index
    %c0_33 = arith.constant 0 : index
    %c0_34 = arith.constant 0 : index
    %23 = vector.load %arg4[%c0_32, %c0_33, %c0_34] : memref<9x128x128xbf16, #tpu.memory_space<vmem>>, vector<1x128x128xbf16>
    %24 = vector.shape_cast %23 : vector<1x128x128xbf16> to vector<128x128xbf16>
    %cst_35 = arith.constant dense<0.000000e+00> : vector<256x128xf32>
    %25 = tpu.matmul %22, %24, %cst_35 {dimension_numbers = #tpu.dot_dimension_numbers<[1], [0], [0], [1], [0, 0, 1, 1], [], []>} : vector<256x128xbf16>, vector<128x128xbf16>, vector<256x128xf32> -> vector<256x128xf32>
    %26 = arith.addf %20, %25 : vector<256x128xf32>
    %c0_36 = arith.constant 0 : index
    %c0_37 = arith.constant 0 : index
    %c1_38 = arith.constant 1 : index
    %c0_39 = arith.constant 0 : index
    %27 = vector.load %arg7[%c0_36, %c0_37, %c1_38, %c0_39] : memref<1x18x18x128xbf16, #tpu.memory_space<vmem>>, vector<1x16x16x128xbf16>
    %28 = vector.shape_cast %27 : vector<1x16x16x128xbf16> to vector<256x128xbf16>
    %c1_40 = arith.constant 1 : index
    %c0_41 = arith.constant 0 : index
    %c0_42 = arith.constant 0 : index
    %29 = vector.load %arg4[%c1_40, %c0_41, %c0_42] : memref<9x128x128xbf16, #tpu.memory_space<vmem>>, vector<1x128x128xbf16>
    %30 = vector.shape_cast %29 : vector<1x128x128xbf16> to vector<128x128xbf16>
    %cst_43 = arith.constant dense<0.000000e+00> : vector<256x128xf32>
    %31 = tpu.matmul %28, %30, %cst_43 {dimension_numbers = #tpu.dot_dimension_numbers<[1], [0], [0], [1], [0, 0, 1, 1], [], []>} : vector<256x128xbf16>, vector<128x128xbf16>, vector<256x128xf32> -> vector<256x128xf32>
    %32 = arith.addf %26, %31 : vector<256x128xf32>
    %c0_44 = arith.constant 0 : index
    %c0_45 = arith.constant 0 : index
    %c2 = arith.constant 2 : index
    %c0_46 = arith.constant 0 : index
    %33 = vector.load %arg7[%c0_44, %c0_45, %c2, %c0_46] : memref<1x18x18x128xbf16, #tpu.memory_space<vmem>>, vector<1x16x16x128xbf16>
    %34 = vector.shape_cast %33 : vector<1x16x16x128xbf16> to vector<256x128xbf16>
    %c2_47 = arith.constant 2 : index
    %c0_48 = arith.constant 0 : index
    %c0_49 = arith.constant 0 : index
    %35 = vector.load %arg4[%c2_47, %c0_48, %c0_49] : memref<9x128x128xbf16, #tpu.memory_space<vmem>>, vector<1x128x128xbf16>
    %36 = vector.shape_cast %35 : vector<1x128x128xbf16> to vector<128x128xbf16>
    %cst_50 = arith.constant dense<0.000000e+00> : vector<256x128xf32>
    %37 = tpu.matmul %34, %36, %cst_50 {dimension_numbers = #tpu.dot_dimension_numbers<[1], [0], [0], [1], [0, 0, 1, 1], [], []>} : vector<256x128xbf16>, vector<128x128xbf16>, vector<256x128xf32> -> vector<256x128xf32>
    %38 = arith.addf %32, %37 : vector<256x128xf32>
    %c0_51 = arith.constant 0 : index
    %c1_52 = arith.constant 1 : index
    %c0_53 = arith.constant 0 : index
    %c0_54 = arith.constant 0 : index
    %39 = vector.load %arg7[%c0_51, %c1_52, %c0_53, %c0_54] : memref<1x18x18x128xbf16, #tpu.memory_space<vmem>>, vector<1x16x16x128xbf16>
    %40 = vector.shape_cast %39 : vector<1x16x16x128xbf16> to vector<256x128xbf16>
    %c3 = arith.constant 3 : index
    %c0_55 = arith.constant 0 : index
    %c0_56 = arith.constant 0 : index
    %41 = vector.load %arg4[%c3, %c0_55, %c0_56] : memref<9x128x128xbf16, #tpu.memory_space<vmem>>, vector<1x128x128xbf16>
    %42 = vector.shape_cast %41 : vector<1x128x128xbf16> to vector<128x128xbf16>
    %cst_57 = arith.constant dense<0.000000e+00> : vector<256x128xf32>
    %43 = tpu.matmul %40, %42, %cst_57 {dimension_numbers = #tpu.dot_dimension_numbers<[1], [0], [0], [1], [0, 0, 1, 1], [], []>} : vector<256x128xbf16>, vector<128x128xbf16>, vector<256x128xf32> -> vector<256x128xf32>
    %44 = arith.addf %38, %43 : vector<256x128xf32>
    %c0_58 = arith.constant 0 : index
    %c1_59 = arith.constant 1 : index
    %c1_60 = arith.constant 1 : index
    %c0_61 = arith.constant 0 : index
    %45 = vector.load %arg7[%c0_58, %c1_59, %c1_60, %c0_61] : memref<1x18x18x128xbf16, #tpu.memory_space<vmem>>, vector<1x16x16x128xbf16>
    %46 = vector.shape_cast %45 : vector<1x16x16x128xbf16> to vector<256x128xbf16>
    %c4 = arith.constant 4 : index
    %c0_62 = arith.constant 0 : index
    %c0_63 = arith.constant 0 : index
    %47 = vector.load %arg4[%c4, %c0_62, %c0_63] : memref<9x128x128xbf16, #tpu.memory_space<vmem>>, vector<1x128x128xbf16>
    %48 = vector.shape_cast %47 : vector<1x128x128xbf16> to vector<128x128xbf16>
    %cst_64 = arith.constant dense<0.000000e+00> : vector<256x128xf32>
    %49 = tpu.matmul %46, %48, %cst_64 {dimension_numbers = #tpu.dot_dimension_numbers<[1], [0], [0], [1], [0, 0, 1, 1], [], []>} : vector<256x128xbf16>, vector<128x128xbf16>, vector<256x128xf32> -> vector<256x128xf32>
    %50 = arith.addf %44, %49 : vector<256x128xf32>
    %c0_65 = arith.constant 0 : index
    %c1_66 = arith.constant 1 : index
    %c2_67 = arith.constant 2 : index
    %c0_68 = arith.constant 0 : index
    %51 = vector.load %arg7[%c0_65, %c1_66, %c2_67, %c0_68] : memref<1x18x18x128xbf16, #tpu.memory_space<vmem>>, vector<1x16x16x128xbf16>
    %52 = vector.shape_cast %51 : vector<1x16x16x128xbf16> to vector<256x128xbf16>
    %c5 = arith.constant 5 : index
    %c0_69 = arith.constant 0 : index
    %c0_70 = arith.constant 0 : index
    %53 = vector.load %arg4[%c5, %c0_69, %c0_70] : memref<9x128x128xbf16, #tpu.memory_space<vmem>>, vector<1x128x128xbf16>
    %54 = vector.shape_cast %53 : vector<1x128x128xbf16> to vector<128x128xbf16>
    %cst_71 = arith.constant dense<0.000000e+00> : vector<256x128xf32>
    %55 = tpu.matmul %52, %54, %cst_71 {dimension_numbers = #tpu.dot_dimension_numbers<[1], [0], [0], [1], [0, 0, 1, 1], [], []>} : vector<256x128xbf16>, vector<128x128xbf16>, vector<256x128xf32> -> vector<256x128xf32>
    %56 = arith.addf %50, %55 : vector<256x128xf32>
    %c0_72 = arith.constant 0 : index
    %c2_73 = arith.constant 2 : index
    %c0_74 = arith.constant 0 : index
    %c0_75 = arith.constant 0 : index
    %57 = vector.load %arg7[%c0_72, %c2_73, %c0_74, %c0_75] : memref<1x18x18x128xbf16, #tpu.memory_space<vmem>>, vector<1x16x16x128xbf16>
    %58 = vector.shape_cast %57 : vector<1x16x16x128xbf16> to vector<256x128xbf16>
    %c6 = arith.constant 6 : index
    %c0_76 = arith.constant 0 : index
    %c0_77 = arith.constant 0 : index
    %59 = vector.load %arg4[%c6, %c0_76, %c0_77] : memref<9x128x128xbf16, #tpu.memory_space<vmem>>, vector<1x128x128xbf16>
    %60 = vector.shape_cast %59 : vector<1x128x128xbf16> to vector<128x128xbf16>
    %cst_78 = arith.constant dense<0.000000e+00> : vector<256x128xf32>
    %61 = tpu.matmul %58, %60, %cst_78 {dimension_numbers = #tpu.dot_dimension_numbers<[1], [0], [0], [1], [0, 0, 1, 1], [], []>} : vector<256x128xbf16>, vector<128x128xbf16>, vector<256x128xf32> -> vector<256x128xf32>
    %62 = arith.addf %56, %61 : vector<256x128xf32>
    %c0_79 = arith.constant 0 : index
    %c2_80 = arith.constant 2 : index
    %c1_81 = arith.constant 1 : index
    %c0_82 = arith.constant 0 : index
    %63 = vector.load %arg7[%c0_79, %c2_80, %c1_81, %c0_82] : memref<1x18x18x128xbf16, #tpu.memory_space<vmem>>, vector<1x16x16x128xbf16>
    %64 = vector.shape_cast %63 : vector<1x16x16x128xbf16> to vector<256x128xbf16>
    %c7 = arith.constant 7 : index
    %c0_83 = arith.constant 0 : index
    %c0_84 = arith.constant 0 : index
    %65 = vector.load %arg4[%c7, %c0_83, %c0_84] : memref<9x128x128xbf16, #tpu.memory_space<vmem>>, vector<1x128x128xbf16>
    %66 = vector.shape_cast %65 : vector<1x128x128xbf16> to vector<128x128xbf16>
    %cst_85 = arith.constant dense<0.000000e+00> : vector<256x128xf32>
    %67 = tpu.matmul %64, %66, %cst_85 {dimension_numbers = #tpu.dot_dimension_numbers<[1], [0], [0], [1], [0, 0, 1, 1], [], []>} : vector<256x128xbf16>, vector<128x128xbf16>, vector<256x128xf32> -> vector<256x128xf32>
    %68 = arith.addf %62, %67 : vector<256x128xf32>
    %c0_86 = arith.constant 0 : index
    %c2_87 = arith.constant 2 : index
    %c2_88 = arith.constant 2 : index
    %c0_89 = arith.constant 0 : index
    %69 = vector.load %arg7[%c0_86, %c2_87, %c2_88, %c0_89] : memref<1x18x18x128xbf16, #tpu.memory_space<vmem>>, vector<1x16x16x128xbf16>
    %70 = vector.shape_cast %69 : vector<1x16x16x128xbf16> to vector<256x128xbf16>
    %c8 = arith.constant 8 : index
    %c0_90 = arith.constant 0 : index
    %c0_91 = arith.constant 0 : index
    %71 = vector.load %arg4[%c8, %c0_90, %c0_91] : memref<9x128x128xbf16, #tpu.memory_space<vmem>>, vector<1x128x128xbf16>
    %72 = vector.shape_cast %71 : vector<1x128x128xbf16> to vector<128x128xbf16>
    %cst_92 = arith.constant dense<0.000000e+00> : vector<256x128xf32>
    %73 = tpu.matmul %70, %72, %cst_92 {dimension_numbers = #tpu.dot_dimension_numbers<[1], [0], [0], [1], [0, 0, 1, 1], [], []>} : vector<256x128xbf16>, vector<128x128xbf16>, vector<256x128xf32> -> vector<256x128xf32>
    %74 = arith.addf %68, %73 : vector<256x128xf32>
    %75 = arith.truncf %74 : vector<256x128xf32> to vector<256x128xbf16>
    %76 = vector.shape_cast %75 : vector<256x128xbf16> to vector<1x16x16x128xbf16>
    %c0_93 = arith.constant 0 : index
    %c0_94 = arith.constant 0 : index
    %c0_95 = arith.constant 0 : index
    %c0_96 = arith.constant 0 : index
    %77 = vector.load %arg5[%c0_93, %c0_94, %c0_95, %c0_96] : memref<1x16x16x128xbf16, #tpu.memory_space<vmem>>, vector<1x16x16x128xbf16>
    tpu.vector_store %arg5[%c0_93, %c0_94, %c0_95, %c0_96], %76 {strides = array<i32>} : memref<1x16x16x128xbf16, #tpu.memory_space<vmem>>, vector<1x16x16x128xbf16>,
    %cst_97 = arith.constant dense<0.000000e+00> : vector<128xf32>
    %78 = vector.multi_reduction <add>, %74, %cst_97 [0] : vector<256x128xf32> to vector<128xf32>
    %79 = vector.shape_cast %78 : vector<128xf32> to vector<1x128xf32>
    %80 = arith.mulf %74, %74 : vector<256x128xf32>
    %cst_98 = arith.constant dense<0.000000e+00> : vector<128xf32>
    %81 = vector.multi_reduction <add>, %80, %cst_98 [0] : vector<256x128xf32> to vector<128xf32>
    %82 = vector.shape_cast %81 : vector<128xf32> to vector<1x128xf32>
    %cst_99 = arith.constant 0.000000e+00 : f32
    %83 = vector.broadcast %cst_99 : f32 to vector<6x128xf32>
    %84 = tpu.concatenate %79, %82, %83 in 0 : vector<1x128xf32>, vector<1x128xf32>, vector<6x128xf32> -> vector<8x128xf32>
    %c0_100 = arith.constant 0 : index
    %c0_101 = arith.constant 0 : index
    %85 = vector.load %arg6[%c0_100, %c0_101] : memref<8x128xf32, #tpu.memory_space<vmem>>, vector<8x128xf32>
    tpu.vector_store %arg6[%c0_100, %c0_101], %84 {strides = array<i32>} : memref<8x128xf32, #tpu.memory_space<vmem>>, vector<8x128xf32>,
    return
  }
  func.func @transform_0(%arg0: i32) -> (i32, i32, i32, i32) {
    %c0_i32 = arith.constant 0 : i32
    %c0_i32_0 = arith.constant 0 : i32
    %c0_i32_1 = arith.constant 0 : i32
    %c0_i32_2 = arith.constant 0 : i32
    return %arg0, %c0_i32, %c0_i32_0, %c0_i32_1 : i32, i32, i32, i32
  }
  func.func @transform_1(%arg0: i32) -> (i32, i32) {
    %c0_i32 = arith.constant 0 : i32
    %c0_i32_0 = arith.constant 0 : i32
    %c0_i32_1 = arith.constant 0 : i32
    return %c0_i32, %c0_i32_0 : i32, i32
  }
  func.func @transform_2(%arg0: i32) -> (i32, i32) {
    %c0_i32 = arith.constant 0 : i32
    %c0_i32_0 = arith.constant 0 : i32
    %c0_i32_1 = arith.constant 0 : i32
    return %c0_i32, %c0_i32_0 : i32, i32
  }
  func.func @transform_3(%arg0: i32) -> (i32, i32, i32) {
    %c0_i32 = arith.constant 0 : i32
    %c0_i32_0 = arith.constant 0 : i32
    %c0_i32_1 = arith.constant 0 : i32
    %c0_i32_2 = arith.constant 0 : i32
    return %c0_i32, %c0_i32_0, %c0_i32_1 : i32, i32, i32
  }
  func.func @transform_4(%arg0: i32) -> (i32, i32, i32, i32) {
    %c0_i32 = arith.constant 0 : i32
    %c0_i32_0 = arith.constant 0 : i32
    %c0_i32_1 = arith.constant 0 : i32
    %c0_i32_2 = arith.constant 0 : i32
    return %arg0, %c0_i32, %c0_i32_0, %c0_i32_1 : i32, i32, i32, i32
  }
  func.func @transform_5(%arg0: i32) -> (i32, i32) {
    %c0_i32 = arith.constant 0 : i32
    %c0_i32_0 = arith.constant 0 : i32
    return %arg0, %c0_i32 : i32, i32
  }
}

module attributes {stable_mosaic.version = 11 : i64} {
  func.func @bn_relu_conv1x1_stats_kernel(%arg0: i32, %arg1: memref<1x256x128xbf16, #tpu.memory_space<vmem>>, %arg2: memref<1x128xf32, #tpu.memory_space<vmem>>, %arg3: memref<1x128xf32, #tpu.memory_space<vmem>>, %arg4: memref<128x128xbf16, #tpu.memory_space<vmem>>, %arg5: memref<1x256x128xbf16, #tpu.memory_space<vmem>>, %arg6: memref<8x128xf32, #tpu.memory_space<vmem>>) attributes {dimension_semantics = [#tpu.dimension_semantics<parallel>], iteration_bounds = array<i64: 2>, scalar_prefetch = 0 : i64, scratch_operands = 0 : i64, tpu.core_type = #tpu.core_type<tc>, window_params = [{transform_indices = @transform_0, window_bounds = array<i64: 1, 256, 128>}, {pipeline_mode = #tpu.pipeline_mode<synchronous>, transform_indices = @transform_1, window_bounds = array<i64: 1, 128>}, {pipeline_mode = #tpu.pipeline_mode<synchronous>, transform_indices = @transform_2, window_bounds = array<i64: 1, 128>}, {pipeline_mode = #tpu.pipeline_mode<synchronous>, transform_indices = @transform_3, window_bounds = array<i64: 128, 128>}, {transform_indices = @transform_4, window_bounds = array<i64: 1, 256, 128>}, {transform_indices = @transform_5, window_bounds = array<i64: 8, 128>}]} {
    %c0 = arith.constant 0 : index
    %c0_0 = arith.constant 0 : index
    %c0_1 = arith.constant 0 : index
    %0 = vector.load %arg1[%c0, %c0_0, %c0_1] : memref<1x256x128xbf16, #tpu.memory_space<vmem>>, vector<1x256x128xbf16>
    %1 = vector.shape_cast %0 : vector<1x256x128xbf16> to vector<256x128xbf16>
    %2 = arith.extf %1 : vector<256x128xbf16> to vector<256x128xf32>
    %c0_2 = arith.constant 0 : index
    %c0_3 = arith.constant 0 : index
    %3 = vector.load %arg2[%c0_2, %c0_3] : memref<1x128xf32, #tpu.memory_space<vmem>>, vector<1x128xf32>
    %4 = vector.broadcast %3 : vector<1x128xf32> to vector<256x128xf32>
    %5 = arith.mulf %2, %4 : vector<256x128xf32>
    %c0_4 = arith.constant 0 : index
    %c0_5 = arith.constant 0 : index
    %6 = vector.load %arg3[%c0_4, %c0_5] : memref<1x128xf32, #tpu.memory_space<vmem>>, vector<1x128xf32>
    %7 = vector.broadcast %6 : vector<1x128xf32> to vector<256x128xf32>
    %8 = arith.addf %5, %7 : vector<256x128xf32>
    %cst = arith.constant 0.000000e+00 : f32
    %9 = vector.broadcast %cst : f32 to vector<256x128xf32>
    %10 = arith.maximumf %8, %9 : vector<256x128xf32>
    %11 = arith.truncf %10 : vector<256x128xf32> to vector<256x128xbf16>
    %c0_6 = arith.constant 0 : index
    %c0_7 = arith.constant 0 : index
    %12 = vector.load %arg4[%c0_6, %c0_7] : memref<128x128xbf16, #tpu.memory_space<vmem>>, vector<128x128xbf16>
    %cst_8 = arith.constant dense<0.000000e+00> : vector<256x128xf32>
    %13 = tpu.matmul %11, %12, %cst_8 {dimension_numbers = #tpu.dot_dimension_numbers<[1], [0], [0], [1], [0, 0, 1, 1], [], []>} : vector<256x128xbf16>, vector<128x128xbf16>, vector<256x128xf32> -> vector<256x128xf32>
    %14 = arith.truncf %13 : vector<256x128xf32> to vector<256x128xbf16>
    %15 = vector.shape_cast %14 : vector<256x128xbf16> to vector<1x256x128xbf16>
    %c0_9 = arith.constant 0 : index
    %c0_10 = arith.constant 0 : index
    %c0_11 = arith.constant 0 : index
    %16 = vector.load %arg5[%c0_9, %c0_10, %c0_11] : memref<1x256x128xbf16, #tpu.memory_space<vmem>>, vector<1x256x128xbf16>
    tpu.vector_store %arg5[%c0_9, %c0_10, %c0_11], %15 {strides = array<i32>} : memref<1x256x128xbf16, #tpu.memory_space<vmem>>, vector<1x256x128xbf16>,
    %cst_12 = arith.constant dense<0.000000e+00> : vector<128xf32>
    %17 = vector.multi_reduction <add>, %13, %cst_12 [0] : vector<256x128xf32> to vector<128xf32>
    %18 = vector.shape_cast %17 : vector<128xf32> to vector<1x128xf32>
    %19 = arith.mulf %13, %13 : vector<256x128xf32>
    %cst_13 = arith.constant dense<0.000000e+00> : vector<128xf32>
    %20 = vector.multi_reduction <add>, %19, %cst_13 [0] : vector<256x128xf32> to vector<128xf32>
    %21 = vector.shape_cast %20 : vector<128xf32> to vector<1x128xf32>
    %cst_14 = arith.constant 0.000000e+00 : f32
    %22 = vector.broadcast %cst_14 : f32 to vector<6x128xf32>
    %23 = tpu.concatenate %18, %21, %22 in 0 : vector<1x128xf32>, vector<1x128xf32>, vector<6x128xf32> -> vector<8x128xf32>
    %c0_15 = arith.constant 0 : index
    %c0_16 = arith.constant 0 : index
    %24 = vector.load %arg6[%c0_15, %c0_16] : memref<8x128xf32, #tpu.memory_space<vmem>>, vector<8x128xf32>
    tpu.vector_store %arg6[%c0_15, %c0_16], %23 {strides = array<i32>} : memref<8x128xf32, #tpu.memory_space<vmem>>, vector<8x128xf32>,
    return
  }
  func.func @transform_0(%arg0: i32) -> (i32, i32, i32) {
    %c0_i32 = arith.constant 0 : i32
    %c0_i32_0 = arith.constant 0 : i32
    %c0_i32_1 = arith.constant 0 : i32
    return %arg0, %c0_i32, %c0_i32_0 : i32, i32, i32
  }
  func.func @transform_1(%arg0: i32) -> (i32, i32) {
    %c0_i32 = arith.constant 0 : i32
    %c0_i32_0 = arith.constant 0 : i32
    %c0_i32_1 = arith.constant 0 : i32
    return %c0_i32, %c0_i32_0 : i32, i32
  }
  func.func @transform_2(%arg0: i32) -> (i32, i32) {
    %c0_i32 = arith.constant 0 : i32
    %c0_i32_0 = arith.constant 0 : i32
    %c0_i32_1 = arith.constant 0 : i32
    return %c0_i32, %c0_i32_0 : i32, i32
  }
  func.func @transform_3(%arg0: i32) -> (i32, i32) {
    %c0_i32 = arith.constant 0 : i32
    %c0_i32_0 = arith.constant 0 : i32
    %c0_i32_1 = arith.constant 0 : i32
    return %c0_i32, %c0_i32_0 : i32, i32
  }
  func.func @transform_4(%arg0: i32) -> (i32, i32, i32) {
    %c0_i32 = arith.constant 0 : i32
    %c0_i32_0 = arith.constant 0 : i32
    %c0_i32_1 = arith.constant 0 : i32
    return %arg0, %c0_i32, %c0_i32_0 : i32, i32, i32
  }
  func.func @transform_5(%arg0: i32) -> (i32, i32) {
    %c0_i32 = arith.constant 0 : i32
    %c0_i32_0 = arith.constant 0 : i32
    return %arg0, %c0_i32 : i32, i32
  }
}

module attributes {stable_mosaic.version = 11 : i64} {
  func.func @bn_add_relu_kernel(%arg0: i32, %arg1: memref<1x256x128xbf16, #tpu.memory_space<vmem>>, %arg2: memref<1x128xf32, #tpu.memory_space<vmem>>, %arg3: memref<1x128xf32, #tpu.memory_space<vmem>>, %arg4: memref<1x256x128xbf16, #tpu.memory_space<vmem>>, %arg5: memref<1x256x128xf32, #tpu.memory_space<vmem>>) attributes {dimension_semantics = [#tpu.dimension_semantics<parallel>], iteration_bounds = array<i64: 2>, scalar_prefetch = 0 : i64, scratch_operands = 0 : i64, tpu.core_type = #tpu.core_type<tc>, window_params = [{transform_indices = @transform_0, window_bounds = array<i64: 1, 256, 128>}, {pipeline_mode = #tpu.pipeline_mode<synchronous>, transform_indices = @transform_1, window_bounds = array<i64: 1, 128>}, {pipeline_mode = #tpu.pipeline_mode<synchronous>, transform_indices = @transform_2, window_bounds = array<i64: 1, 128>}, {transform_indices = @transform_3, window_bounds = array<i64: 1, 256, 128>}, {transform_indices = @transform_4, window_bounds = array<i64: 1, 256, 128>}]} {
    %c0 = arith.constant 0 : index
    %c0_0 = arith.constant 0 : index
    %c0_1 = arith.constant 0 : index
    %0 = vector.load %arg1[%c0, %c0_0, %c0_1] : memref<1x256x128xbf16, #tpu.memory_space<vmem>>, vector<1x256x128xbf16>
    %1 = vector.shape_cast %0 : vector<1x256x128xbf16> to vector<256x128xbf16>
    %2 = arith.extf %1 : vector<256x128xbf16> to vector<256x128xf32>
    %c0_2 = arith.constant 0 : index
    %c0_3 = arith.constant 0 : index
    %3 = vector.load %arg2[%c0_2, %c0_3] : memref<1x128xf32, #tpu.memory_space<vmem>>, vector<1x128xf32>
    %4 = vector.broadcast %3 : vector<1x128xf32> to vector<256x128xf32>
    %5 = arith.mulf %2, %4 : vector<256x128xf32>
    %c0_4 = arith.constant 0 : index
    %c0_5 = arith.constant 0 : index
    %6 = vector.load %arg3[%c0_4, %c0_5] : memref<1x128xf32, #tpu.memory_space<vmem>>, vector<1x128xf32>
    %7 = vector.broadcast %6 : vector<1x128xf32> to vector<256x128xf32>
    %8 = arith.addf %5, %7 : vector<256x128xf32>
    %c0_6 = arith.constant 0 : index
    %c0_7 = arith.constant 0 : index
    %c0_8 = arith.constant 0 : index
    %9 = vector.load %arg4[%c0_6, %c0_7, %c0_8] : memref<1x256x128xbf16, #tpu.memory_space<vmem>>, vector<1x256x128xbf16>
    %10 = vector.shape_cast %9 : vector<1x256x128xbf16> to vector<256x128xbf16>
    %11 = arith.extf %10 : vector<256x128xbf16> to vector<256x128xf32>
    %12 = arith.addf %8, %11 : vector<256x128xf32>
    %cst = arith.constant 0.000000e+00 : f32
    %13 = vector.broadcast %cst : f32 to vector<256x128xf32>
    %14 = arith.maximumf %12, %13 : vector<256x128xf32>
    %15 = vector.shape_cast %14 : vector<256x128xf32> to vector<1x256x128xf32>
    %c0_9 = arith.constant 0 : index
    %c0_10 = arith.constant 0 : index
    %c0_11 = arith.constant 0 : index
    %16 = vector.load %arg5[%c0_9, %c0_10, %c0_11] : memref<1x256x128xf32, #tpu.memory_space<vmem>>, vector<1x256x128xf32>
    tpu.vector_store %arg5[%c0_9, %c0_10, %c0_11], %15 {strides = array<i32>} : memref<1x256x128xf32, #tpu.memory_space<vmem>>, vector<1x256x128xf32>,
    return
  }
  func.func @transform_0(%arg0: i32) -> (i32, i32, i32) {
    %c0_i32 = arith.constant 0 : i32
    %c0_i32_0 = arith.constant 0 : i32
    %c0_i32_1 = arith.constant 0 : i32
    return %arg0, %c0_i32, %c0_i32_0 : i32, i32, i32
  }
  func.func @transform_1(%arg0: i32) -> (i32, i32) {
    %c0_i32 = arith.constant 0 : i32
    %c0_i32_0 = arith.constant 0 : i32
    %c0_i32_1 = arith.constant 0 : i32
    return %c0_i32, %c0_i32_0 : i32, i32
  }
  func.func @transform_2(%arg0: i32) -> (i32, i32) {
    %c0_i32 = arith.constant 0 : i32
    %c0_i32_0 = arith.constant 0 : i32
    %c0_i32_1 = arith.constant 0 : i32
    return %c0_i32, %c0_i32_0 : i32, i32
  }
  func.func @transform_3(%arg0: i32) -> (i32, i32, i32) {
    %c0_i32 = arith.constant 0 : i32
    %c0_i32_0 = arith.constant 0 : i32
    %c0_i32_1 = arith.constant 0 : i32
    return %arg0, %c0_i32, %c0_i32_0 : i32, i32, i32
  }
  func.func @transform_4(%arg0: i32) -> (i32, i32, i32) {
    %c0_i32 = arith.constant 0 : i32
    %c0_i32_0 = arith.constant 0 : i32
    %c0_i32_1 = arith.constant 0 : i32
    return %arg0, %c0_i32, %c0_i32_0 : i32, i32, i32
  }
}

</mosaic_0001>

<bundles_post_ra>
// kernel: bottleneck_forward.4
= control target key start
LH: loop header
LB: loop body
LE: loop exit
PB: predicated region body
PF: predicated region fallthrough
CT: control target
= control target key end

     0   :  { %s1013_s12 = smov 0   ;;  %s1219_s0 = inlined_call_operand.vmem [shape: bf16[2,256,128], index: 0, kind: input, shape index: {}]   ;;  %s1220_s1 = inlined_call_operand.vmem [shape: bf16[128,128], index: 1, kind: input, shape index: {}]   ;;  %s1221_s2 = inlined_call_operand.vmem [shape: bf16[2,256,128], index: 2, kind: output, shape index: {0}]   ;;  %s1222_s3 = inlined_call_operand.vmem [shape: f32[16,128], index: 3, kind: output, shape index: {1}]  }
   0x1 LB: > { %s724_s13 = sadd.s32 4294967295, %s991_s12   ;;  %p728_p0 = scmp.ge.s32.totalorder %s991_s12, 1  ;;  %s991_s12 = sphi %s1013_s12, %s14_s12  }
   0x2   : > { %p140_p1 = scmp.lt.s32.totalorder %s991_s12, 3 }
   0x4   : > { %p141_p2 = pnand %p728_p0, %p140_p1 }
   0x5   : > { %p168_p3 = scmp.lt.s32.totalorder (!%p141_p2), %s724_s13, 1 }
   0x6   : > { %144 = sbr.rel (%p141_p2) target bundleno = 292 (0x124), region = 28 }
   0xb   : > { %v857_v0 = vld [vmem:[%s1220_s1 + $0x38] sm:$0xff]  ;;  %v856_v1 = vld [vmem:[%s1220_s1 + $0x30] sm:$0xff]  ;;  %v855_v2 = vld [vmem:[%s1220_s1 + $0x28] sm:$0xff]  ;;  %s1224_s13 = smov (!%p168_p3, %s724_s13), 1  ;;  %vm633_vm0 = vcmask 1040384   ;;  %vm635_vm1 = vcmask 1041408  }
   0xc   : > { %374 = vmatpush.bf16.msra.mxu0 %v857_v0  ;;  %953 = vmatpush.bf16.msra.mxu1 %v857_v0  ;;  %v854_v3 = vld [vmem:[%s1220_s1 + $0x20] sm:$0xff]  ;;  %v853_v4 = vld [vmem:[%s1220_s1 + $0x18] sm:$0xff]  ;;  %v852_v5 = vld [vmem:[%s1220_s1 + $0x10] sm:$0xff]  ;;  %s832_s28 = sshll.u32 %s1224_s13, 7  ;;  %s733_s10 = sshll.u32 %s1224_s13, 3 }
   0xd   : > { %954 = vmatpush.bf16.msra.mxu2 %v857_v0  ;;  %955 = vmatpush.bf16.msra.mxu3 %v857_v0  ;;  %v851_v6 = vld [vmem:[%s1220_s1 + $0x8] sm:$0xff]  ;;  %v850_v7 = vld [vmem:[%s1220_s1] sm:$0xff]  ;;  %s1057_s6 = scalar_lea.vmem %s1219_s0, %s832_s28  ;;  %s1084_s9 = scalar_lea.vmem %s1221_s2, %s832_s28 }
   0xe   : > { %v834_v8 = vld [vmem:[%s1057_s6] sm:$0xff]  ;;  %v835_v12 = vld [vmem:[%s1057_s6 + $0x8] sm:$0xff]  ;;  %v836_v16 = vld [vmem:[%s1057_s6 + $0x10] sm:$0xff]  ;;  %s181_s15 = scalar_lea.vmem %s1222_s3, %s733_s10 }
   0xf   : > { %v838_v9 = vld [vmem:[%s1057_s6 + $0x20] sm:$0xff]  ;;  %v839_v13 = vld [vmem:[%s1057_s6 + $0x28] sm:$0xff]  ;;  %v840_v17 = vld [vmem:[%s1057_s6 + $0x30] sm:$0xff] }
  0x10   : > { %375 = vmatpush.bf16.msra.mxu0 %v856_v1  ;;  %956 = vmatpush.bf16.msra.mxu1 %v856_v1  ;;  %v842_v10 = vld [vmem:[%s1057_s6 + $0x40] sm:$0xff]  ;;  %v843_v14 = vld [vmem:[%s1057_s6 + $0x48] sm:$0xff]  ;;  %v844_v18 = vld [vmem:[%s1057_s6 + $0x50] sm:$0xff] }
  0x11   : > { %957 = vmatpush.bf16.msra.mxu2 %v856_v1  ;;  %958 = vmatpush.bf16.msra.mxu3 %v856_v1  ;;  %v846_v11 = vld [vmem:[%s1057_s6 + $0x60] sm:$0xff]  ;;  %v847_v15 = vld [vmem:[%s1057_s6 + $0x68] sm:$0xff]  ;;  %v848_v19 = vld [vmem:[%s1057_s6 + $0x70] sm:$0xff] }
  0x12   : > { %v837_v20 = vld [vmem:[%s1057_s6 + $0x18] sm:$0xff] }
  0x13   : > { %v841_v21 = vld [vmem:[%s1057_s6 + $0x38] sm:$0xff] }
  0x14   : > { %376 = vmatpush.bf16.msra.mxu0 %v855_v2  ;;  %959 = vmatpush.bf16.msra.mxu1 %v855_v2  ;;  %v845_v22 = vld [vmem:[%s1057_s6 + $0x58] sm:$0xff] }
  0x15   : > { %960 = vmatpush.bf16.msra.mxu2 %v855_v2  ;;  %961 = vmatpush.bf16.msra.mxu3 %v855_v2  ;;  %v849_v23 = vld [vmem:[%s1057_s6 + $0x78] sm:$0xff] }
  0x18   : > { %377 = vmatpush.bf16.msra.mxu0 %v854_v3  ;;  %962 = vmatpush.bf16.msra.mxu1 %v854_v3 }
  0x19   : > { %963 = vmatpush.bf16.msra.mxu2 %v854_v3  ;;  %964 = vmatpush.bf16.msra.mxu3 %v854_v3 }
  0x1c   : > { %378 = vmatpush.bf16.msra.mxu0 %v853_v4  ;;  %965 = vmatpush.bf16.msra.mxu1 %v853_v4 }
  0x1d   : > { %966 = vmatpush.bf16.msra.mxu2 %v853_v4  ;;  %967 = vmatpush.bf16.msra.mxu3 %v853_v4 }
  0x20   : > { %379 = vmatpush.bf16.msra.mxu0 %v852_v5  ;;  %968 = vmatpush.bf16.msra.mxu1 %v852_v5 }
  0x21   : > { %969 = vmatpush.bf16.msra.mxu2 %v852_v5  ;;  %970 = vmatpush.bf16.msra.mxu3 %v852_v5 }
  0x24   : > { %380 = vmatpush.bf16.msra.mxu0 %v851_v6  ;;  %971 = vmatpush.bf16.msra.mxu1 %v851_v6 }
  0x25   : > { %972 = vmatpush.bf16.msra.mxu2 %v851_v6  ;;  %973 = vmatpush.bf16.msra.mxu3 %v851_v6 }
  0x28   : > { %381 = vmatpush.bf16.msra.mxu0 %v850_v7  ;;  %974 = vmatpush.bf16.msra.mxu1 %v850_v7 }
  0x29   : > { %975 = vmatpush.bf16.msra.mxu2 %v850_v7  ;;  %976 = vmatpush.bf16.msra.mxu3 %v850_v7 }
  0x2b   : > { %382 = vmatmul.bf16.vlgmr.msra.gmra.mxu0 %v834_v8  ;;  %402 = vmatmul.bf16.vlgmr.msra.gmra.mxu1 %v838_v9 }
  0x2c   : > { %422 = vmatmul.bf16.vlgmr.msra.gmra.mxu2 %v842_v10  ;;  %442 = vmatmul.bf16.vlgmr.msra.gmra.mxu3 %v846_v11 }
  0x3b   : > { %387 = vmatmul.bf16.gmra.mxu0 %v835_v12  ;;  %407 = vmatmul.bf16.gmra.mxu1 %v839_v13 }
  0x3c   : > { %427 = vmatmul.bf16.gmra.mxu2 %v843_v14  ;;  %447 = vmatmul.bf16.gmra.mxu3 %v847_v15 }
  0x4b   : > { %392 = vmatmul.bf16.gmra.mxu0 %v836_v16  ;;  %412 = vmatmul.bf16.gmra.mxu1 %v840_v17 }
  0x4c   : > { %432 = vmatmul.bf16.gmra.mxu2 %v844_v18  ;;  %452 = vmatmul.bf16.gmra.mxu3 %v848_v19 }
  0x5b   : > { %397 = vmatmul.bf16.gmra.mxu0 %v837_v20  ;;  %417 = vmatmul.bf16.gmra.mxu1 %v841_v21 }
  0x5c   : > { %437 = vmatmul.bf16.gmra.mxu2 %v845_v22  ;;  %457 = vmatmul.bf16.gmra.mxu3 %v849_v23 }
  0xa8   : > { %v383_v24 = vpop.f32.mrf.mxu0  ;;  %v1075_v25 = vpop.f32.mrf.mxu1 }
  0xa9   : > { %v564_v57 = vmul.f32 %v383_v24, %v383_v24 }
  0xaf   : > { %v1077_v26 = vpop.f32.mrf.mxu2  ;;  %v1090_v31 = vpop.f32.mrf.mxu3 }
  0xb0   : > { %v385_v27 = vpop.f32.mrf.mxu0  ;;  %v1086_v28 = vpop.f32.mrf.mxu1 }
  0xb1   : > { %v861_v29 = vpack.c.bf16 %v385_v27, %v383_v24  ;;  %v881_v30 = vpack.c.bf16 %v1086_v28, %v1075_v25  ;;  %v565_v56 = vmul.f32 %v385_v27, %v385_v27  ;;  %v527_v59 = vadd.f32 %v385_v27, %v383_v24 }
  0xb2   : > { %v572_v27 = vmul.f32 %v1075_v25, %v1075_v25 }
  0xb3   : > { %862 = vst [vmem:[%s1084_s9] sm:$0xff] %v861_v29   ;;  %v596_v60 = vadd.f32 %v565_v56, %v564_v57 }
  0xb4   : > { %941 = vst [vmem:[%s1084_s9 + $0x20] sm:$0xff] %v881_v30  }
  0xb7   : > { %v1094_v32 = vpop.f32.mrf.mxu2  ;;  %v1100_v36 = vpop.f32.mrf.mxu3 }
  0xb8   : > { %v388_v33 = vpop.f32.mrf.mxu0  ;;  %v1096_v34 = vpop.f32.mrf.mxu1  ;;  %v901_v35 = vpack.c.bf16 %v1094_v32, %v1077_v26  ;;  %v921_v37 = vpack.c.bf16 %v1100_v36, %v1090_v31 }
  0xb9   : > { %v566_v58 = vmul.f32 %v388_v33, %v388_v33  ;;  %v528_v62 = vadd.f32 %v527_v59, %v388_v33 }
  0xba   : > { %945 = vst [vmem:[%s1084_s9 + $0x40] sm:$0xff] %v901_v35  }
  0xbb   : > { %949 = vst [vmem:[%s1084_s9 + $0x60] sm:$0xff] %v921_v37   ;;  %v597_v0 = vadd.f32 %v596_v60, %v566_v58 }
  0xbf   : > { %v1106_v38 = vpop.f32.mrf.mxu2  ;;  %v1112_v43 = vpop.f32.mrf.mxu3 }
  0xc0   : > { %v390_v39 = vpop.f32.mrf.mxu0  ;;  %v1108_v40 = vpop.f32.mrf.mxu1 }
  0xc1   : > { %v866_v41 = vpack.c.bf16 %v390_v39, %v388_v33  ;;  %v886_v42 = vpack.c.bf16 %v1108_v40, %v1096_v34  ;;  %v567_v61 = vmul.f32 %v390_v39, %v390_v39  ;;  %v529_v5 = vadd.f32 %v528_v62, %v390_v39 }
  0xc2   : > { %v573_v33 = vmul.f32 %v1086_v28, %v1086_v28  ;;  %v574_v39 = vmul.f32 %v1096_v34, %v1096_v34 }
  0xc3   : > { %938 = vst [vmem:[%s1084_s9 + $0x8] sm:$0xff] %v866_v41   ;;  %v598_v7 = vadd.f32 %v597_v0, %v567_v61 }
  0xc4   : > { %942 = vst [vmem:[%s1084_s9 + $0x28] sm:$0xff] %v886_v42  }
  0xc7   : > { %v1116_v44 = vpop.f32.mrf.mxu2  ;;  %v1122_v48 = vpop.f32.mrf.mxu3 }
  0xc8   : > { %v393_v45 = vpop.f32.mrf.mxu0  ;;  %v1118_v46 = vpop.f32.mrf.mxu1  ;;  %v906_v47 = vpack.c.bf16 %v1116_v44, %v1106_v38  ;;  %v926_v49 = vpack.c.bf16 %v1122_v48, %v1112_v43 }
  0xc9   : > { %v568_v1 = vmul.f32 %v393_v45, %v393_v45  ;;  %v530_v10 = vadd.f32 %v529_v5, %v393_v45  ;;  %v581_v5 = vmul.f32 %v1094_v32, %v1094_v32 }
  0xca   : > { %946 = vst [vmem:[%s1084_s9 + $0x48] sm:$0xff] %v906_v47  }
  0xcb   : > { %950 = vst [vmem:[%s1084_s9 + $0x68] sm:$0xff] %v926_v49   ;;  %v599_v11 = vadd.f32 %v598_v7, %v568_v1 }
  0xcf   : > { %v1128_v50 = vpop.f32.mrf.mxu2  ;;  %v1134_v55 = vpop.f32.mrf.mxu3 }
  0xd0   : > { %v395_v51 = vpop.f32.mrf.mxu0  ;;  %v1130_v52 = vpop.f32.mrf.mxu1 }
  0xd1   : > { %v871_v53 = vpack.c.bf16 %v395_v51, %v393_v45  ;;  %v891_v54 = vpack.c.bf16 %v1130_v52, %v1118_v46  ;;  %v569_v8 = vmul.f32 %v395_v51, %v395_v51  ;;  %v531_v13 = vadd.f32 %v530_v10, %v395_v51 }
  0xd2   : > { %v583_v10 = vmul.f32 %v1116_v44, %v1116_v44 }
  0xd3   : > { %939 = vst [vmem:[%s1084_s9 + $0x10] sm:$0xff] %v871_v53   ;;  %v600_v14 = vadd.f32 %v599_v11, %v569_v8 }
  0xd4   : > { %943 = vst [vmem:[%s1084_s9 + $0x30] sm:$0xff] %v891_v54   ;;  %v576_v54 = vmul.f32 %v1118_v46, %v1118_v46 }
  0xd7   : > { %v1138_v63 = vpop.f32.mrf.mxu2  ;;  %v1142_v6 = vpop.f32.mrf.mxu3 }
  0xd8   : > { %v398_v2 = vpop.f32.mrf.mxu0  ;;  %v418_v3 = vpop.f32.mrf.mxu1  ;;  %v911_v4 = vpack.c.bf16 %v1138_v63, %v1128_v50  ;;  %v931_v9 = vpack.c.bf16 %v1142_v6, %v1134_v55 }
  0xd9   : > { %v570_v12 = vmul.f32 %v398_v2, %v398_v2  ;;  %v532_v15 = vadd.f32 %v531_v13, %v398_v2  ;;  %v578_v61 = vmul.f32 %v418_v3, %v418_v3 }
  0xda   : > { %947 = vst [vmem:[%s1084_s9 + $0x50] sm:$0xff] %v911_v4  }
  0xdb   : > { %951 = vst [vmem:[%s1084_s9 + $0x70] sm:$0xff] %v931_v9   ;;  %v601_v17 = vadd.f32 %v600_v14, %v570_v12 }
  0xdf   : > { %v438_v16 = vpop.f32.mrf.mxu2  ;;  %v1148_v24 = vpop.f32.mrf.mxu3 }
  0xe0   : > { %v400_v18 = vpop.f32.mrf.mxu0  ;;  %v420_v19 = vpop.f32.mrf.mxu1 }
  0xe1   : > { %v876_v20 = vpack.c.bf16 %v400_v18, %v398_v2  ;;  %v533_v21 = vadd.f32 %v532_v15, %v400_v18  ;;  %v571_v22 = vmul.f32 %v400_v18, %v400_v18  ;;  %v896_v23 = vpack.c.bf16 %v420_v19, %v418_v3 }
  0xe2   : > { %v579_v1 = vmul.f32 %v420_v19, %v420_v19  ;;  %v580_v2 = vmul.f32 %v1077_v26, %v1077_v26  ;;  %v585_v15 = vmul.f32 %v1138_v63, %v1138_v63 }
  0xe3   : > { %940 = vst [vmem:[%s1084_s9 + $0x18] sm:$0xff] %v876_v20   ;;  %v534_v29 = vadd.f32 %v533_v21, %v1075_v25  ;;  %v602_v30 = vadd.f32 %v601_v17, %v571_v22  ;;  %v575_v25 = vmul.f32 %v1108_v40, %v1108_v40 }
  0xe4   : > { %944 = vst [vmem:[%s1084_s9 + $0x38] sm:$0xff] %v896_v23  }
  0xe5   : > { %v535_v35 = vadd.f32 %v534_v29, %v1086_v28  ;;  %v603_v37 = vadd.f32 %v602_v30, %v572_v27 }
  0xe7   : > { %v536_v41 = vadd.f32 %v535_v35, %v1096_v34  ;;  %v604_v42 = vadd.f32 %v603_v37, %v573_v33  ;;  %v440_v45 = vpop.f32.mrf.mxu2  ;;  %v460_v53 = vpop.f32.mrf.mxu3  ;;  %v577_v34 = vmul.f32 %v1130_v52, %v1130_v52  ;;  %v591_v35 = vmul.f32 %v1122_v48, %v1122_v48 }
  0xe8   : > { %v916_v47 = vpack.c.bf16 %v440_v45, %v438_v16  ;;  %v936_v28 = vpack.c.bf16 %v460_v53, %v1148_v24  ;;  %v587_v22 = vmul.f32 %v440_v45, %v440_v45 }
  0xe9   : > { %v605_v49 = vadd.f32 %v604_v42, %v574_v39  ;;  %v537_v51 = vadd.f32 %v536_v41, %v1108_v40 }
  0xea   : > { %948 = vst [vmem:[%s1084_s9 + $0x58] sm:$0xff] %v916_v47  }
  0xeb   : > { %v538_v56 = vadd.f32 %v537_v51, %v1118_v46  ;;  %v606_v57 = vadd.f32 %v605_v49, %v575_v25  ;;  %952 = vst [vmem:[%s1084_s9 + $0x78] sm:$0xff] %v936_v28   ;;  %v594_v49 = vmul.f32 %v1148_v24, %v1148_v24  ;;  %v595_v28 = vmul.f32 %v460_v53, %v460_v53 }
  0xed   : > { %v539_v58 = vadd.f32 %v538_v56, %v1130_v52  ;;  %v607_v59 = vadd.f32 %v606_v57, %v576_v54  ;;  %v582_v52 = vmul.f32 %v1106_v38, %v1106_v38 }
  0xef   : > { %v540_v60 = vadd.f32 %v539_v58, %v418_v3  ;;  %v608_v40 = vadd.f32 %v607_v59, %v577_v34 }
  0xf1   : > { %v609_v62 = vadd.f32 %v608_v40, %v578_v61  ;;  %v541_v0 = vadd.f32 %v540_v60, %v420_v19  ;;  %v586_v19 = vmul.f32 %v438_v16, %v438_v16 }
  0xf3   : > { %v542_v4 = vadd.f32 %v541_v0, %v1077_v26  ;;  %v610_v46 = vadd.f32 %v609_v62, %v579_v1  ;;  %v584_v26 = vmul.f32 %v1128_v50, %v1128_v50 }
  0xf5   : > { %v543_v7 = vadd.f32 %v542_v4, %v1094_v32  ;;  %v611_v8 = vadd.f32 %v610_v46, %v580_v2 }
  0xf7   : > { %v544_v3 = vadd.f32 %v543_v7, %v1106_v38  ;;  %v612_v9 = vadd.f32 %v611_v8, %v581_v5 }
  0xf9   : > { %v613_v11 = vadd.f32 %v612_v9, %v582_v52  ;;  %v545_v12 = vadd.f32 %v544_v3, %v1116_v44  ;;  %v588_v44 = vmul.f32 %v1090_v31, %v1090_v31 }
  0xfb   : > { %v546_v13 = vadd.f32 %v545_v12, %v1128_v50  ;;  %v614_v14 = vadd.f32 %v613_v11, %v583_v10  ;;  %v589_v50 = vmul.f32 %v1100_v36, %v1100_v36 }
  0xfd   : > { %v547_v32 = vadd.f32 %v546_v13, %v1138_v63  ;;  %v615_v17 = vadd.f32 %v614_v14, %v584_v26  ;;  %v590_v63 = vmul.f32 %v1112_v43, %v1112_v43 }
  0xff   : > { %v616_v38 = vadd.f32 %v615_v17, %v585_v15  ;;  %v548_v18 = vadd.f32 %v547_v32, %v438_v16 }
 0x101   : > { %v617_v20 = vadd.f32 %v616_v38, %v586_v19  ;;  %v549_v21 = vadd.f32 %v548_v18, %v440_v45  ;;  %v593_v45 = vmul.f32 %v1142_v6, %v1142_v6 }
 0x103   : > { %v550_v23 = vadd.f32 %v549_v21, %v1090_v31  ;;  %v618_v27 = vadd.f32 %v617_v20, %v587_v22  ;;  %v592_v31 = vmul.f32 %v1134_v55, %v1134_v55 }
 0x105   : > { %v551_v29 = vadd.f32 %v550_v23, %v1100_v36  ;;  %v619_v30 = vadd.f32 %v618_v27, %v588_v44 }
 0x107   : > { %v552_v16 = vadd.f32 %v551_v29, %v1112_v43  ;;  %v620_v33 = vadd.f32 %v619_v30, %v589_v50 }
 0x109   : > { %v621_v37 = vadd.f32 %v620_v33, %v590_v63  ;;  %v553_v39 = vadd.f32 %v552_v16, %v1122_v48 }
 0x10b   : > { %v554_v41 = vadd.f32 %v553_v39, %v1134_v55  ;;  %v622_v42 = vadd.f32 %v621_v37, %v591_v35 }
 0x10d   : > { %v555_v36 = vadd.f32 %v554_v41, %v1142_v6  ;;  %v623_v47 = vadd.f32 %v622_v42, %v592_v31 }
 0x10f   : > { %v624_v43 = vadd.f32 %v623_v47, %v593_v45  ;;  %v556_v25 = vadd.f32 %v555_v36, %v1148_v24 }
 0x111   : > { %v625_v48 = vadd.f32 %v624_v43, %v594_v49  ;;  %v557_v51 = vadd.f32 %v556_v25, %v460_v53 }
 0x113   : > { %v558_v54 = vrot.slane %v557_v51, 4  ;;  %v626_v56 = vadd.f32 %v625_v48, %v595_v28 }
 0x115   : > { %v559_v55 = vadd.f32 %v558_v54, %v557_v51  ;;  %v627_v57 = vrot.slane %v626_v56, 4 }
 0x117   : > { %v560_v34 = vrot.slane %v559_v55, 2  ;;  %v628_v58 = vadd.f32 %v627_v57, %v626_v56 }
 0x119   : > { %v561_v59 = vadd.f32 %v560_v34, %v559_v55  ;;  %v629_v60 = vrot.slane %v628_v58, 2 }
 0x11b   : > { %v562_v6 = vrot.slane %v561_v59, 1  ;;  %v630_v61 = vadd.f32 %v629_v60, %v628_v58 }
 0x11d   : > { %v631_v40 = vrot.slane %v630_v61, 1  ;;  %v563_v62 = vadd.f32 %v562_v6, %v561_v59 }
 0x11f   : > { %v632_v0 = vadd.f32 %v631_v40, %v630_v61 }
 0x121   : > { %v634_v24 = vsel %vm633_vm0, %v563_v62, %v632_v0 }
 0x122   : > { %v636_v53 = vsel %vm635_vm1, %v634_v24, 0.0 }
 0x123   : > { %637 = vst [vmem:[%s181_s15] sm:$0xff] %v636_v53 }
 0x124 PF: > { %s14_s12 = sadd.s32 1, %s991_s12  }
 0x125   : > { %p11_p4 = scmp.ge.s32.totalorder %s14_s12, 4  }
 0x127   :  { %13 = sbr.rel (!%p11_p4) target bundleno = 1 (0x1), region = 70 }

// kernel: bottleneck_forward.7
= control target key start
LH: loop header
LB: loop body
LE: loop exit
PB: predicated region body
PF: predicated region fallthrough
CT: control target
= control target key end

     0   :  { %s798_s15 = smov 0   ;;  %s966_s0 = inlined_call_operand.vmem [shape: bf16[2,256,128], index: 0, kind: input, shape index: {}]   ;;  %s967_s1 = inlined_call_operand.vmem [shape: f32[1,128], index: 1, kind: input, shape index: {}]   ;;  %s968_s2 = inlined_call_operand.vmem [shape: f32[1,128], index: 2, kind: input, shape index: {}]   ;;  %s969_s3 = inlined_call_operand.vmem [shape: bf16[2,256,128], index: 3, kind: input, shape index: {}]   ;;  %s970_s4 = inlined_call_operand.vmem [shape: f32[2,256,128], index: 4, kind: output, shape index: {}]  }
   0x1 LB: > { %s581_s16 = sadd.s32 4294967295, %s771_s15   ;;  %p585_p0 = scmp.ge.s32.totalorder %s771_s15, 1  ;;  %s771_s15 = sphi %s798_s15, %s14_s15  }
   0x2   : > { %p172_p1 = scmp.lt.s32.totalorder %s771_s15, 3 }
   0x4   : > { %p173_p2 = pnand %p585_p0, %p172_p1 }
   0x5   : > { %p203_p3 = scmp.lt.s32.totalorder (!%p173_p2), %s581_s16, 1 }
   0x6   : > { %176 = sbr.rel (%p173_p2) target bundleno = 69 (0x45), region = 36 }
   0xb   : > { %s972_s16 = smov (!%p203_p3, %s581_s16), 1  ;;  %v822_v0 = vld [vmem:[%s967_s1] ss:$0 sm:$0xff] }
   0xc   : > { %s594_s17 = sshll.u32 %s972_s16, 7  ;;  %v827_v1 = vld [vmem:[%s968_s2] ss:$0 sm:$0xff]  ;;  %s596_s28 = sshll.u32 %s972_s16, 8 }
   0xd   : > { %s812_s20 = scalar_lea.vmem %s966_s0, %s594_s17  ;;  %s817_s23 = scalar_lea.vmem %s969_s3, %s594_s17 }
   0xe   : > { %v598_v2 = vld [vmem:[%s812_s20] sm:$0xff]   ;;  %v725_v4 = vld [vmem:[%s812_s20 + $0x8] sm:$0xff]   ;;  %v726_v10 = vld [vmem:[%s812_s20 + $0x10] sm:$0xff]   ;;  %s853_s5 = scalar_lea.vmem %s970_s4, %s596_s28 }
   0xf   : > { %v662_v3 = vld [vmem:[%s817_s23] sm:$0xff]   ;;  %v599_v5 = vunpack.c.l.bf16 %v598_v2  ;;  %v600_v7 = vunpack.c.h.bf16 %v598_v2  ;;  %v740_v9 = vld [vmem:[%s817_s23 + $0x8] sm:$0xff]   ;;  %v741_v11 = vld [vmem:[%s817_s23 + $0x10] sm:$0xff]   ;;  %v603_v12 = vunpack.c.l.bf16 %v725_v4  ;;  %v604_v14 = vunpack.c.h.bf16 %v725_v4 }
  0x10   : > { %v663_v6 = vunpack.c.l.bf16 %v662_v3  ;;  %v664_v8 = vunpack.c.h.bf16 %v662_v3  ;;  %v667_v13 = vunpack.c.l.bf16 %v740_v9  ;;  %v668_v15 = vunpack.c.h.bf16 %v740_v9  ;;  %v727_v16 = vld [vmem:[%s812_s20 + $0x18] sm:$0xff]   ;;  %v728_v42 = vld [vmem:[%s812_s20 + $0x20] sm:$0xff]   ;;  %v729_v52 = vld [vmem:[%s812_s20 + $0x28] sm:$0xff]  }
  0x11   : > { %v286_v17 = vmul.f32 %v822_v0, %v599_v5  ;;  %v287_v18 = vmul.f32 %v822_v0, %v600_v7  ;;  %v607_v19 = vunpack.c.l.bf16 %v726_v10  ;;  %v671_v20 = vunpack.c.l.bf16 %v741_v11  ;;  %v742_v21 = vld [vmem:[%s817_s23 + $0x18] sm:$0xff]   ;;  %v743_v47 = vld [vmem:[%s817_s23 + $0x20] sm:$0xff]   ;;  %v744_v57 = vld [vmem:[%s817_s23 + $0x28] sm:$0xff]  }
  0x12   : > { %v288_v22 = vmul.f32 %v822_v0, %v603_v12  ;;  %v289_v23 = vmul.f32 %v822_v0, %v604_v14  ;;  %v608_v24 = vunpack.c.h.bf16 %v726_v10  ;;  %v672_v25 = vunpack.c.h.bf16 %v741_v11  ;;  %v730_v62 = vld [vmem:[%s812_s20 + $0x30] sm:$0xff]   ;;  %v731_v14 = vld [vmem:[%s812_s20 + $0x38] sm:$0xff]  }
  0x13   : > { %v322_v26 = vadd.f32 %v827_v1, %v286_v17  ;;  %v323_v27 = vadd.f32 %v827_v1, %v287_v18  ;;  %v290_v28 = vmul.f32 %v822_v0, %v607_v19  ;;  %v611_v29 = vunpack.c.l.bf16 %v727_v16  ;;  %v745_v5 = vld [vmem:[%s817_s23 + $0x30] sm:$0xff]  }
  0x14   : > { %v324_v30 = vadd.f32 %v827_v1, %v288_v22  ;;  %v325_v31 = vadd.f32 %v827_v1, %v289_v23  ;;  %v291_v32 = vmul.f32 %v822_v0, %v608_v24  ;;  %v675_v33 = vunpack.c.l.bf16 %v742_v21  ;;  %v746_v23 = vld [vmem:[%s817_s23 + $0x38] sm:$0xff]  }
  0x15   : > { %v418_v34 = vadd.f32 %v663_v6, %v322_v26  ;;  %v419_v35 = vadd.f32 %v664_v8, %v323_v27  ;;  %v326_v36 = vadd.f32 %v827_v1, %v290_v28  ;;  %v292_v37 = vmul.f32 %v822_v0, %v611_v29 }
  0x16   : > { %v420_v38 = vadd.f32 %v667_v13, %v324_v30  ;;  %v421_v39 = vadd.f32 %v668_v15, %v325_v31  ;;  %v327_v40 = vadd.f32 %v827_v1, %v291_v32  ;;  %v612_v41 = vunpack.c.h.bf16 %v727_v16  ;;  %v732_v32 = vld [vmem:[%s812_s20 + $0x40] sm:$0xff]  }
  0x17   : > { %v450_v43 = vmax.f32 %v418_v34, 0.0  ;;  %v451_v44 = vmax.f32 %v419_v35, 0.0  ;;  %v422_v45 = vadd.f32 %v671_v20, %v326_v36  ;;  %v328_v46 = vadd.f32 %v827_v1, %v292_v37  ;;  %v747_v37 = vld [vmem:[%s817_s23 + $0x40] sm:$0xff]  }
  0x18   : > { %v452_v48 = vmax.f32 %v420_v38, 0.0  ;;  %v453_v49 = vmax.f32 %v421_v39, 0.0  ;;  %v423_v50 = vadd.f32 %v672_v25, %v327_v40  ;;  %v293_v51 = vmul.f32 %v822_v0, %v612_v41 }
  0x19   : > { %482 = vst [vmem:[%s853_s5] sm:$0xff] %v450_v43  ;;  %v454_v53 = vmax.f32 %v422_v45, 0.0  ;;  %v424_v54 = vadd.f32 %v675_v33, %v328_v46  ;;  %v676_v55 = vunpack.c.h.bf16 %v742_v21  ;;  %v615_v56 = vunpack.c.l.bf16 %v728_v42  ;;  %v733_v46 = vld [vmem:[%s812_s20 + $0x48] sm:$0xff]  }
  0x1a   : > { %483 = vst [vmem:[%s853_s5 + $0x8] sm:$0xff] %v451_v44  ;;  %v455_v58 = vmax.f32 %v423_v50, 0.0  ;;  %v329_v59 = vadd.f32 %v827_v1, %v293_v51  ;;  %v679_v60 = vunpack.c.l.bf16 %v743_v47  ;;  %v616_v61 = vunpack.c.h.bf16 %v728_v42 }
  0x1b   : > { %484 = vst [vmem:[%s853_s5 + $0x10] sm:$0xff] %v452_v48  ;;  %v456_v63 = vmax.f32 %v424_v54, 0.0  ;;  %v294_v2 = vmul.f32 %v822_v0, %v615_v56  ;;  %v680_v3 = vunpack.c.h.bf16 %v743_v47  ;;  %v619_v4 = vunpack.c.l.bf16 %v729_v52  ;;  %v748_v47 = vld [vmem:[%s817_s23 + $0x48] sm:$0xff]   ;;  %v734_v56 = vld [vmem:[%s812_s20 + $0x50] sm:$0xff]  }
  0x1c   : > { %485 = vst [vmem:[%s853_s5 + $0x18] sm:$0xff] %v453_v49  ;;  %v425_v6 = vadd.f32 %v676_v55, %v329_v59  ;;  %v295_v7 = vmul.f32 %v822_v0, %v616_v61  ;;  %v683_v8 = vunpack.c.l.bf16 %v744_v57  ;;  %v620_v9 = vunpack.c.h.bf16 %v729_v52  ;;  %v749_v61 = vld [vmem:[%s817_s23 + $0x50] sm:$0xff]  }
  0x1d   : > { %486 = vst [vmem:[%s853_s5 + $0x20] sm:$0xff] %v454_v53  ;;  %v330_v10 = vadd.f32 %v827_v1, %v294_v2  ;;  %v296_v11 = vmul.f32 %v822_v0, %v619_v4  ;;  %v684_v12 = vunpack.c.h.bf16 %v744_v57  ;;  %v623_v13 = vunpack.c.l.bf16 %v730_v62 }
  0x1e   : > { %487 = vst [vmem:[%s853_s5 + $0x28] sm:$0xff] %v455_v58  ;;  %v457_v15 = vmax.f32 %v425_v6, 0.0  ;;  %v331_v16 = vadd.f32 %v827_v1, %v295_v7  ;;  %v297_v17 = vmul.f32 %v822_v0, %v620_v9  ;;  %v687_v18 = vunpack.c.l.bf16 %v745_v5 }
  0x1f   : > { %488 = vst [vmem:[%s853_s5 + $0x30] sm:$0xff] %v456_v63  ;;  %v426_v19 = vadd.f32 %v679_v60, %v330_v10  ;;  %v332_v20 = vadd.f32 %v827_v1, %v296_v11  ;;  %v298_v21 = vmul.f32 %v822_v0, %v623_v13  ;;  %v624_v22 = vunpack.c.h.bf16 %v730_v62 }
  0x20   : > { %489 = vst [vmem:[%s853_s5 + $0x38] sm:$0xff] %v457_v15  ;;  %v427_v24 = vadd.f32 %v680_v3, %v331_v16  ;;  %v333_v25 = vadd.f32 %v827_v1, %v297_v17  ;;  %v688_v26 = vunpack.c.h.bf16 %v745_v5  ;;  %v627_v27 = vunpack.c.l.bf16 %v731_v14  ;;  %v750_v17 = vld [vmem:[%s817_s23 + $0x58] sm:$0xff]  }
  0x21   : > { %v458_v28 = vmax.f32 %v426_v19, 0.0  ;;  %v428_v29 = vadd.f32 %v683_v8, %v332_v20  ;;  %v334_v30 = vadd.f32 %v827_v1, %v298_v21  ;;  %v299_v31 = vmul.f32 %v822_v0, %v624_v22 }
  0x22   : > { %v459_v33 = vmax.f32 %v427_v24, 0.0  ;;  %v429_v34 = vadd.f32 %v684_v12, %v333_v25  ;;  %v300_v35 = vmul.f32 %v822_v0, %v627_v27  ;;  %v691_v36 = vunpack.c.l.bf16 %v746_v23  ;;  %v735_v12 = vld [vmem:[%s812_s20 + $0x58] sm:$0xff]  }
  0x23   : > { %490 = vst [vmem:[%s853_s5 + $0x40] sm:$0xff] %v458_v28  ;;  %v460_v38 = vmax.f32 %v428_v29, 0.0  ;;  %v430_v39 = vadd.f32 %v687_v18, %v334_v30  ;;  %v335_v40 = vadd.f32 %v827_v1, %v299_v31  ;;  %v628_v41 = vunpack.c.h.bf16 %v731_v14  ;;  %v751_v31 = vld [vmem:[%s817_s23 + $0x60] sm:$0xff]  }
  0x24   : > { %491 = vst [vmem:[%s853_s5 + $0x48] sm:$0xff] %v459_v33  ;;  %v461_v42 = vmax.f32 %v429_v34, 0.0  ;;  %v336_v43 = vadd.f32 %v827_v1, %v300_v35  ;;  %v692_v44 = vunpack.c.h.bf16 %v746_v23  ;;  %v631_v45 = vunpack.c.l.bf16 %v732_v32 }
  0x25   : > { %492 = vst [vmem:[%s853_s5 + $0x50] sm:$0xff] %v460_v38  ;;  %v462_v48 = vmax.f32 %v430_v39, 0.0  ;;  %v431_v49 = vadd.f32 %v688_v26, %v335_v40  ;;  %v301_v50 = vmul.f32 %v822_v0, %v628_v41  ;;  %v695_v51 = vunpack.c.l.bf16 %v747_v37  ;;  %v736_v26 = vld [vmem:[%s812_s20 + $0x60] sm:$0xff]   ;;  %v737_v40 = vld [vmem:[%s812_s20 + $0x68] sm:$0xff]  }
  0x26   : > { %493 = vst [vmem:[%s853_s5 + $0x58] sm:$0xff] %v461_v42  ;;  %v432_v52 = vadd.f32 %v691_v36, %v336_v43  ;;  %v302_v53 = vmul.f32 %v822_v0, %v631_v45  ;;  %v632_v54 = vunpack.c.h.bf16 %v732_v32  ;;  %v696_v55 = vunpack.c.h.bf16 %v747_v37  ;;  %v752_v41 = vld [vmem:[%s817_s23 + $0x68] sm:$0xff]  }
  0x27   : > { %494 = vst [vmem:[%s853_s5 + $0x60] sm:$0xff] %v462_v48  ;;  %v463_v57 = vmax.f32 %v431_v49, 0.0  ;;  %v337_v58 = vadd.f32 %v827_v1, %v301_v50  ;;  %v635_v59 = vunpack.c.l.bf16 %v733_v46  ;;  %v699_v60 = vunpack.c.l.bf16 %v748_v47  ;;  %v738_v50 = vld [vmem:[%s812_s20 + $0x70] sm:$0xff]  }
  0x28   : > { %v464_v62 = vmax.f32 %v432_v52, 0.0  ;;  %v338_v63 = vadd.f32 %v827_v1, %v302_v53  ;;  %v303_v2 = vmul.f32 %v822_v0, %v632_v54  ;;  %v636_v3 = vunpack.c.h.bf16 %v733_v46 }
  0x29   : > { %495 = vst [vmem:[%s853_s5 + $0x68] sm:$0xff] %v463_v57  ;;  %v433_v4 = vadd.f32 %v692_v44, %v337_v58  ;;  %v304_v5 = vmul.f32 %v822_v0, %v635_v59  ;;  %v700_v6 = vunpack.c.h.bf16 %v748_v47  ;;  %v639_v7 = vunpack.c.l.bf16 %v734_v56  ;;  %v753_v59 = vld [vmem:[%s817_s23 + $0x70] sm:$0xff]  }
  0x2a   : > { %496 = vst [vmem:[%s853_s5 + $0x70] sm:$0xff] %v464_v62  ;;  %v434_v8 = vadd.f32 %v695_v51, %v338_v63  ;;  %v339_v9 = vadd.f32 %v827_v1, %v303_v2  ;;  %v305_v10 = vmul.f32 %v822_v0, %v636_v3  ;;  %v703_v11 = vunpack.c.l.bf16 %v749_v61 }
  0x2b   : > { %v465_v13 = vmax.f32 %v433_v4, 0.0  ;;  %v340_v14 = vadd.f32 %v827_v1, %v304_v5  ;;  %v306_v15 = vmul.f32 %v822_v0, %v639_v7  ;;  %v640_v16 = vunpack.c.h.bf16 %v734_v56 }
  0x2c   : > { %v466_v18 = vmax.f32 %v434_v8, 0.0  ;;  %v435_v19 = vadd.f32 %v696_v55, %v339_v9  ;;  %v341_v20 = vadd.f32 %v827_v1, %v305_v10  ;;  %v704_v21 = vunpack.c.h.bf16 %v749_v61 }
  0x2d   : > { %497 = vst [vmem:[%s853_s5 + $0x78] sm:$0xff] %v465_v13  ;;  %v436_v22 = vadd.f32 %v699_v60, %v340_v14  ;;  %v342_v23 = vadd.f32 %v827_v1, %v306_v15  ;;  %v307_v24 = vmul.f32 %v822_v0, %v640_v16  ;;  %v643_v25 = vunpack.c.l.bf16 %v735_v12 }
  0x2e   : > { %498 = vst [vmem:[%s853_s5 + $0x80] sm:$0xff] %v466_v18  ;;  %v467_v27 = vmax.f32 %v435_v19, 0.0  ;;  %v437_v28 = vadd.f32 %v700_v6, %v341_v20  ;;  %v707_v29 = vunpack.c.l.bf16 %v750_v17  ;;  %v644_v30 = vunpack.c.h.bf16 %v735_v12  ;;  %v739_v6 = vld [vmem:[%s812_s20 + $0x78] sm:$0xff]  }
  0x2f   : > { %v468_v32 = vmax.f32 %v436_v22, 0.0  ;;  %v438_v33 = vadd.f32 %v703_v11, %v342_v23  ;;  %v343_v34 = vadd.f32 %v827_v1, %v307_v24  ;;  %v308_v35 = vmul.f32 %v822_v0, %v643_v25  ;;  %v754_v11 = vld [vmem:[%s817_s23 + $0x78] sm:$0xff]  }
  0x30   : > { %499 = vst [vmem:[%s853_s5 + $0x88] sm:$0xff] %v467_v27  ;;  %v469_v36 = vmax.f32 %v437_v28, 0.0  ;;  %v309_v37 = vmul.f32 %v822_v0, %v644_v30  ;;  %v708_v38 = vunpack.c.h.bf16 %v750_v17  ;;  %v647_v39 = vunpack.c.l.bf16 %v736_v26 }
  0x31   : > { %500 = vst [vmem:[%s853_s5 + $0x90] sm:$0xff] %v468_v32  ;;  %v470_v42 = vmax.f32 %v438_v33, 0.0  ;;  %v439_v43 = vadd.f32 %v704_v21, %v343_v34  ;;  %v344_v44 = vadd.f32 %v827_v1, %v308_v35  ;;  %v711_v45 = vunpack.c.l.bf16 %v751_v31 }
  0x32   : > { %501 = vst [vmem:[%s853_s5 + $0x98] sm:$0xff] %v469_v36  ;;  %v345_v46 = vadd.f32 %v827_v1, %v309_v37  ;;  %v310_v47 = vmul.f32 %v822_v0, %v647_v39  ;;  %v648_v48 = vunpack.c.h.bf16 %v736_v26  ;;  %v712_v49 = vunpack.c.h.bf16 %v751_v31 }
  0x33   : > { %502 = vst [vmem:[%s853_s5 + $0xa0] sm:$0xff] %v470_v42  ;;  %v471_v51 = vmax.f32 %v439_v43, 0.0  ;;  %v440_v52 = vadd.f32 %v707_v29, %v344_v44  ;;  %v651_v53 = vunpack.c.l.bf16 %v737_v40  ;;  %v715_v54 = vunpack.c.l.bf16 %v752_v41 }
  0x34   : > { %v441_v55 = vadd.f32 %v708_v38, %v345_v46  ;;  %v346_v56 = vadd.f32 %v827_v1, %v310_v47  ;;  %v311_v57 = vmul.f32 %v822_v0, %v648_v48  ;;  %v652_v58 = vunpack.c.h.bf16 %v737_v40 }
  0x35   : > { %503 = vst [vmem:[%s853_s5 + $0xa8] sm:$0xff] %v471_v51  ;;  %v472_v60 = vmax.f32 %v440_v52, 0.0  ;;  %v312_v61 = vmul.f32 %v822_v0, %v651_v53  ;;  %v716_v62 = vunpack.c.h.bf16 %v752_v41  ;;  %v655_v63 = vunpack.c.l.bf16 %v738_v50 }
  0x36   : > { %v473_v2 = vmax.f32 %v441_v55, 0.0  ;;  %v442_v3 = vadd.f32 %v711_v45, %v346_v56  ;;  %v347_v4 = vadd.f32 %v827_v1, %v311_v57  ;;  %v313_v5 = vmul.f32 %v822_v0, %v652_v58 }
  0x37   : > { %504 = vst [vmem:[%s853_s5 + $0xb0] sm:$0xff] %v472_v60  ;;  %v348_v7 = vadd.f32 %v827_v1, %v312_v61  ;;  %v314_v8 = vmul.f32 %v822_v0, %v655_v63  ;;  %v719_v9 = vunpack.c.l.bf16 %v753_v59  ;;  %v656_v10 = vunpack.c.h.bf16 %v738_v50 }
  0x38   : > { %505 = vst [vmem:[%s853_s5 + $0xb8] sm:$0xff] %v473_v2  ;;  %v474_v12 = vmax.f32 %v442_v3, 0.0  ;;  %v443_v13 = vadd.f32 %v712_v49, %v347_v4  ;;  %v349_v14 = vadd.f32 %v827_v1, %v313_v5  ;;  %v720_v15 = vunpack.c.h.bf16 %v753_v59 }
  0x39   : > { %v444_v16 = vadd.f32 %v715_v54, %v348_v7  ;;  %v350_v17 = vadd.f32 %v827_v1, %v314_v8  ;;  %v315_v18 = vmul.f32 %v822_v0, %v656_v10  ;;  %v659_v19 = vunpack.c.l.bf16 %v739_v6 }
  0x3a   : > { %506 = vst [vmem:[%s853_s5 + $0xc0] sm:$0xff] %v474_v12  ;;  %v475_v20 = vmax.f32 %v443_v13, 0.0  ;;  %v445_v21 = vadd.f32 %v716_v62, %v349_v14  ;;  %v723_v22 = vunpack.c.l.bf16 %v754_v11  ;;  %v660_v23 = vunpack.c.h.bf16 %v739_v6 }
  0x3b   : > { %v476_v24 = vmax.f32 %v444_v16, 0.0  ;;  %v446_v25 = vadd.f32 %v719_v9, %v350_v17  ;;  %v351_v26 = vadd.f32 %v827_v1, %v315_v18  ;;  %v316_v27 = vmul.f32 %v822_v0, %v659_v19 }
  0x3c   : > { %507 = vst [vmem:[%s853_s5 + $0xc8] sm:$0xff] %v475_v20  ;;  %v477_v28 = vmax.f32 %v445_v21, 0.0  ;;  %v317_v29 = vmul.f32 %v822_v0, %v660_v23  ;;  %v724_v30 = vunpack.c.h.bf16 %v754_v11 }
  0x3d   : > { %508 = vst [vmem:[%s853_s5 + $0xd0] sm:$0xff] %v476_v24  ;;  %v478_v31 = vmax.f32 %v446_v25, 0.0  ;;  %v447_v32 = vadd.f32 %v720_v15, %v351_v26  ;;  %v352_v33 = vadd.f32 %v827_v1, %v316_v27 }
  0x3e   : > { %509 = vst [vmem:[%s853_s5 + $0xd8] sm:$0xff] %v477_v28  ;;  %v353_v34 = vadd.f32 %v827_v1, %v317_v29 }
  0x3f   : > { %510 = vst [vmem:[%s853_s5 + $0xe0] sm:$0xff] %v478_v31  ;;  %v479_v35 = vmax.f32 %v447_v32, 0.0  ;;  %v448_v36 = vadd.f32 %v723_v22, %v352_v33 }
  0x40   : > { %v449_v37 = vadd.f32 %v724_v30, %v353_v34 }
  0x41   : > { %511 = vst [vmem:[%s853_s5 + $0xe8] sm:$0xff] %v479_v35  ;;  %v480_v38 = vmax.f32 %v448_v36, 0.0 }
  0x42   : > { %v481_v39 = vmax.f32 %v449_v37, 0.0 }
  0x43   : > { %512 = vst [vmem:[%s853_s5 + $0xf0] sm:$0xff] %v480_v38 }
  0x44   : > { %513 = vst [vmem:[%s853_s5 + $0xf8] sm:$0xff] %v481_v39 }
  0x45 PF: > { %s14_s15 = sadd.s32 1, %s771_s15  }
  0x46   : > { %p11_p4 = scmp.ge.s32.totalorder %s14_s15, 4  }
  0x48   :  { %13 = sbr.rel (!%p11_p4) target bundleno = 1 (0x1), region = 69 }

// kernel: bottleneck_forward.6
= control target key start
LH: loop header
LB: loop body
LE: loop exit
PB: predicated region body
PF: predicated region fallthrough
CT: control target
= control target key end

     0   :  { %s1134_s18 = smov 0   ;;  %s1410_s0 = inlined_call_operand.vmem [shape: bf16[2,256,128], index: 0, kind: input, shape index: {}]   ;;  %s1411_s1 = inlined_call_operand.vmem [shape: f32[1,128], index: 1, kind: input, shape index: {}]   ;;  %s1412_s2 = inlined_call_operand.vmem [shape: f32[1,128], index: 2, kind: input, shape index: {}]   ;;  %s1413_s3 = inlined_call_operand.vmem [shape: bf16[128,128], index: 3, kind: input, shape index: {}]   ;;  %s1414_s4 = inlined_call_operand.vmem [shape: bf16[2,256,128], index: 4, kind: output, shape index: {0}]   ;;  %s1415_s5 = inlined_call_operand.vmem [shape: f32[16,128], index: 5, kind: output, shape index: {1}]  }
   0x1 LB: > { %s834_s19 = sadd.s32 4294967295, %s1102_s18   ;;  %p838_p0 = scmp.ge.s32.totalorder %s1102_s18, 1  ;;  %s1102_s18 = sphi %s1134_s18, %s16_s18  }
   0x2   : > { %p190_p1 = scmp.lt.s32.totalorder %s1102_s18, 3 }
   0x4   : > { %p191_p2 = pnand %p838_p0, %p190_p1 }
   0x5   : > { %p222_p3 = scmp.lt.s32.totalorder (!%p191_p2), %s834_s19, 1 }
   0x6   : > { %194 = sbr.rel (%p191_p2) target bundleno = 292 (0x124), region = 36 }
   0xb   : > { %v887_v0 = vld [vmem:[%s1413_s3 + $0x38] sm:$0xff]  ;;  %v886_v1 = vld [vmem:[%s1413_s3 + $0x30] sm:$0xff]  ;;  %s1417_s19 = smov (!%p222_p3, %s834_s19), 1  ;;  %v885_v2 = vld [vmem:[%s1413_s3 + $0x28] sm:$0xff]  ;;  %vm743_vm0 = vcmask 1040384   ;;  %vm745_vm1 = vcmask 1041408  }
   0xc   : > { %484 = vmatpush.bf16.msra.mxu0 %v887_v0  ;;  %1062 = vmatpush.bf16.msra.mxu1 %v887_v0  ;;  %s878_s24 = sshll.u32 %s1417_s19, 7  ;;  %v884_v4 = vld [vmem:[%s1413_s3 + $0x20] sm:$0xff]  ;;  %v883_v12 = vld [vmem:[%s1413_s3 + $0x18] sm:$0xff]  ;;  %v882_v20 = vld [vmem:[%s1413_s3 + $0x10] sm:$0xff] }
   0xd   : > { %1063 = vmatpush.bf16.msra.mxu2 %v887_v0  ;;  %1064 = vmatpush.bf16.msra.mxu3 %v887_v0  ;;  %s1159_s29 = scalar_lea.vmem %s1410_s0, %s878_s24  ;;  %v1170_v9 = vld [vmem:[%s1411_s1] ss:$0 sm:$0xff]  ;;  %v881_v27 = vld [vmem:[%s1413_s3 + $0x8] sm:$0xff]  ;;  %s1275_s23 = scalar_lea.vmem %s1414_s4, %s878_s24 }
   0xe   : > { %v889_v3 = vld [vmem:[%s1159_s29] sm:$0xff]   ;;  %v1032_v35 = vld [vmem:[%s1159_s29 + $0x8] sm:$0xff]   ;;  %s843_s24 = sshll.u32 %s1417_s19, 3 }
   0xf   : > { %v1035_v5 = vld [vmem:[%s1159_s29 + $0x20] sm:$0xff]   ;;  %v890_v7 = vunpack.c.l.bf16 %v889_v3  ;;  %v891_v8 = vunpack.c.h.bf16 %v889_v3  ;;  %v1036_v36 = vld [vmem:[%s1159_s29 + $0x28] sm:$0xff]   ;;  %v894_v45 = vunpack.c.l.bf16 %v1032_v35  ;;  %v895_v46 = vunpack.c.h.bf16 %v1032_v35  ;;  %s235_s27 = scalar_lea.vmem %s1415_s5, %s843_s24 }
  0x10   : > { %485 = vmatpush.bf16.msra.mxu0 %v886_v1  ;;  %1065 = vmatpush.bf16.msra.mxu1 %v886_v1  ;;  %v1039_v6 = vld [vmem:[%s1159_s29 + $0x40] sm:$0xff]   ;;  %v906_v10 = vunpack.c.l.bf16 %v1035_v5  ;;  %v907_v11 = vunpack.c.h.bf16 %v1035_v5  ;;  %v1040_v42 = vld [vmem:[%s1159_s29 + $0x48] sm:$0xff]   ;;  %v910_v47 = vunpack.c.l.bf16 %v1036_v36  ;;  %v911_v48 = vunpack.c.h.bf16 %v1036_v36 }
  0x11   : > { %1066 = vmatpush.bf16.msra.mxu2 %v886_v1  ;;  %1067 = vmatpush.bf16.msra.mxu3 %v886_v1  ;;  %v922_v13 = vunpack.c.l.bf16 %v1039_v6  ;;  %v923_v14 = vunpack.c.h.bf16 %v1039_v6  ;;  %v304_v15 = vmul.f32 %v1170_v9, %v890_v7  ;;  %v305_v16 = vmul.f32 %v1170_v9, %v891_v8  ;;  %v1180_v17 = vld [vmem:[%s1412_s2] ss:$0 sm:$0xff] }
  0x12   : > { %v312_v18 = vmul.f32 %v1170_v9, %v906_v10  ;;  %v313_v19 = vmul.f32 %v1170_v9, %v907_v11  ;;  %v1043_v32 = vld [vmem:[%s1159_s29 + $0x60] sm:$0xff]   ;;  %v926_v54 = vunpack.c.l.bf16 %v1040_v42  ;;  %v927_v55 = vunpack.c.h.bf16 %v1040_v42 }
  0x13   : > { %v320_v21 = vmul.f32 %v1170_v9, %v922_v13  ;;  %v321_v22 = vmul.f32 %v1170_v9, %v923_v14  ;;  %v340_v23 = vadd.f32 %v1180_v17, %v304_v15  ;;  %v341_v24 = vadd.f32 %v1180_v17, %v305_v16  ;;  %v880_v39 = vld [vmem:[%s1413_s3] sm:$0xff]  ;;  %v1033_v13 = vld [vmem:[%s1159_s29 + $0x10] sm:$0xff]  }
  0x14   : > { %486 = vmatpush.bf16.msra.mxu0 %v885_v2  ;;  %1068 = vmatpush.bf16.msra.mxu1 %v885_v2  ;;  %v348_v25 = vadd.f32 %v1180_v17, %v312_v18  ;;  %v349_v26 = vadd.f32 %v1180_v17, %v313_v19  ;;  %v938_v37 = vunpack.c.l.bf16 %v1043_v32  ;;  %v939_v38 = vunpack.c.h.bf16 %v1043_v32  ;;  %v1037_v19 = vld [vmem:[%s1159_s29 + $0x30] sm:$0xff]  }
  0x15   : > { %1069 = vmatpush.bf16.msra.mxu2 %v885_v2  ;;  %1070 = vmatpush.bf16.msra.mxu3 %v885_v2  ;;  %v356_v28 = vadd.f32 %v1180_v17, %v320_v21  ;;  %v357_v29 = vadd.f32 %v1180_v17, %v321_v22  ;;  %v372_v30 = vmax.f32 %v340_v23, 0.0  ;;  %v373_v31 = vmax.f32 %v341_v24, 0.0 }
  0x16   : > { %v380_v33 = vmax.f32 %v348_v25, 0.0  ;;  %v381_v34 = vmax.f32 %v349_v26, 0.0  ;;  %v328_v43 = vmul.f32 %v1170_v9, %v938_v37  ;;  %v329_v44 = vmul.f32 %v1170_v9, %v939_v38 }
  0x17   : > { %v388_v40 = vmax.f32 %v356_v28, 0.0  ;;  %v389_v41 = vmax.f32 %v357_v29, 0.0  ;;  %v404_v49 = vpack.c.bf16 %v373_v31, %v372_v30  ;;  %v306_v58 = vmul.f32 %v1170_v9, %v894_v45 }
  0x18   : > { %487 = vmatpush.bf16.msra.mxu0 %v884_v4  ;;  %1071 = vmatpush.bf16.msra.mxu1 %v884_v4  ;;  %v408_v50 = vpack.c.bf16 %v381_v34, %v380_v33  ;;  %v364_v51 = vadd.f32 %v1180_v17, %v328_v43  ;;  %v365_v52 = vadd.f32 %v1180_v17, %v329_v44  ;;  %v898_v25 = vunpack.c.l.bf16 %v1033_v13  ;;  %v1045_v43 = vld [vmem:[%s1159_s29 + $0x70] sm:$0xff]  }
  0x19   : > { %1072 = vmatpush.bf16.msra.mxu2 %v884_v4  ;;  %1073 = vmatpush.bf16.msra.mxu3 %v884_v4  ;;  %v412_v53 = vpack.c.bf16 %v389_v41, %v388_v40  ;;  %v307_v59 = vmul.f32 %v1170_v9, %v895_v46  ;;  %v314_v60 = vmul.f32 %v1170_v9, %v910_v47  ;;  %v899_v26 = vunpack.c.h.bf16 %v1033_v13 }
  0x1a   : > { %v396_v56 = vmax.f32 %v364_v51, 0.0  ;;  %v397_v57 = vmax.f32 %v365_v52, 0.0  ;;  %v315_v61 = vmul.f32 %v1170_v9, %v911_v48  ;;  %v322_v63 = vmul.f32 %v1170_v9, %v926_v54 }
  0x1b   : > { %v323_v0 = vmul.f32 %v1170_v9, %v927_v55  ;;  %v342_v1 = vadd.f32 %v1180_v17, %v306_v58  ;;  %v343_v2 = vadd.f32 %v1180_v17, %v307_v59  ;;  %v350_v3 = vadd.f32 %v1180_v17, %v314_v60  ;;  %v1034_v60 = vld [vmem:[%s1159_s29 + $0x18] sm:$0xff]  }
  0x1c   : > { %488 = vmatpush.bf16.msra.mxu0 %v883_v12  ;;  %1074 = vmatpush.bf16.msra.mxu1 %v883_v12  ;;  %v416_v62 = vpack.c.bf16 %v397_v57, %v396_v56  ;;  %v351_v4 = vadd.f32 %v1180_v17, %v315_v61  ;;  %v358_v5 = vadd.f32 %v1180_v17, %v322_v63  ;;  %v915_v28 = vunpack.c.h.bf16 %v1037_v19  ;;  %v1038_v63 = vld [vmem:[%s1159_s29 + $0x38] sm:$0xff]  }
  0x1d   : > { %1075 = vmatpush.bf16.msra.mxu2 %v883_v12  ;;  %1076 = vmatpush.bf16.msra.mxu3 %v883_v12  ;;  %v359_v6 = vadd.f32 %v1180_v17, %v323_v0  ;;  %v374_v7 = vmax.f32 %v342_v1, 0.0  ;;  %v375_v8 = vmax.f32 %v343_v2, 0.0  ;;  %v382_v10 = vmax.f32 %v350_v3, 0.0  ;;  %v1044_v12 = vld [vmem:[%s1159_s29 + $0x68] sm:$0xff]   ;;  %v1042_v0 = vld [vmem:[%s1159_s29 + $0x58] sm:$0xff]  }
  0x1e   : > { %v383_v11 = vmax.f32 %v351_v4, 0.0  ;;  %v942_v14 = vunpack.c.l.bf16 %v1044_v12  ;;  %v943_v15 = vunpack.c.h.bf16 %v1044_v12  ;;  %v390_v16 = vmax.f32 %v358_v5, 0.0  ;;  %v1046_v5 = vld [vmem:[%s1159_s29 + $0x78] sm:$0xff]  }
  0x1f   : > { %v391_v18 = vmax.f32 %v359_v6, 0.0  ;;  %v405_v23 = vpack.c.bf16 %v375_v8, %v374_v7  ;;  %v308_v36 = vmul.f32 %v1170_v9, %v898_v25  ;;  %v309_v37 = vmul.f32 %v1170_v9, %v899_v26 }
  0x20   : > { %489 = vmatpush.bf16.msra.mxu0 %v882_v20  ;;  %1077 = vmatpush.bf16.msra.mxu1 %v882_v20  ;;  %v330_v21 = vmul.f32 %v1170_v9, %v942_v14  ;;  %v331_v22 = vmul.f32 %v1170_v9, %v943_v15  ;;  %v409_v24 = vpack.c.bf16 %v383_v11, %v382_v10  ;;  %v946_v44 = vunpack.c.l.bf16 %v1045_v43 }
  0x21   : > { %1078 = vmatpush.bf16.msra.mxu2 %v882_v20  ;;  %1079 = vmatpush.bf16.msra.mxu3 %v882_v20  ;;  %v1041_v20 = vld [vmem:[%s1159_s29 + $0x50] sm:$0xff]   ;;  %v413_v31 = vpack.c.bf16 %v391_v18, %v390_v16  ;;  %v947_v45 = vunpack.c.h.bf16 %v1045_v43  ;;  %v344_v46 = vadd.f32 %v1180_v17, %v308_v36  ;;  %v345_v47 = vadd.f32 %v1180_v17, %v309_v37 }
  0x22   : > { %v366_v29 = vadd.f32 %v1180_v17, %v330_v21  ;;  %v367_v30 = vadd.f32 %v1180_v17, %v331_v22  ;;  %v930_v32 = vunpack.c.l.bf16 %v1041_v20  ;;  %v931_v33 = vunpack.c.h.bf16 %v1041_v20 }
  0x23   : > { %v333_v51 = vmul.f32 %v1170_v9, %v947_v45  ;;  %v376_v56 = vmax.f32 %v344_v46, 0.0  ;;  %v377_v57 = vmax.f32 %v345_v47, 0.0  ;;  %v902_v4 = vunpack.c.l.bf16 %v1034_v60 }
  0x24   : > { %490 = vmatpush.bf16.msra.mxu0 %v881_v27  ;;  %1080 = vmatpush.bf16.msra.mxu1 %v881_v27  ;;  %v398_v34 = vmax.f32 %v366_v29, 0.0  ;;  %v399_v35 = vmax.f32 %v367_v30, 0.0  ;;  %v324_v41 = vmul.f32 %v1170_v9, %v930_v32  ;;  %v325_v42 = vmul.f32 %v1170_v9, %v931_v33 }
  0x25   : > { %1081 = vmatpush.bf16.msra.mxu2 %v881_v27  ;;  %1082 = vmatpush.bf16.msra.mxu3 %v881_v27  ;;  %v914_v27 = vunpack.c.l.bf16 %v1037_v19  ;;  %v369_v55 = vadd.f32 %v1180_v17, %v333_v51  ;;  %v406_v3 = vpack.c.bf16 %v377_v57, %v376_v56  ;;  %v903_v7 = vunpack.c.h.bf16 %v1034_v60 }
  0x26   : > { %v417_v40 = vpack.c.bf16 %v399_v35, %v398_v34  ;;  %v360_v52 = vadd.f32 %v1180_v17, %v324_v41  ;;  %v918_v8 = vunpack.c.l.bf16 %v1038_v63  ;;  %v919_v10 = vunpack.c.h.bf16 %v1038_v63 }
  0x27   : > { %v316_v38 = vmul.f32 %v1170_v9, %v914_v27  ;;  %v401_v2 = vmax.f32 %v369_v55, 0.0  ;;  %v934_v12 = vunpack.c.l.bf16 %v1042_v0  ;;  %v935_v13 = vunpack.c.h.bf16 %v1042_v0 }
  0x28   : > { %491 = vmatpush.bf16.msra.mxu0 %v880_v39  ;;  %1083 = vmatpush.bf16.msra.mxu1 %v880_v39  ;;  %v392_v61 = vmax.f32 %v360_v52, 0.0  ;;  %v950_v15 = vunpack.c.l.bf16 %v1046_v5  ;;  %v951_v16 = vunpack.c.h.bf16 %v1046_v5  ;;  %v310_v18 = vmul.f32 %v1170_v9, %v902_v4 }
  0x29   : > { %1084 = vmatpush.bf16.msra.mxu2 %v880_v39  ;;  %1085 = vmatpush.bf16.msra.mxu3 %v880_v39  ;;  %v317_v39 = vmul.f32 %v1170_v9, %v915_v28  ;;  %v352_v48 = vadd.f32 %v1180_v17, %v316_v38  ;;  %v311_v19 = vmul.f32 %v1170_v9, %v903_v7 }
  0x2a   : > { %v318_v20 = vmul.f32 %v1170_v9, %v918_v8  ;;  %v319_v21 = vmul.f32 %v1170_v9, %v919_v10  ;;  %v326_v22 = vmul.f32 %v1170_v9, %v934_v12  ;;  %v335_v25 = vmul.f32 %v1170_v9, %v951_v16 }
  0x2b   : > { %492 = vmatmul.bf16.vlgmr.msra.gmra.mxu0 %v404_v49  ;;  %512 = vmatmul.bf16.vlgmr.msra.gmra.mxu1 %v408_v50  ;;  %v353_v49 = vadd.f32 %v1180_v17, %v317_v39  ;;  %v332_v50 = vmul.f32 %v1170_v9, %v946_v44  ;;  %v384_v58 = vmax.f32 %v352_v48, 0.0  ;;  %v346_v26 = vadd.f32 %v1180_v17, %v310_v18 }
  0x2c   : > { %532 = vmatmul.bf16.vlgmr.msra.gmra.mxu2 %v412_v53  ;;  %552 = vmatmul.bf16.vlgmr.msra.gmra.mxu3 %v416_v62  ;;  %v361_v53 = vadd.f32 %v1180_v17, %v325_v42  ;;  %v347_v27 = vadd.f32 %v1180_v17, %v311_v19  ;;  %v354_v28 = vadd.f32 %v1180_v17, %v318_v20 }
  0x2d   : > { %v368_v54 = vadd.f32 %v1180_v17, %v332_v50  ;;  %v385_v59 = vmax.f32 %v353_v49, 0.0  ;;  %v355_v29 = vadd.f32 %v1180_v17, %v319_v21  ;;  %v362_v30 = vadd.f32 %v1180_v17, %v326_v22 }
  0x2e   : > { %v393_v62 = vmax.f32 %v361_v53, 0.0  ;;  %v371_v33 = vadd.f32 %v1180_v17, %v335_v25  ;;  %v378_v34 = vmax.f32 %v346_v26, 0.0  ;;  %v379_v35 = vmax.f32 %v347_v27, 0.0 }
  0x2f   : > { %v400_v1 = vmax.f32 %v368_v54, 0.0  ;;  %v410_v6 = vpack.c.bf16 %v385_v59, %v384_v58  ;;  %v386_v36 = vmax.f32 %v354_v28, 0.0  ;;  %v394_v37 = vmax.f32 %v362_v30, 0.0 }
  0x30   : > { %v414_v11 = vpack.c.bf16 %v393_v62, %v392_v61  ;;  %v407_v41 = vpack.c.bf16 %v379_v35, %v378_v34 }
  0x31   : > { %v418_v14 = vpack.c.bf16 %v401_v2, %v400_v1 }
  0x3b   : > { %497 = vmatmul.bf16.gmra.mxu0 %v405_v23  ;;  %517 = vmatmul.bf16.gmra.mxu1 %v409_v24  ;;  %v327_v23 = vmul.f32 %v1170_v9, %v935_v13  ;;  %v334_v24 = vmul.f32 %v1170_v9, %v950_v15  ;;  %v387_v9 = vmax.f32 %v355_v29, 0.0 }
  0x3c   : > { %537 = vmatmul.bf16.gmra.mxu2 %v413_v31  ;;  %557 = vmatmul.bf16.gmra.mxu3 %v417_v40  ;;  %v403_v40 = vmax.f32 %v371_v33, 0.0 }
  0x3d   : > { %v363_v31 = vadd.f32 %v1180_v17, %v327_v23  ;;  %v370_v32 = vadd.f32 %v1180_v17, %v334_v24  ;;  %v411_v42 = vpack.c.bf16 %v387_v9, %v386_v36 }
  0x3f   : > { %v395_v38 = vmax.f32 %v363_v31, 0.0  ;;  %v402_v39 = vmax.f32 %v370_v32, 0.0 }
  0x41   : > { %v415_v43 = vpack.c.bf16 %v395_v38, %v394_v37  ;;  %v419_v44 = vpack.c.bf16 %v403_v40, %v402_v39 }
  0x4b   : > { %502 = vmatmul.bf16.gmra.mxu0 %v406_v3  ;;  %522 = vmatmul.bf16.gmra.mxu1 %v410_v6 }
  0x4c   : > { %542 = vmatmul.bf16.gmra.mxu2 %v414_v11  ;;  %562 = vmatmul.bf16.gmra.mxu3 %v418_v14 }
  0x5b   : > { %507 = vmatmul.bf16.gmra.mxu0 %v407_v41  ;;  %527 = vmatmul.bf16.gmra.mxu1 %v411_v42 }
  0x5c   : > { %547 = vmatmul.bf16.gmra.mxu2 %v415_v43  ;;  %567 = vmatmul.bf16.gmra.mxu3 %v419_v44 }
  0xa8   : > { %v493_v45 = vpop.f32.mrf.mxu0  ;;  %v1266_v46 = vpop.f32.mrf.mxu1 }
  0xa9   : > { %v674_v14 = vmul.f32 %v493_v45, %v493_v45 }
  0xaf   : > { %v1268_v17 = vpop.f32.mrf.mxu2  ;;  %v1281_v51 = vpop.f32.mrf.mxu3 }
  0xb0   : > { %v495_v47 = vpop.f32.mrf.mxu0  ;;  %v1277_v48 = vpop.f32.mrf.mxu1 }
  0xb1   : > { %v955_v49 = vpack.c.bf16 %v495_v47, %v493_v45  ;;  %v975_v50 = vpack.c.bf16 %v1277_v48, %v1266_v46  ;;  %v675_v13 = vmul.f32 %v495_v47, %v495_v47  ;;  %v637_v16 = vadd.f32 %v495_v47, %v493_v45 }
  0xb2   : > { %v682_v47 = vmul.f32 %v1266_v46, %v1266_v46 }
  0xb3   : > { %956 = vst [vmem:[%s1275_s23] sm:$0xff] %v955_v49   ;;  %v706_v18 = vadd.f32 %v675_v13, %v674_v14 }
  0xb4   : > { %1050 = vst [vmem:[%s1275_s23 + $0x20] sm:$0xff] %v975_v50  }
  0xb7   : > { %v1285_v52 = vpop.f32.mrf.mxu2  ;;  %v1291_v56 = vpop.f32.mrf.mxu3 }
  0xb8   : > { %v498_v53 = vpop.f32.mrf.mxu0  ;;  %v1287_v54 = vpop.f32.mrf.mxu1  ;;  %v995_v55 = vpack.c.bf16 %v1285_v52, %v1268_v17  ;;  %v1015_v57 = vpack.c.bf16 %v1291_v56, %v1281_v51 }
  0xb9   : > { %v676_v15 = vmul.f32 %v498_v53, %v498_v53  ;;  %v638_v20 = vadd.f32 %v637_v16, %v498_v53 }
  0xba   : > { %1054 = vst [vmem:[%s1275_s23 + $0x40] sm:$0xff] %v995_v55  }
  0xbb   : > { %1058 = vst [vmem:[%s1275_s23 + $0x60] sm:$0xff] %v1015_v57   ;;  %v707_v22 = vadd.f32 %v706_v18, %v676_v15 }
  0xbf   : > { %v1297_v58 = vpop.f32.mrf.mxu2  ;;  %v1303_v63 = vpop.f32.mrf.mxu3 }
  0xc0   : > { %v500_v59 = vpop.f32.mrf.mxu0  ;;  %v1299_v60 = vpop.f32.mrf.mxu1 }
  0xc1   : > { %v960_v61 = vpack.c.bf16 %v500_v59, %v498_v53  ;;  %v980_v62 = vpack.c.bf16 %v1299_v60, %v1287_v54  ;;  %v677_v19 = vmul.f32 %v500_v59, %v500_v59  ;;  %v639_v27 = vadd.f32 %v638_v20, %v500_v59 }
  0xc2   : > { %v683_v53 = vmul.f32 %v1277_v48, %v1277_v48  ;;  %v684_v59 = vmul.f32 %v1287_v54, %v1287_v54 }
  0xc3   : > { %1047 = vst [vmem:[%s1275_s23 + $0x8] sm:$0xff] %v960_v61   ;;  %v708_v29 = vadd.f32 %v707_v22, %v677_v19 }
  0xc4   : > { %1051 = vst [vmem:[%s1275_s23 + $0x28] sm:$0xff] %v980_v62  }
  0xc7   : > { %v1307_v0 = vpop.f32.mrf.mxu2  ;;  %v1313_v4 = vpop.f32.mrf.mxu3 }
  0xc8   : > { %v503_v1 = vpop.f32.mrf.mxu0  ;;  %v1309_v2 = vpop.f32.mrf.mxu1  ;;  %v1000_v3 = vpack.c.bf16 %v1307_v0, %v1297_v58  ;;  %v1020_v5 = vpack.c.bf16 %v1313_v4, %v1303_v63 }
  0xc9   : > { %v678_v23 = vmul.f32 %v503_v1, %v503_v1  ;;  %v640_v32 = vadd.f32 %v639_v27, %v503_v1  ;;  %v691_v27 = vmul.f32 %v1285_v52, %v1285_v52 }
  0xca   : > { %1055 = vst [vmem:[%s1275_s23 + $0x48] sm:$0xff] %v1000_v3  }
  0xcb   : > { %1059 = vst [vmem:[%s1275_s23 + $0x68] sm:$0xff] %v1020_v5   ;;  %v709_v33 = vadd.f32 %v708_v29, %v678_v23 }
  0xcf   : > { %v1319_v6 = vpop.f32.mrf.mxu2  ;;  %v1325_v12 = vpop.f32.mrf.mxu3 }
  0xd0   : > { %v505_v7 = vpop.f32.mrf.mxu0  ;;  %v1321_v8 = vpop.f32.mrf.mxu1 }
  0xd1   : > { %v965_v10 = vpack.c.bf16 %v505_v7, %v503_v1  ;;  %v985_v11 = vpack.c.bf16 %v1321_v8, %v1309_v2  ;;  %v679_v30 = vmul.f32 %v505_v7, %v505_v7  ;;  %v641_v35 = vadd.f32 %v640_v32, %v505_v7 }
  0xd2   : > { %v693_v32 = vmul.f32 %v1307_v0, %v1307_v0 }
  0xd3   : > { %1048 = vst [vmem:[%s1275_s23 + $0x10] sm:$0xff] %v965_v10   ;;  %v710_v36 = vadd.f32 %v709_v33, %v679_v30 }
  0xd4   : > { %1052 = vst [vmem:[%s1275_s23 + $0x30] sm:$0xff] %v985_v11   ;;  %v686_v11 = vmul.f32 %v1309_v2, %v1309_v2 }
  0xd7   : > { %v1329_v21 = vpop.f32.mrf.mxu2  ;;  %v1333_v28 = vpop.f32.mrf.mxu3 }
  0xd8   : > { %v508_v24 = vpop.f32.mrf.mxu0  ;;  %v528_v25 = vpop.f32.mrf.mxu1  ;;  %v1005_v26 = vpack.c.bf16 %v1329_v21, %v1319_v6  ;;  %v1025_v31 = vpack.c.bf16 %v1333_v28, %v1325_v12 }
  0xd9   : > { %v680_v34 = vmul.f32 %v508_v24, %v508_v24  ;;  %v642_v9 = vadd.f32 %v641_v35, %v508_v24  ;;  %v688_v19 = vmul.f32 %v528_v25, %v528_v25 }
  0xda   : > { %1056 = vst [vmem:[%s1275_s23 + $0x50] sm:$0xff] %v1005_v26  }
  0xdb   : > { %1060 = vst [vmem:[%s1275_s23 + $0x70] sm:$0xff] %v1025_v31   ;;  %v711_v38 = vadd.f32 %v710_v36, %v680_v34 }
  0xdf   : > { %v548_v37 = vpop.f32.mrf.mxu2  ;;  %v1339_v45 = vpop.f32.mrf.mxu3 }
  0xe0   : > { %v510_v39 = vpop.f32.mrf.mxu0  ;;  %v530_v40 = vpop.f32.mrf.mxu1 }
  0xe1   : > { %v970_v41 = vpack.c.bf16 %v510_v39, %v508_v24  ;;  %v643_v42 = vadd.f32 %v642_v9, %v510_v39  ;;  %v681_v43 = vmul.f32 %v510_v39, %v510_v39  ;;  %v990_v44 = vpack.c.bf16 %v530_v40, %v528_v25 }
  0xe2   : > { %v689_v23 = vmul.f32 %v530_v40, %v530_v40  ;;  %v690_v24 = vmul.f32 %v1268_v17, %v1268_v17  ;;  %v695_v9 = vmul.f32 %v1329_v21, %v1329_v21 }
  0xe3   : > { %1049 = vst [vmem:[%s1275_s23 + $0x18] sm:$0xff] %v970_v41   ;;  %v644_v49 = vadd.f32 %v643_v42, %v1266_v46  ;;  %v712_v50 = vadd.f32 %v711_v38, %v681_v43  ;;  %v685_v46 = vmul.f32 %v1299_v60, %v1299_v60 }
  0xe4   : > { %1053 = vst [vmem:[%s1275_s23 + $0x38] sm:$0xff] %v990_v44  }
  0xe5   : > { %v645_v55 = vadd.f32 %v644_v49, %v1277_v48  ;;  %v713_v57 = vadd.f32 %v712_v50, %v682_v47 }
  0xe7   : > { %v646_v61 = vadd.f32 %v645_v55, %v1287_v54  ;;  %v714_v62 = vadd.f32 %v713_v57, %v683_v53  ;;  %v550_v1 = vpop.f32.mrf.mxu2  ;;  %v570_v10 = vpop.f32.mrf.mxu3  ;;  %v687_v54 = vmul.f32 %v1321_v8, %v1321_v8  ;;  %v701_v55 = vmul.f32 %v1313_v4, %v1313_v4 }
  0xe8   : > { %v1010_v3 = vpack.c.bf16 %v550_v1, %v548_v37  ;;  %v1030_v48 = vpack.c.bf16 %v570_v10, %v1339_v45  ;;  %v697_v43 = vmul.f32 %v550_v1, %v550_v1 }
  0xe9   : > { %v715_v5 = vadd.f32 %v714_v62, %v684_v59  ;;  %v647_v7 = vadd.f32 %v646_v61, %v1299_v60 }
  0xea   : > { %1057 = vst [vmem:[%s1275_s23 + $0x58] sm:$0xff] %v1010_v3  }
  0xeb   : > { %v648_v13 = vadd.f32 %v647_v7, %v1309_v2  ;;  %v716_v14 = vadd.f32 %v715_v5, %v685_v46  ;;  %1061 = vst [vmem:[%s1275_s23 + $0x78] sm:$0xff] %v1030_v48   ;;  %v704_v5 = vmul.f32 %v1339_v45, %v1339_v45  ;;  %v705_v48 = vmul.f32 %v570_v10, %v570_v10 }
  0xed   : > { %v649_v15 = vadd.f32 %v648_v13, %v1321_v8  ;;  %v717_v16 = vadd.f32 %v716_v14, %v686_v11  ;;  %v692_v8 = vmul.f32 %v1297_v58, %v1297_v58 }
  0xef   : > { %v650_v18 = vadd.f32 %v649_v15, %v528_v25  ;;  %v718_v60 = vadd.f32 %v717_v16, %v687_v54 }
  0xf1   : > { %v719_v20 = vadd.f32 %v718_v60, %v688_v19  ;;  %v651_v22 = vadd.f32 %v650_v18, %v530_v40  ;;  %v696_v40 = vmul.f32 %v548_v37, %v548_v37 }
  0xf3   : > { %v652_v26 = vadd.f32 %v651_v22, %v1268_v17  ;;  %v720_v2 = vadd.f32 %v719_v20, %v689_v23  ;;  %v694_v17 = vmul.f32 %v1319_v6, %v1319_v6 }
  0xf5   : > { %v653_v29 = vadd.f32 %v652_v26, %v1285_v52  ;;  %v721_v30 = vadd.f32 %v720_v2, %v690_v24 }
  0xf7   : > { %v654_v25 = vadd.f32 %v653_v29, %v1297_v58  ;;  %v722_v31 = vadd.f32 %v721_v30, %v691_v27 }
  0xf9   : > { %v723_v33 = vadd.f32 %v722_v31, %v692_v8  ;;  %v655_v34 = vadd.f32 %v654_v25, %v1307_v0  ;;  %v698_v0 = vmul.f32 %v1281_v51, %v1281_v51 }
  0xfb   : > { %v656_v35 = vadd.f32 %v655_v34, %v1319_v6  ;;  %v724_v36 = vadd.f32 %v723_v33, %v693_v32  ;;  %v699_v6 = vmul.f32 %v1291_v56, %v1291_v56 }
  0xfd   : > { %v657_v52 = vadd.f32 %v656_v35, %v1329_v21  ;;  %v725_v38 = vadd.f32 %v724_v36, %v694_v17  ;;  %v700_v21 = vmul.f32 %v1303_v63, %v1303_v63 }
  0xff   : > { %v726_v58 = vadd.f32 %v725_v38, %v695_v9  ;;  %v658_v39 = vadd.f32 %v657_v52, %v548_v37 }
 0x101   : > { %v727_v41 = vadd.f32 %v726_v58, %v696_v40  ;;  %v659_v42 = vadd.f32 %v658_v39, %v550_v1  ;;  %v703_v1 = vmul.f32 %v1333_v28, %v1333_v28 }
 0x103   : > { %v660_v44 = vadd.f32 %v659_v42, %v1281_v51  ;;  %v728_v47 = vadd.f32 %v727_v41, %v697_v43  ;;  %v702_v51 = vmul.f32 %v1325_v12, %v1325_v12 }
 0x105   : > { %v661_v49 = vadd.f32 %v660_v44, %v1291_v56  ;;  %v729_v50 = vadd.f32 %v728_v47, %v698_v0 }
 0x107   : > { %v662_v37 = vadd.f32 %v661_v49, %v1303_v63  ;;  %v730_v53 = vadd.f32 %v729_v50, %v699_v6 }
 0x109   : > { %v731_v57 = vadd.f32 %v730_v53, %v700_v21  ;;  %v663_v59 = vadd.f32 %v662_v37, %v1313_v4 }
 0x10b   : > { %v664_v61 = vadd.f32 %v663_v59, %v1325_v12  ;;  %v732_v62 = vadd.f32 %v731_v57, %v701_v55 }
 0x10d   : > { %v665_v56 = vadd.f32 %v664_v61, %v1333_v28  ;;  %v733_v3 = vadd.f32 %v732_v62, %v702_v51 }
 0x10f   : > { %v734_v63 = vadd.f32 %v733_v3, %v703_v1  ;;  %v666_v46 = vadd.f32 %v665_v56, %v1339_v45 }
 0x111   : > { %v735_v4 = vadd.f32 %v734_v63, %v704_v5  ;;  %v667_v7 = vadd.f32 %v666_v46, %v570_v10 }
 0x113   : > { %v668_v11 = vrot.slane %v667_v7, 4  ;;  %v736_v13 = vadd.f32 %v735_v4, %v705_v48 }
 0x115   : > { %v669_v12 = vadd.f32 %v668_v11, %v667_v7  ;;  %v737_v14 = vrot.slane %v736_v13, 4 }
 0x117   : > { %v670_v54 = vrot.slane %v669_v12, 2  ;;  %v738_v15 = vadd.f32 %v737_v14, %v736_v13 }
 0x119   : > { %v671_v16 = vadd.f32 %v670_v54, %v669_v12  ;;  %v739_v18 = vrot.slane %v738_v15, 2 }
 0x11b   : > { %v672_v28 = vrot.slane %v671_v16, 1  ;;  %v740_v19 = vadd.f32 %v739_v18, %v738_v15 }
 0x11d   : > { %v741_v60 = vrot.slane %v740_v19, 1  ;;  %v673_v20 = vadd.f32 %v672_v28, %v671_v16 }
 0x11f   : > { %v742_v22 = vadd.f32 %v741_v60, %v740_v19 }
 0x121   : > { %v744_v45 = vsel %vm743_vm0, %v673_v20, %v742_v22 }
 0x122   : > { %v746_v10 = vsel %vm745_vm1, %v744_v45, 0.0 }
 0x123   : > { %747 = vst [vmem:[%s235_s27] sm:$0xff] %v746_v10 }
 0x124 PF: > { %s16_s18 = sadd.s32 1, %s1102_s18  }
 0x125   : > { %p13_p4 = scmp.ge.s32.totalorder %s16_s18, 4  }
 0x127   :  { %15 = sbr.rel (!%p13_p4) target bundleno = 1 (0x1), region = 78 }

// kernel: bottleneck_forward.5
= control target key start
LH: loop header
LB: loop body
LE: loop exit
PB: predicated region body
PF: predicated region fallthrough
CT: control target
= control target key end

     0   :  { %s6513_s18 = smov 0   ;;  %s8050_s0 = inlined_call_operand.vmem [shape: bf16[2,16,16,128], index: 0, kind: input, shape index: {}]   ;;  %s8051_s1 = inlined_call_operand.vmem [shape: f32[1,128], index: 1, kind: input, shape index: {}]   ;;  %s8052_s2 = inlined_call_operand.vmem [shape: f32[1,128], index: 2, kind: input, shape index: {}]   ;;  %s8053_s3 = inlined_call_operand.vmem [shape: bf16[9,128,128], index: 3, kind: input, shape index: {}]   ;;  %s8054_s4 = inlined_call_operand.vmem [shape: bf16[2,16,16,128], index: 4, kind: output, shape index: {0}]   ;;  %s8055_s5 = inlined_call_operand.vmem [shape: f32[16,128], index: 5, kind: output, shape index: {1}]  }
   0x1 LB: > { %s5415_s19 = sadd.s32 4294967295, %s6480_s18   ;;  %p5419_p0 = scmp.ge.s32.totalorder %s6480_s18, 1  ;;  %s6480_s18 = sphi %s6513_s18, %s16_s18  }
   0x2   : > { %p190_p1 = scmp.lt.s32.totalorder %s6480_s18, 3 }
   0x4   : > { %p191_p2 = pnand %p5419_p0, %p190_p1 }
   0x6   : > { %194 = sbr.rel (%p191_p2) target bundleno = 874 (0x36a), region = 36 }
   0xb   : > { %v6116_v0 = vld [vmem:[%s8053_s3 + $0x78] sm:$0xff]  ;;  %p222_p3 = scmp.lt.s32.totalorder %s5415_s19, 1  ;;  %vm244_vm0 = vcmask 1040384   ;;  %vm245_vm1 = vsmask.f32 256  ;;  %v6115_v1 = vld [vmem:[%s8053_s3 + $0x70] sm:$0xff] }
   0xc   : > { %6379 = vmatpush.bf16.msra.mxu1 %v6116_v0  ;;  %6380 = vmatpush.bf16.msra.mxu2 %v6116_v0  ;;  %vm6531_vm2 = vmand %vm244_vm0, %vm245_vm1  ;;  %vm301_vm3 = vsmask.f32 7938  ;;  %v259_v3 = vld [vmem:[#allocation2 + $0x30] sm:$0x1]  ;;  %v315_v5 = vld [vmem:[#allocation2 + $0x38] sm:$0x1] }
   0xd   : > { %s8097_s19 = smov (!%p222_p3, %s5415_s19), 1  ;;  %6381 = vmatpush.bf16.msra.mxu3 %v6116_v0  ;;  %1574 = vmatpush.bf16.msra.mxu0 %v6116_v0  ;;  %vm6537_vm4 = vmand %vm244_vm0, %vm301_vm3  ;;  %v260_v6 = vsel %vm6531_vm2, 0, %v259_v3  ;;  %v6556_v8 = vld [vmem:[%s8051_s1] ss:$0 sm:$0xff]  ;;  %v6114_v9 = vld [vmem:[%s8053_s3 + $0x68] sm:$0xff]  ;;  %vm880_vm5 = vcmask 1043456  }
   0xe   : > { %s6083_s24 = sshll.u32 %s8097_s19, 7  ;;  %v316_v7 = vsel %vm6537_vm4, 0, %v315_v5  ;;  %261 = vst [vmem:[#allocation2 + $0x30] sm:$0x1] %v260_v6  ;;  %v6566_v14 = vld [vmem:[%s8052_s2] ss:$0 sm:$0xff]  ;;  %vm6624_vm8 = vmand %vm880_vm5, %vm301_vm3 }
   0xf   : > { %s6551_s27 = scalar_lea.vmem %s8050_s0, %s6083_s24  ;;  %317 = vst [vmem:[#allocation2 + $0x38] sm:$0x1] %v316_v7  ;;  %v271_v15 = vld [vmem:[#allocation2 + $0x60] sm:$0x1]  ;;  %v327_v18 = vld [vmem:[#allocation2 + $0x68] sm:$0x1]  ;;  %s7847_s9 = scalar_lea.vmem %s8054_s4, %s6083_s24 }
  0x10   : > { %6382 = vmatpush.bf16.msra.mxu1 %v6115_v1  ;;  %6383 = vmatpush.bf16.msra.mxu2 %v6115_v1  ;;  %v6351_v10 = vld [vmem:[%s6551_s27 + $0x18] sm:$0xff]   ;;  %v6113_v16 = vld [vmem:[%s8053_s3 + $0x60] sm:$0xff]  ;;  %v272_v17 = vsel %vm6531_vm2, 0, %v271_v15  ;;  %v283_v21 = vld [vmem:[#allocation2 + $0x90] sm:$0x1]  ;;  %v328_v24 = vsel %vm6537_vm4, 0, %v327_v18 }
  0x11   : > { %v6355_v11 = vld [vmem:[%s6551_s27 + $0x38] sm:$0xff]   ;;  %6384 = vmatpush.bf16.msra.mxu3 %v6115_v1  ;;  %1575 = vmatpush.bf16.msra.mxu0 %v6115_v1  ;;  %v6219_v12 = vunpack.c.l.bf16 %v6351_v10  ;;  %v6220_v13 = vunpack.c.h.bf16 %v6351_v10  ;;  %273 = vst [vmem:[#allocation2 + $0x60] sm:$0x1] %v272_v17  ;;  %v284_v25 = vsel %vm6531_vm2, 0, %v283_v21  ;;  %v6352_v36 = vld [vmem:[%s6551_s27 + $0x20] sm:$0xff]   ;;  %v6482_v46 = vmov 0  }
  0x12   : > { %v6235_v19 = vunpack.c.l.bf16 %v6355_v11  ;;  %v6236_v20 = vunpack.c.h.bf16 %v6355_v11  ;;  %v339_v26 = vld [vmem:[#allocation2 + $0x98] sm:$0x1]  ;;  %329 = vst [vmem:[#allocation2 + $0x68] sm:$0x1] %v328_v24  ;;  %v6584_v31 = vld [vmem:[#allocation2 + $0x3c] sm:$0x1]  ;;  %v6223_v40 = vunpack.c.l.bf16 %v6352_v36  ;;  %v6224_v50 = vunpack.c.h.bf16 %v6352_v36 }
  0x13   : > { %v431_v22 = vmul.f32 %v6556_v8, %v6219_v12  ;;  %v432_v23 = vmul.f32 %v6556_v8, %v6220_v13  ;;  %v340_v29 = vsel %vm6537_vm4, 0, %v339_v26  ;;  %v6359_v30 = vld [vmem:[%s6551_s27 + $0x58] sm:$0xff]   ;;  %285 = vst [vmem:[#allocation2 + $0x90] sm:$0x1] %v284_v25  ;;  %v263_v39 = vsel %vm6531_vm2, 0, %v6584_v31  ;;  %v6111_v59 = vld [vmem:[%s8053_s3 + $0x50] sm:$0xff] }
  0x14   : > { %6385 = vmatpush.bf16.msra.mxu1 %v6114_v9  ;;  %6386 = vmatpush.bf16.msra.mxu2 %v6114_v9  ;;  %v439_v27 = vmul.f32 %v6556_v8, %v6235_v19  ;;  %v440_v28 = vmul.f32 %v6556_v8, %v6236_v20  ;;  %v6251_v34 = vunpack.c.l.bf16 %v6359_v30  ;;  %v6252_v35 = vunpack.c.h.bf16 %v6359_v30  ;;  %341 = vst [vmem:[#allocation2 + $0x98] sm:$0x1] %v340_v29  ;;  %v6112_v41 = vld [vmem:[%s8053_s3 + $0x58] sm:$0xff]  ;;  %v6599_v49 = vld [vmem:[#allocation2 + $0x44] sm:$0x1]  ;;  %v6110_v17 = vld [vmem:[%s8053_s3 + $0x48] sm:$0xff] }
  0x15   : > { %6387 = vmatpush.bf16.msra.mxu3 %v6114_v9  ;;  %1576 = vmatpush.bf16.msra.mxu0 %v6114_v9  ;;  %v467_v32 = vadd.f32 %v6566_v14, %v431_v22  ;;  %v468_v33 = vadd.f32 %v6566_v14, %v432_v23  ;;  %237 = vst [vmem:[#allocation2] sm:$0xf] %v6482_v46  ;;  %vm557_vm6 = vsmask.f32 4368  ;;  %v319_v58 = vsel %vm6537_vm4, 0, %v6599_v49  ;;  %s5424_s24 = sshll.u32 %s8097_s19, 3 }
  0x16   : > { %v475_v37 = vadd.f32 %v6566_v14, %v439_v27  ;;  %v476_v38 = vadd.f32 %v6566_v14, %v440_v28  ;;  %v447_v44 = vmul.f32 %v6556_v8, %v6251_v34  ;;  %v448_v45 = vmul.f32 %v6556_v8, %v6252_v35  ;;  %238 = vst [vmem:[#allocation2 + $0x4] sm:$0xf] %v6482_v46  ;;  %v903_v0 = vld [vmem:[#allocation2 + $0x30] sm:$0xf]  ;;  %v907_v1 = vld [vmem:[#allocation2 + $0x38] sm:$0x1]  ;;  %vm6614_vm7 = vmor %vm245_vm1, %vm557_vm6  ;;  %s235_s12 = scalar_lea.vmem %s8055_s5, %s5424_s24 }
  0x17   : > { %v499_v42 = vmax.f32 %v467_v32, 0.0  ;;  %v500_v43 = vmax.f32 %v468_v33, 0.0  ;;  %v433_v51 = vmul.f32 %v6556_v8, %v6223_v40  ;;  %239 = vst [vmem:[#allocation2 + $0x8] sm:$0x1] %v6482_v46  ;;  %v434_v22 = vmul.f32 %v6556_v8, %v6224_v50  ;;  %v6356_v40 = vld [vmem:[%s6551_s27 + $0x40] sm:$0xff]  }
  0x18   : > { %6388 = vmatpush.bf16.msra.mxu1 %v6113_v16  ;;  %6389 = vmatpush.bf16.msra.mxu2 %v6113_v16  ;;  %v507_v47 = vmax.f32 %v475_v37, 0.0  ;;  %v508_v48 = vmax.f32 %v476_v38, 0.0  ;;  %v6603_v54 = vadd.f32 %v6566_v14, %v447_v44  ;;  %v484_v57 = vadd.f32 %v6566_v14, %v448_v45  ;;  %241 = vst [vmem:[#allocation2 + $0xcc] sm:$0xf] %v6482_v46  ;;  %v931_v12 = vld [vmem:[#allocation2 + $0x60] sm:$0xf] }
  0x19   : > { %6390 = vmatpush.bf16.msra.mxu3 %v6113_v16  ;;  %1577 = vmatpush.bf16.msra.mxu0 %v6113_v16  ;;  %v531_v52 = vpack.c.bf16 %v499_v42, %v499_v42  ;;  %v532_v53 = vpack.c.bf16 %v500_v43, %v500_v43  ;;  %v935_v13 = vld [vmem:[#allocation2 + $0x68] sm:$0x1]  ;;  %242 = vst [vmem:[#allocation2 + $0xd0] sm:$0xf] %v6482_v46  ;;  %vm1058_vm9 = vsmask.f32 3328 }
  0x1a   : > { %v539_v55 = vpack.c.bf16 %v507_v47, %v507_v47  ;;  %v540_v56 = vpack.c.bf16 %v508_v48, %v508_v48  ;;  %v515_v15 = vmax.f32 %v6603_v54, 0.0  ;;  %v516_v16 = vmax.f32 %v484_v57, 0.0  ;;  %243 = vst [vmem:[#allocation2 + $0xd4] sm:$0x1] %v6482_v46  ;;  %v6660_v47 = vld [vmem:[%s6551_s27 + $0x60] sm:$0xff]  }
  0x1b   : > { %v611_v60 = vshrl.u32 %v531_v52, 16  ;;  %v614_v61 = vshll.u32 %v531_v52, 16  ;;  %v619_v62 = vshrl.u32 %v532_v53, 16  ;;  %v622_v63 = vshll.u32 %v532_v53, 16  ;;  %264 = vst [vmem:[#allocation2 + $0x3c] sm:$0x1] %v263_v39 }
  0x1c   : > { %6391 = vmatpush.bf16.msra.mxu1 %v6112_v41  ;;  %6392 = vmatpush.bf16.msra.mxu2 %v6112_v41  ;;  %v679_v3 = vshrl.u32 %v539_v55, 16  ;;  %v682_v5 = vshll.u32 %v539_v55, 16  ;;  %v687_v6 = vshrl.u32 %v540_v56, 16  ;;  %v690_v7 = vshll.u32 %v540_v56, 16  ;;  %v6628_v21 = vld [vmem:[#allocation2] sm:$0x1] }
  0x1d   : > { %6393 = vmatpush.bf16.msra.mxu3 %v6112_v41  ;;  %1578 = vmatpush.bf16.msra.mxu0 %v6112_v41  ;;  %v613_v10 = vrot.slane %v611_v60, 7  ;;  %v621_v11 = vrot.slane %v619_v62, 7  ;;  %v6632_v23 = vadd.f32 %v6566_v14, %v433_v51  ;;  %v995_v28 = vld [vmem:[#allocation2 + $0x4] sm:$0xf]  ;;  %v248_v38 = vsel %vm6531_vm2, 0, %v6628_v21  ;;  %v6124_v62 = vld [vmem:[%s8053_s3 + $0xb8] sm:$0xff] }
  0x1e   : > { %v681_v19 = vrot.slane %v679_v3, 7  ;;  %v689_v20 = vrot.slane %v687_v6, 7  ;;  %v6634_v34 = vld [vmem:[#allocation2 + $0x8] sm:$0x1]  ;;  %v547_v42 = vpack.c.bf16 %v515_v15, %v515_v15  ;;  %v548_v43 = vpack.c.bf16 %v516_v16, %v516_v16  ;;  %v6109_v48 = vld [vmem:[%s8053_s3 + $0x40] sm:$0xff]  ;;  %v6123_v16 = vld [vmem:[%s8053_s3 + $0xb0] sm:$0xff] }
  0x1f   : > { %v616_v24 = vor.u32 %v614_v61, %v613_v10  ;;  %v617_v25 = vrot.slane %v613_v10, 4  ;;  %v624_v26 = vor.u32 %v622_v63, %v621_v11  ;;  %v626_v27 = vrot.slane %v621_v11, 4  ;;  %v959_v56 = vld [vmem:[#allocation2 + $0x90] sm:$0xf]  ;;  %v963_v61 = vld [vmem:[#allocation2 + $0x98] sm:$0x1] }
  0x20   : > { %6394 = vmatpush.bf16.msra.mxu1 %v6111_v59  ;;  %6395 = vmatpush.bf16.msra.mxu2 %v6111_v59  ;;  %v684_v29 = vor.u32 %v682_v5, %v681_v19  ;;  %v685_v30 = vrot.slane %v681_v19, 4  ;;  %v692_v32 = vor.u32 %v690_v7, %v689_v20  ;;  %v694_v33 = vrot.slane %v689_v20, 4  ;;  %v6148_v63 = vld [vmem:[%s8053_s3 + $0xf8] sm:$0xff]  ;;  %249 = vst [vmem:[#allocation2] sm:$0x1] %v248_v38 }
  0x21   : > { %6396 = vmatpush.bf16.msra.mxu3 %v6111_v59  ;;  %1579 = vmatpush.bf16.msra.mxu0 %v6111_v59  ;;  %v625_v35 = vsel %vm6614_vm7, %v617_v25, %v624_v26  ;;  %v904_v36 = vsel %vm6624_vm8, %v616_v24, %v903_v0  ;;  %v908_v37 = vsel %vm6531_vm2, %v626_v27, %v907_v1  ;;  %v304_v44 = vsel %vm6537_vm4, 0, %v6634_v34  ;;  %v6108_v7 = vld [vmem:[%s8053_s3 + $0x38] sm:$0xff]  ;;  %v6107_v25 = vld [vmem:[%s8053_s3 + $0x30] sm:$0xff] }
  0x22   : > { %905 = vst [vmem:[#allocation2 + $0x30] sm:$0xf] %v904_v36  ;;  %v693_v31 = vsel %vm6614_vm7, %v685_v30, %v692_v32  ;;  %v932_v39 = vsel %vm6624_vm8, %v684_v29, %v931_v12  ;;  %v936_v41 = vsel %vm6531_vm2, %v694_v33, %v935_v13  ;;  %v1071_v45 = vshll.u32 %v995_v28, 16  ;;  %v6156_v10 = vld [vmem:[%s8053_s3 + $0x138] sm:$0xff] }
  0x23   : > { %906 = vst [vmem:[#allocation2 + $0x34] sm:$0xf] %v625_v35  ;;  %v1075_v46 = vshrl.u32 %v995_v28, 16  ;;  %vm1059_vm10 = vsmask.f32 7440  ;;  %v747_v50 = vshrl.u32 %v547_v42, 16  ;;  %v470_v52 = vadd.f32 %v6566_v14, %v434_v22 }
  0x24   : > { %6397 = vmatpush.bf16.msra.mxu1 %v6110_v17  ;;  %6398 = vmatpush.bf16.msra.mxu2 %v6110_v17  ;;  %909 = vst [vmem:[#allocation2 + $0x38] sm:$0x1] %v908_v37  ;;  %v750_v51 = vshll.u32 %v547_v42, 16  ;;  %v6239_v53 = vunpack.c.l.bf16 %v6356_v40  ;;  %v755_v54 = vshrl.u32 %v548_v43, 16  ;;  %v758_v55 = vshll.u32 %v548_v43, 16  ;;  %vm6718_vm11 = vmor %vm1058_vm9, %vm1059_vm10 }
  0x25   : > { %6399 = vmatpush.bf16.msra.mxu3 %v6110_v17  ;;  %1580 = vmatpush.bf16.msra.mxu0 %v6110_v17  ;;  %933 = vst [vmem:[#allocation2 + $0x60] sm:$0xf] %v932_v39  ;;  %v6666_v57 = vrot.slane %v1071_v45, 5  ;;  %v1077_v59 = vrot.slane %v1075_v46, 4  ;;  %v749_v60 = vrot.slane %v747_v50, 7  ;;  %v6240_v0 = vunpack.c.h.bf16 %v6356_v40  ;;  %v6147_v17 = vld [vmem:[%s8053_s3 + $0xf0] sm:$0xff] }
  0x26   : > { %934 = vst [vmem:[#allocation2 + $0x64] sm:$0xf] %v693_v31  ;;  %v6675_v1 = vmul.f32 %v6556_v8, %v6239_v53  ;;  %v6255_v3 = vunpack.c.l.bf16 %v6660_v47  ;;  %v757_v5 = vrot.slane %v755_v54, 7  ;;  %v501_v11 = vmax.f32 %v6632_v23, 0.0 }
  0x27   : > { %937 = vst [vmem:[#allocation2 + $0x68] sm:$0x1] %v936_v41  ;;  %v1078_v6 = vor.u32 %v1077_v59, %v6666_v57  ;;  %v6256_v12 = vunpack.c.h.bf16 %v6660_v47  ;;  %v752_v13 = vor.u32 %v750_v51, %v749_v60  ;;  %v753_v15 = vrot.slane %v749_v60, 4 }
  0x28   : > { %6400 = vmatpush.bf16.msra.mxu1 %v6109_v48  ;;  %6401 = vmatpush.bf16.msra.mxu2 %v6109_v48  ;;  %v502_v19 = vmax.f32 %v470_v52, 0.0  ;;  %v6694_v20 = vmul.f32 %v6556_v8, %v6240_v0  ;;  %v760_v22 = vor.u32 %v758_v55, %v757_v5  ;;  %v762_v23 = vrot.slane %v757_v5, 4  ;;  %305 = vst [vmem:[#allocation2 + $0x8] sm:$0x1] %v304_v44 }
  0x29   : > { %6402 = vmatpush.bf16.msra.mxu3 %v6109_v48  ;;  %1581 = vmatpush.bf16.msra.mxu0 %v6109_v48  ;;  %v1002_v21 = vld [vmem:[#allocation2 + $0x30] sm:$0xf]  ;;  %v6696_v24 = vrot.slane %v1078_v6, 4  ;;  %v6701_v26 = vpack.c.bf16 %v501_v11, %v501_v11  ;;  %v960_v30 = vsel %vm6624_vm8, %v752_v13, %v959_v56  ;;  %320 = vst [vmem:[#allocation2 + $0x44] sm:$0x1] %v319_v58  ;;  %vm1944_vm12 = vcmask 1042432  }
  0x2a   : > { %v1003_v27 = vld [vmem:[#allocation2 + $0x34] sm:$0xf]  ;;  %v1158_v28 = vshrl.u32 %v1002_v21, 16  ;;  %v1161_v29 = vshll.u32 %v1002_v21, 16  ;;  %v6709_v32 = vpack.c.bf16 %v502_v19, %v502_v19  ;;  %v761_v36 = vsel %vm6614_vm7, %v753_v15, %v760_v22  ;;  %961 = vst [vmem:[#allocation2 + $0x90] sm:$0xf] %v960_v30 }
  0x2b   : > { %v1046_v33 = vld [vmem:[#allocation2 + $0x38] sm:$0x1]  ;;  %v1167_v34 = vshll.u32 %v1003_v27, 16  ;;  %v1171_v35 = vshrl.u32 %v1003_v27, 16  ;;  %v964_v37 = vsel %vm6531_vm2, %v762_v23, %v963_v61  ;;  %v628_v49 = vshrl.u32 %v6701_v26, 16 }
  0x2c   : > { %2188 = vmatpush.bf16.msrb.mxu2 %v6124_v62  ;;  %1807 = vmatpush.bf16.msrb.mxu1 %v6108_v7  ;;  %v1160_v38 = vrot.slane %v1158_v28, 4  ;;  %v1163_v40 = vrot.slane %v1161_v29, 5  ;;  %v1177_v31 = vshll.u32 %v1046_v33, 16  ;;  %v1010_v39 = vld [vmem:[#allocation2 + $0x60] sm:$0xf]  ;;  %v6726_v7 = vadd.f32 %v6566_v14, %v6675_v1 }
  0x2d   : > { %2502 = vmatpush.bf16.msrb.mxu3 %v6148_v63  ;;  %3184 = vmatpush.bf16.msrb.mxu0 %v6156_v10  ;;  %v1169_v58 = vrot.slane %v1167_v34, 5  ;;  %v1173_v41 = vrot.slane %v1171_v35, 4  ;;  %v1011_v42 = vld [vmem:[#allocation2 + $0x64] sm:$0xf]  ;;  %v1254_v43 = vshrl.u32 %v1010_v39, 16  ;;  %v1257_v44 = vshll.u32 %v1010_v39, 16 }
  0x2e   : > { %v1164_v45 = vor.u32 %v1163_v40, %v1160_v38  ;;  %v1179_v46 = vrot.slane %v1177_v31, 5  ;;  %v1050_v48 = vld [vmem:[#allocation2 + $0x68] sm:$0x1]  ;;  %v1263_v50 = vshll.u32 %v1011_v42, 16  ;;  %v1267_v51 = vshrl.u32 %v1011_v42, 16 }
  0x2f   : > { %v1174_v53 = vor.u32 %v1173_v41, %v1169_v58  ;;  %v1256_v54 = vrot.slane %v1254_v43, 4  ;;  %v1259_v55 = vrot.slane %v1257_v44, 5  ;;  %v1273_v56 = vshll.u32 %v1050_v48, 16  ;;  %962 = vst [vmem:[#allocation2 + $0x94] sm:$0xf] %v761_v36 }
  0x30   : > { %2189 = vmatpush.bf16.msrb.mxu2 %v6123_v16  ;;  %1808 = vmatpush.bf16.msrb.mxu1 %v6107_v25  ;;  %v1165_v59 = vrot.slane %v1164_v45, 4  ;;  %v1265_v60 = vrot.slane %v1263_v50, 5  ;;  %v1269_v61 = vrot.slane %v1267_v51, 4  ;;  %965 = vst [vmem:[#allocation2 + $0x98] sm:$0x1] %v964_v37  ;;  %v6722_v62 = vrot.slane %v628_v49, 7 }
  0x31   : > { %2503 = vmatpush.bf16.msrb.mxu3 %v6147_v17  ;;  %v1175_v63 = vrot.slane %v1174_v53, 4  ;;  %v1260_v0 = vor.u32 %v1259_v55, %v1256_v54  ;;  %v1275_v5 = vrot.slane %v1273_v56, 5  ;;  %v994_v6 = vld [vmem:[#allocation2] sm:$0xf]  ;;  %v1018_v13 = vld [vmem:[#allocation2 + $0x90] sm:$0xf] }
  0x32   : > { %v1170_v10 = vsel %vm6718_vm11, %v1165_v59, %v1169_v58  ;;  %v1270_v11 = vor.u32 %v1269_v61, %v1265_v60  ;;  %v1042_v15 = vld [vmem:[#allocation2 + $0x8] sm:$0x1]  ;;  %v1062_v16 = vshrl.u32 %v994_v6, 16  ;;  %v1065_v17 = vshll.u32 %v994_v6, 16  ;;  %v910_v59 = vld [vmem:[#allocation2 + $0x3c] sm:$0xf] }
  0x33   : > { %v1180_v19 = vsel %vm6718_vm11, %v1175_v63, %v1179_v46  ;;  %v1470_v21 = vunpack.c.l.b16 %v1170_v10  ;;  %v1261_v22 = vrot.slane %v1260_v0, 4  ;;  %v1350_v23 = vshrl.u32 %v1018_v13, 16 }
  0x34   : > { %v1471_v25 = vunpack.c.l.b16 %v1180_v19  ;;  %v1271_v27 = vrot.slane %v1270_v11, 4  ;;  %v1353_v28 = vshll.u32 %v1018_v13, 16  ;;  %v1064_v29 = vrot.slane %v1062_v16, 4  ;;  %v286_v13 = vld [vmem:[#allocation2 + $0x9c] sm:$0x1] }
  0x35   : > { %v1266_v1 = vsel %vm6718_vm11, %v1261_v22, %v1265_v60  ;;  %v1352_v30 = vrot.slane %v1350_v23, 4  ;;  %v1067_v33 = vrot.slane %v1065_v17, 5  ;;  %v1081_v34 = vshll.u32 %v1042_v15, 16  ;;  %v274_v60 = vld [vmem:[#allocation2 + $0x6c] sm:$0x1] }
  0x36   : > { %v1498_v35 = vpack.c.b16 %v1471_v25, %v1470_v21  ;;  %v1276_v36 = vsel %vm6718_vm11, %v1271_v27, %v1275_v5  ;;  %v1478_v37 = vunpack.c.l.b16 %v1266_v1  ;;  %v1019_v38 = vld [vmem:[#allocation2 + $0x94] sm:$0xf]  ;;  %v1355_v40 = vrot.slane %v1353_v28, 5  ;;  %v342_v15 = vld [vmem:[#allocation2 + $0xa4] sm:$0x1] }
  0x37   : > { %v1479_v31 = vunpack.c.l.b16 %v1276_v36  ;;  %v1054_v39 = vld [vmem:[#allocation2 + $0x98] sm:$0x1]  ;;  %v1359_v49 = vshll.u32 %v1019_v38, 16  ;;  %v1363_v58 = vshrl.u32 %v1019_v38, 16  ;;  %v1068_v41 = vor.u32 %v1067_v33, %v1064_v29  ;;  %v330_v5 = vld [vmem:[#allocation2 + $0x74] sm:$0x1] }
  0x38   : > { %1602 = vmatmul.bf16.vlgmr.msra.gmra.mxu1 %v1498_v35  ;;  %v1356_v42 = vor.u32 %v1355_v40, %v1352_v30  ;;  %v1369_v43 = vshll.u32 %v1054_v39, 16  ;;  %v1083_v44 = vrot.slane %v1081_v34, 5  ;;  %v631_v45 = vshll.u32 %v6701_v26, 16  ;;  %v250_v25 = vld [vmem:[#allocation2 + $0xc] sm:$0x1]  ;;  %v6206_v40 = vld [vmem:[%s6551_s27] sm:$0xff]  }
  0x39   : > { %v1502_v46 = vpack.c.b16 %v1479_v31, %v1478_v37  ;;  %v1361_v48 = vrot.slane %v1359_v49, 5  ;;  %v1365_v50 = vrot.slane %v1363_v58, 4  ;;  %v1069_v51 = vrot.slane %v1068_v41, 4  ;;  %v6772_v38 = vld [vmem:[#allocation2 + $0x14] sm:$0x1] }
  0x3a   : > { %v1357_v53 = vrot.slane %v1356_v42, 4  ;;  %v1371_v54 = vrot.slane %v1369_v43, 5  ;;  %v1084_v55 = vsel %vm6718_vm11, %v6696_v24, %v1083_v44  ;;  %v633_v56 = vor.u32 %v631_v45, %v6722_v62 }
  0x3b   : > { %1622 = vmatmul.bf16.vlgmr.msra.gmra.mxu2 %v1502_v46  ;;  %v1366_v61 = vor.u32 %v1365_v50, %v1361_v48  ;;  %v1074_v26 = vsel %vm6718_vm11, %v1069_v51, %v6666_v57  ;;  %v1463_v63 = vunpack.c.l.b16 %v1084_v55  ;;  %v634_v0 = vrot.slane %v6722_v62, 4  ;;  %v914_v57 = vld [vmem:[#allocation2 + $0x44] sm:$0x1] }
  0x3c   : > { %v1362_v6 = vsel %vm6718_vm11, %v1357_v53, %v1361_v48  ;;  %v1462_v10 = vunpack.c.l.b16 %v1074_v26  ;;  %v636_v24 = vshrl.u32 %v6709_v32, 16  ;;  %v639_v11 = vshll.u32 %v6709_v32, 16 }
  0x3d   : > { %v1367_v16 = vrot.slane %v1366_v61, 4  ;;  %v1486_v17 = vunpack.c.l.b16 %v1362_v6  ;;  %v911_v19 = vsel %vm6624_vm8, %v633_v56, %v910_v59  ;;  %v275_v62 = vsel %vm6531_vm2, 0, %v274_v60  ;;  %v6122_v6 = vld [vmem:[%s8053_s3 + $0xa8] sm:$0xff] }
  0x3e   : > { %v1494_v21 = vpack.c.b16 %v1463_v63, %v1462_v10  ;;  %v638_v22 = vrot.slane %v636_v24, 7  ;;  %912 = vst [vmem:[#allocation2 + $0x3c] sm:$0xf] %v911_v19  ;;  %v331_v23 = vsel %vm6537_vm4, 0, %v330_v5  ;;  %v478_v32 = vadd.f32 %v6566_v14, %v6694_v20  ;;  %2190 = vmatpush.bf16.msrb.mxu2 %v6122_v6 }
  0x3f   : > { %v1372_v27 = vsel %vm6718_vm11, %v1367_v16, %v1371_v54  ;;  %276 = vst [vmem:[#allocation2 + $0x6c] sm:$0x1] %v275_v62  ;;  %v509_v28 = vmax.f32 %v6726_v7, 0.0  ;;  %v287_v29 = vsel %vm6531_vm2, 0, %v286_v13  ;;  %v343_v1 = vsel %vm6537_vm4, 0, %v342_v15 }
  0x40   : > { %v1487_v30 = vunpack.c.l.b16 %v1372_v27  ;;  %1582 = vmatmul.bf16.vlgmr.msra.gmra.mxu0 %v1494_v21  ;;  %v641_v33 = vor.u32 %v639_v11, %v638_v22  ;;  %v643_v34 = vrot.slane %v638_v22, 4  ;;  %332 = vst [vmem:[#allocation2 + $0x74] sm:$0x1] %v331_v23  ;;  %v510_v20 = vmax.f32 %v478_v32, 0.0 }
  0x41   : > { %v541_v35 = vpack.c.bf16 %v509_v28, %v509_v28  ;;  %288 = vst [vmem:[#allocation2 + $0x9c] sm:$0x1] %v287_v29  ;;  %v449_v36 = vmul.f32 %v6556_v8, %v6255_v3  ;;  %v450_v7 = vmul.f32 %v6556_v8, %v6256_v12  ;;  %v251_v37 = vsel %vm6531_vm2, 0, %v250_v25 }
  0x42   : > { %v1506_v31 = vpack.c.b16 %v1487_v30, %v1486_v17  ;;  %v642_v39 = vsel %vm6614_vm7, %v634_v0, %v641_v33  ;;  %v915_v49 = vsel %vm6531_vm2, %v643_v34, %v914_v57  ;;  %v542_v58 = vpack.c.bf16 %v510_v20, %v510_v20  ;;  %344 = vst [vmem:[#allocation2 + $0xa4] sm:$0x1] %v343_v1 }
  0x43   : > { %913 = vst [vmem:[#allocation2 + $0x40] sm:$0xf] %v642_v39  ;;  %v696_v3 = vshrl.u32 %v541_v35, 16  ;;  %v699_v47 = vshll.u32 %v541_v35, 16  ;;  %v485_v12 = vadd.f32 %v6566_v14, %v449_v36  ;;  %v486_v41 = vadd.f32 %v6566_v14, %v450_v7 }
  0x44   : > { %1642 = vmatmul.bf16.vlgmr.msra.gmra.mxu3 %v1506_v31  ;;  %916 = vst [vmem:[#allocation2 + $0x44] sm:$0x1] %v915_v49  ;;  %v704_v42 = vshrl.u32 %v542_v58, 16  ;;  %v707_v43 = vshll.u32 %v542_v58, 16  ;;  %v307_v44 = vsel %vm6537_vm4, 0, %v6772_v38  ;;  %v6207_v45 = vunpack.c.l.bf16 %v6206_v40 }
  0x45   : > { %v1004_v46 = vld [vmem:[#allocation2 + $0x3c] sm:$0xf]  ;;  %v698_v48 = vrot.slane %v696_v3, 7  ;;  %v517_v50 = vmax.f32 %v485_v12, 0.0  ;;  %v518_v51 = vmax.f32 %v486_v41, 0.0  ;;  %v6208_v53 = vunpack.c.h.bf16 %v6206_v40 }
  0x46   : > { %v1182_v54 = vshrl.u32 %v1004_v46, 16  ;;  %v1185_v55 = vshll.u32 %v1004_v46, 16  ;;  %v706_v56 = vrot.slane %v704_v42, 7  ;;  %v938_v59 = vld [vmem:[#allocation2 + $0x6c] sm:$0xf]  ;;  %v425_v60 = vmul.f32 %v6556_v8, %v6207_v45 }
  0x47   : > { %v701_v61 = vor.u32 %v699_v47, %v698_v48  ;;  %v702_v26 = vrot.slane %v698_v48, 4  ;;  %v942_v63 = vld [vmem:[#allocation2 + $0x74] sm:$0x1]  ;;  %v549_v0 = vpack.c.bf16 %v517_v50, %v517_v50  ;;  %v550_v5 = vpack.c.bf16 %v518_v51, %v518_v51  ;;  %252 = vst [vmem:[#allocation2 + $0xc] sm:$0x1] %v251_v37  ;;  %v6353_v42 = vld [vmem:[%s6551_s27 + $0x28] sm:$0xff]  }
  0x48   : > { %v1184_v10 = vrot.slane %v1182_v54, 4  ;;  %v1187_v24 = vrot.slane %v1185_v55, 5  ;;  %v709_v11 = vor.u32 %v707_v43, %v706_v56  ;;  %v711_v13 = vrot.slane %v706_v56, 4  ;;  %v966_v28 = vld [vmem:[#allocation2 + $0x9c] sm:$0xf]  ;;  %v6805_v48 = vld [vmem:[%s6551_s27 + $0x48] sm:$0xff]  }
  0x49   : > { %v939_v15 = vsel %vm6624_vm8, %v701_v61, %v938_v59  ;;  %v764_v16 = vshrl.u32 %v549_v0, 16  ;;  %v767_v17 = vshll.u32 %v549_v0, 16  ;;  %v772_v19 = vshrl.u32 %v550_v5, 16  ;;  %308 = vst [vmem:[#allocation2 + $0x14] sm:$0x1] %v307_v44 }
  0x4a   : > { %v1005_v57 = vld [vmem:[#allocation2 + $0x40] sm:$0xf]  ;;  %v1188_v62 = vor.u32 %v1187_v24, %v1184_v10  ;;  %v710_v21 = vsel %vm6614_vm7, %v702_v26, %v709_v11  ;;  %940 = vst [vmem:[#allocation2 + $0x6c] sm:$0xf] %v939_v15  ;;  %v943_v22 = vsel %vm6531_vm2, %v711_v13, %v942_v63  ;;  %v775_v23 = vshll.u32 %v550_v5, 16 }
  0x4b   : > { %v1047_v32 = vld [vmem:[#allocation2 + $0x44] sm:$0x1]  ;;  %v1191_v25 = vshll.u32 %v1005_v57, 16  ;;  %v1195_v27 = vshrl.u32 %v1005_v57, 16  ;;  %941 = vst [vmem:[#allocation2 + $0x70] sm:$0xf] %v710_v21  ;;  %v426_v29 = vmul.f32 %v6556_v8, %v6208_v53  ;;  %v461_v1 = vadd.f32 %v6566_v14, %v425_v60 }
  0x4c   : > { %v1189_v30 = vrot.slane %v1188_v62, 4  ;;  %v1201_v33 = vshll.u32 %v1047_v32, 16  ;;  %944 = vst [vmem:[#allocation2 + $0x74] sm:$0x1] %v943_v22  ;;  %v766_v34 = vrot.slane %v764_v16, 7  ;;  %v774_v20 = vrot.slane %v772_v19, 7 }
  0x4d   : > { %v1193_v35 = vrot.slane %v1191_v25, 5  ;;  %v1197_v36 = vrot.slane %v1195_v27, 4  ;;  %v462_v7 = vadd.f32 %v6566_v14, %v426_v29  ;;  %v493_v37 = vmax.f32 %v461_v1, 0.0  ;;  %v970_v49 = vld [vmem:[#allocation2 + $0xa4] sm:$0x1]  ;;  %v6146_v21 = vld [vmem:[%s8053_s3 + $0xe8] sm:$0xff] }
  0x4e   : > { %v1203_v38 = vrot.slane %v1201_v33, 5  ;;  %v769_v40 = vor.u32 %v767_v17, %v766_v34  ;;  %v770_v31 = vrot.slane %v766_v34, 4  ;;  %v777_v39 = vor.u32 %v775_v23, %v774_v20  ;;  %v265_v58 = vld [vmem:[#allocation2 + $0x48] sm:$0x1]  ;;  %v321_v16 = vld [vmem:[#allocation2 + $0x50] sm:$0x1]  ;;  %2504 = vmatpush.bf16.msrb.mxu3 %v6146_v21 }
  0x4f   : > { %v1194_v3 = vsel %vm6718_vm11, %v1189_v30, %v1193_v35  ;;  %v1198_v47 = vor.u32 %v1197_v36, %v1193_v35  ;;  %v779_v12 = vrot.slane %v774_v20, 4  ;;  %v494_v41 = vmax.f32 %v462_v7, 0.0  ;;  %v6155_v22 = vld [vmem:[%s8053_s3 + $0x130] sm:$0xff]  ;;  %v6121_v29 = vld [vmem:[%s8053_s3 + $0xa0] sm:$0xff]  ;;  %v6154_v20 = vld [vmem:[%s8053_s3 + $0x128] sm:$0xff] }
  0x50   : > { %v1472_v43 = vunpack.c.l.b16 %v1194_v3  ;;  %v778_v44 = vsel %vm6614_vm7, %v770_v31, %v777_v39  ;;  %v967_v45 = vsel %vm6624_vm8, %v769_v40, %v966_v28  ;;  %v525_v46 = vpack.c.bf16 %v493_v37, %v493_v37  ;;  %v6106_v28 = vld [vmem:[%s8053_s3 + $0x28] sm:$0xff]  ;;  %3185 = vmatpush.bf16.msrb.mxu0 %v6155_v22  ;;  %v6145_v34 = vld [vmem:[%s8053_s3 + $0xe0] sm:$0xff]  ;;  %2191 = vmatpush.bf16.msrb.mxu2 %v6121_v29 }
  0x51   : > { %v1199_v50 = vrot.slane %v1198_v47, 4  ;;  %v1012_v51 = vld [vmem:[#allocation2 + $0x6c] sm:$0xf]  ;;  %968 = vst [vmem:[#allocation2 + $0x9c] sm:$0xf] %v967_v45  ;;  %v971_v53 = vsel %vm6531_vm2, %v779_v12, %v970_v49  ;;  %v6809_v54 = vpack.c.bf16 %v494_v41, %v494_v41  ;;  %v266_v55 = vsel %vm6531_vm2, 0, %v265_v58  ;;  %1809 = vmatpush.bf16.msrb.mxu1 %v6106_v28 }
  0x52   : > { %v1013_v56 = vld [vmem:[#allocation2 + $0x70] sm:$0xf]  ;;  %v1278_v59 = vshrl.u32 %v1012_v51, 16  ;;  %v1281_v60 = vshll.u32 %v1012_v51, 16  ;;  %969 = vst [vmem:[#allocation2 + $0xa0] sm:$0xf] %v778_v44  ;;  %v6227_v61 = vunpack.c.l.bf16 %v6353_v42  ;;  %v6228_v26 = vunpack.c.h.bf16 %v6353_v42  ;;  %2505 = vmatpush.bf16.msrb.mxu3 %v6145_v34 }
  0x53   : > { %v1204_v63 = vsel %vm6718_vm11, %v1199_v50, %v1203_v38  ;;  %v1051_v0 = vld [vmem:[#allocation2 + $0x74] sm:$0x1]  ;;  %v1287_v5 = vshll.u32 %v1013_v56, 16  ;;  %v1291_v6 = vshrl.u32 %v1013_v56, 16  ;;  %972 = vst [vmem:[#allocation2 + $0xa4] sm:$0x1] %v971_v53  ;;  %v6243_v10 = vunpack.c.l.bf16 %v6805_v48 }
  0x54   : > { %v1473_v24 = vunpack.c.l.b16 %v1204_v63  ;;  %v1280_v11 = vrot.slane %v1278_v59, 4  ;;  %v1283_v13 = vrot.slane %v1281_v60, 5  ;;  %v1297_v15 = vshll.u32 %v1051_v0, 16  ;;  %267 = vst [vmem:[#allocation2 + $0x48] sm:$0x1] %v266_v55  ;;  %v6105_v12 = vld [vmem:[%s8053_s3 + $0x20] sm:$0xff]  ;;  %3186 = vmatpush.bf16.msrb.mxu0 %v6154_v20 }
  0x55   : > { %v1289_v17 = vrot.slane %v1287_v5, 5  ;;  %v1293_v19 = vrot.slane %v1291_v6, 4  ;;  %v560_v57 = vshrl.u32 %v525_v46, 16  ;;  %v563_v62 = vshll.u32 %v525_v46, 16  ;;  %v882_v38 = vld [vmem:[#allocation2 + $0xc] sm:$0xf]  ;;  %1810 = vmatpush.bf16.msrb.mxu1 %v6105_v12 }
  0x56   : > { %v1499_v23 = vpack.c.b16 %v1473_v24, %v1472_v43  ;;  %v1284_v32 = vor.u32 %v1283_v13, %v1280_v11  ;;  %v1299_v25 = vrot.slane %v1297_v15, 5  ;;  %v568_v27 = vshrl.u32 %v6809_v54, 16  ;;  %v886_v60 = vld [vmem:[#allocation2 + $0x14] sm:$0x1]  ;;  %v277_v5 = vld [vmem:[#allocation2 + $0x78] sm:$0x1] }
  0x57   : > { %v1294_v1 = vor.u32 %v1293_v19, %v1289_v17  ;;  %v562_v30 = vrot.slane %v560_v57, 7  ;;  %v571_v33 = vshll.u32 %v6809_v54, 16  ;;  %v435_v35 = vmul.f32 %v6556_v8, %v6227_v61  ;;  %v333_v6 = vld [vmem:[#allocation2 + $0x80] sm:$0x1] }
  0x58   : > { %1607 = vmatmul.bf16.gmra.mxu1 %v1499_v23  ;;  %v1285_v36 = vrot.slane %v1284_v32, 4  ;;  %v1020_v7 = vld [vmem:[#allocation2 + $0x9c] sm:$0xf]  ;;  %v570_v37 = vrot.slane %v568_v27, 7  ;;  %v322_v40 = vsel %vm6537_vm4, 0, %v321_v16  ;;  %v436_v31 = vmul.f32 %v6556_v8, %v6228_v26 }
  0x59   : > { %v1295_v39 = vrot.slane %v1294_v1, 4  ;;  %v1021_v49 = vld [vmem:[#allocation2 + $0xa0] sm:$0xf]  ;;  %v1374_v58 = vshrl.u32 %v1020_v7, 16  ;;  %v1377_v3 = vshll.u32 %v1020_v7, 16  ;;  %v565_v47 = vor.u32 %v563_v62, %v562_v30 }
  0x5a   : > { %v1290_v41 = vsel %vm6718_vm11, %v1285_v36, %v1289_v17  ;;  %v1055_v42 = vld [vmem:[#allocation2 + $0xa4] sm:$0x1]  ;;  %v1383_v43 = vshll.u32 %v1021_v49, 16  ;;  %v1387_v44 = vshrl.u32 %v1021_v49, 16  ;;  %v566_v45 = vrot.slane %v562_v30, 4  ;;  %v6866_v30 = vld [vmem:[%s6551_s27 + $0x68] sm:$0xff]  }
  0x5b   : > { %v1300_v46 = vsel %vm6718_vm11, %v1295_v39, %v1299_v25  ;;  %v1480_v50 = vunpack.c.l.b16 %v1290_v41  ;;  %v1376_v51 = vrot.slane %v1374_v58, 4  ;;  %v1379_v53 = vrot.slane %v1377_v3, 5  ;;  %323 = vst [vmem:[#allocation2 + $0x50] sm:$0x1] %v322_v40  ;;  %v289_v62 = vld [vmem:[#allocation2 + $0xa8] sm:$0x1] }
  0x5c   : > { %v1481_v54 = vunpack.c.l.b16 %v1300_v46  ;;  %v1385_v55 = vrot.slane %v1383_v43, 5  ;;  %v1389_v56 = vrot.slane %v1387_v44, 4  ;;  %v1393_v59 = vshll.u32 %v1055_v42, 16  ;;  %v345_v1 = vld [vmem:[#allocation2 + $0xb0] sm:$0x1] }
  0x5d   : > { %v1380_v61 = vor.u32 %v1379_v53, %v1376_v51  ;;  %v573_v26 = vor.u32 %v571_v33, %v570_v37  ;;  %v575_v63 = vrot.slane %v570_v37, 4  ;;  %v883_v0 = vsel %vm6624_vm8, %v565_v47, %v882_v38  ;;  %v6885_v47 = vld [vmem:[%s8052_s2] ss:$0 sm:$0xff]  ;;  %v917_v46 = vld [vmem:[#allocation2 + $0x48] sm:$0xf] }
  0x5e   : > { %v1503_v24 = vpack.c.b16 %v1481_v54, %v1480_v50  ;;  %v1390_v11 = vor.u32 %v1389_v56, %v1385_v55  ;;  %v1395_v13 = vrot.slane %v1393_v59, 5  ;;  %884 = vst [vmem:[#allocation2 + $0xc] sm:$0xf] %v883_v0  ;;  %v471_v15 = vadd.f32 %v6566_v14, %v435_v35 }
  0x5f   : > { %v1381_v16 = vrot.slane %v1380_v61, 4  ;;  %v574_v17 = vsel %vm6614_vm7, %v566_v45, %v573_v26  ;;  %v887_v19 = vsel %vm6531_vm2, %v575_v63, %v886_v60  ;;  %v472_v57 = vadd.f32 %v6566_v14, %v436_v31 }
  0x60   : > { %1627 = vmatmul.bf16.gmra.mxu2 %v1503_v24  ;;  %v1391_v21 = vrot.slane %v1390_v11, 4  ;;  %885 = vst [vmem:[#allocation2 + $0x10] sm:$0xf] %v574_v17  ;;  %v503_v22 = vmax.f32 %v471_v15, 0.0  ;;  %v278_v23 = vsel %vm6531_vm2, 0, %v277_v5  ;;  %v334_v32 = vsel %vm6537_vm4, 0, %v333_v6 }
  0x61   : > { %v1386_v25 = vsel %vm6718_vm11, %v1381_v16, %v1385_v55  ;;  %888 = vst [vmem:[#allocation2 + $0x14] sm:$0x1] %v887_v19  ;;  %v504_v27 = vmax.f32 %v472_v57, 0.0  ;;  %v6244_v28 = vunpack.c.h.bf16 %v6805_v48  ;;  %v443_v29 = vmul.f32 %v6556_v8, %v6243_v10  ;;  %v6875_v48 = vld [vmem:[%s8051_s1] ss:$0 sm:$0xff] }
  0x62   : > { %v1396_v33 = vsel %vm6718_vm11, %v1391_v21, %v1395_v13  ;;  %v1488_v34 = vunpack.c.l.b16 %v1386_v25  ;;  %v535_v20 = vpack.c.bf16 %v503_v22, %v503_v22  ;;  %279 = vst [vmem:[#allocation2 + $0x78] sm:$0x1] %v278_v23  ;;  %v290_v35 = vsel %vm6531_vm2, 0, %v289_v62  ;;  %v921_v5 = vld [vmem:[#allocation2 + $0x50] sm:$0x1] }
  0x63   : > { %v1489_v36 = vunpack.c.l.b16 %v1396_v33  ;;  %v536_v7 = vpack.c.bf16 %v504_v27, %v504_v27  ;;  %335 = vst [vmem:[#allocation2 + $0x80] sm:$0x1] %v334_v32  ;;  %v444_v8 = vmul.f32 %v6875_v48, %v6244_v28  ;;  %v479_v10 = vadd.f32 %v6566_v14, %v443_v29  ;;  %v253_v23 = vld [vmem:[#allocation2 + $0x18] sm:$0x1]  ;;  %v309_v29 = vld [vmem:[#allocation2 + $0x20] sm:$0x1] }
  0x64   : > { %v645_v37 = vshrl.u32 %v535_v20, 16  ;;  %v648_v38 = vshll.u32 %v535_v20, 16  ;;  %291 = vst [vmem:[#allocation2 + $0xa8] sm:$0x1] %v290_v35  ;;  %v346_v40 = vsel %vm6537_vm4, 0, %v345_v1  ;;  %v6259_v31 = vunpack.c.l.bf16 %v6866_v30 }
  0x65   : > { %v1507_v39 = vpack.c.b16 %v1489_v36, %v1488_v34  ;;  %v996_v49 = vld [vmem:[#allocation2 + $0xc] sm:$0xf]  ;;  %v653_v58 = vshrl.u32 %v536_v7, 16  ;;  %v656_v3 = vshll.u32 %v536_v7, 16  ;;  %v480_v12 = vadd.f32 %v6885_v47, %v444_v8  ;;  %347 = vst [vmem:[#allocation2 + $0xb0] sm:$0x1] %v346_v40 }
  0x66   : > { %v1086_v14 = vshrl.u32 %v996_v49, 16  ;;  %v1089_v41 = vshll.u32 %v996_v49, 16  ;;  %v647_v42 = vrot.slane %v645_v37, 7  ;;  %v511_v43 = vmax.f32 %v479_v10, 0.0  ;;  %v6349_v8 = vld [vmem:[%s6551_s27 + $0x8] sm:$0xff]  }
  0x67   : > { %1647 = vmatmul.bf16.gmra.mxu3 %v1507_v39  ;;  %v6888_v44 = vld [vmem:[#allocation2 + $0x10] sm:$0xf]  ;;  %v655_v45 = vrot.slane %v653_v58, 7  ;;  %v512_v50 = vmax.f32 %v480_v12, 0.0  ;;  %v6260_v51 = vunpack.c.h.bf16 %v6866_v30  ;;  %v451_v53 = vmul.f32 %v6875_v48, %v6259_v31 }
  0x68   : > { %v6892_v54 = vld [vmem:[#allocation2 + $0x14] sm:$0x1]  ;;  %v1088_v55 = vrot.slane %v1086_v14, 4  ;;  %v1091_v56 = vrot.slane %v1089_v41, 5  ;;  %v1095_v59 = vshll.u32 %v6888_v44, 16  ;;  %v1099_v60 = vshrl.u32 %v6888_v44, 16 }
  0x69   : > { %v1105_v61 = vshll.u32 %v6892_v54, 16  ;;  %v650_v26 = vor.u32 %v648_v38, %v647_v42  ;;  %v651_v63 = vrot.slane %v647_v42, 4  ;;  %v658_v0 = vor.u32 %v656_v3, %v655_v45  ;;  %v945_v38 = vld [vmem:[#allocation2 + $0x78] sm:$0xf] }
  0x6a   : > { %v1092_v6 = vor.u32 %v1091_v56, %v1088_v55  ;;  %v1097_v24 = vrot.slane %v1095_v59, 5  ;;  %v1101_v11 = vrot.slane %v1099_v60, 4  ;;  %v660_v13 = vrot.slane %v655_v45, 4  ;;  %v949_v3 = vld [vmem:[#allocation2 + $0x80] sm:$0x1] }
  0x6b   : > { %v1107_v15 = vrot.slane %v1105_v61, 5  ;;  %v659_v16 = vsel %vm6614_vm7, %v651_v63, %v658_v0  ;;  %v918_v17 = vsel %vm6624_vm8, %v650_v26, %v917_v46  ;;  %v543_v19 = vpack.c.bf16 %v511_v43, %v511_v43 }
  0x6c   : > { %v1093_v57 = vrot.slane %v1092_v6, 4  ;;  %v1102_v62 = vor.u32 %v1101_v11, %v1097_v24  ;;  %919 = vst [vmem:[#allocation2 + $0x48] sm:$0xf] %v918_v17  ;;  %v922_v21 = vsel %vm6531_vm2, %v660_v13, %v921_v5  ;;  %v544_v22 = vpack.c.bf16 %v512_v50, %v512_v50 }
  0x6d   : > { %920 = vst [vmem:[#allocation2 + $0x4c] sm:$0xf] %v659_v16  ;;  %v713_v32 = vshrl.u32 %v543_v19, 16  ;;  %v716_v25 = vshll.u32 %v543_v19, 16  ;;  %v452_v27 = vmul.f32 %v6875_v48, %v6260_v51  ;;  %v487_v28 = vadd.f32 %v6885_v47, %v451_v53 }
  0x6e   : > { %v1098_v1 = vsel %vm6718_vm11, %v1093_v57, %v1097_v24  ;;  %v1103_v30 = vrot.slane %v1102_v62, 4  ;;  %923 = vst [vmem:[#allocation2 + $0x50] sm:$0x1] %v922_v21  ;;  %v721_v33 = vshrl.u32 %v544_v22, 16  ;;  %v724_v34 = vshll.u32 %v544_v22, 16  ;;  %v6120_v21 = vld [vmem:[%s8053_s3 + $0x98] sm:$0xff] }
  0x6f   : > { %v1464_v20 = vunpack.c.l.b16 %v1098_v1  ;;  %v715_v35 = vrot.slane %v713_v32, 7  ;;  %v488_v36 = vadd.f32 %v6885_v47, %v452_v27  ;;  %v519_v7 = vmax.f32 %v487_v28, 0.0  ;;  %v268_v24 = vld [vmem:[#allocation2 + $0x54] sm:$0x1]  ;;  %2192 = vmatpush.bf16.msrb.mxu2 %v6120_v21 }
  0x70   : > { %v1108_v10 = vsel %vm6718_vm11, %v1103_v30, %v1107_v15  ;;  %v723_v37 = vrot.slane %v721_v33, 7  ;;  %v254_v40 = vsel %vm6531_vm2, 0, %v253_v23  ;;  %v310_v31 = vsel %vm6537_vm4, 0, %v309_v29  ;;  %v973_v29 = vld [vmem:[#allocation2 + $0xa8] sm:$0xf] }
  0x71   : > { %v1465_v39 = vunpack.c.l.b16 %v1108_v10  ;;  %v718_v49 = vor.u32 %v716_v25, %v715_v35  ;;  %v719_v58 = vrot.slane %v715_v35, 4  ;;  %v520_v12 = vmax.f32 %v488_v36, 0.0  ;;  %255 = vst [vmem:[#allocation2 + $0x18] sm:$0x1] %v254_v40  ;;  %v977_v35 = vld [vmem:[#allocation2 + $0xb0] sm:$0x1] }
  0x72   : > { %v726_v14 = vor.u32 %v724_v34, %v723_v37  ;;  %v728_v41 = vrot.slane %v723_v37, 4  ;;  %v551_v42 = vpack.c.bf16 %v519_v7, %v519_v7  ;;  %311 = vst [vmem:[#allocation2 + $0x20] sm:$0x1] %v310_v31  ;;  %v6211_v43 = vunpack.c.l.bf16 %v6349_v8 }
  0x73   : > { %v1495_v45 = vpack.c.b16 %v1465_v39, %v1464_v20  ;;  %v1006_v46 = vld [vmem:[#allocation2 + $0x48] sm:$0xf]  ;;  %v946_v50 = vsel %vm6624_vm8, %v718_v49, %v945_v38  ;;  %v552_v51 = vpack.c.bf16 %v520_v12, %v520_v12  ;;  %v6212_v53 = vunpack.c.h.bf16 %v6349_v8 }
  0x74   : > { %v1007_v55 = vld [vmem:[#allocation2 + $0x4c] sm:$0xf]  ;;  %v1206_v56 = vshrl.u32 %v1006_v46, 16  ;;  %v1209_v59 = vshll.u32 %v1006_v46, 16  ;;  %v727_v60 = vsel %vm6614_vm7, %v719_v58, %v726_v14  ;;  %947 = vst [vmem:[#allocation2 + $0x78] sm:$0xf] %v946_v50  ;;  %v950_v61 = vsel %vm6531_vm2, %v728_v41, %v949_v3 }
  0x75   : > { %1587 = vmatmul.bf16.gmra.mxu0 %v1495_v45  ;;  %v1048_v26 = vld [vmem:[#allocation2 + $0x50] sm:$0x1]  ;;  %v1215_v63 = vshll.u32 %v1007_v55, 16  ;;  %v1219_v0 = vshrl.u32 %v1007_v55, 16  ;;  %948 = vst [vmem:[#allocation2 + $0x7c] sm:$0xf] %v727_v60  ;;  %v427_v5 = vmul.f32 %v6875_v48, %v6211_v43  ;;  %v428_v6 = vmul.f32 %v6875_v48, %v6212_v53 }
  0x76   : > { %v1208_v11 = vrot.slane %v1206_v56, 4  ;;  %v1211_v13 = vrot.slane %v1209_v59, 5  ;;  %v1225_v15 = vshll.u32 %v1048_v26, 16  ;;  %951 = vst [vmem:[#allocation2 + $0x80] sm:$0x1] %v950_v61  ;;  %v781_v16 = vshrl.u32 %v551_v42, 16 }
  0x77   : > { %v1217_v17 = vrot.slane %v1215_v63, 5  ;;  %v1221_v19 = vrot.slane %v1219_v0, 4  ;;  %v784_v57 = vshll.u32 %v551_v42, 16  ;;  %v789_v62 = vshrl.u32 %v552_v51, 16  ;;  %v6354_v53 = vld [vmem:[%s6551_s27 + $0x30] sm:$0xff]  }
  0x78   : > { %v1212_v22 = vor.u32 %v1211_v13, %v1208_v11  ;;  %v1227_v23 = vrot.slane %v1225_v15, 5  ;;  %v783_v32 = vrot.slane %v781_v16, 7  ;;  %v792_v25 = vshll.u32 %v552_v51, 16  ;;  %v324_v51 = vld [vmem:[#allocation2 + $0x5c] sm:$0x1]  ;;  %v6942_v61 = vld [vmem:[%s6551_s27 + $0x50] sm:$0xff]  }
  0x79   : > { %v1222_v27 = vor.u32 %v1221_v19, %v1217_v17  ;;  %v791_v28 = vrot.slane %v789_v62, 7  ;;  %v463_v1 = vadd.f32 %v6885_v47, %v427_v5  ;;  %v464_v30 = vadd.f32 %v6885_v47, %v428_v6  ;;  %v6144_v11 = vld [vmem:[%s8053_s3 + $0xd8] sm:$0xff]  ;;  %v6153_v13 = vld [vmem:[%s8053_s3 + $0x120] sm:$0xff]  ;;  %v6119_v62 = vld [vmem:[%s8053_s3 + $0x90] sm:$0xff] }
  0x7a   : > { %v1213_v33 = vrot.slane %v1212_v22, 4  ;;  %v786_v34 = vor.u32 %v784_v57, %v783_v32  ;;  %v787_v20 = vrot.slane %v783_v32, 4  ;;  %v269_v36 = vsel %vm6531_vm2, 0, %v268_v24  ;;  %v6104_v15 = vld [vmem:[%s8053_s3 + $0x18] sm:$0xff]  ;;  %v280_v22 = vld [vmem:[#allocation2 + $0x84] sm:$0x1]  ;;  %2506 = vmatpush.bf16.msrb.mxu3 %v6144_v11  ;;  %3187 = vmatpush.bf16.msrb.mxu0 %v6153_v13 }
  0x7b   : > { %v1223_v7 = vrot.slane %v1222_v27, 4  ;;  %v1014_v8 = vld [vmem:[#allocation2 + $0x78] sm:$0xf]  ;;  %v794_v10 = vor.u32 %v792_v25, %v791_v28  ;;  %v796_v37 = vrot.slane %v791_v28, 4  ;;  %v495_v38 = vmax.f32 %v463_v1, 0.0  ;;  %v6143_v28 = vld [vmem:[%s8053_s3 + $0xd0] sm:$0xff]  ;;  %1811 = vmatpush.bf16.msrb.mxu1 %v6104_v15  ;;  %2193 = vmatpush.bf16.msrb.mxu2 %v6119_v62 }
  0x7c   : > { %v1218_v40 = vsel %vm6718_vm11, %v1213_v33, %v1217_v17  ;;  %v1015_v31 = vld [vmem:[#allocation2 + $0x7c] sm:$0xf]  ;;  %v1302_v39 = vshrl.u32 %v1014_v8, 16  ;;  %v1305_v49 = vshll.u32 %v1014_v8, 16  ;;  %v974_v58 = vsel %vm6624_vm8, %v786_v34, %v973_v29  ;;  %270 = vst [vmem:[#allocation2 + $0x54] sm:$0x1] %v269_v36 }
  0x7d   : > { %v1228_v3 = vsel %vm6718_vm11, %v1223_v7, %v1227_v23  ;;  %v1474_v12 = vunpack.c.l.b16 %v1218_v40  ;;  %v1052_v14 = vld [vmem:[#allocation2 + $0x80] sm:$0x1]  ;;  %v1311_v41 = vshll.u32 %v1015_v31, 16  ;;  %v1315_v42 = vshrl.u32 %v1015_v31, 16  ;;  %975 = vst [vmem:[#allocation2 + $0xa8] sm:$0xf] %v974_v58 }
  0x7e   : > { %v1475_v43 = vunpack.c.l.b16 %v1228_v3  ;;  %v1304_v45 = vrot.slane %v1302_v39, 4  ;;  %v1307_v46 = vrot.slane %v1305_v49, 5  ;;  %v1321_v50 = vshll.u32 %v1052_v14, 16  ;;  %v6152_v29 = vld [vmem:[%s8053_s3 + $0x118] sm:$0xff]  ;;  %2507 = vmatpush.bf16.msrb.mxu3 %v6143_v28 }
  0x7f   : > { %v1313_v55 = vrot.slane %v1311_v41, 5  ;;  %v1317_v56 = vrot.slane %v1315_v42, 4  ;;  %v795_v59 = vsel %vm6614_vm7, %v787_v20, %v794_v10  ;;  %v978_v60 = vsel %vm6531_vm2, %v796_v37, %v977_v35  ;;  %v6103_v35 = vld [vmem:[%s8053_s3 + $0x10] sm:$0xff]  ;;  %v889_v39 = vld [vmem:[#allocation2 + $0x18] sm:$0xf]  ;;  %3188 = vmatpush.bf16.msrb.mxu0 %v6152_v29 }
  0x80   : > { %v1500_v26 = vpack.c.b16 %v1475_v43, %v1474_v12  ;;  %v1308_v63 = vor.u32 %v1307_v46, %v1304_v45  ;;  %v1323_v0 = vrot.slane %v1321_v50, 5  ;;  %976 = vst [vmem:[#allocation2 + $0xac] sm:$0xf] %v795_v59  ;;  %v496_v5 = vmax.f32 %v464_v30, 0.0  ;;  %1812 = vmatpush.bf16.msrb.mxu1 %v6103_v35  ;;  %v893_v59 = vld [vmem:[#allocation2 + $0x20] sm:$0x1] }
  0x81   : > { %v1318_v6 = vor.u32 %v1317_v56, %v1313_v55  ;;  %979 = vst [vmem:[#allocation2 + $0xb0] sm:$0x1] %v978_v60  ;;  %v527_v24 = vpack.c.bf16 %v495_v38, %v495_v38  ;;  %v325_v16 = vsel %vm6537_vm4, 0, %v324_v51  ;;  %v6231_v17 = vunpack.c.l.bf16 %v6354_v53  ;;  %v336_v60 = vld [vmem:[#allocation2 + $0x8c] sm:$0x1] }
  0x82   : > { %1612 = vmatmul.bf16.gmra.mxu1 %v1500_v26  ;;  %v1309_v19 = vrot.slane %v1308_v63, 4  ;;  %v528_v57 = vpack.c.bf16 %v496_v5, %v496_v5  ;;  %326 = vst [vmem:[#allocation2 + $0x5c] sm:$0x1] %v325_v16  ;;  %v6232_v21 = vunpack.c.h.bf16 %v6354_v53  ;;  %v6247_v23 = vunpack.c.l.bf16 %v6942_v61 }
  0x83   : > { %v1319_v32 = vrot.slane %v1318_v6, 4  ;;  %v577_v25 = vshrl.u32 %v527_v24, 16  ;;  %v580_v27 = vshll.u32 %v527_v24, 16  ;;  %v437_v1 = vmul.f32 %v6875_v48, %v6231_v17  ;;  %v292_v6 = vld [vmem:[#allocation2 + $0xb4] sm:$0x1] }
  0x84   : > { %v1314_v30 = vsel %vm6718_vm11, %v1309_v19, %v1313_v55  ;;  %v1022_v33 = vld [vmem:[#allocation2 + $0xa8] sm:$0xf]  ;;  %v585_v34 = vshrl.u32 %v528_v57, 16  ;;  %v588_v20 = vshll.u32 %v528_v57, 16  ;;  %v438_v36 = vmul.f32 %v6875_v48, %v6232_v21 }
  0x85   : > { %v1324_v7 = vsel %vm6718_vm11, %v1319_v32, %v1323_v0  ;;  %v1482_v8 = vunpack.c.l.b16 %v1314_v30  ;;  %v1398_v10 = vshrl.u32 %v1022_v33, 16  ;;  %v1401_v37 = vshll.u32 %v1022_v33, 16  ;;  %v6362_v30 = vld [vmem:[%s6551_s27 + $0x70] sm:$0xff]  }
  0x86   : > { %v1483_v38 = vunpack.c.l.b16 %v1324_v7  ;;  %v579_v40 = vrot.slane %v577_v25, 7  ;;  %v587_v31 = vrot.slane %v585_v34, 7  ;;  %v473_v49 = vadd.f32 %v6885_v47, %v437_v1  ;;  %v348_v25 = vld [vmem:[#allocation2 + $0xbc] sm:$0x1] }
  0x87   : > { %v1023_v58 = vld [vmem:[#allocation2 + $0xac] sm:$0xf]  ;;  %v1400_v3 = vrot.slane %v1398_v10, 4  ;;  %v1403_v12 = vrot.slane %v1401_v37, 5  ;;  %v474_v14 = vadd.f32 %v6885_v47, %v438_v36  ;;  %v281_v41 = vsel %vm6531_vm2, 0, %v280_v22 }
  0x88   : > { %v1504_v42 = vpack.c.b16 %v1483_v38, %v1482_v8  ;;  %v1056_v43 = vld [vmem:[#allocation2 + $0xb0] sm:$0x1]  ;;  %v1407_v45 = vshll.u32 %v1023_v58, 16  ;;  %v1411_v46 = vshrl.u32 %v1023_v58, 16  ;;  %v582_v50 = vor.u32 %v580_v27, %v579_v40  ;;  %282 = vst [vmem:[#allocation2 + $0x84] sm:$0x1] %v281_v41 }
  0x89   : > { %v1404_v51 = vor.u32 %v1403_v12, %v1400_v3  ;;  %v1417_v53 = vshll.u32 %v1056_v43, 16  ;;  %v583_v55 = vrot.slane %v579_v40, 4  ;;  %v590_v56 = vor.u32 %v588_v20, %v587_v31  ;;  %v256_v36 = vld [vmem:[#allocation2 + $0x24] sm:$0x1]  ;;  %v924_v38 = vld [vmem:[#allocation2 + $0x54] sm:$0xf] }
  0x8a   : > { %1632 = vmatmul.bf16.gmra.mxu2 %v1504_v42  ;;  %v1409_v26 = vrot.slane %v1407_v45, 5  ;;  %v1413_v63 = vrot.slane %v1411_v46, 4  ;;  %v592_v0 = vrot.slane %v587_v31, 4  ;;  %v890_v5 = vsel %vm6624_vm8, %v582_v50, %v889_v39  ;;  %v928_v58 = vld [vmem:[#allocation2 + $0x5c] sm:$0x1] }
  0x8b   : > { %v1405_v24 = vrot.slane %v1404_v51, 4  ;;  %v1419_v11 = vrot.slane %v1417_v53, 5  ;;  %v591_v13 = vsel %vm6614_vm7, %v583_v55, %v590_v56  ;;  %891 = vst [vmem:[#allocation2 + $0x18] sm:$0xf] %v890_v5  ;;  %v505_v15 = vmax.f32 %v473_v49, 0.0 }
  0x8c   : > { %v1414_v16 = vor.u32 %v1413_v63, %v1409_v26  ;;  %892 = vst [vmem:[#allocation2 + $0x1c] sm:$0xf] %v591_v13  ;;  %v894_v17 = vsel %vm6531_vm2, %v592_v0, %v893_v59  ;;  %v506_v19 = vmax.f32 %v474_v14, 0.0  ;;  %v337_v57 = vsel %vm6537_vm4, 0, %v336_v60  ;;  %v7016_v13 = vld [vmem:[%s6551_s27 + $0x10] sm:$0xff]  }
  0x8d   : > { %v1410_v62 = vsel %vm6718_vm11, %v1405_v24, %v1409_v26  ;;  %895 = vst [vmem:[#allocation2 + $0x20] sm:$0x1] %v894_v17  ;;  %v537_v21 = vpack.c.bf16 %v505_v15, %v505_v15  ;;  %v6248_v22 = vunpack.c.h.bf16 %v6942_v61  ;;  %v445_v32 = vmul.f32 %v6875_v48, %v6247_v23 }
  0x8e   : > { %v1415_v27 = vrot.slane %v1414_v16, 4  ;;  %v1490_v28 = vunpack.c.l.b16 %v1410_v62  ;;  %v538_v29 = vpack.c.bf16 %v506_v19, %v506_v19  ;;  %338 = vst [vmem:[#allocation2 + $0x8c] sm:$0x1] %v337_v57  ;;  %v293_v1 = vsel %vm6531_vm2, 0, %v292_v6 }
  0x8f   : > { %v662_v33 = vshrl.u32 %v537_v21, 16  ;;  %v665_v34 = vshll.u32 %v537_v21, 16  ;;  %v446_v20 = vmul.f32 %v6875_v48, %v6248_v22  ;;  %v481_v35 = vadd.f32 %v6885_v47, %v445_v32  ;;  %294 = vst [vmem:[#allocation2 + $0xb4] sm:$0x1] %v293_v1 }
  0x90   : > { %v1420_v61 = vsel %vm6718_vm11, %v1415_v27, %v1419_v11  ;;  %v670_v23 = vshrl.u32 %v538_v29, 16  ;;  %v673_v7 = vshll.u32 %v538_v29, 16  ;;  %v349_v8 = vsel %vm6537_vm4, 0, %v348_v25  ;;  %v312_v11 = vld [vmem:[#allocation2 + $0x2c] sm:$0x1] }
  0x91   : > { %v1491_v10 = vunpack.c.l.b16 %v1420_v61  ;;  %v664_v37 = vrot.slane %v662_v33, 7  ;;  %v482_v40 = vadd.f32 %v6885_v47, %v446_v20  ;;  %v513_v31 = vmax.f32 %v481_v35, 0.0  ;;  %350 = vst [vmem:[#allocation2 + $0xbc] sm:$0x1] %v349_v8 }
  0x92   : > { %v998_v39 = vld [vmem:[#allocation2 + $0x18] sm:$0xf]  ;;  %v672_v49 = vrot.slane %v670_v23, 7  ;;  %v6263_v3 = vunpack.c.l.bf16 %v6362_v30  ;;  %v6264_v12 = vunpack.c.h.bf16 %v6362_v30  ;;  %v257_v14 = vsel %vm6531_vm2, 0, %v256_v36 }
  0x93   : > { %v1508_v41 = vpack.c.b16 %v1491_v10, %v1490_v28  ;;  %v7004_v42 = vld [vmem:[#allocation2 + $0x1c] sm:$0xf]  ;;  %v1110_v43 = vshrl.u32 %v998_v39, 16  ;;  %v1113_v45 = vshll.u32 %v998_v39, 16  ;;  %v667_v46 = vor.u32 %v665_v34, %v664_v37  ;;  %258 = vst [vmem:[#allocation2 + $0x24] sm:$0x1] %v257_v14 }
  0x94   : > { %v7006_v50 = vld [vmem:[#allocation2 + $0x20] sm:$0x1]  ;;  %v1119_v51 = vshll.u32 %v7004_v42, 16  ;;  %v1123_v53 = vshrl.u32 %v7004_v42, 16  ;;  %v668_v55 = vrot.slane %v664_v37, 4  ;;  %v675_v56 = vor.u32 %v673_v7, %v672_v49 }
  0x95   : > { %1652 = vmatmul.bf16.gmra.mxu3 %v1508_v41  ;;  %v1112_v59 = vrot.slane %v1110_v43, 4  ;;  %v1115_v60 = vrot.slane %v1113_v45, 5  ;;  %v1129_v26 = vshll.u32 %v7006_v50, 16  ;;  %v677_v63 = vrot.slane %v672_v49, 4 }
  0x96   : > { %v1121_v0 = vrot.slane %v1119_v51, 5  ;;  %v1125_v5 = vrot.slane %v1123_v53, 4  ;;  %v676_v6 = vsel %vm6614_vm7, %v668_v55, %v675_v56  ;;  %v925_v24 = vsel %vm6624_vm8, %v667_v46, %v924_v38  ;;  %v952_v38 = vld [vmem:[#allocation2 + $0x84] sm:$0xf]  ;;  %v956_v51 = vld [vmem:[#allocation2 + $0x8c] sm:$0x1] }
  0x97   : > { %v1116_v15 = vor.u32 %v1115_v60, %v1112_v59  ;;  %v1131_v16 = vrot.slane %v1129_v26, 5  ;;  %926 = vst [vmem:[#allocation2 + $0x54] sm:$0xf] %v925_v24  ;;  %v929_v17 = vsel %vm6531_vm2, %v677_v63, %v928_v58  ;;  %v514_v19 = vmax.f32 %v482_v40, 0.0  ;;  %v6118_v26 = vld [vmem:[%s8053_s3 + $0x88] sm:$0xff] }
  0x98   : > { %v1126_v57 = vor.u32 %v1125_v5, %v1121_v0  ;;  %927 = vst [vmem:[#allocation2 + $0x58] sm:$0xf] %v676_v6  ;;  %v545_v62 = vpack.c.bf16 %v513_v31, %v513_v31  ;;  %v453_v21 = vmul.f32 %v6875_v48, %v6263_v3  ;;  %v454_v22 = vmul.f32 %v6875_v48, %v6264_v12 }
  0x99   : > { %v1117_v32 = vrot.slane %v1116_v15, 4  ;;  %930 = vst [vmem:[#allocation2 + $0x5c] sm:$0x1] %v929_v17  ;;  %v546_v25 = vpack.c.bf16 %v514_v19, %v514_v19  ;;  %v313_v27 = vsel %vm6537_vm4, 0, %v312_v11  ;;  %v6215_v28 = vunpack.c.l.bf16 %v7016_v13  ;;  %2194 = vmatpush.bf16.msrb.mxu2 %v6118_v26 }
  0x9a   : > { %v1127_v29 = vrot.slane %v1126_v57, 4  ;;  %v730_v1 = vshrl.u32 %v545_v62, 16  ;;  %v733_v30 = vshll.u32 %v545_v62, 16  ;;  %v489_v33 = vadd.f32 %v6885_v47, %v453_v21  ;;  %314 = vst [vmem:[#allocation2 + $0x2c] sm:$0x1] %v313_v27 }
  0x9b   : > { %v1122_v34 = vsel %vm6718_vm11, %v1117_v32, %v1121_v0  ;;  %v738_v20 = vshrl.u32 %v546_v25, 16  ;;  %v741_v35 = vshll.u32 %v546_v25, 16  ;;  %v490_v36 = vadd.f32 %v6885_v47, %v454_v22 }
  0x9c   : > { %v1132_v61 = vsel %vm6718_vm11, %v1127_v29, %v1131_v16  ;;  %v1466_v23 = vunpack.c.l.b16 %v1122_v34  ;;  %v732_v7 = vrot.slane %v730_v1, 7  ;;  %v521_v8 = vmax.f32 %v489_v33, 0.0 }
  0x9d   : > { %v1467_v10 = vunpack.c.l.b16 %v1132_v61  ;;  %v740_v37 = vrot.slane %v738_v20, 7  ;;  %v522_v40 = vmax.f32 %v490_v36, 0.0  ;;  %v6216_v31 = vunpack.c.h.bf16 %v7016_v13  ;;  %v984_v36 = vld [vmem:[#allocation2 + $0xbc] sm:$0x1] }
  0x9e   : > { %v1008_v39 = vld [vmem:[#allocation2 + $0x54] sm:$0xf]  ;;  %v735_v49 = vor.u32 %v733_v30, %v732_v7  ;;  %v736_v58 = vrot.slane %v732_v7, 4  ;;  %v553_v3 = vpack.c.bf16 %v521_v8, %v521_v8  ;;  %v429_v12 = vmul.f32 %v6875_v48, %v6215_v28 }
  0x9f   : > { %v1496_v14 = vpack.c.b16 %v1467_v10, %v1466_v23  ;;  %v7033_v41 = vld [vmem:[#allocation2 + $0x58] sm:$0xf]  ;;  %v1230_v43 = vshrl.u32 %v1008_v39, 16  ;;  %v1233_v45 = vshll.u32 %v1008_v39, 16  ;;  %v743_v46 = vor.u32 %v741_v35, %v740_v37  ;;  %v980_v30 = vld [vmem:[#allocation2 + $0xb4] sm:$0xf] }
  0xa0   : > { %v7035_v53 = vld [vmem:[#allocation2 + $0x5c] sm:$0x1]  ;;  %v1239_v55 = vshll.u32 %v7033_v41, 16  ;;  %v1243_v56 = vshrl.u32 %v7033_v41, 16  ;;  %v745_v59 = vrot.slane %v740_v37, 4  ;;  %v953_v60 = vsel %vm6624_vm8, %v735_v49, %v952_v38 }
  0xa1   : > { %1592 = vmatmul.bf16.gmra.mxu0 %v1496_v14  ;;  %v1232_v63 = vrot.slane %v1230_v43, 4  ;;  %v1235_v0 = vrot.slane %v1233_v45, 5  ;;  %v1249_v5 = vshll.u32 %v7035_v53, 16  ;;  %v744_v6 = vsel %vm6614_vm7, %v736_v58, %v743_v46  ;;  %954 = vst [vmem:[#allocation2 + $0x84] sm:$0xf] %v953_v60 }
  0xa2   : > { %v1241_v24 = vrot.slane %v1239_v55, 5  ;;  %v1245_v11 = vrot.slane %v1243_v56, 4  ;;  %955 = vst [vmem:[#allocation2 + $0x88] sm:$0xf] %v744_v6  ;;  %v957_v13 = vsel %vm6531_vm2, %v745_v59, %v956_v51  ;;  %v554_v15 = vpack.c.bf16 %v522_v40, %v522_v40 }
  0xa3   : > { %v1236_v16 = vor.u32 %v1235_v0, %v1232_v63  ;;  %v1251_v17 = vrot.slane %v1249_v5, 5  ;;  %958 = vst [vmem:[#allocation2 + $0x8c] sm:$0x1] %v957_v13  ;;  %v798_v19 = vshrl.u32 %v553_v3, 16  ;;  %v801_v57 = vshll.u32 %v553_v3, 16  ;;  %v6151_v13 = vld [vmem:[%s8053_s3 + $0x110] sm:$0xff] }
  0xa4   : > { %v1246_v62 = vor.u32 %v1245_v11, %v1241_v24  ;;  %v806_v21 = vshrl.u32 %v554_v15, 16  ;;  %v809_v22 = vshll.u32 %v554_v15, 16  ;;  %v430_v32 = vmul.f32 %v6875_v48, %v6216_v31  ;;  %v6142_v11 = vld [vmem:[%s8053_s3 + $0xc8] sm:$0xff]  ;;  %3189 = vmatpush.bf16.msrb.mxu0 %v6151_v13 }
  0xa5   : > { %v1237_v25 = vrot.slane %v1236_v16, 4  ;;  %v800_v27 = vrot.slane %v798_v19, 7  ;;  %v465_v28 = vadd.f32 %v6885_v47, %v429_v12  ;;  %v6102_v15 = vld [vmem:[%s8053_s3 + $0x8] sm:$0xff]  ;;  %2508 = vmatpush.bf16.msrb.mxu3 %v6142_v11  ;;  %vm1945_vm13 = vcmask 1046532  }
  0xa6   : > { %v1247_v29 = vrot.slane %v1246_v62, 4  ;;  %v808_v1 = vrot.slane %v806_v21, 7  ;;  %v466_v33 = vadd.f32 %v6885_v47, %v430_v32  ;;  %v6141_v32 = vld [vmem:[%s8053_s3 + $0xc0] sm:$0xff]  ;;  %1813 = vmatpush.bf16.msrb.mxu1 %v6102_v15  ;;  %vm7101_vm14 = vmor %vm1944_vm12, %vm1945_vm13  ;;  %vm5326_vm15 = vcmask 1041408  }
  0xa7   : > { %v1242_v34 = vsel %vm6718_vm11, %v1237_v25, %v1241_v24  ;;  %v803_v20 = vor.u32 %v801_v57, %v800_v27  ;;  %v804_v35 = vrot.slane %v800_v27, 4  ;;  %v497_v61 = vmax.f32 %v465_v28, 0.0  ;;  %v6117_v57 = vld [vmem:[%s8053_s3 + $0x80] sm:$0xff]  ;;  %v6150_v25 = vld [vmem:[%s8053_s3 + $0x108] sm:$0xff] }
  0xa8   : > { %v1252_v23 = vsel %vm6718_vm11, %v1247_v29, %v1251_v17  ;;  %v1476_v48 = vunpack.c.l.b16 %v1242_v34  ;;  %v1016_v7 = vld [vmem:[#allocation2 + $0x84] sm:$0xf]  ;;  %v811_v8 = vor.u32 %v809_v22, %v808_v1  ;;  %v813_v10 = vrot.slane %v808_v1, 4  ;;  %2195 = vmatpush.bf16.msrb.mxu2 %v6117_v57  ;;  %3190 = vmatpush.bf16.msrb.mxu0 %v6150_v25 }
  0xa9   : > { %v1477_v37 = vunpack.c.l.b16 %v1252_v23  ;;  %v1017_v38 = vld [vmem:[#allocation2 + $0x88] sm:$0xf]  ;;  %v1326_v40 = vshrl.u32 %v1016_v7, 16  ;;  %v1329_v31 = vshll.u32 %v1016_v7, 16  ;;  %v981_v47 = vsel %vm6624_vm8, %v803_v20, %v980_v30  ;;  %v6416_v27 = vld [vmem:[#allocation2 + $0x4] sm:$0xf]  ;;  %2509 = vmatpush.bf16.msrb.mxu3 %v6141_v32 }
  0xaa   : > { %v1053_v39 = vld [vmem:[#allocation2 + $0x8c] sm:$0x1]  ;;  %v1335_v49 = vshll.u32 %v1017_v38, 16  ;;  %v1339_v58 = vshrl.u32 %v1017_v38, 16  ;;  %v812_v3 = vsel %vm6614_vm7, %v804_v35, %v811_v8  ;;  %982 = vst [vmem:[#allocation2 + $0xb4] sm:$0xf] %v981_v47  ;;  %v985_v12 = vsel %vm6531_vm2, %v813_v10, %v984_v36 }
  0xab   : > { %v1501_v14 = vpack.c.b16 %v1477_v37, %v1476_v48  ;;  %v1328_v43 = vrot.slane %v1326_v40, 4  ;;  %v1331_v45 = vrot.slane %v1329_v31, 5  ;;  %v1345_v46 = vshll.u32 %v1053_v39, 16  ;;  %983 = vst [vmem:[#allocation2 + $0xb8] sm:$0xf] %v812_v3  ;;  %v6101_v20 = vld [vmem:[%s8053_s3] sm:$0xff] }
  0xac   : > { %v1337_v51 = vrot.slane %v1335_v49, 5  ;;  %v1341_v55 = vrot.slane %v1339_v58, 4  ;;  %986 = vst [vmem:[#allocation2 + $0xbc] sm:$0x1] %v985_v12  ;;  %v498_v56 = vmax.f32 %v466_v33, 0.0  ;;  %v529_v59 = vpack.c.bf16 %v497_v61, %v497_v61  ;;  %v6188_v40 = vld [vmem:[%s8053_s3 + $0x1b8] sm:$0xff]  ;;  %1814 = vmatpush.bf16.msrb.mxu1 %v6101_v20 }
  0xad   : > { %1617 = vmatmul.bf16.gmra.mxu1 %v1501_v14  ;;  %v1332_v60 = vor.u32 %v1331_v45, %v1328_v43  ;;  %v1347_v63 = vrot.slane %v1345_v46, 5  ;;  %v1949_v28 = vrot.slane %v6416_v27, 5  ;;  %v896_v7 = vld [vmem:[#allocation2 + $0x24] sm:$0xf]  ;;  %v1896_v3 = vld [vmem:[#allocation2] sm:$0xe]  ;;  %3925 = vmatpush.bf16.msra.mxu2 %v6188_v40 }
  0xae   : > { %v1342_v26 = vor.u32 %v1341_v55, %v1337_v51  ;;  %v530_v0 = vpack.c.bf16 %v498_v56, %v498_v56  ;;  %v594_v5 = vshrl.u32 %v529_v59, 16  ;;  %v597_v24 = vshll.u32 %v529_v59, 16  ;;  %v6149_v58 = vld [vmem:[%s8053_s3 + $0x100] sm:$0xff]  ;;  %v900_v43 = vld [vmem:[#allocation2 + $0x2c] sm:$0x1] }
  0xaf   : > { %v1333_v6 = vrot.slane %v1332_v60, 4  ;;  %v5569_v59 = vrot.slane %v1896_v3, 9  ;;  %v1951_v60 = vrot.slane %v1949_v28, 4  ;;  %3191 = vmatpush.bf16.msrb.mxu0 %v6149_v58 }
  0xb0   : > { %v1343_v16 = vrot.slane %v1342_v26, 4  ;;  %v596_v17 = vrot.slane %v594_v5, 7  ;;  %v602_v19 = vshrl.u32 %v530_v0, 16  ;;  %v605_v22 = vshll.u32 %v530_v0, 16  ;;  %v6417_v26 = vld [vmem:[#allocation2 + $0x8] sm:$0x1] }
  0xb1   : > { %v1338_v62 = vsel %vm6718_vm11, %v1333_v6, %v1337_v51  ;;  %v1024_v21 = vld [vmem:[#allocation2 + $0xb4] sm:$0xf] }
  0xb2   : > { %v1348_v29 = vsel %vm6718_vm11, %v1343_v16, %v1347_v63  ;;  %v1484_v1 = vunpack.c.l.b16 %v1338_v62  ;;  %v1025_v30 = vld [vmem:[#allocation2 + $0xb8] sm:$0xf]  ;;  %v1422_v33 = vshrl.u32 %v1024_v21, 16  ;;  %v1425_v34 = vshll.u32 %v1024_v21, 16 }
  0xb3   : > { %v1485_v35 = vunpack.c.l.b16 %v1348_v29  ;;  %v1057_v36 = vld [vmem:[#allocation2 + $0xbc] sm:$0x1]  ;;  %v1431_v61 = vshll.u32 %v1025_v30, 16  ;;  %v1435_v23 = vshrl.u32 %v1025_v30, 16  ;;  %v599_v48 = vor.u32 %v597_v24, %v596_v17  ;;  %v6085_v24 = vld [vmem:[#allocation2] sm:$0xff] }
  0xb4   : > { %v1424_v8 = vrot.slane %v1422_v33, 4  ;;  %v1427_v10 = vrot.slane %v1425_v34, 5  ;;  %v1441_v37 = vshll.u32 %v1057_v36, 16  ;;  %v600_v38 = vrot.slane %v596_v17, 4  ;;  %v6196_v30 = vld [vmem:[%s8053_s3 + $0x1f8] sm:$0xff] }
  0xb5   : > { %v1505_v31 = vpack.c.b16 %v1485_v35, %v1484_v1  ;;  %v1433_v47 = vrot.slane %v1431_v61, 5  ;;  %v1437_v39 = vrot.slane %v1435_v23, 4  ;;  %v604_v49 = vrot.slane %v602_v19, 7  ;;  %v2624_v1 = vld [vmem:[#allocation2 + $0x10] sm:$0xf]  ;;  %v6204_v33 = vld [vmem:[%s8053_s3 + $0x238] sm:$0xff]  ;;  %4607 = vmatpush.bf16.msra.mxu3 %v6196_v30 }
  0xb6   : > { %v1428_v12 = vor.u32 %v1427_v10, %v1424_v8  ;;  %v897_v14 = vsel %vm6624_vm8, %v599_v48, %v896_v7  ;;  %v1443_v46 = vrot.slane %v1441_v37, 5  ;;  %v1952_v63 = vrot.slane %v6417_v26, 5  ;;  %5033 = vmatpush.bf16.msra.mxu0 %v6204_v33  ;;  %v6187_v30 = vld [vmem:[%s8053_s3 + $0x1b0] sm:$0xff] }
  0xb7   : > { %1637 = vmatmul.bf16.gmra.mxu2 %v1505_v31  ;;  %v1438_v45 = vor.u32 %v1437_v39, %v1433_v47  ;;  %v607_v51 = vor.u32 %v605_v22, %v604_v49  ;;  %v609_v55 = vrot.slane %v604_v49, 4  ;;  %898 = vst [vmem:[#allocation2 + $0x24] sm:$0xf] %v897_v14  ;;  %v1950_v19 = vsel %vm7101_vm14, %v5569_v59, %v1949_v28  ;;  %v2623_v22 = vld [vmem:[#allocation2 + $0xc] sm:$0xf]  ;;  %v6164_v28 = vld [vmem:[%s8053_s3 + $0x178] sm:$0xff] }
  0xb8   : > { %v1429_v56 = vrot.slane %v1428_v12, 4  ;;  %v1953_v57 = vsel %vm7101_vm14, %v1951_v60, %v1952_v63  ;;  %v2076_v27 = vunpack.c.l.b16 %v1950_v19  ;;  %v2672_v36 = vshrl.u32 %v2623_v22, 16  ;;  %3610 = vmatpush.bf16.msra.mxu1 %v6164_v28  ;;  %v1897_v12 = vld [vmem:[#allocation2 + $0xc] sm:$0xe]  ;;  %v2627_v28 = vld [vmem:[#allocation2 + $0x1c] sm:$0xf]  ;;  %3926 = vmatpush.bf16.msra.mxu2 %v6187_v30 }
  0xb9   : > { %v1439_v0 = vrot.slane %v1438_v45, 4  ;;  %v608_v5 = vsel %vm6614_vm7, %v600_v38, %v607_v51  ;;  %v901_v6 = vsel %vm6531_vm2, %v609_v55, %v900_v43  ;;  %v2077_v29 = vunpack.c.l.b16 %v1953_v57  ;;  %v2625_v55 = vld [vmem:[#allocation2 + $0x14] sm:$0x1] }
  0xba   : > { %v1434_v13 = vsel %vm6718_vm11, %v1429_v56, %v1433_v47  ;;  %899 = vst [vmem:[#allocation2 + $0x28] sm:$0xf] %v608_v5  ;;  %v2675_v61 = vshll.u32 %v2623_v22, 16  ;;  %v2681_v8 = vshll.u32 %v2624_v1, 16  ;;  %v2685_v10 = vshrl.u32 %v2624_v1, 16 }
  0xbb   : > { %v1444_v15 = vsel %vm6718_vm11, %v1439_v0, %v1443_v46  ;;  %v1492_v16 = vunpack.c.l.b16 %v1434_v13  ;;  %902 = vst [vmem:[#allocation2 + $0x2c] sm:$0x1] %v901_v6  ;;  %v2108_v40 = vpack.c.b16 %v2077_v29, %v2076_v27  ;;  %v1956_v39 = vrot.slane %v6888_v44, 5  ;;  %v6086_v44 = vld [vmem:[#allocation2 + $0xc] sm:$0xff]  ;;  %v2626_v29 = vld [vmem:[#allocation2 + $0x18] sm:$0xf] }
  0xbc   : > { %v1493_v17 = vunpack.c.l.b16 %v1444_v15  ;;  %v2674_v58 = vrot.slane %v2672_v36, 4  ;;  %v2677_v3 = vrot.slane %v2675_v61, 5  ;;  %v2683_v45 = vrot.slane %v2681_v8, 5  ;;  %v6125_v15 = vld [vmem:[#allocation2 + $0xc] sm:$0xff] }
  0xbd   : > { %1815 = vmatmul.bf16.vlgmr.msrb.gmra.mxu1 %v6085_v24  ;;  %v2687_v46 = vrot.slane %v2685_v10, 4  ;;  %v5570_v59 = vrot.slane %v1897_v12, 9  ;;  %v1958_v60 = vrot.slane %v1956_v39, 4  ;;  %v1959_v26 = vrot.slane %v6892_v54, 5  ;;  %v6087_v12 = vld [vmem:[#allocation2 + $0x18] sm:$0xff] }
  0xbe   : > { %v1509_v62 = vpack.c.b16 %v1493_v17, %v1492_v16  ;;  %v1000_v21 = vld [vmem:[#allocation2 + $0x24] sm:$0xf]  ;;  %v2678_v5 = vor.u32 %v2677_v3, %v2674_v58  ;;  %v2691_v24 = vshll.u32 %v2625_v55, 16  ;;  %v1966_v27 = vrot.slane %v7006_v50, 5  ;;  %v2628_v3 = vld [vmem:[#allocation2 + $0x20] sm:$0x1] }
  0xbf   : > { %v1134_v32 = vshrl.u32 %v1000_v21, 16  ;;  %v1137_v25 = vshll.u32 %v1000_v21, 16  ;;  %v2688_v6 = vor.u32 %v2687_v46, %v2683_v45  ;;  %v1957_v16 = vsel %vm7101_vm14, %v5570_v59, %v1956_v39  ;;  %v2629_v55 = vld [vmem:[#allocation2 + $0x24] sm:$0xf]  ;;  %v6163_v59 = vld [vmem:[%s8053_s3 + $0x170] sm:$0xff] }
  0xc0   : > { %1657 = vmatmul.bf16.gmra.mxu3 %v1509_v62  ;;  %v1960_v17 = vsel %vm7101_vm14, %v1958_v60, %v1959_v26  ;;  %v2679_v57 = vrot.slane %v2678_v5, 4  ;;  %v2693_v62 = vrot.slane %v2691_v24, 5  ;;  %v2078_v21 = vunpack.c.l.b16 %v1957_v16  ;;  %v6203_v60 = vld [vmem:[%s8053_s3 + $0x230] sm:$0xff]  ;;  %3611 = vmatpush.bf16.msra.mxu1 %v6163_v59  ;;  %v2634_v59 = vld [vmem:[#allocation2 + $0x38] sm:$0x1] }
  0xc1   : > { %v7122_v34 = vld [vmem:[#allocation2 + $0x28] sm:$0xf]  ;;  %v1136_v20 = vrot.slane %v1134_v32, 4  ;;  %v1139_v35 = vrot.slane %v1137_v25, 5  ;;  %v2689_v54 = vrot.slane %v2688_v6, 4  ;;  %v2079_v22 = vunpack.c.l.b16 %v1960_v17  ;;  %5034 = vmatpush.bf16.msra.mxu0 %v6203_v60 }
  0xc2   : > { %v7124_v23 = vld [vmem:[#allocation2 + $0x2c] sm:$0x1]  ;;  %v1143_v48 = vshll.u32 %v7122_v34, 16  ;;  %v1147_v7 = vshrl.u32 %v7122_v34, 16  ;;  %v1898_v32 = vld [vmem:[#allocation2 + $0x18] sm:$0xe] }
  0xc3   : > { %v1140_v37 = vor.u32 %v1139_v35, %v1136_v20  ;;  %v1153_v38 = vshll.u32 %v7124_v23, 16  ;;  %v1963_v25 = vrot.slane %v7004_v42, 5  ;;  %v5571_v1 = vrot.slane %v1898_v32, 9  ;;  %v2631_v32 = vld [vmem:[#allocation2 + $0x2c] sm:$0x1]  ;;  %v6088_v30 = vld [vmem:[#allocation2 + $0x24] sm:$0xff] }
  0xc4   : > { %v1145_v31 = vrot.slane %v1143_v48, 5  ;;  %v1149_v47 = vrot.slane %v1147_v7, 4  ;;  %v2684_v20 = vsel %vm6718_vm11, %v2679_v57, %v2683_v45  ;;  %v2694_v35 = vsel %vm6718_vm11, %v2689_v54, %v2693_v62 }
  0xc5   : > { %v1141_v49 = vrot.slane %v1140_v37, 4  ;;  %v1155_v43 = vrot.slane %v1153_v38, 5  ;;  %v1965_v33 = vrot.slane %v1963_v25, 4  ;;  %v1964_v42 = vsel %vm7101_vm14, %v5571_v1, %v1963_v25 }
  0xc6   : > { %v1150_v14 = vor.u32 %v1149_v47, %v1145_v31  ;;  %v2109_v50 = vpack.c.b16 %v2079_v22, %v2078_v21  ;;  %v2696_v36 = vshrl.u32 %v2626_v29, 16  ;;  %v2080_v48 = vunpack.c.l.b16 %v1964_v42 }
  0xc7   : > { %v1146_v51 = vsel %vm6718_vm11, %v1141_v49, %v1145_v31  ;;  %2196 = vmatmul.bf16.vlgmr.msrb.gmra.mxu2 %v2108_v40  ;;  %v1967_v61 = vsel %vm7101_vm14, %v1965_v33, %v1966_v27  ;;  %v2699_v7 = vshll.u32 %v2626_v29, 16  ;;  %v2705_v8 = vshll.u32 %v2627_v28, 16 }
  0xc8   : > { %v1151_v56 = vrot.slane %v1150_v14, 4  ;;  %v1468_v63 = vunpack.c.l.b16 %v1146_v51  ;;  %v2709_v10 = vshrl.u32 %v2627_v28, 16  ;;  %v2081_v37 = vunpack.c.l.b16 %v1967_v61 }
  0xc9   : > { %v3072_v40 = vunpack.c.l.b16 %v2684_v20  ;;  %v3073_v31 = vunpack.c.l.b16 %v2694_v35  ;;  %v2698_v47 = vrot.slane %v2696_v36, 4  ;;  %v2701_v39 = vrot.slane %v2699_v7, 5  ;;  %v6127_v35 = vld [vmem:[#allocation2 + $0x24] sm:$0xff] }
  0xca   : > { %v1156_v0 = vsel %vm6718_vm11, %v1151_v56, %v1155_v43  ;;  %v2110_v38 = vpack.c.b16 %v2081_v37, %v2080_v48  ;;  %v2707_v49 = vrot.slane %v2705_v8, 5  ;;  %v2711_v58 = vrot.slane %v2709_v10, 4  ;;  %v6126_v43 = vld [vmem:[#allocation2 + $0x18] sm:$0xff]  ;;  %v6195_v56 = vld [vmem:[%s8053_s3 + $0x1f0] sm:$0xff]  ;;  %v6186_v37 = vld [vmem:[%s8053_s3 + $0x1a8] sm:$0xff] }
  0xcb   : > { %v1469_v13 = vunpack.c.l.b16 %v1156_v0  ;;  %v3104_v14 = vpack.c.b16 %v3073_v31, %v3072_v40  ;;  %v2702_v45 = vor.u32 %v2701_v39, %v2698_v47  ;;  %v2715_v51 = vshll.u32 %v2628_v3, 16  ;;  %v2630_v0 = vld [vmem:[#allocation2 + $0x28] sm:$0xf]  ;;  %4608 = vmatpush.bf16.msra.mxu3 %v6195_v56  ;;  %v2632_v8 = vld [vmem:[#allocation2 + $0x30] sm:$0xf]  ;;  %3927 = vmatpush.bf16.msra.mxu2 %v6186_v37 }
  0xcc   : > { %v2712_v46 = vor.u32 %v2711_v58, %v2707_v49  ;;  %v2720_v5 = vshrl.u32 %v2629_v55, 16  ;;  %v2723_v6 = vshll.u32 %v2629_v55, 16  ;;  %v2729_v24 = vshll.u32 %v2630_v0, 16  ;;  %v2633_v10 = vld [vmem:[#allocation2 + $0x34] sm:$0xf] }
  0xcd   : > { %v1497_v19 = vpack.c.b16 %v1469_v13, %v1468_v63  ;;  %1820 = vmatmul.bf16.gmra.mxu1 %v6086_v44  ;;  %v2703_v26 = vrot.slane %v2702_v45, 4  ;;  %v2717_v44 = vrot.slane %v2715_v51, 5  ;;  %v2733_v16 = vshrl.u32 %v2630_v0, 16  ;;  %v6418_v3 = vld [vmem:[#allocation2 + $0x34] sm:$0xf]  ;;  %v7178_v45 = vpop.f32.mrf.mxu1 }
  0xce   : > { %v2713_v63 = vrot.slane %v2712_v46, 4  ;;  %v1970_v17 = vrot.slane %v7122_v34, 5  ;;  %v2722_v57 = vrot.slane %v2720_v5, 4  ;;  %v2725_v54 = vrot.slane %v2723_v6, 5  ;;  %v6089_v5 = vld [vmem:[#allocation2 + $0x30] sm:$0xff] }
  0xcf   : > { %1597 = vmatmul.bf16.gmra.mxu0 %v1497_v19  ;;  %v2708_v13 = vsel %vm6718_vm11, %v2703_v26, %v2707_v49  ;;  %v1899_v19 = vld [vmem:[#allocation2 + $0x24] sm:$0xe]  ;;  %v2731_v22 = vrot.slane %v2729_v24, 5  ;;  %v2735_v25 = vrot.slane %v2733_v16, 4  ;;  %v1973_v1 = vrot.slane %v7124_v23, 5 }
  0xd0   : > { %2510 = vmatmul.bf16.vlgmr.msrb.gmra.mxu3 %v6125_v15  ;;  %v2718_v15 = vsel %vm6718_vm11, %v2713_v63, %v2717_v44  ;;  %v3074_v62 = vunpack.c.l.b16 %v2708_v13  ;;  %v5572_v27 = vrot.slane %v1899_v19, 9  ;;  %v1972_v29 = vrot.slane %v1970_v17, 4  ;;  %v6419_v44 = vld [vmem:[#allocation2 + $0x38] sm:$0x1]  ;;  %v6128_v13 = vld [vmem:[#allocation2 + $0x30] sm:$0xff] }
  0xd1   : > { %v3075_v21 = vunpack.c.l.b16 %v2718_v15  ;;  %v2726_v28 = vor.u32 %v2725_v54, %v2722_v57  ;;  %v2739_v20 = vshll.u32 %v2631_v32, 16  ;;  %v2736_v42 = vor.u32 %v2735_v25, %v2731_v22  ;;  %v2635_v57 = vld [vmem:[#allocation2 + $0x3c] sm:$0xf]  ;;  %v6162_v32 = vld [vmem:[%s8053_s3 + $0x168] sm:$0xff] }
  0xd2   : > { %v1971_v34 = vsel %vm7101_vm14, %v5572_v27, %v1970_v17  ;;  %v2744_v31 = vshrl.u32 %v2632_v8, 16  ;;  %v2747_v47 = vshll.u32 %v2632_v8, 16  ;;  %v2753_v39 = vshll.u32 %v2633_v10, 16  ;;  %v6202_v25 = vld [vmem:[%s8053_s3 + $0x228] sm:$0xff]  ;;  %3612 = vmatpush.bf16.msra.mxu1 %v6162_v32 }
  0xd3   : > { %v3105_v33 = vpack.c.b16 %v3075_v21, %v3074_v62  ;;  %v2727_v36 = vrot.slane %v2726_v28, 4  ;;  %v2741_v61 = vrot.slane %v2739_v20, 5  ;;  %v2082_v48 = vunpack.c.l.b16 %v1971_v34  ;;  %v6194_v21 = vld [vmem:[%s8053_s3 + $0x1e8] sm:$0xff]  ;;  %5035 = vmatpush.bf16.msra.mxu0 %v6202_v25 }
  0xd4   : > { %v2737_v23 = vrot.slane %v2736_v42, 4  ;;  %v2757_v58 = vshrl.u32 %v2633_v10, 16  ;;  %v2746_v51 = vrot.slane %v2744_v31, 4  ;;  %v2749_v55 = vrot.slane %v2747_v47, 5  ;;  %4609 = vmatpush.bf16.msra.mxu3 %v6194_v21  ;;  %v2637_v31 = vld [vmem:[#allocation2 + $0x44] sm:$0x1] }
  0xd5   : > { %v2755_v56 = vrot.slane %v2753_v39, 5  ;;  %v1980_v0 = vrot.slane %v6419_v44, 5  ;;  %v2763_v24 = vshll.u32 %v2634_v59, 16  ;;  %v7195_v28 = vpop.f32.mrf.mxu1  ;;  %v2771_v20 = vshll.u32 %v2635_v57, 16  ;;  %v7211_v44 = vpop.f32.mrf.mxu0 }
  0xd6   : > { %v2742_v49 = vsel %vm6718_vm11, %v2737_v23, %v2741_v61  ;;  %v2759_v60 = vrot.slane %v2757_v58, 4  ;;  %v2750_v15 = vor.u32 %v2749_v55, %v2746_v51  ;;  %v6420_v61 = vld [vmem:[#allocation2 + $0x40] sm:$0xf]  ;;  %v2787_v55 = vshll.u32 %v2637_v31, 16 }
  0xd7   : > { %2201 = vmatmul.bf16.gmra.mxu2 %v2109_v50  ;;  %v1974_v50 = vsel %vm7101_vm14, %v1972_v29, %v1973_v1  ;;  %v3077_v46 = vunpack.c.l.b16 %v2742_v49  ;;  %v2765_v1 = vrot.slane %v2763_v24, 5  ;;  %v2773_v8 = vrot.slane %v2771_v20, 5 }
  0xd8   : > { %v2083_v7 = vunpack.c.l.b16 %v1974_v50  ;;  %v2760_v16 = vor.u32 %v2759_v60, %v2755_v56  ;;  %v2751_v27 = vrot.slane %v2750_v15, 4  ;;  %v2639_v15 = vld [vmem:[#allocation2 + $0x4c] sm:$0xf] }
  0xd9   : > { %v2801_v25 = vshll.u32 %v2639_v15, 16 }
  0xda   : > { %v2111_v40 = vpack.c.b16 %v2083_v7, %v2082_v48  ;;  %v2761_v29 = vrot.slane %v2760_v16, 4  ;;  %v2756_v34 = vsel %vm6718_vm11, %v2751_v27, %v2755_v56  ;;  %v1984_v48 = vrot.slane %v6420_v61, 5  ;;  %v1901_v7 = vld [vmem:[#allocation2 + $0x3c] sm:$0xe] }
  0xdb   : > { %v3078_v10 = vunpack.c.l.b16 %v2756_v34  ;;  %v5574_v58 = vrot.slane %v1901_v7, 9  ;;  %v6129_v56 = vld [vmem:[#allocation2 + $0x3c] sm:$0xff] }
  0xdc   : > { %v2766_v50 = vsel %vm6718_vm11, %v2761_v29, %v2765_v1  ;;  %v2805_v29 = vshrl.u32 %v2639_v15, 16  ;;  %v6422_v1 = vld [vmem:[#allocation2 + $0x4c] sm:$0xf] }
  0xdd   : > { %1825 = vmatmul.bf16.gmra.mxu1 %v6087_v12  ;;  %v1977_v12 = vrot.slane %v6418_v3, 5  ;;  %v3079_v37 = vunpack.c.l.b16 %v2766_v50  ;;  %v7205_v49 = vpop.f32.mrf.mxu1  ;;  %v1986_v3 = vrot.slane %v1984_v48, 4  ;;  %v1985_v60 = vsel %vm7101_vm14, %v5574_v58, %v1984_v48 }
  0xde   : > { %v2803_v50 = vrot.slane %v2801_v25, 5  ;;  %v2807_v61 = vrot.slane %v2805_v29, 4  ;;  %v1998_v29 = vrot.slane %v7033_v41, 5 }
  0xdf   : > { %3192 = vmatmul.bf16.vlgmr.msrb.gmra.mxu0 %v3104_v14  ;;  %v1900_v14 = vld [vmem:[#allocation2 + $0x30] sm:$0xe]  ;;  %v1979_v63 = vrot.slane %v1977_v12, 4  ;;  %v3107_v51 = vpack.c.b16 %v3079_v37, %v3078_v10  ;;  %v7228_v37 = vpop.f32.mrf.mxu0 }
  0xe0   : > { %2515 = vmatmul.bf16.gmra.mxu3 %v6126_v43  ;;  %v5573_v26 = vrot.slane %v1900_v14, 9 }
  0xe1   : > { %v1981_v19 = vsel %vm7101_vm14, %v1979_v63, %v1980_v0  ;;  %v2789_v0 = vrot.slane %v2787_v55, 5  ;;  %v2641_v55 = vld [vmem:[#allocation2 + $0x54] sm:$0xf] }
  0xe2   : > { %v1978_v17 = vsel %vm7101_vm14, %v5573_v26, %v1977_v12  ;;  %v2085_v62 = vunpack.c.l.b16 %v1981_v19  ;;  %v6421_v12 = vld [vmem:[#allocation2 + $0x44] sm:$0x1]  ;;  %v2816_v15 = vshrl.u32 %v2641_v55, 16 }
  0xe3   : > { %v2084_v54 = vunpack.c.l.b16 %v1978_v17  ;;  %v1987_v14 = vrot.slane %v6421_v12, 5  ;;  %v6185_v17 = vld [vmem:[%s8053_s3 + $0x1a0] sm:$0xff] }
  0xe4   : > { %3928 = vmatpush.bf16.msra.mxu2 %v6185_v17  ;;  %v2819_v17 = vshll.u32 %v2641_v55, 16 }
  0xe5   : > { %v1988_v26 = vsel %vm7101_vm14, %v1986_v3, %v1987_v14  ;;  %v7213_v16 = vpop.f32.mrf.mxu1  ;;  %v6130_v3 = vld [vmem:[#allocation2 + $0x48] sm:$0xff]  ;;  %v2808_v14 = vor.u32 %v2807_v61, %v2803_v50 }
  0xe7   : > { %2206 = vmatmul.bf16.gmra.mxu2 %v2110_v38  ;;  %v2732_v38 = vsel %vm6718_vm11, %v2727_v36, %v2731_v22  ;;  %v7187_v22 = vpop.f32.mrf.mxu2 }
  0xe8   : > { %v3076_v43 = vunpack.c.l.b16 %v2732_v38 }
  0xea   : > { %v3106_v6 = vpack.c.b16 %v3077_v46, %v3076_v43  ;;  %v6090_v43 = vld [vmem:[#allocation2 + $0x3c] sm:$0xff] }
  0xed   : > { %1830 = vmatmul.bf16.gmra.mxu1 %v6088_v30  ;;  %v2636_v30 = vld [vmem:[#allocation2 + $0x40] sm:$0xf] }
  0xee   : > { %v2777_v42 = vshll.u32 %v2636_v30, 16  ;;  %v2781_v36 = vshrl.u32 %v2636_v30, 16  ;;  %v1991_v30 = vrot.slane %v6422_v1, 5 }
  0xef   : > { %3197 = vmatmul.bf16.gmra.mxu0 %v3105_v33  ;;  %v2768_v33 = vshrl.u32 %v2635_v57, 16  ;;  %v7203_v39 = vpop.f32.mrf.mxu2 }
  0xf0   : > { %2520 = vmatmul.bf16.gmra.mxu3 %v6127_v35  ;;  %v2112_v35 = vpack.c.b16 %v2085_v62, %v2084_v54  ;;  %v2779_v38 = vrot.slane %v2777_v42, 5  ;;  %v2783_v47 = vrot.slane %v2781_v36, 4  ;;  %v2640_v36 = vld [vmem:[#allocation2 + $0x50] sm:$0x1] }
  0xf1   : > { %v2770_v23 = vrot.slane %v2768_v33, 4  ;;  %v1902_v33 = vld [vmem:[#allocation2 + $0x48] sm:$0xe] }
  0xf2   : > { %v2784_v59 = vor.u32 %v2783_v47, %v2779_v38  ;;  %v5575_v7 = vrot.slane %v1902_v33, 9  ;;  %v2811_v47 = vshll.u32 %v2640_v36, 16  ;;  %v2818_v33 = vrot.slane %v2816_v15, 4 }
  0xf3   : > { %v2774_v46 = vor.u32 %v2773_v8, %v2770_v23  ;;  %v1993_v23 = vrot.slane %v1991_v30, 4  ;;  %v6423_v8 = vld [vmem:[#allocation2 + $0x50] sm:$0x1] }
  0xf4   : > { %v2785_v24 = vrot.slane %v2784_v59, 4  ;;  %v1994_v10 = vrot.slane %v6423_v8, 5  ;;  %v2643_v8 = vld [vmem:[#allocation2 + $0x5c] sm:$0x1] }
  0xf5   : > { %v2775_v63 = vrot.slane %v2774_v46, 4  ;;  %v1992_v46 = vsel %vm7101_vm14, %v5575_v7, %v1991_v30  ;;  %v1903_v30 = vld [vmem:[#allocation2 + $0x54] sm:$0xe] }
  0xf6   : > { %v2790_v27 = vsel %vm6718_vm11, %v2785_v24, %v2789_v0  ;;  %v2642_v24 = vld [vmem:[#allocation2 + $0x58] sm:$0xf]  ;;  %v5576_v7 = vrot.slane %v1903_v30, 9  ;;  %v1904_v30 = vld [vmem:[#allocation2 + $0x60] sm:$0xe] }
  0xf7   : > { %2211 = vmatmul.bf16.gmra.mxu2 %v2111_v40  ;;  %v7201_v40 = vpop.f32.mrf.mxu3  ;;  %v2780_v57 = vsel %vm6718_vm11, %v2775_v63, %v2779_v38  ;;  %v7222_v54 = vpop.f32.mrf.mxu2  ;;  %v6091_v38 = vld [vmem:[#allocation2 + $0x48] sm:$0xff]  ;;  %v6201_v63 = vld [vmem:[%s8053_s3 + $0x220] sm:$0xff] }
  0xf8   : > { %v3080_v20 = vunpack.c.l.b16 %v2780_v57  ;;  %5036 = vmatpush.bf16.msra.mxu0 %v6201_v63  ;;  %v7249_v57 = vpop.f32.mrf.mxu0 }
  0xfd   : > { %1835 = vmatmul.bf16.gmra.mxu1 %v6089_v5  ;;  %v2086_v5 = vunpack.c.l.b16 %v1985_v60  ;;  %v6193_v60 = vld [vmem:[%s8053_s3 + $0x1e0] sm:$0xff] }
  0xfe   : > { %4610 = vmatpush.bf16.msra.mxu3 %v6193_v60 }
  0xff   : > { %3202 = vmatmul.bf16.gmra.mxu0 %v3106_v6  ;;  %v2087_v6 = vunpack.c.l.b16 %v1988_v26  ;;  %v7218_v19 = vpop.f32.mrf.mxu3  ;;  %v7226_v48 = vpop.f32.mrf.mxu1  ;;  %v6161_v26 = vld [vmem:[%s8053_s3 + $0x160] sm:$0xff] }
 0x100   : > { %2525 = vmatmul.bf16.gmra.mxu3 %v6128_v13  ;;  %v2638_v13 = vld [vmem:[#allocation2 + $0x48] sm:$0xf]  ;;  %3613 = vmatpush.bf16.msra.mxu1 %v6161_v26 }
 0x101   : > { %v2113_v62 = vpack.c.b16 %v2087_v6, %v2086_v5  ;;  %v2792_v21 = vshrl.u32 %v2638_v13, 16  ;;  %v2795_v32 = vshll.u32 %v2638_v13, 16  ;;  %v2809_v5 = vrot.slane %v2808_v14, 4 }
 0x102   : > { %v2813_v6 = vrot.slane %v2811_v47, 5  ;;  %v6131_v47 = vld [vmem:[#allocation2 + $0x54] sm:$0xff]  ;;  %v1999_v14 = vsel %vm7101_vm14, %v5576_v7, %v1998_v29 }
 0x103   : > { %v2794_v42 = vrot.slane %v2792_v21, 4  ;;  %v2797_v34 = vrot.slane %v2795_v32, 5  ;;  %v2825_v21 = vshll.u32 %v2642_v24, 16 }
 0x104   : > { %v2814_v25 = vsel %vm6718_vm11, %v2809_v5, %v2813_v6  ;;  %v2645_v5 = vld [vmem:[#allocation2 + $0x64] sm:$0xf] }
 0x105   : > { %v2798_v12 = vor.u32 %v2797_v34, %v2794_v42  ;;  %v3083_v34 = vunpack.c.l.b16 %v2814_v25  ;;  %v2827_v36 = vrot.slane %v2825_v21, 5  ;;  %v2849_v21 = vshll.u32 %v2645_v5, 16 }
 0x106   : > { %v2853_v25 = vshrl.u32 %v2645_v5, 16  ;;  %v6184_v5 = vld [vmem:[%s8053_s3 + $0x198] sm:$0xff] }
 0x107   : > { %2216 = vmatmul.bf16.gmra.mxu2 %v2112_v35  ;;  %v3081_v35 = vunpack.c.l.b16 %v2790_v27  ;;  %v7230_v58 = vpop.f32.mrf.mxu3  ;;  %v2799_v0 = vrot.slane %v2798_v12, 4  ;;  %v7247_v13 = vpop.f32.mrf.mxu1  ;;  %v2829_v27 = vshrl.u32 %v2642_v24, 16  ;;  %v2835_v12 = vshll.u32 %v2643_v8, 16  ;;  %v6425_v8 = vld [vmem:[#allocation2 + $0x68] sm:$0x1] }
 0x108   : > { %v2855_v7 = vrot.slane %v2853_v25, 4  ;;  %3929 = vmatpush.bf16.msra.mxu2 %v6184_v5  ;;  %v2649_v5 = vld [vmem:[#allocation2 + $0x74] sm:$0x1] }
 0x109   : > { %v3108_v31 = vpack.c.b16 %v3081_v35, %v3080_v20  ;;  %v2804_v32 = vsel %vm6718_vm11, %v2799_v0, %v2803_v50  ;;  %v2821_v20 = vrot.slane %v2819_v17, 5  ;;  %v2831_v61 = vrot.slane %v2829_v27, 4  ;;  %v2644_v0 = vld [vmem:[#allocation2 + $0x60] sm:$0xf]  ;;  %v6424_v27 = vld [vmem:[#allocation2 + $0x64] sm:$0xf] }
 0x10a   : > { %v3082_v42 = vunpack.c.l.b16 %v2804_v32  ;;  %v2000_v50 = vrot.slane %v1998_v29, 4  ;;  %v2837_v26 = vrot.slane %v2835_v12, 5  ;;  %v2840_v17 = vshrl.u32 %v2644_v0, 16 }
 0x10b   : > { %v2005_v29 = vrot.slane %v6424_v27, 5 }
 0x10c   : > { %v3109_v41 = vpack.c.b16 %v3083_v34, %v3082_v42  ;;  %v2842_v34 = vrot.slane %v2840_v17, 4  ;;  %v2648_v17 = vld [vmem:[#allocation2 + $0x70] sm:$0xf] }
 0x10d   : > { %1840 = vmatmul.bf16.gmra.mxu1 %v6090_v43  ;;  %v7232_v43 = vpop.f32.mrf.mxu2 }
 0x10f   : > { %3207 = vmatmul.bf16.gmra.mxu0 %v3107_v51  ;;  %v1995_v51 = vsel %vm7101_vm14, %v1993_v23, %v1994_v10  ;;  %v7256_v1 = vpop.f32.mrf.mxu3  ;;  %v2001_v23 = vrot.slane %v7035_v53, 5  ;;  %v2822_v10 = vor.u32 %v2821_v20, %v2818_v33 }
 0x110   : > { %2530 = vmatmul.bf16.gmra.mxu3 %v6129_v56  ;;  %v2088_v56 = vunpack.c.l.b16 %v1992_v46  ;;  %v2089_v59 = vunpack.c.l.b16 %v1995_v51  ;;  %v7267_v51 = vpop.f32.mrf.mxu0 }
 0x111   : > { %v2002_v46 = vsel %vm7101_vm14, %v2000_v50, %v2001_v23  ;;  %v2823_v55 = vrot.slane %v2822_v10, 4  ;;  %v5577_v50 = vrot.slane %v1904_v30, 9  ;;  %v2007_v23 = vrot.slane %v2005_v29, 4 }
 0x112   : > { %v2008_v10 = vrot.slane %v6425_v8, 5 }
 0x113   : > { %v2828_v6 = vsel %vm6718_vm11, %v2823_v55, %v2827_v36  ;;  %v6093_v55 = vld [vmem:[#allocation2 + $0x60] sm:$0xff] }
 0x114   : > { %v3084_v33 = vunpack.c.l.b16 %v2828_v6  ;;  %v2647_v6 = vld [vmem:[#allocation2 + $0x6c] sm:$0xf] }
 0x115   : > { %v7258_v35 = vpop.f32.mrf.mxu2 }
 0x117   : > { %2221 = vmatmul.bf16.gmra.mxu2 %v2113_v62  ;;  %v2114_v62 = vpack.c.b16 %v2089_v59, %v2088_v56  ;;  %v2090_v56 = vunpack.c.l.b16 %v1999_v14  ;;  %v2091_v59 = vunpack.c.l.b16 %v2002_v46 }
 0x118   : > { %v7269_v53 = vpop.f32.mrf.mxu3 }
 0x119   : > { %v2115_v15 = vpack.c.b16 %v2091_v59, %v2090_v56  ;;  %v6132_v56 = vld [vmem:[#allocation2 + $0x60] sm:$0xff] }
 0x11d   : > { %1845 = vmatmul.bf16.gmra.mxu1 %v6091_v38  ;;  %v7271_v63 = vpop.f32.mrf.mxu2 }
 0x11e   : > { %v7279_v20 = vpop.f32.mrf.mxu0 }
 0x11f   : > { %3212 = vmatmul.bf16.gmra.mxu0 %v3108_v31  ;;  %v6092_v31 = vld [vmem:[#allocation2 + $0x54] sm:$0xff] }
 0x120   : > { %2535 = vmatmul.bf16.gmra.mxu3 %v6130_v3  ;;  %v2832_v3 = vor.u32 %v2831_v61, %v2827_v36  ;;  %v2851_v61 = vrot.slane %v2849_v21, 5  ;;  %v6160_v21 = vld [vmem:[%s8053_s3 + $0x158] sm:$0xff] }
 0x121   : > { %3614 = vmatpush.bf16.msra.mxu1 %v6160_v21  ;;  %v2883_v21 = vshll.u32 %v2649_v5, 16 }
 0x122   : > { %v2833_v60 = vrot.slane %v2832_v3, 4  ;;  %v2856_v59 = vor.u32 %v2855_v7, %v2851_v61 }
 0x124   : > { %v2838_v32 = vsel %vm6718_vm11, %v2833_v60, %v2837_v26  ;;  %v2006_v26 = vsel %vm7101_vm14, %v5577_v50, %v2005_v29  ;;  %v2857_v25 = vrot.slane %v2856_v59, 4 }
 0x125   : > { %v3085_v42 = vunpack.c.l.b16 %v2838_v32 }
 0x126   : > { %v7299_v29 = vpop.f32.mrf.mxu0 }
 0x127   : > { %2226 = vmatmul.bf16.gmra.mxu2 %v2114_v62  ;;  %v2843_v62 = vshll.u32 %v2644_v0, 16  ;;  %v3110_v12 = vpack.c.b16 %v3085_v42, %v3084_v33  ;;  %v2009_v0 = vsel %vm7101_vm14, %v2007_v23, %v2008_v10  ;;  %v2864_v33 = vshrl.u32 %v2647_v6, 16 }
 0x128   : > { %v2867_v42 = vshll.u32 %v2647_v6, 16 }
 0x129   : > { %v2845_v36 = vrot.slane %v2843_v62, 5  ;;  %v6192_v62 = vld [vmem:[%s8053_s3 + $0x1d8] sm:$0xff] }
 0x12a   : > { %v7261_v38 = vpop.f32.mrf.mxu1  ;;  %4611 = vmatpush.bf16.msra.mxu3 %v6192_v62 }
 0x12b   : > { %v2846_v14 = vor.u32 %v2845_v36, %v2842_v34  ;;  %v2873_v34 = vshll.u32 %v2648_v17, 16  ;;  %v2877_v36 = vshrl.u32 %v2648_v17, 16 }
 0x12d   : > { %1850 = vmatmul.bf16.gmra.mxu1 %v6092_v31  ;;  %v2646_v31 = vld [vmem:[#allocation2 + $0x68] sm:$0x1]  ;;  %v2847_v32 = vrot.slane %v2846_v14, 4  ;;  %v1905_v14 = vld [vmem:[#allocation2 + $0x6c] sm:$0xe]  ;;  %v2875_v59 = vrot.slane %v2873_v34, 5 }
 0x12e   : > { %v2859_v60 = vshll.u32 %v2646_v31, 16  ;;  %v6200_v31 = vld [vmem:[%s8053_s3 + $0x218] sm:$0xff]  ;;  %v6094_v34 = vld [vmem:[#allocation2 + $0x6c] sm:$0xff] }
 0x12f   : > { %3217 = vmatmul.bf16.gmra.mxu0 %v3109_v41  ;;  %v7281_v41 = vpop.f32.mrf.mxu3  ;;  %v2852_v8 = vsel %vm6718_vm11, %v2847_v32, %v2851_v61  ;;  %v5578_v61 = vrot.slane %v1905_v14, 9 }
 0x130   : > { %2540 = vmatmul.bf16.gmra.mxu3 %v6131_v47  ;;  %v2861_v27 = vrot.slane %v2859_v60, 5  ;;  %v2879_v60 = vrot.slane %v2877_v36, 4  ;;  %5037 = vmatpush.bf16.msra.mxu0 %v6200_v31 }
 0x132   : > { %v7275_v24 = vpop.f32.mrf.mxu1  ;;  %v2862_v10 = vsel %vm6718_vm11, %v2857_v25, %v2861_v27  ;;  %v2880_v62 = vor.u32 %v2879_v60, %v2875_v59 }
 0x134   : > { %v2881_v14 = vrot.slane %v2880_v62, 4 }
 0x137   : > { %2231 = vmatmul.bf16.gmra.mxu2 %v2115_v15  ;;  %v2092_v15 = vunpack.c.l.b16 %v2006_v26  ;;  %v3086_v26 = vunpack.c.l.b16 %v2852_v8 }
 0x13a   : > { %v7283_v47 = vpop.f32.mrf.mxu2  ;;  %v1816_v3 = vpop.f32.mrf.mxu1 }
 0x13b   : > { %v1817_v46 = vadd.f32 %v1816_v3, %v7211_v44  ;;  %v2093_v44 = vunpack.c.l.b16 %v2009_v0  ;;  %v6426_v3 = vld [vmem:[#allocation2 + $0x70] sm:$0xf]  ;;  %v3087_v0 = vunpack.c.l.b16 %v2862_v10 }
 0x13d   : > { %1855 = vmatmul.bf16.gmra.mxu1 %v6093_v55  ;;  %v2116_v23 = vpack.c.b16 %v2093_v44, %v2092_v15  ;;  %v2866_v55 = vrot.slane %v2864_v33, 4  ;;  %v6427_v15 = vld [vmem:[#allocation2 + $0x74] sm:$0x1]  ;;  %v3111_v27 = vpack.c.b16 %v3087_v0, %v3086_v26 }
 0x13e   : > { %v2015_v44 = vrot.slane %v6427_v15, 5 }
 0x13f   : > { %3222 = vmatmul.bf16.gmra.mxu0 %v3110_v12  ;;  %v2012_v12 = vrot.slane %v6426_v3, 5 }
 0x140   : > { %2545 = vmatmul.bf16.gmra.mxu3 %v6132_v56  ;;  %v2869_v56 = vrot.slane %v2867_v42, 5 }
 0x141   : > { %v2014_v6 = vrot.slane %v2012_v12, 4  ;;  %v2013_v8 = vsel %vm7101_vm14, %v5578_v61, %v2012_v12 }
 0x142   : > { %v7301_v30 = vpop.f32.mrf.mxu2  ;;  %v1818_v7 = vpop.f32.mrf.mxu1  ;;  %v2870_v17 = vor.u32 %v2869_v56, %v2866_v55  ;;  %v2885_v55 = vrot.slane %v2883_v21, 5  ;;  %v2094_v56 = vunpack.c.l.b16 %v2013_v8 }
 0x143   : > { %v7303_v50 = vpop.f32.mrf.mxu3  ;;  %v2016_v10 = vsel %vm7101_vm14, %v2014_v6, %v2015_v44  ;;  %v1819_v26 = vadd.f32 %v1818_v7, %v7228_v37  ;;  %v1906_v7 = vld [vmem:[#allocation2 + $0x78] sm:$0xe] }
 0x144   : > { %v2871_v31 = vrot.slane %v2870_v17, 4  ;;  %v2095_v60 = vunpack.c.l.b16 %v2016_v10  ;;  %v2886_v12 = vsel %vm6718_vm11, %v2881_v14, %v2885_v55  ;;  %v5579_v55 = vrot.slane %v1906_v7, 9 }
 0x146   : > { %v2876_v0 = vsel %vm6718_vm11, %v2871_v31, %v2875_v59  ;;  %v2117_v62 = vpack.c.b16 %v2095_v60, %v2094_v56  ;;  %v3089_v59 = vunpack.c.l.b16 %v2886_v12  ;;  %v2652_v60 = vld [vmem:[#allocation2 + $0x80] sm:$0x1] }
 0x147   : > { %2236 = vmatmul.bf16.gmra.mxu2 %v2116_v23  ;;  %v6133_v23 = vld [vmem:[#allocation2 + $0x6c] sm:$0xff] }
 0x14a   : > { %v2197_v32 = vpop.f32.mrf.mxu2  ;;  %v1821_v25 = vpop.f32.mrf.mxu1 }
 0x14b   : > { %v7312_v3 = vpop.f32.mrf.mxu3  ;;  %v2277_v33 = vadd.f32 %v2197_v32, %v1817_v46  ;;  %v1822_v42 = vadd.f32 %v1821_v25, %v7249_v57  ;;  %v2650_v46 = vld [vmem:[#allocation2 + $0x78] sm:$0xf]  ;;  %v2651_v57 = vld [vmem:[#allocation2 + $0x7c] sm:$0xf] }
 0x14c   : > { %8068 = vst [vmem:[#allocation3_spill] sm:$0xff] %v7312_v3  ;;  %v7315_v36 = vpop.f32.mrf.mxu0  ;;  %v2888_v61 = vshrl.u32 %v2650_v46, 16  ;;  %v2891_v6 = vshll.u32 %v2650_v46, 16  ;;  %v2897_v21 = vshll.u32 %v2651_v57, 16  ;;  %v2901_v32 = vshrl.u32 %v2651_v57, 16 }
 0x14d   : > { %1860 = vmatmul.bf16.gmra.mxu1 %v6094_v34  ;;  %v6428_v34 = vld [vmem:[#allocation2 + $0x7c] sm:$0xf] }
 0x14e   : > { %v2019_v37 = vrot.slane %v6428_v34, 5  ;;  %v2890_v8 = vrot.slane %v2888_v61, 4  ;;  %v2893_v10 = vrot.slane %v2891_v6, 5  ;;  %v7328_v31 = vrot.slane %v2897_v21, 5  ;;  %v6095_v61 = vld [vmem:[#allocation2 + $0x78] sm:$0xff] }
 0x14f   : > { %3227 = vmatmul.bf16.gmra.mxu0 %v3111_v27  ;;  %v2903_v14 = vrot.slane %v2901_v32, 4  ;;  %v6134_v21 = vld [vmem:[#allocation2 + $0x78] sm:$0xff]  ;;  %v2907_v32 = vshll.u32 %v2652_v60, 16 }
 0x150   : > { %2550 = vmatmul.bf16.gmra.mxu3 %v6133_v23  ;;  %v3088_v23 = vunpack.c.l.b16 %v2876_v0  ;;  %v2021_v46 = vrot.slane %v2019_v37, 4  ;;  %v2020_v7 = vsel %vm7101_vm14, %v5579_v55, %v2019_v37  ;;  %v6191_v37 = vld [vmem:[%s8053_s3 + $0x1d0] sm:$0xff] }
 0x151   : > { %v2904_v34 = vor.u32 %v2903_v14, %v7328_v31  ;;  %4612 = vmatpush.bf16.msra.mxu3 %v6191_v37 }
 0x152   : > { %v2199_v5 = vpop.f32.mrf.mxu2  ;;  %v1823_v15 = vpop.f32.mrf.mxu1  ;;  %v3112_v57 = vpack.c.b16 %v3089_v59, %v3088_v23  ;;  %v6183_v59 = vld [vmem:[%s8053_s3 + $0x190] sm:$0xff] }
 0x153   : > { %v2511_v44 = vpop.f32.mrf.mxu3  ;;  %v2278_v17 = vadd.f32 %v2199_v5, %v1819_v26  ;;  %v6429_v26 = vld [vmem:[#allocation2 + $0x80] sm:$0x1]  ;;  %3930 = vmatpush.bf16.msra.mxu2 %v6183_v59  ;;  %v2905_v55 = vrot.slane %v2904_v34, 4  ;;  %v6199_v34 = vld [vmem:[%s8053_s3 + $0x210] sm:$0xff] }
 0x154   : > { %v7326_v25 = vpop.f32.mrf.mxu0  ;;  %v2591_v27 = vadd.f32 %v2511_v44, %v2277_v33  ;;  %v2022_v56 = vrot.slane %v6429_v26, 5  ;;  %v2894_v44 = vor.u32 %v2893_v10, %v2890_v8  ;;  %v2654_v8 = vld [vmem:[#allocation2 + $0x88] sm:$0xf]  ;;  %v6159_v10 = vld [vmem:[%s8053_s3 + $0x150] sm:$0xff]  ;;  %5038 = vmatpush.bf16.msra.mxu0 %v6199_v34 }
 0x155   : > { %3615 = vmatpush.bf16.msra.mxu1 %v6159_v10 }
 0x156   : > { %v2023_v23 = vsel %vm7101_vm14, %v2021_v46, %v2022_v56  ;;  %v2895_v14 = vrot.slane %v2894_v44, 4  ;;  %v2909_v46 = vrot.slane %v2907_v32, 5 }
 0x157   : > { %2241 = vmatmul.bf16.gmra.mxu2 %v2117_v62 }
 0x158   : > { %v2900_v44 = vsel %vm6718_vm11, %v2895_v14, %v7328_v31  ;;  %v2655_v14 = vld [vmem:[#allocation2 + $0x8c] sm:$0x1] }
 0x159   : > { %v3090_v10 = vunpack.c.l.b16 %v2900_v44 }
 0x15a   : > { %v2202_v5 = vpop.f32.mrf.mxu2  ;;  %v1826_v3 = vpop.f32.mrf.mxu1 }
 0x15b   : > { %v2513_v33 = vpop.f32.mrf.mxu3  ;;  %v2279_v0 = vadd.f32 %v2202_v5, %v1822_v42  ;;  %v7332_v12 = vadd.f32 %v1826_v3, %v7279_v20  ;;  %v2653_v20 = vld [vmem:[#allocation2 + $0x84] sm:$0xf]  ;;  %v2096_v3 = vunpack.c.l.b16 %v2020_v7  ;;  %v2925_v5 = vshrl.u32 %v2654_v8, 16 }
 0x15c   : > { %v3193_v6 = vpop.f32.mrf.mxu0  ;;  %v2592_v62 = vadd.f32 %v2513_v33, %v2278_v17  ;;  %v2097_v17 = vunpack.c.l.b16 %v2023_v23  ;;  %v2912_v26 = vshrl.u32 %v2653_v20, 16  ;;  %v2915_v56 = vshll.u32 %v2653_v20, 16 }
 0x15d   : > { %1865 = vmatmul.bf16.gmra.mxu1 %v6095_v61  ;;  %v7341_v42 = vadd.f32 %v3193_v6, %v2591_v27  ;;  %v1824_v27 = vadd.f32 %v1823_v15, %v7267_v51  ;;  %v2910_v51 = vsel %vm6718_vm11, %v2905_v55, %v2909_v46  ;;  %v2927_v37 = vrot.slane %v2925_v5, 4  ;;  %v6431_v46 = vld [vmem:[#allocation2 + $0x8c] sm:$0x1]  ;;  %v6096_v5 = vld [vmem:[#allocation2 + $0x84] sm:$0xff] }
 0x15e   : > { %v2118_v7 = vpack.c.b16 %v2097_v17, %v2096_v3  ;;  %v2914_v20 = vrot.slane %v2912_v26, 4  ;;  %v1907_v3 = vld [vmem:[#allocation2 + $0x84] sm:$0xe]  ;;  %v3091_v31 = vunpack.c.l.b16 %v2910_v51 }
 0x15f   : > { %8069 = vst [vmem:[#allocation4_spill] sm:$0xff] %v7341_v42  ;;  %3232 = vmatmul.bf16.gmra.mxu0 %v3112_v57  ;;  %v2921_v57 = vshll.u32 %v2654_v8, 16  ;;  %v2917_v8 = vrot.slane %v2915_v56, 5  ;;  %v5580_v55 = vrot.slane %v1907_v3, 9 }
 0x160   : > { %2555 = vmatmul.bf16.gmra.mxu3 %v6134_v21  ;;  %v6430_v21 = vld [vmem:[#allocation2 + $0x88] sm:$0xf]  ;;  %v3113_v56 = vpack.c.b16 %v3091_v31, %v3090_v10  ;;  %v2657_v31 = vld [vmem:[#allocation2 + $0x94] sm:$0xf] }
 0x161   : > { %v2026_v32 = vrot.slane %v6430_v21, 5 }
 0x162   : > { %v2204_v60 = vpop.f32.mrf.mxu2  ;;  %v1828_v33 = vpop.f32.mrf.mxu1 }
 0x163   : > { %v2516_v61 = vpop.f32.mrf.mxu3  ;;  %v2280_v6 = vadd.f32 %v2204_v60, %v1824_v27  ;;  %v1829_v23 = vadd.f32 %v1828_v33, %v7299_v29  ;;  %v2923_v29 = vrot.slane %v2921_v57, 5  ;;  %v2029_v27 = vrot.slane %v6431_v46, 5 }
 0x164   : > { %v3195_v59 = vpop.f32.mrf.mxu0  ;;  %v2593_v15 = vadd.f32 %v2516_v61, %v2279_v0  ;;  %v2028_v0 = vrot.slane %v2026_v32, 4  ;;  %v2918_v60 = vor.u32 %v2917_v8, %v2914_v20  ;;  %v2931_v61 = vshll.u32 %v2655_v14, 16 }
 0x165   : > { %v7359_v17 = vadd.f32 %v3195_v59, %v2592_v62  ;;  %v2928_v33 = vor.u32 %v2927_v37, %v2923_v29  ;;  %v2027_v51 = vsel %vm7101_vm14, %v5580_v55, %v2026_v32 }
 0x166   : > { %v2030_v34 = vsel %vm7101_vm14, %v2028_v0, %v2029_v27  ;;  %v2919_v20 = vrot.slane %v2918_v60, 4  ;;  %v2933_v37 = vrot.slane %v2931_v61, 5  ;;  %v2945_v0 = vshll.u32 %v2657_v31, 16 }
 0x167   : > { %2246 = vmatmul.bf16.gmra.mxu2 %v2118_v7  ;;  %v6135_v7 = vld [vmem:[#allocation2 + $0x84] sm:$0xff]  ;;  %v2929_v3 = vrot.slane %v2928_v33, 4  ;;  %v2099_v10 = vunpack.c.l.b16 %v2030_v34  ;;  %v2949_v33 = vshrl.u32 %v2657_v31, 16  ;;  %v2658_v31 = vld [vmem:[#allocation2 + $0x98] sm:$0x1] }
 0x16a   : > { %v2207_v21 = vpop.f32.mrf.mxu2  ;;  %v1831_v26 = vpop.f32.mrf.mxu1 }
 0x16b   : > { %v2518_v42 = vpop.f32.mrf.mxu3  ;;  %v2281_v62 = vadd.f32 %v2207_v21, %v7332_v12  ;;  %v1832_v57 = vadd.f32 %v1831_v26, %v7315_v36  ;;  %v2098_v12 = vunpack.c.l.b16 %v2027_v51  ;;  %v2656_v36 = vld [vmem:[#allocation2 + $0x90] sm:$0xf] }
 0x16c   : > { %v3198_v59 = vpop.f32.mrf.mxu0  ;;  %v2594_v44 = vadd.f32 %v2518_v42, %v2280_v6  ;;  %v2924_v42 = vsel %vm6718_vm11, %v2919_v20, %v2923_v29  ;;  %v2934_v6 = vsel %vm6718_vm11, %v2929_v3, %v2933_v37  ;;  %v2936_v14 = vshrl.u32 %v2656_v36, 16 }
 0x16d   : > { %1870 = vmatmul.bf16.gmra.mxu1 %v6096_v5  ;;  %v7367_v8 = vadd.f32 %v3198_v59, %v2593_v15  ;;  %v2939_v55 = vshll.u32 %v2656_v36, 16  ;;  %v2119_v60 = vpack.c.b16 %v2099_v10, %v2098_v12  ;;  %v1908_v59 = vld [vmem:[#allocation2 + $0x90] sm:$0xe]  ;;  %v3093_v51 = vunpack.c.l.b16 %v2934_v6  ;;  %v6433_v12 = vld [vmem:[#allocation2 + $0x98] sm:$0x1] }
 0x16e   : > { %v2938_v34 = vrot.slane %v2936_v14, 4  ;;  %v2947_v3 = vrot.slane %v2945_v0, 5  ;;  %v2951_v37 = vrot.slane %v2949_v33, 4  ;;  %v5581_v36 = vrot.slane %v1908_v59, 9  ;;  %v6136_v14 = vld [vmem:[#allocation2 + $0x90] sm:$0xff] }
 0x16f   : > { %8070 = vst [vmem:[#allocation5_spill] sm:$0xff] %v7367_v8  ;;  %3237 = vmatmul.bf16.gmra.mxu0 %v3113_v56  ;;  %v6432_v56 = vld [vmem:[#allocation2 + $0x94] sm:$0xf]  ;;  %v2941_v20 = vrot.slane %v2939_v55, 5  ;;  %v2036_v10 = vrot.slane %v6433_v12, 5  ;;  %v2955_v55 = vshll.u32 %v2658_v31, 16 }
 0x170   : > { %2560 = vmatmul.bf16.gmra.mxu3 %v6135_v7  ;;  %v2033_v5 = vrot.slane %v6432_v56, 5  ;;  %v3092_v7 = vunpack.c.l.b16 %v2924_v42  ;;  %v6097_v42 = vld [vmem:[#allocation2 + $0x90] sm:$0xff]  ;;  %v6182_v56 = vld [vmem:[%s8053_s3 + $0x188] sm:$0xff]  ;;  %v2659_v59 = vld [vmem:[#allocation2 + $0x9c] sm:$0xf] }
 0x171   : > { %3931 = vmatpush.bf16.msra.mxu2 %v6182_v56 }
 0x172   : > { %v2209_v32 = vpop.f32.mrf.mxu2  ;;  %v1833_v15 = vpop.f32.mrf.mxu1  ;;  %v2034_v0 = vsel %vm7101_vm14, %v5581_v36, %v2033_v5 }
 0x173   : > { %v2521_v46 = vpop.f32.mrf.mxu3  ;;  %v2282_v27 = vadd.f32 %v2209_v32, %v1829_v23  ;;  %v1834_v61 = vadd.f32 %v1833_v15, %v7326_v25  ;;  %v2035_v23 = vrot.slane %v2033_v5, 4  ;;  %v6190_v5 = vld [vmem:[%s8053_s3 + $0x1c8] sm:$0xff] }
 0x174   : > { %v3200_v21 = vpop.f32.mrf.mxu0  ;;  %v2595_v26 = vadd.f32 %v2521_v46, %v2281_v62  ;;  %v3114_v62 = vpack.c.b16 %v3093_v51, %v3092_v7  ;;  %v2942_v46 = vor.u32 %v2941_v20, %v2938_v34  ;;  %v2960_v34 = vshrl.u32 %v2659_v59, 16  ;;  %4613 = vmatpush.bf16.msra.mxu3 %v6190_v5 }
 0x175   : > { %v7374_v29 = vadd.f32 %v3200_v21, %v2594_v44  ;;  %v2952_v44 = vor.u32 %v2951_v37, %v2947_v3  ;;  %v2037_v33 = vsel %vm7101_vm14, %v2035_v23, %v2036_v10  ;;  %v2963_v20 = vshll.u32 %v2659_v59, 16  ;;  %v6158_v37 = vld [vmem:[%s8053_s3 + $0x148] sm:$0xff] }
 0x176   : > { %v2101_v51 = vunpack.c.l.b16 %v2037_v33  ;;  %v2943_v36 = vrot.slane %v2942_v46, 4  ;;  %3616 = vmatpush.bf16.msra.mxu1 %v6158_v37 }
 0x177   : > { %8071 = vst [vmem:[#allocation6_spill] sm:$0xff] %v7374_v29  ;;  %2251 = vmatmul.bf16.gmra.mxu2 %v2119_v60  ;;  %v2953_v23 = vrot.slane %v2952_v44, 4  ;;  %v2666_v29 = vld [vmem:[#allocation2 + $0xb8] sm:$0xf] }
 0x178   : > { %v2948_v56 = vsel %vm6718_vm11, %v2943_v36, %v2947_v3  ;;  %v6435_v36 = vld [vmem:[#allocation2 + $0xa4] sm:$0x1] }
 0x179   : > { %v3094_v3 = vunpack.c.l.b16 %v2948_v56 }
 0x17a   : > { %v2212_v25 = vpop.f32.mrf.mxu2  ;;  %v7376_v32 = vpop.f32.mrf.mxu1 }
 0x17b   : > { %v2523_v15 = vpop.f32.mrf.mxu3  ;;  %v2283_v21 = vadd.f32 %v2212_v25, %v1832_v57  ;;  %v2660_v57 = vld [vmem:[#allocation2 + $0xa0] sm:$0xf] }
 0x17c   : > { %v3203_v6 = vpop.f32.mrf.mxu0  ;;  %v2596_v60 = vadd.f32 %v2523_v15, %v2282_v27  ;;  %v2100_v27 = vunpack.c.l.b16 %v2034_v0  ;;  %v2969_v12 = vshll.u32 %v2660_v57, 16  ;;  %v2973_v10 = vshrl.u32 %v2660_v57, 16 }
 0x17d   : > { %1875 = vmatmul.bf16.gmra.mxu1 %v6097_v42  ;;  %v7385_v7 = vadd.f32 %v3203_v6, %v2595_v26  ;;  %v2957_v26 = vrot.slane %v2955_v55, 5  ;;  %v2962_v6 = vrot.slane %v2960_v34, 4  ;;  %v2965_v0 = vrot.slane %v2963_v20, 5  ;;  %v6434_v55 = vld [vmem:[#allocation2 + $0xa0] sm:$0xf] }
 0x17e   : > { %v2120_v42 = vpack.c.b16 %v2101_v51, %v2100_v27  ;;  %v2040_v59 = vrot.slane %v6434_v55, 5  ;;  %v7402_v57 = vrot.slane %v2969_v12, 5  ;;  %v1909_v27 = vld [vmem:[#allocation2 + $0x9c] sm:$0xe]  ;;  %v2661_v34 = vld [vmem:[#allocation2 + $0xa4] sm:$0x1] }
 0x17f   : > { %8072 = vst [vmem:[#allocation7_spill] sm:$0xff] %v7385_v7  ;;  %3242 = vmatmul.bf16.gmra.mxu0 %v3114_v62  ;;  %v2958_v46 = vsel %vm6718_vm11, %v2953_v23, %v2957_v26  ;;  %v2966_v5 = vor.u32 %v2965_v0, %v2962_v6  ;;  %v2043_v23 = vrot.slane %v6435_v36, 5  ;;  %v6363_v26 = vld [vmem:[%s6551_s27 + $0x78] sm:$0xff]  }
 0x180   : > { %2565 = vmatmul.bf16.gmra.mxu3 %v6136_v14  ;;  %v6198_v14 = vld [vmem:[%s8053_s3 + $0x208] sm:$0xff]  ;;  %v3095_v20 = vunpack.c.l.b16 %v2958_v46  ;;  %v2042_v37 = vrot.slane %v2040_v59, 4  ;;  %v6098_v0 = vld [vmem:[#allocation2 + $0x9c] sm:$0xff] }
 0x181   : > { %5039 = vmatpush.bf16.msra.mxu0 %v6198_v14  ;;  %v6268_v14 = vunpack.c.h.bf16 %v6363_v26  ;;  %v6137_v36 = vld [vmem:[#allocation2 + $0x9c] sm:$0xff] }
 0x182   : > { %v2214_v31 = vpop.f32.mrf.mxu2  ;;  %v7393_v25 = vpop.f32.mrf.mxu1  ;;  %v3115_v56 = vpack.c.b16 %v3095_v20, %v3094_v3 }
 0x183   : > { %v2526_v62 = vpop.f32.mrf.mxu3  ;;  %v2284_v15 = vadd.f32 %v2214_v31, %v1834_v61  ;;  %v2975_v61 = vrot.slane %v2973_v10, 4  ;;  %v1837_v31 = vadd.f32 %v7376_v32, %v7178_v45  ;;  %v2979_v10 = vshll.u32 %v2661_v34, 16  ;;  %v6436_v32 = vld [vmem:[%s8051_s1] ss:$0 sm:$0xff] }
 0x184   : > { %v3205_v33 = vpop.f32.mrf.mxu0  ;;  %v2597_v44 = vadd.f32 %v2526_v62, %v2283_v21  ;;  %v5582_v21 = vrot.slane %v1909_v27, 9  ;;  %v2044_v45 = vsel %vm7101_vm14, %v2042_v37, %v2043_v23  ;;  %v456_v20 = vmul.f32 %v6436_v32, %v6268_v14  ;;  %v2662_v37 = vld [vmem:[#allocation2 + $0xa8] sm:$0xf]  ;;  %v2663_v23 = vld [vmem:[#allocation2 + $0xac] sm:$0xf] }
 0x185   : > { %v7404_v51 = vadd.f32 %v3205_v33, %v2596_v60  ;;  %v2976_v12 = vor.u32 %v2975_v61, %v7402_v57  ;;  %v6267_v33 = vunpack.c.l.bf16 %v6363_v26  ;;  %v2981_v3 = vrot.slane %v2979_v10, 5 }
 0x187   : > { %8073 = vst [vmem:[#allocation8_spill] sm:$0xff] %v7404_v51  ;;  %2256 = vmatmul.bf16.gmra.mxu2 %v2120_v42  ;;  %v2967_v42 = vrot.slane %v2966_v5, 4  ;;  %v2041_v51 = vsel %vm7101_vm14, %v5582_v21, %v2040_v59  ;;  %v455_v61 = vmul.f32 %v6436_v32, %v6267_v33  ;;  %v2977_v34 = vrot.slane %v2976_v12, 4 }
 0x188   : > { %v2102_v59 = vunpack.c.l.b16 %v2041_v51  ;;  %v2103_v21 = vunpack.c.l.b16 %v2044_v45  ;;  %v1839_v51 = vadd.f32 %v7393_v25, %v7195_v28 }
 0x189   : > { %v2982_v33 = vsel %vm6718_vm11, %v2977_v34, %v2981_v3  ;;  %v1910_v3 = vld [vmem:[#allocation2 + $0xa8] sm:$0xe] }
 0x18a   : > { %v2217_v62 = vpop.f32.mrf.mxu2  ;;  %v7410_v60 = vpop.f32.mrf.mxu1 }
 0x18b   : > { %v2528_v46 = vpop.f32.mrf.mxu3  ;;  %v2285_v6 = vadd.f32 %v2217_v62, %v1837_v31  ;;  %v295_v31 = vld [vmem:[#allocation2 + $0xc0] sm:$0x1] }
 0x18c   : > { %v3208_v55 = vpop.f32.mrf.mxu0  ;;  %v2598_v27 = vadd.f32 %v2528_v46, %v2284_v15  ;;  %v6437_v15 = vld [vmem:[%s8052_s2] ss:$0 sm:$0xff]  ;;  %v296_v12 = vsel %vm6531_vm2, 0, %v295_v31  ;;  %v2987_v46 = vshll.u32 %v2662_v37, 16 }
 0x18d   : > { %1880 = vmatmul.bf16.gmra.mxu1 %v6098_v0  ;;  %v7419_v5 = vadd.f32 %v3208_v55, %v2597_v44  ;;  %v491_v26 = vadd.f32 %v6437_v15, %v455_v61  ;;  %v492_v62 = vadd.f32 %v6437_v15, %v456_v20  ;;  %v2972_v44 = vsel %vm6718_vm11, %v2967_v42, %v7402_v57 }
 0x18e   : > { %297 = vst [vmem:[#allocation2 + $0xc0] sm:$0x1] %v296_v12  ;;  %v2993_v0 = vshll.u32 %v2663_v23, 16  ;;  %v2997_v55 = vshrl.u32 %v2663_v23, 16  ;;  %v2121_v61 = vpack.c.b16 %v2103_v21, %v2102_v59  ;;  %v3096_v25 = vunpack.c.l.b16 %v2972_v44  ;;  %v2664_v21 = vld [vmem:[#allocation2 + $0xb0] sm:$0x1] }
 0x18f   : > { %8074 = vst [vmem:[#allocation9_spill] sm:$0xff] %v7419_v5  ;;  %3247 = vmatmul.bf16.gmra.mxu0 %v3115_v56  ;;  %v523_v10 = vmax.f32 %v491_v26, 0.0  ;;  %v2984_v56 = vshrl.u32 %v2662_v37, 16  ;;  %v524_v20 = vmax.f32 %v492_v62, 0.0  ;;  %v6438_v26 = vld [vmem:[#allocation2 + $0xac] sm:$0xf]  ;;  %v3097_v12 = vunpack.c.l.b16 %v2982_v33 }
 0x190   : > { %2570 = vmatmul.bf16.gmra.mxu3 %v6137_v36  ;;  %v2047_v34 = vrot.slane %v6438_v26, 5  ;;  %v2989_v5 = vrot.slane %v2987_v46, 5  ;;  %v7437_v23 = vrot.slane %v2993_v0, 5  ;;  %v2999_v7 = vrot.slane %v2997_v55, 4 }
 0x191   : > { %v555_v15 = vpack.c.bf16 %v523_v10, %v523_v10  ;;  %v556_v31 = vpack.c.bf16 %v524_v20, %v524_v20  ;;  %v2986_v37 = vrot.slane %v2984_v56, 4  ;;  %v6439_v10 = vld [vmem:[#allocation2 + $0xb0] sm:$0x1]  ;;  %v2665_v20 = vld [vmem:[#allocation2 + $0xb4] sm:$0xf]  ;;  %v3116_v44 = vpack.c.b16 %v3097_v12, %v3096_v25  ;;  %v6138_v25 = vld [vmem:[#allocation2 + $0xa8] sm:$0xff] }
 0x192   : > { %v2219_v14 = vpop.f32.mrf.mxu2  ;;  %v7433_v36 = vpop.f32.mrf.mxu1  ;;  %v2049_v62 = vrot.slane %v2047_v34, 4 }
 0x193   : > { %v2531_v45 = vpop.f32.mrf.mxu3  ;;  %v2286_v32 = vadd.f32 %v2219_v14, %v1839_v51  ;;  %v5583_v51 = vrot.slane %v1910_v3, 9  ;;  %v815_v59 = vshrl.u32 %v555_v15, 16  ;;  %v818_v14 = vshll.u32 %v555_v15, 16 }
 0x194   : > { %v3210_v57 = vpop.f32.mrf.mxu0  ;;  %v2599_v42 = vadd.f32 %v2531_v45, %v2285_v6  ;;  %v2050_v6 = vrot.slane %v6439_v10, 5  ;;  %v823_v45 = vshrl.u32 %v556_v31, 16  ;;  %v826_v55 = vshll.u32 %v556_v31, 16 }
 0x195   : > { %v7435_v28 = vadd.f32 %v3210_v57, %v2598_v27  ;;  %v1842_v27 = vadd.f32 %v7410_v60, %v7205_v49  ;;  %v817_v46 = vrot.slane %v815_v59, 7  ;;  %v2990_v26 = vor.u32 %v2989_v5, %v2986_v37  ;;  %v987_v8 = vld [vmem:[#allocation2 + $0xc0] sm:$0xf] }
 0x196   : > { %v7443_v0 = vrot.slane %v823_v45, 7  ;;  %v3000_v3 = vor.u32 %v2999_v7, %v7437_v23  ;;  %v3003_v10 = vshll.u32 %v2664_v21, 16  ;;  %v2048_v12 = vsel %vm7101_vm14, %v5583_v51, %v2047_v34  ;;  %v6181_v5 = vld [vmem:[%s8053_s3 + $0x180] sm:$0xff] }
 0x197   : > { %8075 = vst [vmem:[#allocation10_spill] sm:$0xff] %v7435_v28  ;;  %2261 = vmatmul.bf16.gmra.mxu2 %v2121_v61  ;;  %v351_v61 = vld [vmem:[#allocation2 + $0xc8] sm:$0x1]  ;;  %v2051_v59 = vsel %vm7101_vm14, %v2049_v62, %v2050_v6  ;;  %v820_v31 = vor.u32 %v818_v14, %v817_v46  ;;  %v3008_v7 = vshrl.u32 %v2665_v20, 16  ;;  %v821_v37 = vrot.slane %v817_v46, 4  ;;  %v6189_v14 = vld [vmem:[%s8053_s3 + $0x1c0] sm:$0xff] }
 0x198   : > { %v6099_v28 = vld [vmem:[#allocation2 + $0xa8] sm:$0xff]  ;;  %v828_v21 = vor.u32 %v826_v55, %v7443_v0  ;;  %3932 = vmatpush.bf16.msra.mxu2 %v6181_v5  ;;  %v3011_v45 = vshll.u32 %v2665_v20, 16  ;;  %v2104_v62 = vunpack.c.l.b16 %v2048_v12  ;;  %v2105_v6 = vunpack.c.l.b16 %v2051_v59  ;;  %4614 = vmatpush.bf16.msra.mxu3 %v6189_v14 }
 0x199   : > { %v988_v34 = vsel %vm6624_vm8, %v820_v31, %v987_v8  ;;  %v2991_v18 = vrot.slane %v2990_v26, 4  ;;  %v3001_v8 = vrot.slane %v3000_v3, 4  ;;  %v3010_v46 = vrot.slane %v3008_v7, 4  ;;  %v2667_v31 = vld [vmem:[#allocation2 + $0xbc] sm:$0x1] }
 0x19a   : > { %v2222_v33 = vpop.f32.mrf.mxu2  ;;  %v7441_v56 = vpop.f32.mrf.mxu1  ;;  %v829_v20 = vsel %vm6614_vm7, %v821_v37, %v828_v21  ;;  %989 = vst [vmem:[#allocation2 + $0xc0] sm:$0xf] %v988_v34  ;;  %v3013_v55 = vrot.slane %v3011_v45, 5  ;;  %v2122_v12 = vpack.c.b16 %v2105_v6, %v2104_v62  ;;  %v1911_v7 = vld [vmem:[#allocation2 + $0xb4] sm:$0xe]  ;;  %v3027_v34 = vshll.u32 %v2667_v31, 16 }
 0x19b   : > { %v2533_v57 = vpop.f32.mrf.mxu3  ;;  %v2287_v15 = vadd.f32 %v2222_v33, %v1842_v27  ;;  %v3017_v27 = vshll.u32 %v2666_v29, 16  ;;  %v6157_v33 = vld [vmem:[%s8053_s3 + $0x140] sm:$0xff]  ;;  %990 = vst [vmem:[#allocation2 + $0xc4] sm:$0xf] %v829_v20  ;;  %v5584_v62 = vrot.slane %v1911_v7, 9 }
 0x19c   : > { %v3213_v49 = vpop.f32.mrf.mxu0  ;;  %v2600_v60 = vadd.f32 %v2533_v57, %v2286_v32  ;;  %v352_v32 = vsel %vm6537_vm4, 0, %v351_v61  ;;  %3617 = vmatpush.bf16.msra.mxu1 %v6157_v33  ;;  %v830_v57 = vrot.slane %v7443_v0, 4  ;;  %v6440_v0 = vld [vmem:[#allocation2 + $0xb8] sm:$0xf]  ;;  %v6442_v31 = vld [vmem:[#allocation2 + $0x10] sm:$0xf] }
 0x19d   : > { %1885 = vmatmul.bf16.gmra.mxu1 %v6099_v28  ;;  %353 = vst [vmem:[#allocation2 + $0xc8] sm:$0x1] %v352_v32  ;;  %v7458_v51 = vadd.f32 %v3213_v49, %v2599_v42  ;;  %v3021_v28 = vshrl.u32 %v2666_v29, 16  ;;  %v3005_v42 = vrot.slane %v3003_v10, 5  ;;  %v1844_v29 = vadd.f32 %v7433_v36, %v7213_v16 }
 0x19e   : > { %v7471_v59 = vrot.slane %v3017_v27, 5  ;;  %v2996_v10 = vsel %vm6718_vm11, %v2991_v18, %v7437_v23  ;;  %v2054_v5 = vrot.slane %v6440_v0, 5  ;;  %v3014_v27 = vor.u32 %v3013_v55, %v3010_v46  ;;  %v6100_v46 = vld [vmem:[#allocation2 + $0xb4] sm:$0xff] }
 0x19f   : > { %3252 = vmatmul.bf16.gmra.mxu0 %v3116_v44  ;;  %v3023_v26 = vrot.slane %v3021_v28, 4  ;;  %v3006_v16 = vsel %vm6718_vm11, %v3001_v8, %v3005_v42  ;;  %v3098_v23 = vunpack.c.l.b16 %v2996_v10  ;;  %v6441_v28 = vld [vmem:[#allocation2 + $0xbc] sm:$0x1]  ;;  %v4046_v0 = vld [vmem:[#allocation2 + $0x18] sm:$0xf]  ;;  %v3371_v7 = vrot.slane %v6442_v31, 5 }
 0x1a0   : > { %2575 = vmatmul.bf16.gmra.mxu3 %v6138_v25  ;;  %v6197_v25 = vld [vmem:[%s8053_s3 + $0x200] sm:$0xff]  ;;  %v3099_v45 = vunpack.c.l.b16 %v3006_v16  ;;  %v2056_v6 = vrot.slane %v2054_v5, 4  ;;  %v2057_v14 = vrot.slane %v6441_v28, 5  ;;  %v3015_v42 = vrot.slane %v3014_v27, 4  ;;  %v6443_v27 = vld [vmem:[#allocation2 + $0x14] sm:$0x1] }
 0x1a1   : > { %5040 = vmatpush.bf16.msra.mxu0 %v6197_v25  ;;  %v4095_v28 = vshrl.u32 %v4046_v0, 16 }
 0x1a2   : > { %v2224_v44 = vpop.f32.mrf.mxu2  ;;  %v1848_v61 = vpop.f32.mrf.mxu1  ;;  %v3117_v18 = vpack.c.b16 %v3099_v45, %v3098_v23  ;;  %v2669_v10 = vld [vmem:[#allocation2 + $0xc4] sm:$0xf] }
 0x1a3   : > { %v2536_v49 = vpop.f32.mrf.mxu3  ;;  %v2288_v9 = vadd.f32 %v2224_v44, %v1844_v29  ;;  %v3041_v45 = vshll.u32 %v2669_v10, 16 }
 0x1a4   : > { %v3215_v3 = vpop.f32.mrf.mxu0  ;;  %v2601_v36 = vadd.f32 %v2536_v49, %v2287_v15  ;;  %v991_v37 = vld [vmem:[#allocation2 + $0xc8] sm:$0x1]  ;;  %v3024_v15 = vor.u32 %v3023_v26, %v7471_v59  ;;  %v6139_v49 = vld [vmem:[#allocation2 + $0xb4] sm:$0xff]  ;;  %v2055_v26 = vsel %vm7101_vm14, %v5584_v62, %v2054_v5  ;;  %v3045_v62 = vshrl.u32 %v2669_v10, 16 }
 0x1a5   : > { %v7481_v21 = vadd.f32 %v3215_v3, %v2600_v60  ;;  %v992_v32 = vsel %vm6531_vm2, %v830_v57, %v991_v37  ;;  %v1847_v60 = vadd.f32 %v7441_v56, %v7226_v48  ;;  %v2058_v3 = vsel %vm7101_vm14, %v2056_v6, %v2057_v14  ;;  %v2668_v56 = vld [vmem:[#allocation2 + $0xc0] sm:$0xf]  ;;  %v7501_v37 = vld [vmem:[#allocation2 + $0x1c] sm:$0xf] }
 0x1a6   : > { %993 = vst [vmem:[#allocation2 + $0xc8] sm:$0x1] %v992_v32  ;;  %v3025_v29 = vrot.slane %v3024_v15, 4  ;;  %v2106_v16 = vunpack.c.l.b16 %v2055_v26  ;;  %v2107_v25 = vunpack.c.l.b16 %v2058_v3  ;;  %v3032_v32 = vshrl.u32 %v2668_v56, 16  ;;  %v3305_v26 = vld [vmem:[#allocation2 + $0xc] sm:$0xe] }
 0x1a7   : > { %2266 = vmatmul.bf16.gmra.mxu2 %v2122_v12  ;;  %v3029_v12 = vrot.slane %v3027_v34, 5  ;;  %v3035_v23 = vshll.u32 %v2668_v56, 16  ;;  %v3374_v15 = vrot.slane %v6443_v27, 5  ;;  %v4098_v14 = vshll.u32 %v4046_v0, 16 }
 0x1a8   : > { %v3047_v56 = vrot.slane %v3045_v62, 4  ;;  %v5793_v10 = vrot.slane %v3305_v26, 9  ;;  %v4097_v0 = vrot.slane %v4095_v28, 4 }
 0x1a9   : > { %v3030_v5 = vsel %vm6718_vm11, %v3025_v29, %v3029_v12  ;;  %v3043_v12 = vrot.slane %v3041_v45, 5  ;;  %v4100_v31 = vrot.slane %v4098_v14, 5 }
 0x1aa   : > { %v2227_v33 = vpop.f32.mrf.mxu2  ;;  %v7488_v20 = vpop.f32.mrf.mxu1 }
 0x1ab   : > { %v2538_v8 = vpop.f32.mrf.mxu3  ;;  %v2289_v44 = vadd.f32 %v2227_v33, %v1847_v60 }
 0x1ac   : > { %v3218_v55 = vpop.f32.mrf.mxu0  ;;  %v2602_v57 = vadd.f32 %v2538_v8, %v2288_v9  ;;  %v3020_v9 = vsel %vm6718_vm11, %v3015_v42, %v7471_v59  ;;  %v2123_v59 = vpack.c.b16 %v2107_v25, %v2106_v16  ;;  %v4108_v8 = vshrl.u32 %v7501_v37, 16 }
 0x1ad   : > { %1890 = vmatmul.bf16.gmra.mxu1 %v6100_v46  ;;  %v7494_v48 = vadd.f32 %v3218_v55, %v2601_v36  ;;  %v1849_v36 = vadd.f32 %v1848_v61, %v7247_v13  ;;  %v3373_v42 = vrot.slane %v3371_v7, 4  ;;  %v3100_v13 = vunpack.c.l.b16 %v3020_v9  ;;  %v2670_v16 = vld [vmem:[#allocation2 + $0xc8] sm:$0x1] }
 0x1ae   : > { %v3101_v61 = vunpack.c.l.b16 %v3030_v5  ;;  %v3034_v55 = vrot.slane %v3032_v32, 4  ;;  %v3372_v9 = vsel %vm7101_vm14, %v5793_v10, %v3371_v7  ;;  %v7514_v5 = vld [vmem:[#allocation2 + $0x20] sm:$0x1]  ;;  %v3051_v62 = vshll.u32 %v2670_v16, 16 }
 0x1af   : > { %3257 = vmatmul.bf16.gmra.mxu0 %v3117_v18  ;;  %v4104_v18 = vshll.u32 %v7501_v37, 16 }
 0x1b0   : > { %2580 = vmatmul.bf16.gmra.mxu3 %v6139_v49  ;;  %v3037_v49 = vrot.slane %v3035_v23, 5  ;;  %v3118_v32 = vpack.c.b16 %v3101_v61, %v3100_v13  ;;  %v3498_v23 = vunpack.c.l.b16 %v3372_v9  ;;  %v6140_v13 = vld [vmem:[#allocation2 + $0xc0] sm:$0xff] }
 0x1b1   : > { %v7508_v25 = vrot.slane %v4104_v18, 5 }
 0x1b2   : > { %v2229_v34 = vpop.f32.mrf.mxu2  ;;  %v1853_v6 = vpop.f32.mrf.mxu1  ;;  %v3038_v27 = vor.u32 %v3037_v49, %v3034_v55  ;;  %v3053_v55 = vrot.slane %v3051_v62, 5 }
 0x1b3   : > { %v2541_v60 = vpop.f32.mrf.mxu3  ;;  %v2290_v33 = vadd.f32 %v2229_v34, %v1849_v36  ;;  %v4110_v36 = vrot.slane %v4108_v8, 4  ;;  %v3048_v34 = vor.u32 %v3047_v56, %v3043_v12  ;;  %v1854_v10 = vadd.f32 %v1853_v6, %v7275_v24 }
 0x1b4   : > { %v3220_v29 = vpop.f32.mrf.mxu0  ;;  %v2603_v46 = vadd.f32 %v2541_v60, %v2289_v44  ;;  %v3375_v44 = vsel %vm7101_vm14, %v3373_v42, %v3374_v15  ;;  %v4101_v60 = vor.u32 %v4100_v31, %v4097_v0  ;;  %v4114_v15 = vshll.u32 %v7514_v5, 16  ;;  %v4049_v0 = vld [vmem:[#allocation2 + $0x24] sm:$0xf] }
 0x1b5   : > { %v7506_v3 = vadd.f32 %v3220_v29, %v2602_v57  ;;  %v1852_v57 = vadd.f32 %v7488_v20, %v7261_v38  ;;  %v3499_v45 = vunpack.c.l.b16 %v3375_v44  ;;  %v4111_v8 = vor.u32 %v4110_v36, %v7508_v25  ;;  %v7525_v36 = vld [vmem:[#allocation2 + $0x28] sm:$0xf] }
 0x1b6   : > { %v3039_v20 = vrot.slane %v3038_v27, 4  ;;  %v3049_v61 = vrot.slane %v3048_v34, 4  ;;  %v4102_v49 = vrot.slane %v4101_v60, 4  ;;  %v4116_v56 = vrot.slane %v4114_v15, 5 }
 0x1b7   : > { %2271 = vmatmul.bf16.gmra.mxu2 %v2123_v59  ;;  %v3530_v7 = vpack.c.b16 %v3499_v45, %v3498_v23  ;;  %v4112_v26 = vrot.slane %v4111_v8, 4  ;;  %v4119_v27 = vshrl.u32 %v4049_v0, 16  ;;  %v4122_v34 = vshll.u32 %v4049_v0, 16 }
 0x1b8   : > { %v3044_v31 = vsel %vm6718_vm11, %v3039_v20, %v3043_v12  ;;  %v6444_v12 = vld [vmem:[#allocation2 + $0x1c] sm:$0xf]  ;;  %v4128_v60 = vshll.u32 %v7525_v36, 16 }
 0x1b9   : > { %v4117_v24 = vsel %vm6718_vm11, %v4112_v26, %v4116_v56  ;;  %v3378_v45 = vrot.slane %v6444_v12, 5  ;;  %v3102_v62 = vunpack.c.l.b16 %v3044_v31  ;;  %v4121_v56 = vrot.slane %v4119_v27, 4 }
 0x1ba   : > { %v2232_v28 = vpop.f32.mrf.mxu2  ;;  %v1856_v14 = vpop.f32.mrf.mxu1  ;;  %v4797_v27 = vrot.slane %v7514_v5, 5 }
 0x1bb   : > { %v2543_v59 = vpop.f32.mrf.mxu3  ;;  %v2291_v18 = vadd.f32 %v2232_v28, %v1852_v57  ;;  %v4107_v57 = vsel %vm6718_vm11, %v4102_v49, %v7508_v25  ;;  %v3306_v28 = vld [vmem:[#allocation2 + $0x18] sm:$0xe]  ;;  %v3380_v25 = vrot.slane %v3378_v45, 4  ;;  %v1857_v20 = vadd.f32 %v1856_v14, %v7187_v22  ;;  %v7544_v14 = vld [vmem:[#allocation2 + $0x2c] sm:$0x1] }
 0x1bc   : > { %v3223_v42 = vpop.f32.mrf.mxu0  ;;  %v2604_v29 = vadd.f32 %v2543_v59, %v2290_v33  ;;  %v4132_v59 = vshrl.u32 %v7525_v36, 16  ;;  %v5794_v15 = vrot.slane %v3306_v28, 9  ;;  %v4728_v49 = vld [vmem:[#allocation2 + $0x18] sm:$0xe] }
 0x1bd   : > { %3618 = vmatmul.bf16.vlgmr.msra.gmra.mxu1 %v3530_v7  ;;  %v7520_v38 = vadd.f32 %v3223_v42, %v2603_v46  ;;  %v3054_v46 = vsel %vm6718_vm11, %v3049_v61, %v3053_v55  ;;  %v6445_v42 = vld [vmem:[#allocation2 + $0x20] sm:$0x1]  ;;  %v4496_v61 = vunpack.c.l.b16 %v4117_v24  ;;  %v4794_v55 = vrot.slane %v7501_v37, 5 }
 0x1be   : > { %v3103_v8 = vunpack.c.l.b16 %v3054_v46  ;;  %v3379_v26 = vsel %vm7101_vm14, %v5794_v15, %v3378_v45  ;;  %v4134_v46 = vrot.slane %v4132_v59, 4  ;;  %v6017_v37 = vrot.slane %v4728_v49, 9 }
 0x1bf   : > { %3262 = vmatmul.bf16.gmra.mxu0 %v3118_v32  ;;  %v6165_v32 = vld [vmem:[#allocation2 + $0x18] sm:$0xff]  ;;  %v3500_v0 = vunpack.c.l.b16 %v3379_v26  ;;  %v4796_v15 = vrot.slane %v4794_v55, 4 }
 0x1c0   : > { %2585 = vmatmul.bf16.gmra.mxu3 %v6140_v13  ;;  %v3381_v13 = vrot.slane %v6445_v42, 5  ;;  %v4052_v42 = vld [vmem:[#allocation2 + $0x30] sm:$0xf] }
 0x1c1   : > { %v4146_v26 = vshll.u32 %v4052_v42, 16 }
 0x1c2   : > { %v2234_v16 = vpop.f32.mrf.mxu2  ;;  %v1858_v33 = vpop.f32.mrf.mxu1 }
 0x1c3   : > { %v2546_v9 = vpop.f32.mrf.mxu3  ;;  %v2292_v44 = vadd.f32 %v2234_v16, %v1854_v10  ;;  %v4124_v10 = vrot.slane %v4122_v34, 5  ;;  %v4130_v16 = vrot.slane %v4128_v60, 5  ;;  %v4138_v60 = vshll.u32 %v7544_v14, 16 }
 0x1c4   : > { %v3225_v6 = vpop.f32.mrf.mxu0  ;;  %v2605_v23 = vadd.f32 %v2546_v9, %v2291_v18  ;;  %v4495_v18 = vunpack.c.l.b16 %v4107_v57 }
 0x1c5   : > { %v7536_v7 = vadd.f32 %v3225_v6, %v2604_v29  ;;  %v3382_v29 = vsel %vm7101_vm14, %v3380_v25, %v3381_v13  ;;  %v4125_v34 = vor.u32 %v4124_v10, %v4121_v56  ;;  %v4135_v25 = vor.u32 %v4134_v46, %v4130_v16  ;;  %v7555_v13 = vld [vmem:[#allocation2 + $0x34] sm:$0xf]  ;;  %v6166_v10 = vld [vmem:[#allocation2 + $0x24] sm:$0xff] }
 0x1c6   : > { %v3501_v31 = vunpack.c.l.b16 %v3382_v29  ;;  %v4527_v28 = vpack.c.b16 %v4496_v61, %v4495_v18  ;;  %v4140_v18 = vrot.slane %v4138_v60, 5  ;;  %v4143_v61 = vshrl.u32 %v4052_v42, 16 }
 0x1c7   : > { %3933 = vmatmul.bf16.vlgmr.msra.gmra.mxu2 %v6165_v32  ;;  %v3119_v32 = vpack.c.b16 %v3103_v8, %v3102_v62  ;;  %v4795_v62 = vsel %vm7101_vm14, %v6017_v37, %v4794_v55  ;;  %v1859_v8 = vadd.f32 %v1858_v33, %v7203_v39  ;;  %v4126_v5 = vrot.slane %v4125_v34, 4  ;;  %v6446_v33 = vld [vmem:[#allocation2 + $0x28] sm:$0xf]  ;;  %v6447_v34 = vld [vmem:[#allocation2 + $0x2c] sm:$0x1] }
 0x1c8   : > { %v3531_v6 = vpack.c.b16 %v3501_v31, %v3500_v0  ;;  %v4152_v0 = vshll.u32 %v7555_v13, 16  ;;  %v4156_v55 = vshrl.u32 %v7555_v13, 16  ;;  %v4921_v46 = vunpack.c.l.b16 %v4795_v62 }
 0x1c9   : > { %v4148_v60 = vrot.slane %v4146_v26, 5 }
 0x1ca   : > { %v2237_v9 = vpop.f32.mrf.mxu2  ;;  %v1861_v22 = vpop.f32.mrf.mxu1  ;;  %v7565_v42 = vrot.slane %v4152_v0, 5 }
 0x1cb   : > { %v2548_v57 = vpop.f32.mrf.mxu3  ;;  %v2293_v24 = vadd.f32 %v2237_v9, %v1857_v20  ;;  %v4136_v20 = vrot.slane %v4135_v25, 4  ;;  %v3388_v25 = vrot.slane %v6447_v34, 5 }
 0x1cc   : > { %v3228_v12 = vpop.f32.mrf.mxu0  ;;  %v2606_v45 = vadd.f32 %v2548_v57, %v2292_v44  ;;  %v4798_v44 = vsel %vm7101_vm14, %v4796_v15, %v4797_v27  ;;  %v4131_v57 = vsel %vm6718_vm11, %v4126_v5, %v4130_v16  ;;  %v7571_v5 = vld [vmem:[#allocation2 + $0x38] sm:$0x1] }
 0x1cd   : > { %3623 = vmatmul.bf16.gmra.mxu1 %v3531_v6  ;;  %v7548_v59 = vadd.f32 %v3228_v12, %v2605_v23  ;;  %v4922_v9 = vunpack.c.l.b16 %v4798_v44  ;;  %v4141_v37 = vsel %vm6718_vm11, %v4136_v20, %v4140_v18  ;;  %v3307_v6 = vld [vmem:[#allocation2 + $0x24] sm:$0xe]  ;;  %v4145_v12 = vrot.slane %v4143_v61, 4 }
 0x1ce   : > { %v5795_v15 = vrot.slane %v3307_v6, 9  ;;  %v4497_v62 = vunpack.c.l.b16 %v4131_v57  ;;  %v4498_v44 = vunpack.c.l.b16 %v4141_v37  ;;  %v4162_v57 = vshll.u32 %v7571_v5, 16 }
 0x1cf   : > { %3267 = vmatmul.bf16.gmra.mxu0 %v3119_v32  ;;  %v3385_v32 = vrot.slane %v6446_v33, 5  ;;  %v4953_v61 = vpack.c.b16 %v4922_v9, %v4921_v46 }
 0x1d0   : > { %4615 = vmatmul.bf16.vlgmr.msra.gmra.mxu3 %v4527_v28 }
 0x1d1   : > { %v3387_v27 = vrot.slane %v3385_v32, 4  ;;  %v3386_v16 = vsel %vm7101_vm14, %v5795_v15, %v3385_v32  ;;  %v4528_v15 = vpack.c.b16 %v4498_v44, %v4497_v62  ;;  %v7583_v62 = vld [vmem:[#allocation2 + $0x40] sm:$0xf] }
 0x1d2   : > { %v2239_v49 = vpop.f32.mrf.mxu2  ;;  %v1863_v23 = vpop.f32.mrf.mxu1  ;;  %v3502_v20 = vunpack.c.l.b16 %v3386_v16 }
 0x1d3   : > { %v2551_v29 = vpop.f32.mrf.mxu3  ;;  %v2294_v56 = vadd.f32 %v2239_v49, %v1859_v8  ;;  %v3389_v8 = vsel %vm7101_vm14, %v3387_v27, %v3388_v25  ;;  %v4801_v49 = vrot.slane %v7525_v36, 5  ;;  %v4804_v36 = vrot.slane %v7544_v14, 5  ;;  %v4055_v25 = vld [vmem:[#allocation2 + $0x3c] sm:$0xf]  ;;  %v6167_v14 = vld [vmem:[#allocation2 + $0x30] sm:$0xff] }
 0x1d4   : > { %v3230_v31 = vpop.f32.mrf.mxu0  ;;  %v2607_v39 = vadd.f32 %v2551_v29, %v2293_v24  ;;  %v4158_v24 = vrot.slane %v4156_v55, 4  ;;  %v3503_v18 = vunpack.c.l.b16 %v3389_v8  ;;  %v4729_v55 = vld [vmem:[#allocation2 + $0x24] sm:$0xe]  ;;  %v4164_v27 = vrot.slane %v4162_v57, 5 }
 0x1d5   : > { %v7563_v28 = vadd.f32 %v3230_v31, %v2606_v45  ;;  %v1862_v45 = vadd.f32 %v1861_v22, %v7222_v54  ;;  %v6018_v22 = vrot.slane %v4729_v55, 9  ;;  %v4803_v46 = vrot.slane %v4801_v49, 4 }
 0x1d6   : > { %v3532_v33 = vpack.c.b16 %v3503_v18, %v3502_v20  ;;  %v4159_v32 = vor.u32 %v4158_v24, %v7565_v42  ;;  %v1864_v34 = vadd.f32 %v1863_v23, %v7232_v43  ;;  %v6448_v20 = vld [vmem:[#allocation2 + $0x34] sm:$0xf]  ;;  %v4180_v55 = vshrl.u32 %v7583_v62, 16 }
 0x1d7   : > { %3938 = vmatmul.bf16.gmra.mxu2 %v6166_v10  ;;  %v4149_v10 = vor.u32 %v4148_v60, %v4145_v12  ;;  %v4802_v60 = vsel %vm7101_vm14, %v6018_v22, %v4801_v49  ;;  %v3392_v18 = vrot.slane %v6448_v20, 5  ;;  %v4170_v49 = vshll.u32 %v4055_v25, 16 }
 0x1d8   : > { %v4160_v12 = vrot.slane %v4159_v32, 4 }
 0x1d9   : > { %v4150_v9 = vrot.slane %v4149_v10, 4  ;;  %v3308_v10 = vld [vmem:[#allocation2 + $0x30] sm:$0xe] }
 0x1da   : > { %v2242_v26 = vpop.f32.mrf.mxu2  ;;  %v1866_v29 = vpop.f32.mrf.mxu1  ;;  %v4165_v43 = vsel %vm6718_vm11, %v4160_v12, %v4164_v27  ;;  %v5796_v57 = vrot.slane %v3308_v10, 9 }
 0x1db   : > { %v2553_v0 = vpop.f32.mrf.mxu3  ;;  %v2295_v31 = vadd.f32 %v2242_v26, %v1862_v45  ;;  %v4155_v8 = vsel %vm6718_vm11, %v4150_v9, %v7565_v42  ;;  %v4923_v26 = vunpack.c.l.b16 %v4802_v60  ;;  %v3394_v42 = vrot.slane %v3392_v18, 4  ;;  %v4730_v9 = vld [vmem:[#allocation2 + $0x30] sm:$0xe] }
 0x1dc   : > { %v3233_v37 = vpop.f32.mrf.mxu0  ;;  %v2608_v6 = vadd.f32 %v2553_v0, %v2294_v56  ;;  %v4176_v0 = vshll.u32 %v7583_v62, 16  ;;  %v1867_v22 = vadd.f32 %v1866_v29, %v7258_v35  ;;  %v3393_v12 = vsel %vm7101_vm14, %v5796_v57, %v3392_v18  ;;  %v7602_v29 = vld [vmem:[#allocation2 + $0x44] sm:$0x1] }
 0x1dd   : > { %3628 = vmatmul.bf16.gmra.mxu1 %v3532_v33  ;;  %v7577_v54 = vadd.f32 %v3233_v37, %v2607_v39  ;;  %v4805_v39 = vsel %vm7101_vm14, %v4803_v46, %v4804_v36  ;;  %v6449_v37 = vld [vmem:[#allocation2 + $0x38] sm:$0x1]  ;;  %v4500_v46 = vunpack.c.l.b16 %v4165_v43  ;;  %v4808_v36 = vrot.slane %v7555_v13, 5 }
 0x1de   : > { %v4924_v32 = vunpack.c.l.b16 %v4805_v39  ;;  %v4182_v39 = vrot.slane %v4180_v55, 4  ;;  %v6019_v13 = vrot.slane %v4730_v9, 9 }
 0x1df   : > { %5041 = vmatmul.bf16.vlgmr.msra.gmra.mxu0 %v4953_v61  ;;  %v4167_v61 = vshrl.u32 %v4055_v25, 16  ;;  %v3504_v25 = vunpack.c.l.b16 %v3393_v12  ;;  %v4810_v57 = vrot.slane %v4808_v36, 4 }
 0x1e0   : > { %4620 = vmatmul.bf16.gmra.mxu3 %v4528_v15  ;;  %v3395_v15 = vrot.slane %v6449_v37, 5  ;;  %v4058_v37 = vld [vmem:[#allocation2 + $0x48] sm:$0xf] }
 0x1e1   : > { %v4169_v27 = vrot.slane %v4167_v61, 4  ;;  %v4811_v61 = vrot.slane %v7571_v5, 5  ;;  %v4194_v12 = vshll.u32 %v4058_v37, 16 }
 0x1e2   : > { %v2244_v56 = vpop.f32.mrf.mxu2  ;;  %v1868_v24 = vpop.f32.mrf.mxu1 }
 0x1e3   : > { %v2556_v44 = vpop.f32.mrf.mxu3  ;;  %v2296_v16 = vadd.f32 %v2244_v56, %v1864_v34  ;;  %v4172_v34 = vrot.slane %v4170_v49, 5  ;;  %v4178_v56 = vrot.slane %v4176_v0, 5  ;;  %v4186_v0 = vshll.u32 %v7602_v29, 16 }
 0x1e4   : > { %v3235_v23 = vpop.f32.mrf.mxu0  ;;  %v2609_v45 = vadd.f32 %v2556_v44, %v2295_v31  ;;  %v4499_v31 = vunpack.c.l.b16 %v4155_v8 }
 0x1e5   : > { %v7594_v33 = vadd.f32 %v3235_v23, %v2608_v6  ;;  %v3396_v6 = vsel %vm7101_vm14, %v3394_v42, %v3395_v15  ;;  %v4173_v49 = vor.u32 %v4172_v34, %v4169_v27  ;;  %v4183_v42 = vor.u32 %v4182_v39, %v4178_v56  ;;  %v7613_v15 = vld [vmem:[#allocation2 + $0x4c] sm:$0xf]  ;;  %v6168_v34 = vld [vmem:[#allocation2 + $0x3c] sm:$0xff] }
 0x1e6   : > { %v3505_v60 = vunpack.c.l.b16 %v3396_v6  ;;  %v4529_v10 = vpack.c.b16 %v4500_v46, %v4499_v31  ;;  %v4188_v31 = vrot.slane %v4186_v0, 5  ;;  %v4191_v46 = vshrl.u32 %v4058_v37, 16 }
 0x1e7   : > { %3943 = vmatmul.bf16.gmra.mxu2 %v6167_v14  ;;  %v4954_v14 = vpack.c.b16 %v4924_v32, %v4923_v26  ;;  %v4809_v26 = vsel %vm7101_vm14, %v6019_v13, %v4808_v36  ;;  %v1869_v32 = vadd.f32 %v1868_v24, %v7271_v63  ;;  %v4174_v5 = vrot.slane %v4173_v49, 4  ;;  %v6450_v24 = vld [vmem:[#allocation2 + $0x40] sm:$0xf]  ;;  %v6451_v49 = vld [vmem:[#allocation2 + $0x44] sm:$0x1] }
 0x1e8   : > { %v3533_v23 = vpack.c.b16 %v3505_v60, %v3504_v25  ;;  %v4200_v25 = vshll.u32 %v7613_v15, 16  ;;  %v4204_v36 = vshrl.u32 %v7613_v15, 16  ;;  %v4925_v39 = vunpack.c.l.b16 %v4809_v26 }
 0x1e9   : > { %v4196_v0 = vrot.slane %v4194_v12, 5 }
 0x1ea   : > { %v2247_v44 = vpop.f32.mrf.mxu2  ;;  %v1871_v35 = vpop.f32.mrf.mxu1  ;;  %v7623_v37 = vrot.slane %v4200_v25, 5 }
 0x1eb   : > { %v2558_v8 = vpop.f32.mrf.mxu3  ;;  %v2297_v43 = vadd.f32 %v2247_v44, %v1867_v22  ;;  %v4184_v22 = vrot.slane %v4183_v42, 4  ;;  %v3402_v42 = vrot.slane %v6451_v49, 5 }
 0x1ec   : > { %v3238_v20 = vpop.f32.mrf.mxu0  ;;  %v2610_v18 = vadd.f32 %v2558_v8, %v2296_v16  ;;  %v4812_v16 = vsel %vm7101_vm14, %v4810_v57, %v4811_v61  ;;  %v4179_v8 = vsel %vm6718_vm11, %v4174_v5, %v4178_v56  ;;  %v7629_v5 = vld [vmem:[#allocation2 + $0x50] sm:$0x1] }
 0x1ed   : > { %3633 = vmatmul.bf16.gmra.mxu1 %v3533_v23  ;;  %v7606_v55 = vadd.f32 %v3238_v20, %v2609_v45  ;;  %v4926_v44 = vunpack.c.l.b16 %v4812_v16  ;;  %v4189_v13 = vsel %vm6718_vm11, %v4184_v22, %v4188_v31  ;;  %v3309_v23 = vld [vmem:[#allocation2 + $0x3c] sm:$0xe]  ;;  %v4193_v20 = vrot.slane %v4191_v46, 4 }
 0x1ee   : > { %v5797_v57 = vrot.slane %v3309_v23, 9  ;;  %v4501_v26 = vunpack.c.l.b16 %v4179_v8  ;;  %v4502_v16 = vunpack.c.l.b16 %v4189_v13  ;;  %v4210_v8 = vshll.u32 %v7629_v5, 16 }
 0x1ef   : > { %5046 = vmatmul.bf16.gmra.mxu0 %v4954_v14  ;;  %v3399_v14 = vrot.slane %v6450_v24, 5  ;;  %v4955_v46 = vpack.c.b16 %v4926_v44, %v4925_v39 }
 0x1f0   : > { %4625 = vmatmul.bf16.gmra.mxu3 %v4529_v10 }
 0x1f1   : > { %v3401_v61 = vrot.slane %v3399_v14, 4  ;;  %v3400_v56 = vsel %vm7101_vm14, %v5797_v57, %v3399_v14  ;;  %v4530_v57 = vpack.c.b16 %v4502_v16, %v4501_v26  ;;  %v7641_v26 = vld [vmem:[#allocation2 + $0x58] sm:$0xf] }
 0x1f2   : > { %v2249_v9 = vpop.f32.mrf.mxu2  ;;  %v1873_v45 = vpop.f32.mrf.mxu1  ;;  %v3506_v22 = vunpack.c.l.b16 %v3400_v56 }
 0x1f3   : > { %v2561_v6 = vpop.f32.mrf.mxu3  ;;  %v2298_v27 = vadd.f32 %v2249_v9, %v1869_v32  ;;  %v3403_v32 = vsel %vm7101_vm14, %v3401_v61, %v3402_v42  ;;  %v4815_v9 = vrot.slane %v7583_v62, 5  ;;  %v4818_v62 = vrot.slane %v7602_v29, 5  ;;  %v4061_v42 = vld [vmem:[#allocation2 + $0x54] sm:$0xf]  ;;  %v6169_v29 = vld [vmem:[#allocation2 + $0x48] sm:$0xff] }
 0x1f4   : > { %v3240_v60 = vpop.f32.mrf.mxu0  ;;  %v2611_v63 = vadd.f32 %v2561_v6, %v2297_v43  ;;  %v4206_v43 = vrot.slane %v4204_v36, 4  ;;  %v3507_v31 = vunpack.c.l.b16 %v3403_v32  ;;  %v4731_v36 = vld [vmem:[#allocation2 + $0x3c] sm:$0xe]  ;;  %v4212_v61 = vrot.slane %v4210_v8, 5 }
 0x1f5   : > { %v7621_v10 = vadd.f32 %v3240_v60, %v2610_v18  ;;  %v1872_v18 = vadd.f32 %v1871_v35, %v7283_v47  ;;  %v6020_v35 = vrot.slane %v4731_v36, 9  ;;  %v4817_v39 = vrot.slane %v4815_v9, 4 }
 0x1f6   : > { %v3534_v24 = vpack.c.b16 %v3507_v31, %v3506_v22  ;;  %v4207_v14 = vor.u32 %v4206_v43, %v7623_v37  ;;  %v1874_v49 = vadd.f32 %v1873_v45, %v7301_v30  ;;  %v6452_v22 = vld [vmem:[#allocation2 + $0x4c] sm:$0xf]  ;;  %v4228_v36 = vshrl.u32 %v7641_v26, 16 }
 0x1f7   : > { %3948 = vmatmul.bf16.gmra.mxu2 %v6168_v34  ;;  %v4197_v34 = vor.u32 %v4196_v0, %v4193_v20  ;;  %v4816_v0 = vsel %vm7101_vm14, %v6020_v35, %v4815_v9  ;;  %v3406_v31 = vrot.slane %v6452_v22, 5  ;;  %v4218_v9 = vshll.u32 %v4061_v42, 16 }
 0x1f8   : > { %v4208_v20 = vrot.slane %v4207_v14, 4 }
 0x1f9   : > { %v4198_v44 = vrot.slane %v4197_v34, 4  ;;  %v3310_v34 = vld [vmem:[#allocation2 + $0x48] sm:$0xe] }
 0x1fa   : > { %v2252_v12 = vpop.f32.mrf.mxu2  ;;  %v1876_v6 = vpop.f32.mrf.mxu1  ;;  %v4213_v30 = vsel %vm6718_vm11, %v4208_v20, %v4212_v61  ;;  %v5798_v8 = vrot.slane %v3310_v34, 9 }
 0x1fb   : > { %v2563_v25 = vpop.f32.mrf.mxu3  ;;  %v2299_v60 = vadd.f32 %v2252_v12, %v1872_v18  ;;  %v4203_v32 = vsel %vm6718_vm11, %v4198_v44, %v7623_v37  ;;  %v4927_v12 = vunpack.c.l.b16 %v4816_v0  ;;  %v3408_v37 = vrot.slane %v3406_v31, 4  ;;  %v4732_v44 = vld [vmem:[#allocation2 + $0x48] sm:$0xe] }
 0x1fc   : > { %v3243_v13 = vpop.f32.mrf.mxu0  ;;  %v2612_v23 = vadd.f32 %v2563_v25, %v2298_v27  ;;  %v4224_v25 = vshll.u32 %v7641_v26, 16  ;;  %v1877_v35 = vadd.f32 %v1876_v6, %v7201_v40  ;;  %v3407_v20 = vsel %vm7101_vm14, %v5798_v8, %v3406_v31  ;;  %v7660_v6 = vld [vmem:[#allocation2 + $0x5c] sm:$0x1] }
 0x1fd   : > { %3638 = vmatmul.bf16.gmra.mxu1 %v3534_v24  ;;  %v7635_v47 = vadd.f32 %v3243_v13, %v2611_v63  ;;  %v4819_v63 = vsel %vm7101_vm14, %v4817_v39, %v4818_v62  ;;  %v6453_v13 = vld [vmem:[#allocation2 + $0x50] sm:$0x1]  ;;  %v4504_v39 = vunpack.c.l.b16 %v4213_v30  ;;  %v4822_v62 = vrot.slane %v7613_v15, 5 }
 0x1fe   : > { %v4928_v14 = vunpack.c.l.b16 %v4819_v63  ;;  %v4230_v63 = vrot.slane %v4228_v36, 4  ;;  %v6021_v15 = vrot.slane %v4732_v44, 9 }
 0x1ff   : > { %5051 = vmatmul.bf16.gmra.mxu0 %v4955_v46  ;;  %v4215_v46 = vshrl.u32 %v4061_v42, 16  ;;  %v3508_v42 = vunpack.c.l.b16 %v3407_v20  ;;  %v4824_v8 = vrot.slane %v4822_v62, 4 }
 0x200   : > { %4630 = vmatmul.bf16.gmra.mxu3 %v4530_v57  ;;  %v3409_v57 = vrot.slane %v6453_v13, 5  ;;  %v4064_v13 = vld [vmem:[#allocation2 + $0x60] sm:$0xf] }
 0x201   : > { %v4217_v61 = vrot.slane %v4215_v46, 4  ;;  %v4825_v46 = vrot.slane %v7629_v5, 5  ;;  %v4242_v20 = vshll.u32 %v4064_v13, 16 }
 0x202   : > { %v2254_v27 = vpop.f32.mrf.mxu2  ;;  %v1878_v43 = vpop.f32.mrf.mxu1 }
 0x203   : > { %v2566_v16 = vpop.f32.mrf.mxu3  ;;  %v2300_v56 = vadd.f32 %v2254_v27, %v1874_v49  ;;  %v4220_v49 = vrot.slane %v4218_v9, 5  ;;  %v4226_v27 = vrot.slane %v4224_v25, 5  ;;  %v4234_v25 = vshll.u32 %v7660_v6, 16 }
 0x204   : > { %v3245_v45 = vpop.f32.mrf.mxu0  ;;  %v2613_v18 = vadd.f32 %v2566_v16, %v2299_v60  ;;  %v4503_v60 = vunpack.c.l.b16 %v4203_v32 }
 0x205   : > { %v7652_v24 = vadd.f32 %v3245_v45, %v2612_v23  ;;  %v3410_v23 = vsel %vm7101_vm14, %v3408_v37, %v3409_v57  ;;  %v4221_v9 = vor.u32 %v4220_v49, %v4217_v61  ;;  %v4231_v37 = vor.u32 %v4230_v63, %v4226_v27  ;;  %v7671_v57 = vld [vmem:[#allocation2 + $0x64] sm:$0xf]  ;;  %v6170_v49 = vld [vmem:[#allocation2 + $0x54] sm:$0xff] }
 0x206   : > { %v3509_v0 = vunpack.c.l.b16 %v3410_v23  ;;  %v4531_v34 = vpack.c.b16 %v4504_v39, %v4503_v60  ;;  %v4236_v60 = vrot.slane %v4234_v25, 5  ;;  %v4239_v39 = vshrl.u32 %v4064_v13, 16 }
 0x207   : > { %3953 = vmatmul.bf16.gmra.mxu2 %v6169_v29  ;;  %v4956_v29 = vpack.c.b16 %v4928_v14, %v4927_v12  ;;  %v4823_v12 = vsel %vm7101_vm14, %v6021_v15, %v4822_v62  ;;  %v1879_v14 = vadd.f32 %v1878_v43, %v7218_v19  ;;  %v4222_v5 = vrot.slane %v4221_v9, 4  ;;  %v6454_v43 = vld [vmem:[#allocation2 + $0x58] sm:$0xf]  ;;  %v6455_v9 = vld [vmem:[#allocation2 + $0x5c] sm:$0x1] }
 0x208   : > { %v3535_v45 = vpack.c.b16 %v3509_v0, %v3508_v42  ;;  %v4248_v42 = vshll.u32 %v7671_v57, 16  ;;  %v4252_v62 = vshrl.u32 %v7671_v57, 16  ;;  %v4929_v63 = vunpack.c.l.b16 %v4823_v12 }
 0x209   : > { %v4244_v25 = vrot.slane %v4242_v20, 5 }
 0x20a   : > { %v2257_v16 = vpop.f32.mrf.mxu2  ;;  %v1881_v40 = vpop.f32.mrf.mxu1  ;;  %v7681_v13 = vrot.slane %v4248_v42, 5 }
 0x20b   : > { %v2568_v32 = vpop.f32.mrf.mxu3  ;;  %v2301_v30 = vadd.f32 %v2257_v16, %v1877_v35  ;;  %v4232_v35 = vrot.slane %v4231_v37, 4  ;;  %v3416_v37 = vrot.slane %v6455_v9, 5 }
 0x20c   : > { %v3248_v22 = vpop.f32.mrf.mxu0  ;;  %v2614_v31 = vadd.f32 %v2568_v32, %v2300_v56  ;;  %v4826_v56 = vsel %vm7101_vm14, %v4824_v8, %v4825_v46  ;;  %v4227_v32 = vsel %vm6718_vm11, %v4222_v5, %v4226_v27  ;;  %v7687_v5 = vld [vmem:[#allocation2 + $0x68] sm:$0x1] }
 0x20d   : > { %3643 = vmatmul.bf16.gmra.mxu1 %v3535_v45  ;;  %v7664_v36 = vadd.f32 %v3248_v22, %v2613_v18  ;;  %v4930_v16 = vunpack.c.l.b16 %v4826_v56  ;;  %v4237_v15 = vsel %vm6718_vm11, %v4232_v35, %v4236_v60  ;;  %v3311_v45 = vld [vmem:[#allocation2 + $0x54] sm:$0xe]  ;;  %v4241_v22 = vrot.slane %v4239_v39, 4 }
 0x20e   : > { %v5799_v8 = vrot.slane %v3311_v45, 9  ;;  %v4505_v12 = vunpack.c.l.b16 %v4227_v32  ;;  %v4506_v56 = vunpack.c.l.b16 %v4237_v15  ;;  %v4258_v32 = vshll.u32 %v7687_v5, 16 }
 0x20f   : > { %5056 = vmatmul.bf16.gmra.mxu0 %v4956_v29  ;;  %v3413_v29 = vrot.slane %v6454_v43, 5  ;;  %v4957_v39 = vpack.c.b16 %v4930_v16, %v4929_v63 }
 0x210   : > { %4635 = vmatmul.bf16.gmra.mxu3 %v4531_v34 }
 0x211   : > { %v3415_v46 = vrot.slane %v3413_v29, 4  ;;  %v3414_v27 = vsel %vm7101_vm14, %v5799_v8, %v3413_v29  ;;  %v4532_v8 = vpack.c.b16 %v4506_v56, %v4505_v12  ;;  %v7699_v12 = vld [vmem:[#allocation2 + $0x70] sm:$0xf] }
 0x212   : > { %v2259_v44 = vpop.f32.mrf.mxu2  ;;  %v1883_v18 = vpop.f32.mrf.mxu1  ;;  %v3510_v35 = vunpack.c.l.b16 %v3414_v27 }
 0x213   : > { %v2571_v23 = vpop.f32.mrf.mxu3  ;;  %v2302_v61 = vadd.f32 %v2259_v44, %v1879_v14  ;;  %v3417_v14 = vsel %vm7101_vm14, %v3415_v46, %v3416_v37  ;;  %v4829_v44 = vrot.slane %v7641_v26, 5  ;;  %v4832_v26 = vrot.slane %v7660_v6, 5  ;;  %v4067_v37 = vld [vmem:[#allocation2 + $0x6c] sm:$0xf]  ;;  %v6171_v6 = vld [vmem:[#allocation2 + $0x60] sm:$0xff] }
 0x214   : > { %v3250_v0 = vpop.f32.mrf.mxu0  ;;  %v2615_v19 = vadd.f32 %v2571_v23, %v2301_v30  ;;  %v4254_v30 = vrot.slane %v4252_v62, 4  ;;  %v3511_v60 = vunpack.c.l.b16 %v3417_v14  ;;  %v4733_v62 = vld [vmem:[#allocation2 + $0x54] sm:$0xe]  ;;  %v4260_v46 = vrot.slane %v4258_v32, 5 }
 0x215   : > { %v7679_v34 = vadd.f32 %v3250_v0, %v2614_v31  ;;  %v1882_v31 = vadd.f32 %v1881_v40, %v7230_v58  ;;  %v6022_v40 = vrot.slane %v4733_v62, 9  ;;  %v4831_v63 = vrot.slane %v4829_v44, 4 }
 0x216   : > { %v3536_v43 = vpack.c.b16 %v3511_v60, %v3510_v35  ;;  %v4255_v29 = vor.u32 %v4254_v30, %v7681_v13  ;;  %v1884_v9 = vadd.f32 %v1883_v18, %v7256_v1  ;;  %v6456_v35 = vld [vmem:[#allocation2 + $0x64] sm:$0xf]  ;;  %v4276_v62 = vshrl.u32 %v7699_v12, 16 }
 0x217   : > { %3958 = vmatmul.bf16.gmra.mxu2 %v6170_v49  ;;  %v4245_v49 = vor.u32 %v4244_v25, %v4241_v22  ;;  %v4830_v25 = vsel %vm7101_vm14, %v6022_v40, %v4829_v44  ;;  %v3420_v60 = vrot.slane %v6456_v35, 5  ;;  %v4266_v44 = vshll.u32 %v4067_v37, 16 }
 0x218   : > { %v4256_v22 = vrot.slane %v4255_v29, 4 }
 0x219   : > { %v4246_v16 = vrot.slane %v4245_v49, 4  ;;  %v3312_v49 = vld [vmem:[#allocation2 + $0x60] sm:$0xe] }
 0x21a   : > { %v2262_v20 = vpop.f32.mrf.mxu2  ;;  %v1886_v23 = vpop.f32.mrf.mxu1  ;;  %v4261_v1 = vsel %vm6718_vm11, %v4256_v22, %v4260_v46  ;;  %v5800_v32 = vrot.slane %v3312_v49, 9 }
 0x21b   : > { %v2573_v42 = vpop.f32.mrf.mxu3  ;;  %v2303_v0 = vadd.f32 %v2262_v20, %v1882_v31  ;;  %v4251_v14 = vsel %vm6718_vm11, %v4246_v16, %v7681_v13  ;;  %v4931_v20 = vunpack.c.l.b16 %v4830_v25  ;;  %v3422_v13 = vrot.slane %v3420_v60, 4  ;;  %v4734_v16 = vld [vmem:[#allocation2 + $0x60] sm:$0xe] }
 0x21c   : > { %v3253_v15 = vpop.f32.mrf.mxu0  ;;  %v2616_v45 = vadd.f32 %v2573_v42, %v2302_v61  ;;  %v4272_v42 = vshll.u32 %v7699_v12, 16  ;;  %v1887_v40 = vadd.f32 %v1886_v23, %v7269_v53  ;;  %v3421_v22 = vsel %vm7101_vm14, %v5800_v32, %v3420_v60  ;;  %v7718_v23 = vld [vmem:[#allocation2 + $0x74] sm:$0x1] }
 0x21d   : > { %3648 = vmatmul.bf16.gmra.mxu1 %v3536_v43  ;;  %v7693_v58 = vadd.f32 %v3253_v15, %v2615_v19  ;;  %v4833_v19 = vsel %vm7101_vm14, %v4831_v63, %v4832_v26  ;;  %v6457_v15 = vld [vmem:[#allocation2 + $0x68] sm:$0x1]  ;;  %v4508_v63 = vunpack.c.l.b16 %v4261_v1  ;;  %v4836_v26 = vrot.slane %v7671_v57, 5 }
 0x21e   : > { %v4932_v29 = vunpack.c.l.b16 %v4833_v19  ;;  %v4278_v19 = vrot.slane %v4276_v62, 4  ;;  %v6023_v57 = vrot.slane %v4734_v16, 9 }
 0x21f   : > { %5061 = vmatmul.bf16.gmra.mxu0 %v4957_v39  ;;  %v4263_v39 = vshrl.u32 %v4067_v37, 16  ;;  %v3512_v37 = vunpack.c.l.b16 %v3421_v22  ;;  %v4838_v32 = vrot.slane %v4836_v26, 4 }
 0x220   : > { %4640 = vmatmul.bf16.gmra.mxu3 %v4532_v8  ;;  %v3423_v8 = vrot.slane %v6457_v15, 5  ;;  %v4070_v15 = vld [vmem:[#allocation2 + $0x78] sm:$0xf] }
 0x221   : > { %v4265_v46 = vrot.slane %v4263_v39, 4  ;;  %v4839_v39 = vrot.slane %v7687_v5, 5  ;;  %v4290_v22 = vshll.u32 %v4070_v15, 16 }
 0x222   : > { %v2264_v61 = vpop.f32.mrf.mxu2  ;;  %v1888_v30 = vpop.f32.mrf.mxu1 }
 0x223   : > { %v2576_v56 = vpop.f32.mrf.mxu3  ;;  %v2304_v27 = vadd.f32 %v2264_v61, %v1884_v9  ;;  %v4268_v9 = vrot.slane %v4266_v44, 5  ;;  %v4274_v61 = vrot.slane %v4272_v42, 5  ;;  %v4282_v42 = vshll.u32 %v7718_v23, 16 }
 0x224   : > { %v3255_v18 = vpop.f32.mrf.mxu0  ;;  %v2617_v31 = vadd.f32 %v2576_v56, %v2303_v0  ;;  %v4507_v0 = vunpack.c.l.b16 %v4251_v14 }
 0x225   : > { %v7710_v43 = vadd.f32 %v3255_v18, %v2616_v45  ;;  %v3424_v45 = vsel %vm7101_vm14, %v3422_v13, %v3423_v8  ;;  %v4269_v44 = vor.u32 %v4268_v9, %v4265_v46  ;;  %v4279_v13 = vor.u32 %v4278_v19, %v4274_v61  ;;  %v7729_v8 = vld [vmem:[#allocation2 + $0x7c] sm:$0xf]  ;;  %v6172_v9 = vld [vmem:[#allocation2 + $0x6c] sm:$0xff] }
 0x226   : > { %v3513_v25 = vunpack.c.l.b16 %v3424_v45  ;;  %v4533_v49 = vpack.c.b16 %v4508_v63, %v4507_v0  ;;  %v4284_v0 = vrot.slane %v4282_v42, 5  ;;  %v4287_v63 = vshrl.u32 %v4070_v15, 16 }
 0x227   : > { %3963 = vmatmul.bf16.gmra.mxu2 %v6171_v6  ;;  %v4958_v6 = vpack.c.b16 %v4932_v29, %v4931_v20  ;;  %v4837_v20 = vsel %vm7101_vm14, %v6023_v57, %v4836_v26  ;;  %v1889_v29 = vadd.f32 %v1888_v30, %v7281_v41  ;;  %v4270_v5 = vrot.slane %v4269_v44, 4  ;;  %v6458_v30 = vld [vmem:[#allocation2 + $0x70] sm:$0xf]  ;;  %v6459_v44 = vld [vmem:[#allocation2 + $0x74] sm:$0x1] }
 0x228   : > { %v3537_v18 = vpack.c.b16 %v3513_v25, %v3512_v37  ;;  %v4296_v37 = vshll.u32 %v7729_v8, 16  ;;  %v4300_v26 = vshrl.u32 %v7729_v8, 16  ;;  %v4933_v19 = vunpack.c.l.b16 %v4837_v20 }
 0x229   : > { %v4292_v42 = vrot.slane %v4290_v22, 5 }
 0x22a   : > { %v2267_v56 = vpop.f32.mrf.mxu2  ;;  %v1891_v53 = vpop.f32.mrf.mxu1  ;;  %v7739_v15 = vrot.slane %v4296_v37, 5 }
 0x22b   : > { %v2578_v14 = vpop.f32.mrf.mxu3  ;;  %v2305_v1 = vadd.f32 %v2267_v56, %v1887_v40  ;;  %v4280_v40 = vrot.slane %v4279_v13, 4  ;;  %v3430_v13 = vrot.slane %v6459_v44, 5  ;;  %v4073_v44 = vld [vmem:[#allocation2 + $0x84] sm:$0xf] }
 0x22c   : > { %v3258_v35 = vpop.f32.mrf.mxu0  ;;  %v2618_v60 = vadd.f32 %v2578_v14, %v2304_v27  ;;  %v4840_v27 = vsel %vm7101_vm14, %v4838_v32, %v4839_v39  ;;  %v4275_v14 = vsel %vm6718_vm11, %v4270_v5, %v4274_v61  ;;  %v7745_v5 = vld [vmem:[#allocation2 + $0x80] sm:$0x1] }
 0x22d   : > { %3653 = vmatmul.bf16.gmra.mxu1 %v3537_v18  ;;  %v7722_v62 = vadd.f32 %v3258_v35, %v2617_v31  ;;  %v4934_v56 = vunpack.c.l.b16 %v4840_v27  ;;  %v4285_v57 = vsel %vm6718_vm11, %v4280_v40, %v4284_v0  ;;  %v3313_v18 = vld [vmem:[#allocation2 + $0x6c] sm:$0xe]  ;;  %v4289_v35 = vrot.slane %v4287_v63, 4 }
 0x22e   : > { %v5801_v32 = vrot.slane %v3313_v18, 9  ;;  %v4509_v20 = vunpack.c.l.b16 %v4275_v14  ;;  %v4510_v27 = vunpack.c.l.b16 %v4285_v57  ;;  %v4306_v14 = vshll.u32 %v7745_v5, 16 }
 0x22f   : > { %8076 = vst [vmem:[#allocation11_spill] sm:$0xff] %v7722_v62  ;;  %5066 = vmatmul.bf16.gmra.mxu0 %v4958_v6  ;;  %v3427_v6 = vrot.slane %v6458_v30, 5  ;;  %v4959_v63 = vpack.c.b16 %v4934_v56, %v4933_v19  ;;  %v4846_v56 = vrot.slane %v7718_v23, 5 }
 0x230   : > { %4645 = vmatmul.bf16.gmra.mxu3 %v4533_v49 }
 0x231   : > { %v3429_v39 = vrot.slane %v3427_v6, 4  ;;  %v3428_v61 = vsel %vm7101_vm14, %v5801_v32, %v3427_v6 }
 0x232   : > { %v2269_v16 = vpop.f32.mrf.mxu2  ;;  %v1893_v31 = vpop.f32.mrf.mxu1  ;;  %v3514_v40 = vunpack.c.l.b16 %v3428_v61 }
 0x233   : > { %v2581_v45 = vpop.f32.mrf.mxu3  ;;  %v2306_v46 = vadd.f32 %v2269_v16, %v1889_v29  ;;  %v3431_v29 = vsel %vm7101_vm14, %v3429_v39, %v3430_v13  ;;  %v4843_v16 = vrot.slane %v7699_v12, 5  ;;  %v4308_v39 = vrot.slane %v4306_v14, 5  ;;  %v8079_v13 = vld [vmem:[#allocation3_spill] sm:$0xff] }
 0x234   : > { %v3260_v25 = vpop.f32.mrf.mxu0  ;;  %v2619_v41 = vadd.f32 %v2581_v45, %v2305_v1  ;;  %v4302_v1 = vrot.slane %v4300_v26, 4  ;;  %v3515_v0 = vunpack.c.l.b16 %v3431_v29  ;;  %v4735_v26 = vld [vmem:[#allocation2 + $0x6c] sm:$0xe] }
 0x235   : > { %v7737_v49 = vadd.f32 %v3260_v25, %v2618_v60  ;;  %v1892_v60 = vadd.f32 %v1891_v53, %v7303_v50  ;;  %v4534_v50 = vpack.c.b16 %v4510_v27, %v4509_v20  ;;  %v6024_v19 = vrot.slane %v4735_v26, 9 }
 0x236   : > { %v3538_v30 = vpack.c.b16 %v3515_v0, %v3514_v40  ;;  %v4303_v6 = vor.u32 %v4302_v1, %v7739_v15  ;;  %v4845_v12 = vrot.slane %v4843_v16, 4  ;;  %v7757_v1 = vld [vmem:[#allocation2 + $0x88] sm:$0xf]  ;;  %v4311_v40 = vshrl.u32 %v4073_v44, 16 }
 0x237   : > { %8077 = vst [vmem:[#allocation12_spill] sm:$0xff] %v7737_v49  ;;  %3968 = vmatmul.bf16.gmra.mxu2 %v6172_v9  ;;  %v4293_v9 = vor.u32 %v4292_v42, %v4289_v35  ;;  %v1894_v42 = vadd.f32 %v1893_v31, %v8079_v13  ;;  %v4314_v0 = vshll.u32 %v4073_v44, 16  ;;  %v4324_v26 = vshrl.u32 %v7757_v1, 16 }
 0x238   : > { %v4304_v35 = vrot.slane %v4303_v6, 4 }
 0x239   : > { %v4294_v32 = vrot.slane %v4293_v9, 4 }
 0x23a   : > { %v2272_v22 = vpop.f32.mrf.mxu2  ;;  %v7749_v45 = vpop.f32.mrf.mxu1  ;;  %v4309_v31 = vsel %vm6718_vm11, %v4304_v35, %v4308_v39  ;;  %v4313_v35 = vrot.slane %v4311_v40, 4  ;;  %v4850_v40 = vrot.slane %v7729_v8, 5  ;;  %v4853_v8 = vrot.slane %v7745_v5, 5 }
 0x23b   : > { %v2583_v37 = vpop.f32.mrf.mxu3  ;;  %v2307_v25 = vadd.f32 %v2272_v22, %v1892_v60  ;;  %v4299_v23 = vsel %vm6718_vm11, %v4294_v32, %v7739_v15  ;;  %v6173_v60 = vld [vmem:[#allocation2 + $0x78] sm:$0xff]  ;;  %v4512_v32 = vunpack.c.l.b16 %v4309_v31 }
 0x23c   : > { %v3263_v57 = vpop.f32.mrf.mxu0  ;;  %v2620_v18 = vadd.f32 %v2583_v37, %v2306_v46  ;;  %v4844_v46 = vsel %vm7101_vm14, %v6024_v19, %v4843_v16  ;;  %v6460_v22 = vld [vmem:[#allocation2 + $0x7c] sm:$0xf]  ;;  %v4320_v37 = vshll.u32 %v7757_v1, 16  ;;  %v3314_v15 = vld [vmem:[#allocation2 + $0x78] sm:$0xe] }
 0x23d   : > { %3658 = vmatmul.bf16.gmra.mxu1 %v3538_v30  ;;  %v7753_v53 = vadd.f32 %v3263_v57, %v2619_v41  ;;  %v4847_v41 = vsel %vm7101_vm14, %v4845_v12, %v4846_v56  ;;  %v3434_v9 = vrot.slane %v6460_v22, 5  ;;  %v4935_v30 = vunpack.c.l.b16 %v4844_v46  ;;  %v6461_v19 = vld [vmem:[#allocation2 + $0x80] sm:$0x1] }
 0x23e   : > { %v4936_v14 = vunpack.c.l.b16 %v4847_v41  ;;  %v5802_v57 = vrot.slane %v3314_v15, 9  ;;  %v3437_v12 = vrot.slane %v6461_v19, 5  ;;  %v4511_v56 = vunpack.c.l.b16 %v4299_v23  ;;  %v7778_v41 = vld [vmem:[#allocation2 + $0x8c] sm:$0x1] }
 0x23f   : > { %8078 = vst [vmem:[#allocation13_spill] sm:$0xff] %v7753_v53  ;;  %5071 = vmatmul.bf16.gmra.mxu0 %v4959_v63  ;;  %v4322_v13 = vrot.slane %v4320_v37, 5  ;;  %v4852_v19 = vrot.slane %v4850_v40, 4 }
 0x240   : > { %4650 = vmatmul.bf16.gmra.mxu3 %v4534_v50  ;;  %v3436_v50 = vrot.slane %v3434_v9, 4  ;;  %v3435_v39 = vsel %vm7101_vm14, %v5802_v57, %v3434_v9  ;;  %v4960_v23 = vpack.c.b16 %v4936_v14, %v4935_v30  ;;  %v4535_v31 = vpack.c.b16 %v4512_v32, %v4511_v56  ;;  %v4736_v9 = vld [vmem:[#allocation2 + $0x78] sm:$0xe]  ;;  %v7788_v30 = vld [vmem:[#allocation2 + $0x94] sm:$0xf] }
 0x241   : > { %v4854_v5 = vsel %vm7101_vm14, %v4852_v19, %v4853_v8  ;;  %v8083_v8 = vld [vmem:[#allocation4_spill] sm:$0xff] }
 0x242   : > { %v2274_v20 = vpop.f32.mrf.mxu2  ;;  %v7766_v27 = vpop.f32.mrf.mxu1  ;;  %v3438_v44 = vsel %vm7101_vm14, %v3436_v50, %v3437_v12  ;;  %v6025_v50 = vrot.slane %v4736_v9, 9  ;;  %v4076_v12 = vld [vmem:[#allocation2 + $0x90] sm:$0xf]  ;;  %v3315_v9 = vld [vmem:[#allocation2 + $0x84] sm:$0xe]  ;;  %v4938_v53 = vunpack.c.l.b16 %v4854_v5 }
 0x243   : > { %v2586_v61 = vpop.f32.mrf.mxu3  ;;  %v2308_v29 = vadd.f32 %v2274_v20, %v1894_v42  ;;  %v4326_v42 = vrot.slane %v4324_v26, 4  ;;  %v3517_v46 = vunpack.c.l.b16 %v3438_v44  ;;  %v4330_v26 = vshll.u32 %v7778_v41, 16 }
 0x244   : > { %v3265_v63 = vpop.f32.mrf.mxu0  ;;  %v2621_v16 = vadd.f32 %v2586_v61, %v2307_v25  ;;  %v4316_v25 = vrot.slane %v4314_v0, 5  ;;  %v4335_v32 = vshrl.u32 %v4076_v12, 16 }
 0x245   : > { %v7772_v6 = vadd.f32 %v3265_v63, %v2620_v18  ;;  %v3516_v18 = vunpack.c.l.b16 %v3435_v39  ;;  %v4327_v37 = vor.u32 %v4326_v42, %v4322_v13  ;;  %v4851_v42 = vsel %vm7101_vm14, %v6025_v50, %v4850_v40 }
 0x246   : > { %v4317_v15 = vor.u32 %v4316_v25, %v4313_v35  ;;  %v4338_v35 = vshll.u32 %v4076_v12, 16  ;;  %v4344_v25 = vshll.u32 %v7788_v30, 16  ;;  %v5803_v50 = vrot.slane %v3315_v9, 9 }
 0x247   : > { %8080 = vst [vmem:[#allocation3_spill] sm:$0xff] %v7772_v6  ;;  %3973 = vmatmul.bf16.gmra.mxu2 %v6173_v60  ;;  %v3539_v0 = vpack.c.b16 %v3517_v46, %v3516_v18  ;;  %v4328_v56 = vrot.slane %v4327_v37, 4  ;;  %v6174_v46 = vld [vmem:[#allocation2 + $0x84] sm:$0xff] }
 0x248   : > { %v4318_v14 = vrot.slane %v4317_v15, 4  ;;  %v4337_v15 = vrot.slane %v4335_v32, 4  ;;  %v4340_v37 = vrot.slane %v4338_v35, 5 }
 0x24a   : > { %v7780_v20 = vpop.f32.mrf.mxu2  ;;  %v7782_v61 = vpop.f32.mrf.mxu1 }
 0x24b   : > { %v2588_v60 = vpop.f32.mrf.mxu3 }
 0x24c   : > { %v3268_v63 = vpop.f32.mrf.mxu0  ;;  %v2622_v22 = vadd.f32 %v2588_v60, %v2308_v29  ;;  %v4332_v29 = vrot.slane %v4330_v26, 5  ;;  %v4323_v60 = vsel %vm6718_vm11, %v4318_v14, %v4322_v13  ;;  %v7803_v26 = vrot.slane %v4344_v25, 5 }
 0x24d   : > { %3663 = vmatmul.bf16.gmra.mxu1 %v3539_v0  ;;  %v7786_v57 = vadd.f32 %v3268_v63, %v2621_v16  ;;  %v4348_v16 = vshrl.u32 %v7788_v30, 16  ;;  %v6462_v0 = vld [vmem:[#allocation2 + $0x88] sm:$0xf]  ;;  %v3699_v13 = vadd.f32 %v7749_v45, %v8083_v8  ;;  %v4937_v14 = vunpack.c.l.b16 %v4851_v42 }
 0x24e   : > { %v3441_v63 = vrot.slane %v6462_v0, 5  ;;  %v4513_v32 = vunpack.c.l.b16 %v4323_v60  ;;  %v3700_v0 = vadd.f32 %v7766_v27, %v7359_v17  ;;  %v7828_v27 = vld [vmem:[#allocation2 + $0xa0] sm:$0xf] }
 0x24f   : > { %8081 = vst [vmem:[#allocation14_spill] sm:$0xff] %v7786_v57  ;;  %5076 = vmatmul.bf16.gmra.mxu0 %v4960_v23  ;;  %v6463_v57 = vld [vmem:[#allocation2 + $0x8c] sm:$0x1]  ;;  %v4350_v19 = vrot.slane %v4348_v16, 4  ;;  %v4014_v45 = vadd.f32 %v7780_v20, %v3699_v13  ;;  %v4860_v20 = vrot.slane %v7778_v41, 5 }
 0x250   : > { %4655 = vmatmul.bf16.gmra.mxu3 %v4535_v31  ;;  %v4333_v31 = vsel %vm6718_vm11, %v4328_v56, %v4332_v29  ;;  %v3443_v12 = vrot.slane %v3441_v63, 4  ;;  %v3444_v6 = vrot.slane %v6463_v57, 5  ;;  %v4857_v56 = vrot.slane %v7757_v1, 5  ;;  %v7810_v29 = vld [vmem:[#allocation2 + $0x98] sm:$0x1] }
 0x251   : > { %v4514_v35 = vunpack.c.l.b16 %v4333_v31  ;;  %v4737_v57 = vld [vmem:[#allocation2 + $0x84] sm:$0xe]  ;;  %v4351_v1 = vor.u32 %v4350_v19, %v7803_v26  ;;  %v4354_v60 = vshll.u32 %v7810_v29, 16  ;;  %v4961_v31 = vpack.c.b16 %v4938_v53, %v4937_v14 }
 0x252   : > { %v3936_v39 = vpop.f32.mrf.mxu2  ;;  %v7792_v44 = vpop.f32.mrf.mxu1  ;;  %v3445_v25 = vsel %vm7101_vm14, %v3443_v12, %v3444_v6  ;;  %v6026_v12 = vrot.slane %v4737_v57, 9  ;;  %v4859_v8 = vrot.slane %v4857_v56, 4 }
 0x253   : > { %v4616_v18 = vpop.f32.mrf.mxu3  ;;  %v4015_v13 = vadd.f32 %v3936_v39, %v3700_v0  ;;  %v4356_v19 = vrot.slane %v4354_v60, 5  ;;  %v6175_v60 = vld [vmem:[#allocation2 + $0x90] sm:$0xff]  ;;  %v4368_v0 = vshll.u32 %v7828_v27, 16 }
 0x254   : > { %v3270_v23 = vpop.f32.mrf.mxu0  ;;  %v4858_v17 = vsel %vm7101_vm14, %v6026_v12, %v4857_v56  ;;  %v4861_v53 = vsel %vm7101_vm14, %v4859_v8, %v4860_v20 }
 0x255   : > { %v7805_v40 = vadd.f32 %v3270_v23, %v2622_v22  ;;  %v3442_v22 = vsel %vm7101_vm14, %v5803_v50, %v3441_v63  ;;  %v3519_v23 = vunpack.c.l.b16 %v3445_v25  ;;  %v4536_v50 = vpack.c.b16 %v4514_v35, %v4513_v32  ;;  %v4079_v25 = vld [vmem:[#allocation2 + $0x9c] sm:$0xf]  ;;  %v8084_v35 = vld [vmem:[#allocation5_spill] sm:$0xff] }
 0x256   : > { %v3518_v16 = vunpack.c.l.b16 %v3442_v22  ;;  %v4696_v22 = vadd.f32 %v4616_v18, %v4014_v45  ;;  %v4359_v14 = vshrl.u32 %v4079_v25, 16  ;;  %v4362_v32 = vshll.u32 %v4079_v25, 16 }
 0x257   : > { %8082 = vst [vmem:[#allocation15_spill] sm:$0xff] %v7805_v40  ;;  %3978 = vmatmul.bf16.gmra.mxu2 %v6174_v46  ;;  %v4341_v46 = vor.u32 %v4340_v37, %v4337_v15  ;;  %v4352_v37 = vrot.slane %v4351_v1, 4  ;;  %v3701_v18 = vadd.f32 %v7782_v61, %v8084_v35  ;;  %v4939_v45 = vunpack.c.l.b16 %v4858_v17 }
 0x258   : > { %v3540_v9 = vpack.c.b16 %v3519_v23, %v3518_v16 }
 0x259   : > { %v4342_v15 = vrot.slane %v4341_v46, 4  ;;  %v4357_v56 = vsel %vm6718_vm11, %v4352_v37, %v4356_v19  ;;  %v4940_v46 = vunpack.c.l.b16 %v4861_v53  ;;  %v6465_v19 = vld [vmem:[#allocation2 + $0x98] sm:$0x1] }
 0x25a   : > { %v3939_v42 = vpop.f32.mrf.mxu2  ;;  %v7817_v5 = vpop.f32.mrf.mxu1  ;;  %v3451_v25 = vrot.slane %v6465_v19, 5  ;;  %v7854_v19 = vld [vmem:[#allocation2 + $0xa4] sm:$0x1] }
 0x25b   : > { %v4618_v63 = vpop.f32.mrf.mxu3  ;;  %v4347_v16 = vsel %vm6718_vm11, %v4342_v15, %v7803_v26  ;;  %v4372_v26 = vshrl.u32 %v7828_v27, 16  ;;  %v4016_v8 = vadd.f32 %v3939_v42, %v3701_v18  ;;  %v4370_v42 = vrot.slane %v4368_v0, 5 }
 0x25c   : > { %v5042_v6 = vpop.f32.mrf.mxu0  ;;  %v4697_v41 = vadd.f32 %v4618_v63, %v4015_v13  ;;  %v6464_v63 = vld [vmem:[#allocation2 + $0x94] sm:$0xf]  ;;  %v4515_v20 = vunpack.c.l.b16 %v4347_v16  ;;  %v4516_v13 = vunpack.c.l.b16 %v4357_v56 }
 0x25d   : > { %3668 = vmatmul.bf16.gmra.mxu1 %v3540_v9  ;;  %v5122_v39 = vadd.f32 %v5042_v6, %v4696_v22  ;;  %v3448_v9 = vrot.slane %v6464_v63, 5  ;;  %v4361_v6 = vrot.slane %v4359_v14, 4  ;;  %v3316_v22 = vld [vmem:[#allocation2 + $0x90] sm:$0xe]  ;;  %v4374_v16 = vrot.slane %v4372_v26, 4 }
 0x25f   : > { %5081 = vmatmul.bf16.gmra.mxu0 %v4961_v31  ;;  %v4864_v31 = vrot.slane %v7788_v30, 5  ;;  %v5255_v15 = vmul.f32 %v5122_v39, %v5122_v39  ;;  %v5804_v30 = vrot.slane %v3316_v22, 9  ;;  %v3450_v37 = vrot.slane %v3448_v9, 4 }
 0x260   : > { %4660 = vmatmul.bf16.gmra.mxu3 %v4536_v50  ;;  %v4364_v50 = vrot.slane %v4362_v32, 5  ;;  %v4738_v32 = vld [vmem:[#allocation2 + $0x90] sm:$0xe] }
 0x261   : > { %v3452_v35 = vsel %vm7101_vm14, %v3450_v37, %v3451_v25  ;;  %v4866_v49 = vrot.slane %v4864_v31, 4  ;;  %v4378_v37 = vshll.u32 %v7854_v19, 16 }
 0x262   : > { %v3941_v57 = vpop.f32.mrf.mxu2  ;;  %v7837_v23 = vpop.f32.mrf.mxu1  ;;  %v4365_v18 = vor.u32 %v4364_v50, %v4361_v6  ;;  %v3521_v22 = vunpack.c.l.b16 %v3452_v35  ;;  %v4867_v6 = vrot.slane %v7810_v29, 5 }
 0x263   : > { %v4621_v1 = vpop.f32.mrf.mxu3 }
 0x264   : > { %v5044_v61 = vpop.f32.mrf.mxu0  ;;  %v4868_v29 = vsel %vm7101_vm14, %v4866_v49, %v4867_v6  ;;  %v6176_v49 = vld [vmem:[#allocation2 + $0x9c] sm:$0xff] }
 0x265   : > { %v5123_v12 = vadd.f32 %v5044_v61, %v4697_v41  ;;  %v3449_v41 = vsel %vm7101_vm14, %v5804_v30, %v3448_v9  ;;  %v4698_v61 = vadd.f32 %v4621_v1, %v4016_v8  ;;  %v6027_v30 = vrot.slane %v4738_v32, 9  ;;  %v7864_v32 = vld [vmem:[#allocation2 + $0xac] sm:$0xf]  ;;  %v6466_v6 = vld [vmem:[#allocation2 + $0xa0] sm:$0xf] }
 0x266   : > { %v3520_v63 = vunpack.c.l.b16 %v3449_v41  ;;  %v4366_v1 = vrot.slane %v4365_v18, 4  ;;  %v4375_v8 = vor.u32 %v4374_v16, %v4370_v42  ;;  %v4380_v41 = vrot.slane %v4378_v37, 5 }
 0x267   : > { %v6272_v17 = vpack.c.bf16 %v5123_v12, %v5122_v39  ;;  %v5218_v53 = vadd.f32 %v5123_v12, %v5122_v39  ;;  %v5256_v14 = vmul.f32 %v5123_v12, %v5123_v12  ;;  %3983 = vmatmul.bf16.gmra.mxu2 %v6175_v60  ;;  %v4962_v39 = vpack.c.b16 %v4940_v46, %v4939_v45  ;;  %v8085_v12 = vld [vmem:[#allocation6_spill] sm:$0xff] }
 0x268   : > { %v3702_v60 = vadd.f32 %v7792_v44, %v8085_v12  ;;  %v3541_v50 = vpack.c.b16 %v3521_v22, %v3520_v63  ;;  %v8086_v63 = vld [vmem:[#allocation7_spill] sm:$0xff] }
 0x269   : > { %6273 = vst [vmem:[%s7847_s9] sm:$0xff] %v6272_v17   ;;  %v5287_v56 = vadd.f32 %v5256_v14, %v5255_v15  ;;  %v4537_v15 = vpack.c.b16 %v4516_v13, %v4515_v20  ;;  %v4865_v17 = vsel %vm7101_vm14, %v6027_v30, %v4864_v31  ;;  %v4082_v14 = vld [vmem:[#allocation2 + $0xa8] sm:$0xf]  ;;  %v4371_v20 = vsel %vm6718_vm11, %v4366_v1, %v4370_v42  ;;  %v3317_v1 = vld [vmem:[#allocation2 + $0x9c] sm:$0xe] }
 0x26a   : > { %v3944_v0 = vpop.f32.mrf.mxu2  ;;  %v7858_v40 = vpop.f32.mrf.mxu1  ;;  %v4017_v45 = vadd.f32 %v3941_v57, %v3702_v60  ;;  %v4376_v13 = vrot.slane %v4375_v8, 4  ;;  %v4383_v18 = vshrl.u32 %v4082_v14, 16  ;;  %v4392_v31 = vshll.u32 %v7864_v32, 16 }
 0x26b   : > { %v4623_v9 = vpop.f32.mrf.mxu3  ;;  %v3703_v22 = vadd.f32 %v7817_v5, %v8086_v63  ;;  %v4396_v60 = vshrl.u32 %v7864_v32, 16  ;;  %v4942_v30 = vunpack.c.l.b16 %v4868_v29  ;;  %v5805_v5 = vrot.slane %v3317_v1, 9 }
 0x26c   : > { %v5047_v26 = vpop.f32.mrf.mxu0  ;;  %v4699_v35 = vadd.f32 %v4623_v9, %v4017_v45  ;;  %v4517_v9 = vunpack.c.l.b16 %v4371_v20  ;;  %v4385_v8 = vrot.slane %v4383_v18, 4  ;;  %v7885_v18 = vld [vmem:[#allocation2 + $0xb0] sm:$0x1] }
 0x26d   : > { %v5124_v25 = vadd.f32 %v5047_v26, %v4698_v61  ;;  %3673 = vmatmul.bf16.gmra.mxu1 %v3541_v50  ;;  %v3455_v50 = vrot.slane %v6466_v6, 5 }
 0x26f   : > { %5086 = vmatmul.bf16.gmra.mxu0 %v4962_v39  ;;  %v5219_v44 = vadd.f32 %v5218_v53, %v5124_v25  ;;  %v5257_v46 = vmul.f32 %v5124_v25, %v5124_v25  ;;  %v4386_v53 = vshll.u32 %v4082_v14, 16  ;;  %v4941_v39 = vunpack.c.l.b16 %v4865_v17 }
 0x270   : > { %4665 = vmatmul.bf16.gmra.mxu3 %v4537_v15  ;;  %v4018_v15 = vadd.f32 %v3944_v0, %v3703_v22  ;;  %v3457_v45 = vrot.slane %v3455_v50, 4  ;;  %v7878_v14 = vrot.slane %v4392_v31, 5  ;;  %v3456_v0 = vsel %vm7101_vm14, %v5805_v5, %v3455_v50  ;;  %v4739_v22 = vld [vmem:[#allocation2 + $0x9c] sm:$0xe] }
 0x271   : > { %v5288_v57 = vadd.f32 %v5287_v56, %v5257_v46  ;;  %v4381_v56 = vsel %vm6718_vm11, %v4376_v13, %v4380_v41  ;;  %v4388_v37 = vrot.slane %v4386_v53, 5  ;;  %v6467_v46 = vld [vmem:[#allocation2 + $0xa4] sm:$0x1]  ;;  %v4398_v13 = vrot.slane %v4396_v60, 4 }
 0x272   : > { %v3946_v16 = vpop.f32.mrf.mxu2  ;;  %v7870_v61 = vpop.f32.mrf.mxu1  ;;  %v3458_v17 = vrot.slane %v6467_v46, 5  ;;  %v4518_v20 = vunpack.c.l.b16 %v4381_v56  ;;  %v4871_v41 = vrot.slane %v7828_v27, 5  ;;  %v8087_v27 = vld [vmem:[#allocation8_spill] sm:$0xff]  ;;  %v4402_v5 = vshll.u32 %v7885_v18, 16 }
 0x273   : > { %v4626_v12 = vpop.f32.mrf.mxu3  ;;  %v4389_v56 = vor.u32 %v4388_v37, %v4385_v8  ;;  %v3704_v6 = vadd.f32 %v7837_v23, %v8087_v27  ;;  %v4399_v1 = vor.u32 %v4398_v13, %v7878_v14  ;;  %v6177_v27 = vld [vmem:[#allocation2 + $0xa8] sm:$0xff] }
 0x274   : > { %v5049_v42 = vpop.f32.mrf.mxu0  ;;  %v4700_v31 = vadd.f32 %v4626_v12, %v4018_v15  ;;  %v4873_v12 = vrot.slane %v4871_v41, 4  ;;  %v4874_v15 = vrot.slane %v7854_v19, 5 }
 0x275   : > { %v5125_v26 = vadd.f32 %v5049_v42, %v4699_v35  ;;  %v3459_v35 = vsel %vm7101_vm14, %v3457_v45, %v3458_v17  ;;  %v4963_v42 = vpack.c.b16 %v4942_v30, %v4941_v39  ;;  %v4019_v30 = vadd.f32 %v3946_v16, %v3704_v6 }
 0x276   : > { %v4390_v46 = vrot.slane %v4389_v56, 4  ;;  %v4400_v23 = vrot.slane %v4399_v1, 4  ;;  %v4404_v17 = vrot.slane %v4402_v5, 5 }
 0x277   : > { %v6277_v63 = vpack.c.bf16 %v5125_v26, %v5124_v25  ;;  %v5220_v29 = vadd.f32 %v5219_v44, %v5125_v26  ;;  %v5258_v62 = vmul.f32 %v5125_v26, %v5125_v26  ;;  %3988 = vmatmul.bf16.gmra.mxu2 %v6176_v49  ;;  %v3522_v25 = vunpack.c.l.b16 %v3456_v0 }
 0x278   : > { %v3523_v44 = vunpack.c.l.b16 %v3459_v35  ;;  %v4405_v6 = vsel %vm6718_vm11, %v4400_v23, %v4404_v17  ;;  %v6469_v23 = vld [vmem:[#allocation2 + $0xb0] sm:$0x1] }
 0x279   : > { %6364 = vst [vmem:[%s7847_s9 + $0x8] sm:$0xff] %v6277_v63   ;;  %v5289_v53 = vadd.f32 %v5288_v57, %v5258_v62  ;;  %v4538_v62 = vpack.c.b16 %v4518_v20, %v4517_v9  ;;  %v6028_v57 = vrot.slane %v4739_v22, 9  ;;  %v4085_v63 = vld [vmem:[#allocation2 + $0xb4] sm:$0xf]  ;;  %v4875_v9 = vsel %vm7101_vm14, %v4873_v12, %v4874_v15  ;;  %v7899_v20 = vld [vmem:[#allocation2 + $0xb8] sm:$0xf] }
 0x27a   : > { %v3949_v49 = vpop.f32.mrf.mxu2  ;;  %v7888_v60 = vpop.f32.mrf.mxu1  ;;  %v3542_v26 = vpack.c.b16 %v3523_v44, %v3522_v25  ;;  %v4407_v19 = vshrl.u32 %v4085_v63, 16  ;;  %v4410_v0 = vshll.u32 %v4085_v63, 16  ;;  %v4395_v25 = vsel %vm6718_vm11, %v4390_v46, %v7878_v14  ;;  %v3318_v15 = vld [vmem:[#allocation2 + $0xa8] sm:$0xe] }
 0x27b   : > { %v4628_v50 = vpop.f32.mrf.mxu3  ;;  %v4872_v13 = vsel %vm7101_vm14, %v6028_v57, %v4871_v41  ;;  %v4519_v57 = vunpack.c.l.b16 %v4395_v25  ;;  %v4878_v12 = vrot.slane %v7864_v32, 5  ;;  %v5806_v46 = vrot.slane %v3318_v15, 9 }
 0x27c   : > { %v5052_v45 = vpop.f32.mrf.mxu0  ;;  %v4701_v35 = vadd.f32 %v4628_v50, %v4019_v30  ;;  %v4943_v41 = vunpack.c.l.b16 %v4872_v13  ;;  %v4412_v5 = vrot.slane %v4410_v0, 5  ;;  %v4520_v30 = vunpack.c.l.b16 %v4405_v6 }
 0x27d   : > { %v5126_v39 = vadd.f32 %v5052_v45, %v4700_v31  ;;  %3678 = vmatmul.bf16.gmra.mxu1 %v3542_v26  ;;  %v8088_v31 = vld [vmem:[#allocation9_spill] sm:$0xff]  ;;  %v4420_v45 = vshrl.u32 %v7899_v20, 16  ;;  %v3465_v17 = vrot.slane %v6469_v23, 5 }
 0x27e   : > { %v6468_v26 = vld [vmem:[#allocation2 + $0xac] sm:$0xf] }
 0x27f   : > { %5091 = vmatmul.bf16.gmra.mxu0 %v4963_v42  ;;  %v5221_v8 = vadd.f32 %v5220_v29, %v5126_v39  ;;  %v5259_v37 = vmul.f32 %v5126_v39, %v5126_v39  ;;  %v3705_v29 = vadd.f32 %v7858_v40, %v8088_v31  ;;  %v4944_v42 = vunpack.c.l.b16 %v4875_v9 }
 0x280   : > { %4670 = vmatmul.bf16.gmra.mxu3 %v4538_v62  ;;  %v3462_v1 = vrot.slane %v6468_v26, 5  ;;  %v4409_v40 = vrot.slane %v4407_v19, 4  ;;  %v4740_v19 = vld [vmem:[#allocation2 + $0xa8] sm:$0xe]  ;;  %v4422_v31 = vrot.slane %v4420_v45, 4 }
 0x281   : > { %v5290_v16 = vadd.f32 %v5289_v53, %v5259_v37  ;;  %v4416_v53 = vshll.u32 %v7899_v20, 16  ;;  %v4020_v14 = vadd.f32 %v3949_v49, %v3705_v29  ;;  %v7918_v26 = vld [vmem:[#allocation2 + $0xbc] sm:$0x1] }
 0x282   : > { %v3951_v22 = vpop.f32.mrf.mxu2  ;;  %v7906_v44 = vpop.f32.mrf.mxu1  ;;  %v3464_v37 = vrot.slane %v3462_v1, 4  ;;  %v4413_v32 = vor.u32 %v4412_v5, %v4409_v40  ;;  %v4881_v40 = vrot.slane %v7885_v18, 5  ;;  %v4426_v23 = vshll.u32 %v7918_v26, 16  ;;  %v7930_v18 = vld [vmem:[#allocation2 + $0xc4] sm:$0xf] }
 0x283   : > { %v4631_v56 = vpop.f32.mrf.mxu3  ;;  %v4418_v0 = vrot.slane %v4416_v53, 5  ;;  %v6029_v53 = vrot.slane %v4740_v19, 9 }
 0x284   : > { %v5054_v50 = vpop.f32.mrf.mxu0  ;;  %v3466_v49 = vsel %vm7101_vm14, %v3464_v37, %v3465_v17  ;;  %v4702_v25 = vadd.f32 %v4631_v56, %v4020_v14  ;;  %v4880_v37 = vrot.slane %v4878_v12, 4  ;;  %v4414_v45 = vrot.slane %v4413_v32, 4 }
 0x285   : > { %v5127_v62 = vadd.f32 %v5054_v50, %v4701_v35  ;;  %v3463_v35 = vsel %vm7101_vm14, %v5806_v46, %v3462_v1  ;;  %v3525_v50 = vunpack.c.l.b16 %v3466_v49  ;;  %v4539_v46 = vpack.c.b16 %v4520_v30, %v4519_v57  ;;  %v4088_v30 = vld [vmem:[#allocation2 + $0xc0] sm:$0xf] }
 0x286   : > { %v3524_v6 = vunpack.c.l.b16 %v3463_v35  ;;  %v4423_v14 = vor.u32 %v4422_v31, %v4418_v0  ;;  %v4879_v17 = vsel %vm7101_vm14, %v6029_v53, %v4878_v12  ;;  %v4882_v57 = vsel %vm7101_vm14, %v4880_v37, %v4881_v40 }
 0x287   : > { %v6282_v63 = vpack.c.bf16 %v5127_v62, %v5126_v39  ;;  %v5222_v13 = vadd.f32 %v5221_v8, %v5127_v62  ;;  %v5260_v9 = vmul.f32 %v5127_v62, %v5127_v62  ;;  %3993 = vmatmul.bf16.gmra.mxu2 %v6177_v27  ;;  %v4964_v39 = vpack.c.b16 %v4944_v42, %v4943_v41  ;;  %v8089_v8 = vld [vmem:[#allocation10_spill] sm:$0xff] }
 0x288   : > { %v3706_v27 = vadd.f32 %v7870_v61, %v8089_v8  ;;  %v3543_v5 = vpack.c.b16 %v3525_v50, %v3524_v6  ;;  %v4428_v19 = vrot.slane %v4426_v23, 5  ;;  %v4431_v49 = vshrl.u32 %v4088_v30, 16 }
 0x289   : > { %6365 = vst [vmem:[%s7847_s9 + $0x10] sm:$0xff] %v6282_v63   ;;  %v5291_v29 = vadd.f32 %v5290_v16, %v5260_v9  ;;  %v4424_v9 = vrot.slane %v4423_v14, 4  ;;  %v4440_v32 = vshll.u32 %v7930_v18, 16  ;;  %v3707_v12 = vadd.f32 %v7888_v60, %v7458_v51  ;;  %v6471_v14 = vld [vmem:[#allocation2 + $0xbc] sm:$0x1] }
 0x28a   : > { %v3954_v62 = vpop.f32.mrf.mxu2  ;;  %v7922_v15 = vpop.f32.mrf.mxu1  ;;  %v4021_v56 = vadd.f32 %v3951_v22, %v3706_v27  ;;  %v4419_v22 = vsel %vm6718_vm11, %v4414_v45, %v4418_v0  ;;  %v4444_v6 = vshrl.u32 %v7930_v18, 16  ;;  %v4945_v50 = vunpack.c.l.b16 %v4879_v17  ;;  %v6178_v27 = vld [vmem:[#allocation2 + $0xb4] sm:$0xff] }
 0x28b   : > { %v4633_v1 = vpop.f32.mrf.mxu3  ;;  %v4022_v53 = vadd.f32 %v3954_v62, %v3707_v12  ;;  %v4433_v51 = vrot.slane %v4431_v49, 4  ;;  %v3472_v23 = vrot.slane %v6471_v14, 5 }
 0x28c   : > { %v5057_v16 = vpop.f32.mrf.mxu0  ;;  %v4703_v63 = vadd.f32 %v4633_v1, %v4021_v56  ;;  %v4521_v1 = vunpack.c.l.b16 %v4419_v22  ;;  %v7945_v22 = vld [vmem:[#allocation2 + $0xc8] sm:$0x1] }
 0x28d   : > { %v5128_v41 = vadd.f32 %v5057_v16, %v4702_v25  ;;  %3683 = vmatmul.bf16.gmra.mxu1 %v3543_v5  ;;  %v3319_v5 = vld [vmem:[#allocation2 + $0xb4] sm:$0xe]  ;;  %v7942_v16 = vrot.slane %v4440_v32, 5 }
 0x28e   : > { %v5807_v56 = vrot.slane %v3319_v5, 9 }
 0x28f   : > { %5096 = vmatmul.bf16.gmra.mxu0 %v4964_v39  ;;  %v5223_v61 = vadd.f32 %v5222_v13, %v5128_v41  ;;  %v5261_v42 = vmul.f32 %v5128_v41, %v5128_v41  ;;  %v4434_v13 = vshll.u32 %v4088_v30, 16  ;;  %v4946_v39 = vunpack.c.l.b16 %v4882_v57 }
 0x290   : > { %4675 = vmatmul.bf16.gmra.mxu3 %v4539_v46  ;;  %v6470_v46 = vld [vmem:[#allocation2 + $0xb8] sm:$0xf]  ;;  %v4885_v30 = vrot.slane %v7899_v20, 5 }
 0x291   : > { %v5292_v35 = vadd.f32 %v5291_v29, %v5261_v42  ;;  %v4429_v29 = vsel %vm6718_vm11, %v4424_v9, %v4428_v19  ;;  %v3469_v37 = vrot.slane %v6470_v46, 5  ;;  %v4436_v60 = vrot.slane %v4434_v13, 5  ;;  %v4741_v19 = vld [vmem:[#allocation2 + $0xb4] sm:$0xe] }
 0x292   : > { %v3956_v31 = vpop.f32.mrf.mxu2  ;;  %v7937_v25 = vpop.f32.mrf.mxu1  ;;  %v4446_v42 = vrot.slane %v4444_v6, 4  ;;  %v4522_v9 = vunpack.c.l.b16 %v4429_v29  ;;  %v298_v6 = vld [vmem:[#allocation2 + $0xcc] sm:$0x1]  ;;  %v4965_v29 = vpack.c.b16 %v4946_v39, %v4945_v50  ;;  %v3708_v46 = vadd.f32 %v7906_v44, %v7481_v21 }
 0x293   : > { %v4636_v8 = vpop.f32.mrf.mxu3  ;;  %v3471_v45 = vrot.slane %v3469_v37, 4  ;;  %v3470_v49 = vsel %vm7101_vm14, %v5807_v56, %v3469_v37 }
 0x294   : > { %v5059_v0 = vpop.f32.mrf.mxu0  ;;  %v3526_v12 = vunpack.c.l.b16 %v3470_v49  ;;  %v4447_v20 = vor.u32 %v4446_v42, %v7942_v16  ;;  %v4540_v56 = vpack.c.b16 %v4522_v9, %v4521_v1 }
 0x295   : > { %v5129_v40 = vadd.f32 %v5059_v0, %v4703_v63  ;;  %v4704_v63 = vadd.f32 %v4636_v8, %v4022_v53  ;;  %v3473_v13 = vsel %vm7101_vm14, %v3471_v45, %v3472_v23  ;;  %v4450_v8 = vshll.u32 %v7945_v22, 16  ;;  %v354_v53 = vld [vmem:[#allocation2 + $0xd4] sm:$0x1] }
 0x296   : > { %v4887_v45 = vrot.slane %v4885_v30, 4  ;;  %v4023_v23 = vadd.f32 %v3956_v31, %v3708_v46  ;;  %v355_v50 = vsel %vm6537_vm4, 0, %v354_v53  ;;  %v4448_v21 = vrot.slane %v4447_v20, 4  ;;  %v6472_v20 = vld [vmem:[#allocation2 + $0xc4] sm:$0xf] }
 0x297   : > { %v6287_v17 = vpack.c.bf16 %v5129_v40, %v5128_v41  ;;  %v5224_v62 = vadd.f32 %v5223_v61, %v5129_v40  ;;  %v5262_v57 = vmul.f32 %v5129_v40, %v5129_v40  ;;  %3998 = vmatmul.bf16.gmra.mxu2 %v6178_v27  ;;  %v3527_v41 = vunpack.c.l.b16 %v3473_v13  ;;  %356 = vst [vmem:[#allocation2 + $0xd4] sm:$0x1] %v355_v50 }
 0x298   : > { %v4437_v61 = vor.u32 %v4436_v60, %v4433_v51  ;;  %v6030_v40 = vrot.slane %v4741_v19, 9  ;;  %v4888_v51 = vrot.slane %v7918_v26, 5  ;;  %v299_v60 = vsel %vm6531_vm2, 0, %v298_v6 }
 0x299   : > { %6366 = vst [vmem:[%s7847_s9 + $0x18] sm:$0xff] %v6287_v17   ;;  %v5293_v32 = vadd.f32 %v5292_v35, %v5262_v57  ;;  %v3544_v5 = vpack.c.b16 %v3527_v41, %v3526_v12  ;;  %v4452_v44 = vrot.slane %v4450_v8, 5  ;;  %v7963_v17 = vld [vmem:[#allocation2 + $0xd0] sm:$0xf]  ;;  %v3476_v8 = vrot.slane %v6472_v20, 5 }
 0x29a   : > { %v3959_v27 = vpop.f32.mrf.mxu2  ;;  %v7952_v0 = vpop.f32.mrf.mxu1  ;;  %v4438_v42 = vrot.slane %v4437_v61, 4  ;;  %300 = vst [vmem:[#allocation2 + $0xcc] sm:$0x1] %v299_v60  ;;  %v4886_v2 = vsel %vm7101_vm14, %v6030_v40, %v4885_v30  ;;  %v4889_v57 = vsel %vm7101_vm14, %v4887_v45, %v4888_v51  ;;  %v4464_v30 = vshll.u32 %v7963_v17, 16 }
 0x29b   : > { %v4638_v37 = vpop.f32.mrf.mxu3  ;;  %v4453_v9 = vsel %vm6718_vm11, %v4448_v21, %v4452_v44  ;;  %v4947_v49 = vunpack.c.l.b16 %v4886_v2  ;;  %v4468_v12 = vshrl.u32 %v7963_v17, 16  ;;  %v4948_v61 = vunpack.c.l.b16 %v4889_v57 }
 0x29c   : > { %v5062_v35 = vpop.f32.mrf.mxu0  ;;  %v4705_v31 = vadd.f32 %v4638_v37, %v4023_v23  ;;  %v4443_v4 = vsel %vm6718_vm11, %v4438_v42, %v7942_v16  ;;  %v4524_v53 = vunpack.c.l.b16 %v4453_v9  ;;  %v4466_v45 = vrot.slane %v4464_v30, 5 }
 0x29d   : > { %v5130_v14 = vadd.f32 %v5062_v35, %v4704_v63  ;;  %3688 = vmatmul.bf16.gmra.mxu1 %v3544_v5  ;;  %v3709_v63 = vadd.f32 %v7922_v15, %v7494_v48  ;;  %v4523_v16 = vunpack.c.l.b16 %v4443_v4  ;;  %v3478_v5 = vrot.slane %v3476_v8, 4  ;;  %v6473_v35 = vld [vmem:[#allocation2 + $0xc8] sm:$0x1] }
 0x29e   : > { %v3710_v9 = vadd.f32 %v7937_v25, %v7506_v3  ;;  %v4895_v25 = vrot.slane %v7945_v22, 5 }
 0x29f   : > { %5101 = vmatmul.bf16.gmra.mxu0 %v4965_v29  ;;  %v5225_v39 = vadd.f32 %v5224_v62, %v5130_v14  ;;  %v5263_v1 = vmul.f32 %v5130_v14, %v5130_v14  ;;  %v4024_v6 = vadd.f32 %v3959_v27, %v3709_v63  ;;  %v3320_v29 = vld [vmem:[#allocation2 + $0xc0] sm:$0xe]  ;;  %v4470_v27 = vrot.slane %v4468_v12, 4 }
 0x2a0   : > { %4680 = vmatmul.bf16.gmra.mxu3 %v4540_v56  ;;  %v5808_v40 = vrot.slane %v3320_v29, 9  ;;  %v3479_v56 = vrot.slane %v6473_v35, 5  ;;  %v4541_v12 = vpack.c.b16 %v4524_v53, %v4523_v16 }
 0x2a1   : > { %v5294_v26 = vadd.f32 %v5293_v32, %v5263_v1  ;;  %v6179_v32 = vld [vmem:[#allocation2 + $0xc0] sm:$0xff]  ;;  %v4091_v48 = vld [vmem:[#allocation2 + $0xcc] sm:$0xf] }
 0x2a2   : > { %v3961_v62 = vpop.f32.mrf.mxu2  ;;  %v7976_v19 = vpop.f32.mrf.mxu1  ;;  %v4455_v46 = vshrl.u32 %v4091_v48, 16  ;;  %v4458_v37 = vshll.u32 %v4091_v48, 16  ;;  %v3477_v50 = vsel %vm7101_vm14, %v5808_v40, %v3476_v8  ;;  %v3480_v21 = vsel %vm7101_vm14, %v3478_v5, %v3479_v56 }
 0x2a3   : > { %v4641_v13 = vpop.f32.mrf.mxu3  ;;  %v3528_v2 = vunpack.c.l.b16 %v3477_v50  ;;  %v4025_v8 = vadd.f32 %v3961_v62, %v3710_v9  ;;  %v3711_v62 = vadd.f32 %v7952_v0, %v7520_v38 }
 0x2a4   : > { %v5064_v41 = vpop.f32.mrf.mxu0  ;;  %v4706_v42 = vadd.f32 %v4641_v13, %v4024_v6  ;;  %v4457_v44 = vrot.slane %v4455_v46, 4  ;;  %v4460_v57 = vrot.slane %v4458_v37, 5  ;;  %v4892_v6 = vrot.slane %v7930_v18, 5 }
 0x2a5   : > { %v5131_v15 = vadd.f32 %v5064_v41, %v4705_v31  ;;  %v3529_v31 = vunpack.c.l.b16 %v3480_v21  ;;  %v4742_v41 = vld [vmem:[#allocation2 + $0xc0] sm:$0xe] }
 0x2a6   : > { %v4461_v48 = vor.u32 %v4460_v57, %v4457_v44  ;;  %v4894_v3 = vrot.slane %v4892_v6, 4 }
 0x2a7   : > { %v6292_v51 = vpack.c.bf16 %v5131_v15, %v5130_v14  ;;  %v5226_v60 = vadd.f32 %v5225_v39, %v5131_v15  ;;  %v5264_v23 = vmul.f32 %v5131_v15, %v5131_v15  ;;  %4003 = vmatmul.bf16.gmra.mxu2 %v6179_v32  ;;  %v7987_v14 = vld [vmem:[#allocation2 + $0xd4] sm:$0x1]  ;;  %v4966_v39 = vpack.c.b16 %v4948_v61, %v4947_v49 }
 0x2a8   : > { %v3545_v13 = vpack.c.b16 %v3529_v31, %v3528_v2  ;;  %v4474_v15 = vshll.u32 %v7987_v14, 16  ;;  %v6031_v61 = vrot.slane %v4742_v41, 9  ;;  %v4462_v37 = vrot.slane %v4461_v48, 4 }
 0x2a9   : > { %6367 = vst [vmem:[%s7847_s9 + $0x20] sm:$0xff] %v6292_v51   ;;  %v5295_v1 = vadd.f32 %v5294_v26, %v5264_v23  ;;  %v4471_v26 = vor.u32 %v4470_v27, %v4466_v45  ;;  %v6180_v51 = vld [vmem:[#allocation2 + $0xcc] sm:$0xff]  ;;  %v4896_v22 = vsel %vm7101_vm14, %v4894_v3, %v4895_v25  ;;  %v4899_v41 = vrot.slane %v7963_v17, 5 }
 0x2aa   : > { %v3964_v4 = vpop.f32.mrf.mxu2  ;;  %v7985_v63 = vpop.f32.mrf.mxu1  ;;  %v4476_v18 = vrot.slane %v4474_v15, 5  ;;  %v4893_v35 = vsel %vm7101_vm14, %v6031_v61, %v4892_v6 }
 0x2ab   : > { %v4643_v30 = vpop.f32.mrf.mxu3  ;;  %v4472_v46 = vrot.slane %v4471_v26, 4  ;;  %v4026_v27 = vadd.f32 %v3964_v4, %v3711_v62  ;;  %v4949_v21 = vunpack.c.l.b16 %v4893_v35  ;;  %v4901_v15 = vrot.slane %v4899_v41, 4 }
 0x2ac   : > { %v5067_v32 = vpop.f32.mrf.mxu0  ;;  %v4707_v53 = vadd.f32 %v4643_v30, %v4025_v8  ;;  %v3713_v3 = vadd.f32 %v7985_v63, %v7548_v59 }
 0x2ad   : > { %v5132_v20 = vadd.f32 %v5067_v32, %v4706_v42  ;;  %3693 = vmatmul.bf16.gmra.mxu1 %v3545_v13  ;;  %v4467_v42 = vsel %vm6718_vm11, %v4462_v37, %v4466_v45  ;;  %v4477_v50 = vsel %vm6718_vm11, %v4472_v46, %v4476_v18  ;;  %v3712_v45 = vadd.f32 %v7976_v19, %v7536_v7 }
 0x2ae   : > { %v4525_v2 = vunpack.c.l.b16 %v4467_v42  ;;  %v4526_v31 = vunpack.c.l.b16 %v4477_v50 }
 0x2af   : > { %5106 = vmatmul.bf16.gmra.mxu0 %v4966_v39  ;;  %v5227_v29 = vadd.f32 %v5226_v60, %v5132_v20  ;;  %v5265_v49 = vmul.f32 %v5132_v20, %v5132_v20 }
 0x2b0   : > { %4685 = vmatmul.bf16.gmra.mxu3 %v4541_v12  ;;  %v4542_v32 = vpack.c.b16 %v4526_v31, %v4525_v2  ;;  %v4743_v12 = vld [vmem:[#allocation2 + $0xcc] sm:$0xe] }
 0x2b1   : > { %v5296_v16 = vadd.f32 %v5295_v1, %v5265_v49  ;;  %v4950_v1 = vunpack.c.l.b16 %v4896_v22  ;;  %v6032_v48 = vrot.slane %v4743_v12, 9 }
 0x2b2   : > { %v3966_v40 = vpop.f32.mrf.mxu2  ;;  %v3656_v5 = vpop.f32.mrf.mxu1 }
 0x2b3   : > { %v4646_v56 = vpop.f32.mrf.mxu3  ;;  %v4967_v4 = vpack.c.b16 %v4950_v1, %v4949_v21  ;;  %v4027_v26 = vadd.f32 %v3966_v40, %v3712_v45  ;;  %v4900_v17 = vsel %vm7101_vm14, %v6032_v48, %v4899_v41  ;;  %v3714_v22 = vadd.f32 %v3656_v5, %v7563_v28 }
 0x2b4   : > { %v5069_v60 = vpop.f32.mrf.mxu0  ;;  %v4708_v39 = vadd.f32 %v4646_v56, %v4026_v27  ;;  %v4951_v18 = vunpack.c.l.b16 %v4900_v17 }
 0x2b5   : > { %v5133_v23 = vadd.f32 %v5069_v60, %v4707_v53 }
 0x2b7   : > { %v6297_v38 = vpack.c.bf16 %v5133_v23, %v5132_v20  ;;  %v5228_v0 = vadd.f32 %v5227_v29, %v5133_v23  ;;  %v5266_v44 = vmul.f32 %v5133_v23, %v5133_v23  ;;  %4008 = vmatmul.bf16.gmra.mxu2 %v6180_v51  ;;  %v4902_v29 = vrot.slane %v7987_v14, 5 }
 0x2b9   : > { %6368 = vst [vmem:[%s7847_s9 + $0x28] sm:$0xff] %v6297_v38   ;;  %v5297_v57 = vadd.f32 %v5296_v16, %v5266_v44  ;;  %v4903_v16 = vsel %vm7101_vm14, %v4901_v15, %v4902_v29 }
 0x2ba   : > { %v3969_v9 = vpop.f32.mrf.mxu2  ;;  %v3659_v30 = vpop.f32.mrf.mxu1  ;;  %v4952_v35 = vunpack.c.l.b16 %v4903_v16 }
 0x2bb   : > { %v4648_v13 = vpop.f32.mrf.mxu3  ;;  %v4028_v37 = vadd.f32 %v3969_v9, %v3713_v3  ;;  %v3715_v2 = vadd.f32 %v3659_v30, %v7577_v54 }
 0x2bc   : > { %v5072_v52 = vpop.f32.mrf.mxu0  ;;  %v4709_v61 = vadd.f32 %v4648_v13, %v4027_v26  ;;  %v4968_v63 = vpack.c.b16 %v4952_v35, %v4951_v18 }
 0x2bd   : > { %v5134_v6 = vadd.f32 %v5072_v52, %v4708_v39 }
 0x2bf   : > { %5111 = vmatmul.bf16.gmra.mxu0 %v4967_v4  ;;  %v5229_v20 = vadd.f32 %v5228_v0, %v5134_v6  ;;  %v5267_v8 = vmul.f32 %v5134_v6, %v5134_v6 }
 0x2c0   : > { %4690 = vmatmul.bf16.gmra.mxu3 %v4542_v32 }
 0x2c1   : > { %v5298_v49 = vadd.f32 %v5297_v57, %v5267_v8 }
 0x2c2   : > { %v3971_v7 = vpop.f32.mrf.mxu2  ;;  %v3661_v19 = vpop.f32.mrf.mxu1 }
 0x2c3   : > { %v4651_v25 = vpop.f32.mrf.mxu3  ;;  %v4029_v11 = vadd.f32 %v3971_v7, %v3714_v22  ;;  %v3716_v12 = vadd.f32 %v3661_v19, %v7594_v33 }
 0x2c4   : > { %v5074_v46 = vpop.f32.mrf.mxu0  ;;  %v4710_v51 = vadd.f32 %v4651_v25, %v4028_v37 }
 0x2c5   : > { %v5135_v53 = vadd.f32 %v5074_v46, %v4709_v61 }
 0x2c7   : > { %v6302_v14 = vpack.c.bf16 %v5135_v53, %v5134_v6  ;;  %v5230_v40 = vadd.f32 %v5229_v20, %v5135_v53  ;;  %v5268_v62 = vmul.f32 %v5135_v53, %v5135_v53 }
 0x2c9   : > { %6369 = vst [vmem:[%s7847_s9 + $0x30] sm:$0xff] %v6302_v14   ;;  %v5299_v56 = vadd.f32 %v5298_v49, %v5268_v62 }
 0x2ca   : > { %v3974_v60 = vpop.f32.mrf.mxu2  ;;  %v3664_v59 = vpop.f32.mrf.mxu1 }
 0x2cb   : > { %v4653_v23 = vpop.f32.mrf.mxu3  ;;  %v4030_v9 = vadd.f32 %v3974_v60, %v3715_v2  ;;  %v3717_v29 = vadd.f32 %v3664_v59, %v7606_v55 }
 0x2cc   : > { %v5077_v27 = vpop.f32.mrf.mxu0  ;;  %v4711_v0 = vadd.f32 %v4653_v23, %v4029_v11 }
 0x2cd   : > { %v5136_v42 = vadd.f32 %v5077_v27, %v4710_v51 }
 0x2cf   : > { %5116 = vmatmul.bf16.gmra.mxu0 %v4968_v63  ;;  %v5231_v50 = vadd.f32 %v5230_v40, %v5136_v42  ;;  %v5269_v21 = vmul.f32 %v5136_v42, %v5136_v42 }
 0x2d1   : > { %v5300_v38 = vadd.f32 %v5299_v56, %v5269_v21 }
 0x2d2   : > { %v3976_v44 = vpop.f32.mrf.mxu2  ;;  %v3666_v1 = vpop.f32.mrf.mxu1 }
 0x2d3   : > { %v4656_v31 = vpop.f32.mrf.mxu3  ;;  %v4031_v20 = vadd.f32 %v3976_v44, %v3716_v12  ;;  %v3718_v37 = vadd.f32 %v3666_v1, %v7621_v10 }
 0x2d4   : > { %v5079_v57 = vpop.f32.mrf.mxu0  ;;  %v4712_v13 = vadd.f32 %v4656_v31, %v4030_v9 }
 0x2d5   : > { %v5137_v39 = vadd.f32 %v5079_v57, %v4711_v0 }
 0x2d7   : > { %v6307_v4 = vpack.c.bf16 %v5137_v39, %v5136_v42  ;;  %v5232_v28 = vadd.f32 %v5231_v50, %v5137_v39  ;;  %v5270_v5 = vmul.f32 %v5137_v39, %v5137_v39 }
 0x2d9   : > { %6370 = vst [vmem:[%s7847_s9 + $0x38] sm:$0xff] %v6307_v4   ;;  %v5301_v45 = vadd.f32 %v5300_v38, %v5270_v5 }
 0x2da   : > { %v3979_v52 = vpop.f32.mrf.mxu2  ;;  %v3669_v32 = vpop.f32.mrf.mxu1 }
 0x2db   : > { %v4658_v41 = vpop.f32.mrf.mxu3  ;;  %v4032_v17 = vadd.f32 %v3979_v52, %v3717_v29  ;;  %v3719_v63 = vadd.f32 %v3669_v32, %v7635_v47 }
 0x2dc   : > { %v5082_v6 = vpop.f32.mrf.mxu0  ;;  %v4713_v48 = vadd.f32 %v4658_v41, %v4031_v20 }
 0x2dd   : > { %v5138_v26 = vadd.f32 %v5082_v6, %v4712_v13 }
 0x2df   : > { %v5233_v54 = vadd.f32 %v5232_v28, %v5138_v26  ;;  %v5271_v30 = vmul.f32 %v5138_v26, %v5138_v26 }
 0x2e1   : > { %v5302_v8 = vadd.f32 %v5301_v45, %v5271_v30 }
 0x2e2   : > { %v3981_v15 = vpop.f32.mrf.mxu2  ;;  %v3671_v7 = vpop.f32.mrf.mxu1 }
 0x2e3   : > { %v4661_v49 = vpop.f32.mrf.mxu3  ;;  %v4033_v62 = vadd.f32 %v3981_v15, %v3718_v37  ;;  %v3720_v1 = vadd.f32 %v3671_v7, %v7652_v24 }
 0x2e4   : > { %v5084_v61 = vpop.f32.mrf.mxu0  ;;  %v4714_v16 = vadd.f32 %v4661_v49, %v4032_v17 }
 0x2e5   : > { %v5139_v3 = vadd.f32 %v5084_v61, %v4713_v48 }
 0x2e7   : > { %v6312_v25 = vpack.c.bf16 %v5139_v3, %v5138_v26  ;;  %v5234_v46 = vadd.f32 %v5233_v54, %v5139_v3  ;;  %v5272_v33 = vmul.f32 %v5139_v3, %v5139_v3 }
 0x2e9   : > { %6371 = vst [vmem:[%s7847_s9 + $0x40] sm:$0xff] %v6312_v25   ;;  %v5303_v19 = vadd.f32 %v5302_v8, %v5272_v33 }
 0x2ea   : > { %v3984_v53 = vpop.f32.mrf.mxu2  ;;  %v3674_v55 = vpop.f32.mrf.mxu1 }
 0x2eb   : > { %v4663_v18 = vpop.f32.mrf.mxu3  ;;  %v4034_v42 = vadd.f32 %v3984_v53, %v3719_v63  ;;  %v3721_v13 = vadd.f32 %v3674_v55, %v7664_v36 }
 0x2ec   : > { %v5087_v14 = vpop.f32.mrf.mxu0  ;;  %v4715_v60 = vadd.f32 %v4663_v18, %v4033_v62 }
 0x2ed   : > { %v5140_v40 = vadd.f32 %v5087_v14, %v4714_v16 }
 0x2ef   : > { %v5235_v35 = vadd.f32 %v5234_v46, %v5140_v40  ;;  %v5273_v56 = vmul.f32 %v5140_v40, %v5140_v40 }
 0x2f1   : > { %v5304_v51 = vadd.f32 %v5303_v19, %v5273_v56 }
 0x2f2   : > { %v3986_v59 = vpop.f32.mrf.mxu2  ;;  %v3676_v21 = vpop.f32.mrf.mxu1 }
 0x2f3   : > { %v4666_v22 = vpop.f32.mrf.mxu3  ;;  %v4035_v39 = vadd.f32 %v3986_v59, %v3720_v1  ;;  %v3722_v8 = vadd.f32 %v3676_v21, %v7679_v34 }
 0x2f4   : > { %v5089_v23 = vpop.f32.mrf.mxu0  ;;  %v4716_v0 = vadd.f32 %v4666_v22, %v4034_v42 }
 0x2f5   : > { %v5141_v27 = vadd.f32 %v5089_v23, %v4715_v60 }
 0x2f7   : > { %v6317_v11 = vpack.c.bf16 %v5141_v27, %v5140_v40  ;;  %v5236_v50 = vadd.f32 %v5235_v35, %v5141_v27  ;;  %v5274_v10 = vmul.f32 %v5141_v27, %v5141_v27 }
 0x2f9   : > { %6372 = vst [vmem:[%s7847_s9 + $0x48] sm:$0xff] %v6317_v11   ;;  %v5305_v38 = vadd.f32 %v5304_v51, %v5274_v10  ;;  %v8090_v11 = vld [vmem:[#allocation11_spill] sm:$0xff] }
 0x2fa   : > { %v3989_v44 = vpop.f32.mrf.mxu2  ;;  %v3679_v45 = vpop.f32.mrf.mxu1 }
 0x2fb   : > { %v4668_v2 = vpop.f32.mrf.mxu3  ;;  %v4036_v41 = vadd.f32 %v3989_v44, %v3721_v13  ;;  %v3723_v46 = vadd.f32 %v3679_v45, %v7693_v58 }
 0x2fc   : > { %v5092_v31 = vpop.f32.mrf.mxu0  ;;  %v4717_v28 = vadd.f32 %v4668_v2, %v4035_v39  ;;  %v8091_v39 = vld [vmem:[#allocation12_spill] sm:$0xff] }
 0x2fd   : > { %v5142_v57 = vadd.f32 %v5092_v31, %v4716_v0 }
 0x2ff   : > { %v5237_v47 = vadd.f32 %v5236_v50, %v5142_v57  ;;  %v5275_v9 = vmul.f32 %v5142_v57, %v5142_v57 }
 0x301   : > { %v5306_v4 = vadd.f32 %v5305_v38, %v5275_v9 }
 0x302   : > { %v3991_v5 = vpop.f32.mrf.mxu2  ;;  %v3681_v29 = vpop.f32.mrf.mxu1 }
 0x303   : > { %v4671_v52 = vpop.f32.mrf.mxu3  ;;  %v4037_v61 = vadd.f32 %v3991_v5, %v3722_v8  ;;  %v3724_v35 = vadd.f32 %v3681_v29, %v7710_v43 }
 0x304   : > { %v5094_v32 = vpop.f32.mrf.mxu0  ;;  %v4718_v54 = vadd.f32 %v4671_v52, %v4036_v41  ;;  %v8092_v41 = vld [vmem:[#allocation13_spill] sm:$0xff] }
 0x305   : > { %v5143_v12 = vadd.f32 %v5094_v32, %v4717_v28 }
 0x307   : > { %v6322_v6 = vpack.c.bf16 %v5143_v12, %v5142_v57  ;;  %v5238_v26 = vadd.f32 %v5237_v47, %v5143_v12  ;;  %v5276_v24 = vmul.f32 %v5143_v12, %v5143_v12 }
 0x309   : > { %6373 = vst [vmem:[%s7847_s9 + $0x50] sm:$0xff] %v6322_v6   ;;  %v5307_v20 = vadd.f32 %v5306_v4, %v5276_v24 }
 0x30a   : > { %v3994_v30 = vpop.f32.mrf.mxu2  ;;  %v3684_v37 = vpop.f32.mrf.mxu1 }
 0x30b   : > { %v4673_v48 = vpop.f32.mrf.mxu3  ;;  %v4038_v53 = vadd.f32 %v3994_v30, %v3723_v46  ;;  %v3725_v50 = vadd.f32 %v3684_v37, %v8090_v11 }
 0x30c   : > { %v5097_v15 = vpop.f32.mrf.mxu0  ;;  %v4719_v17 = vadd.f32 %v4673_v48, %v4037_v61 }
 0x30d   : > { %v5144_v49 = vadd.f32 %v5097_v15, %v4718_v54 }
 0x30f   : > { %v5239_v36 = vadd.f32 %v5238_v26, %v5144_v49  ;;  %v5277_v7 = vmul.f32 %v5144_v49, %v5144_v49 }
 0x311   : > { %v5308_v3 = vadd.f32 %v5307_v20, %v5277_v7 }
 0x312   : > { %v3996_v25 = vpop.f32.mrf.mxu2  ;;  %v3686_v22 = vpop.f32.mrf.mxu1 }
 0x313   : > { %v4676_v33 = vpop.f32.mrf.mxu3  ;;  %v4039_v59 = vadd.f32 %v3996_v25, %v3724_v35  ;;  %v3726_v47 = vadd.f32 %v3686_v22, %v8091_v39 }
 0x314   : > { %v5099_v19 = vpop.f32.mrf.mxu0  ;;  %v4720_v62 = vadd.f32 %v4676_v33, %v4038_v53 }
 0x315   : > { %v5145_v16 = vadd.f32 %v5099_v19, %v4719_v17 }
 0x317   : > { %v6327_v18 = vpack.c.bf16 %v5145_v16, %v5144_v49  ;;  %v5240_v34 = vadd.f32 %v5239_v36, %v5145_v16  ;;  %v5278_v14 = vmul.f32 %v5145_v16, %v5145_v16  ;;  %v8093_v36 = vld [vmem:[#allocation3_spill] sm:$0xff] }
 0x319   : > { %6374 = vst [vmem:[%s7847_s9 + $0x58] sm:$0xff] %v6327_v18   ;;  %v5309_v40 = vadd.f32 %v5308_v3, %v5278_v14 }
 0x31a   : > { %v3999_v55 = vpop.f32.mrf.mxu2  ;;  %v3689_v57 = vpop.f32.mrf.mxu1 }
 0x31b   : > { %v4678_v56 = vpop.f32.mrf.mxu3  ;;  %v4040_v0 = vadd.f32 %v3999_v55, %v3725_v50  ;;  %v3727_v6 = vadd.f32 %v3689_v57, %v8092_v41 }
 0x31c   : > { %v5102_v51 = vpop.f32.mrf.mxu0  ;;  %v4721_v27 = vadd.f32 %v4678_v56, %v4039_v59 }
 0x31d   : > { %v5146_v60 = vadd.f32 %v5102_v51, %v4720_v62 }
 0x31f   : > { %v5241_v58 = vadd.f32 %v5240_v34, %v5146_v60  ;;  %v5279_v63 = vmul.f32 %v5146_v60, %v5146_v60  ;;  %v8094_v34 = vld [vmem:[#allocation14_spill] sm:$0xff] }
 0x321   : > { %v5310_v23 = vadd.f32 %v5309_v40, %v5279_v63 }
 0x322   : > { %v4001_v42 = vpop.f32.mrf.mxu2  ;;  %v3691_v20 = vpop.f32.mrf.mxu1 }
 0x323   : > { %v4681_v10 = vpop.f32.mrf.mxu3  ;;  %v4041_v45 = vadd.f32 %v4001_v42, %v3726_v47  ;;  %v3728_v7 = vadd.f32 %v3691_v20, %v8093_v36 }
 0x324   : > { %v5104_v21 = vpop.f32.mrf.mxu0  ;;  %v4722_v31 = vadd.f32 %v4681_v10, %v4040_v0 }
 0x325   : > { %v5147_v38 = vadd.f32 %v5104_v21, %v4721_v27 }
 0x327   : > { %v6332_v44 = vpack.c.bf16 %v5147_v38, %v5146_v60  ;;  %v5242_v1 = vadd.f32 %v5241_v58, %v5147_v38  ;;  %v5280_v43 = vmul.f32 %v5147_v38, %v5147_v38 }
 0x329   : > { %6375 = vst [vmem:[%s7847_s9 + $0x60] sm:$0xff] %v6332_v44   ;;  %v5311_v2 = vadd.f32 %v5310_v23, %v5280_v43  ;;  %v8095_v23 = vld [vmem:[#allocation15_spill] sm:$0xff] }
 0x32a   : > { %v4004_v28 = vpop.f32.mrf.mxu2  ;;  %v3694_v33 = vpop.f32.mrf.mxu1 }
 0x32b   : > { %v4683_v9 = vpop.f32.mrf.mxu3  ;;  %v4042_v30 = vadd.f32 %v4004_v28, %v3727_v6  ;;  %v3729_v14 = vadd.f32 %v3694_v33, %v8094_v34 }
 0x32c   : > { %v5107_v4 = vpop.f32.mrf.mxu0  ;;  %v4723_v12 = vadd.f32 %v4683_v9, %v4041_v45 }
 0x32d   : > { %v5148_v5 = vadd.f32 %v5107_v4, %v4722_v31 }
 0x32f   : > { %v5243_v13 = vadd.f32 %v5242_v1, %v5148_v5  ;;  %v5281_v52 = vmul.f32 %v5148_v5, %v5148_v5 }
 0x331   : > { %v5312_v32 = vadd.f32 %v5311_v2, %v5281_v52 }
 0x332   : > { %v4006_v8 = vpop.f32.mrf.mxu2  ;;  %v3696_v59 = vpop.f32.mrf.mxu1 }
 0x333   : > { %v4686_v26 = vpop.f32.mrf.mxu3  ;;  %v4043_v46 = vadd.f32 %v4006_v8, %v3728_v7  ;;  %v3730_v27 = vadd.f32 %v3696_v59, %v8095_v23 }
 0x334   : > { %v5109_v24 = vpop.f32.mrf.mxu0  ;;  %v4724_v61 = vadd.f32 %v4686_v26, %v4042_v30 }
 0x335   : > { %v5149_v54 = vadd.f32 %v5109_v24, %v4723_v12 }
 0x337   : > { %v6337_v48 = vpack.c.bf16 %v5149_v54, %v5148_v5  ;;  %v5244_v15 = vadd.f32 %v5243_v13, %v5149_v54  ;;  %v5282_v29 = vmul.f32 %v5149_v54, %v5149_v54 }
 0x339   : > { %6376 = vst [vmem:[%s7847_s9 + $0x68] sm:$0xff] %v6337_v48   ;;  %v5313_v49 = vadd.f32 %v5312_v32, %v5282_v29 }
 0x33a   : > { %v4009_v53 = vpop.f32.mrf.mxu2 }
 0x33b   : > { %v4688_v17 = vpop.f32.mrf.mxu3  ;;  %v4044_v55 = vadd.f32 %v4009_v53, %v3729_v14 }
 0x33c   : > { %v5112_v3 = vpop.f32.mrf.mxu0  ;;  %v4725_v18 = vadd.f32 %v4688_v17, %v4043_v46 }
 0x33d   : > { %v5150_v25 = vadd.f32 %v5112_v3, %v4724_v61 }
 0x33f   : > { %v5245_v19 = vadd.f32 %v5244_v15, %v5150_v25  ;;  %v5283_v16 = vmul.f32 %v5150_v25, %v5150_v25 }
 0x341   : > { %v5314_v37 = vadd.f32 %v5313_v49, %v5283_v16 }
 0x342   : > { %v4011_v22 = vpop.f32.mrf.mxu2 }
 0x343   : > { %v4691_v35 = vpop.f32.mrf.mxu3  ;;  %v4045_v50 = vadd.f32 %v4011_v22, %v3730_v27 }
 0x344   : > { %v5114_v40 = vpop.f32.mrf.mxu0  ;;  %v4726_v63 = vadd.f32 %v4691_v35, %v4044_v55 }
 0x345   : > { %v5151_v62 = vadd.f32 %v5114_v40, %v4725_v18 }
 0x347   : > { %v6342_v56 = vpack.c.bf16 %v5151_v62, %v5150_v25  ;;  %v5246_v51 = vadd.f32 %v5245_v19, %v5151_v62  ;;  %v5284_v60 = vmul.f32 %v5151_v62, %v5151_v62 }
 0x349   : > { %6377 = vst [vmem:[%s7847_s9 + $0x70] sm:$0xff] %v6342_v56   ;;  %v5315_v58 = vadd.f32 %v5314_v37, %v5284_v60 }
 0x34b   : > { %v4693_v38 = vpop.f32.mrf.mxu3 }
 0x34c   : > { %v5117_v42 = vpop.f32.mrf.mxu0  ;;  %v4727_v44 = vadd.f32 %v4693_v38, %v4045_v50 }
 0x34d   : > { %v5152_v11 = vadd.f32 %v5117_v42, %v4726_v63 }
 0x34f   : > { %v5247_v10 = vadd.f32 %v5246_v51, %v5152_v11  ;;  %v5285_v21 = vmul.f32 %v5152_v11, %v5152_v11 }
 0x351   : > { %v5316_v0 = vadd.f32 %v5315_v58, %v5285_v21 }
 0x354   : > { %v5119_v1 = vpop.f32.mrf.mxu0 }
 0x355   : > { %v5153_v43 = vadd.f32 %v5119_v1, %v4727_v44 }
 0x357   : > { %v6347_v2 = vpack.c.bf16 %v5153_v43, %v5152_v11  ;;  %v5248_v31 = vadd.f32 %v5247_v10, %v5153_v43  ;;  %v5286_v57 = vmul.f32 %v5153_v43, %v5153_v43 }
 0x359   : > { %6378 = vst [vmem:[%s7847_s9 + $0x78] sm:$0xff] %v6347_v2   ;;  %v5249_v39 = vrot.slane %v5248_v31, 4  ;;  %v5317_v47 = vadd.f32 %v5316_v0, %v5286_v57 }
 0x35b   : > { %v5250_v9 = vadd.f32 %v5249_v39, %v5248_v31  ;;  %v5318_v4 = vrot.slane %v5317_v47, 4 }
 0x35d   : > { %v5251_v28 = vrot.slane %v5250_v9, 2  ;;  %v5319_v5 = vadd.f32 %v5318_v4, %v5317_v47 }
 0x35f   : > { %v5252_v45 = vadd.f32 %v5251_v28, %v5250_v9  ;;  %v5320_v13 = vrot.slane %v5319_v5, 2 }
 0x361   : > { %v5253_v52 = vrot.slane %v5252_v45, 1  ;;  %v5321_v32 = vadd.f32 %v5320_v13, %v5319_v5 }
 0x363   : > { %v5322_v12 = vrot.slane %v5321_v32, 1  ;;  %v5254_v41 = vadd.f32 %v5253_v52, %v5252_v45 }
 0x365   : > { %v5323_v6 = vadd.f32 %v5322_v12, %v5321_v32 }
 0x367   : > { %v5325_v26 = vsel %vm244_vm0, %v5254_v41, %v5323_v6 }
 0x368   : > { %v5327_v24 = vsel %vm5326_vm15, %v5325_v26, 0.0 }
 0x369   : > { %5328 = vst [vmem:[%s235_s12] sm:$0xff] %v5327_v24 }
 0x36a PF: > { %s16_s18 = sadd.s32 1, %s6480_s18  }
 0x36b   : > { %p13_p4 = scmp.ge.s32.totalorder %s16_s18, 4  }
 0x36d   :  { %15 = sbr.rel (!%p13_p4) target bundleno = 1 (0x1), region = 89 }

</bundles_post_ra>
